<compile_context>
chip_gen: v7x
topology: tpu7x:2x2x1
jax: 0.10.0
libtpu: 0.0.40
codegen_flags: <defaults>
</compile_context>

<pallas_src>
import functools

import jax
import jax.numpy as jnp
from jax import lax
from jax.experimental import pallas as pl
from jax.experimental.pallas import tpu as pltpu


def _round_up(x, m):
    return ((x + m - 1) // m) * m


# ============================================================================ extraction kernel
def _gru_cell(gx, whh, bhh, h, Hp):
    """One GRU step.  gx = x@W_ih + b_ih (precomputed); whh bf16, bhh f32, h f32."""
    gh = jnp.dot(h.astype(jnp.bfloat16), whh,
                 preferred_element_type=jnp.float32) + bhh            # (B, 3*Hp)
    r = jax.nn.sigmoid(gx[:, :Hp] + gh[:, :Hp])
    z = jax.nn.sigmoid(gx[:, Hp:2 * Hp] + gh[:, Hp:2 * Hp])
    n = jnp.tanh(gx[:, 2 * Hp:] + r * gh[:, 2 * Hp:])
    return (1.0 - z) * n + z * h


def _layernorm(v, g, b, eps=1e-5):
    mu = jnp.mean(v, axis=-1, keepdims=True)
    cv = v - mu
    var = jnp.mean(cv * cv, axis=-1, keepdims=True)
    return cv * lax.rsqrt(var + eps) * g + b


def _extraction_kernel(x_ref,
                       wih_bi_ref, bih_bi_ref, whh_f_ref, bhh_f_ref,
                       whh_b_ref, bhh_b_ref,
                       ln1_g_ref, ln1_b_ref,
                       wih1_ref, bih1_ref, whh1_ref, bhh1_ref,
                       ln2_g_ref, ln2_b_ref,
                       wih2_ref, bih2_ref, whh2_ref, bhh2_ref,
                       out_ref,
                       gxbi_sc, seqf_sc, seqb_sc, hbi_sc, gx1_sc, h1_sc, gx2_sc,
                       *, T, B, H, Hp, H2, H2p):
    f32 = jnp.float32
    bf16 = jnp.bfloat16

    def mm(a, w_ref):
        return jnp.dot(a.astype(bf16), w_ref[...], preferred_element_type=f32)

    # ------------------ stage 1: bidirectional GRU ------------------
    # Hoisted input projection for BOTH directions: one (T*B, E) x (E, 6*Hp) MXU matmul.
    gxbi_sc[...] = mm(x_ref[...], wih_bi_ref) + bih_bi_ref[...]

    whh_f = whh_f_ref[...]
    bhh_f = bhh_f_ref[...]
    whh_b = whh_b_ref[...]
    bhh_b = bhh_b_ref[...]

    def bi_step(s, carry):
        h_f, h_b = carry
        rf = s * B                  # forward direction processes t = s
        rb = (T - 1 - s) * B        # backward direction processes t = T-1-s
        gx_f = gxbi_sc[pl.ds(rf, B), :3 * Hp]
        gx_b = gxbi_sc[pl.ds(rb, B), 3 * Hp:]
        h_f = _gru_cell(gx_f, whh_f, bhh_f, h_f, Hp)
        h_b = _gru_cell(gx_b, whh_b, bhh_b, h_b, Hp)
        seqf_sc[pl.ds(rf, B), :] = h_f          # lane-dense (B, Hp) stores
        seqb_sc[pl.ds(rb, B), :] = h_b
        return (h_f, h_b)

    h0 = jnp.zeros((B, Hp), f32)
    lax.fori_loop(0, T, bi_step, (h0, h0), unroll=True)

    # Concatenated bi-GRU output (real lanes only), built with two bulk copies.
    hbi_sc[:, :H] = seqf_sc[:, :H]
    hbi_sc[:, H:] = seqb_sc[:, :H]
    h_bi = hbi_sc[...]                           # (T*B, 2H)

    # ------------------ stage 2: layernorm_1 + gru_1 ------------------
    xn1 = _layernorm(h_bi, ln1_g_ref[...], ln1_b_ref[...])
    gx1_sc[...] = mm(xn1, wih1_ref) + bih1_ref[...]      # hoisted input projection

    whh1 = whh1_ref[...]
    bhh1 = bhh1_ref[...]

    def step1(s, h):
        r = s * B
        h = _gru_cell(gx1_sc[pl.ds(r, B), :], whh1, bhh1, h, H2p)
        h1_sc[pl.ds(r, B), :] = h
        return h

    lax.fori_loop(0, T, step1, jnp.zeros((B, H2p), f32), unroll=True)

    # ------------------ stage 3: residual + layernorm_2 + gru_2 ------------------
    y = _layernorm(h_bi + h1_sc[:, :H2], ln2_g_ref[...], ln2_b_ref[...])
    gx2_sc[...] = mm(y, wih2_ref) + bih2_ref[...]        # hoisted input projection

    whh2 = whh2_ref[...]
    bhh2 = bhh2_ref[...]

    def step2(s, h):
        r = s * B
        h = _gru_cell(gx2_sc[pl.ds(r, B), :], whh2, bhh2, h, H2p)
        out_ref[pl.ds(r, B), :] = h              # lane-dense (B, H2p) store
        return h

    lax.fori_loop(0, T, step2, jnp.zeros((B, H2p), f32), unroll=True)


# ============================================================================ head kernel
def _head_kernel(seq_ref, lens_ref,
                 bn0_s_ref, bn0_b_ref,
                 w1_ref, b1_ref, bn1_s_ref, bn1_b_ref,
                 w2_ref, b2_ref, bn2_s_ref, bn2_b_ref,
                 w3_ref, b3_ref,
                 out_ref, *, T, B, H2):
    f32 = jnp.float32
    bf16 = jnp.bfloat16
    lens = lens_ref[...]                                    # (B, 1) int32

    # out1 = seq at t = len-1 ; out2 = max over valid steps t < len
    last = jnp.zeros((B, H2), f32)
    mx = jnp.full((B, H2), -1e30, f32)
    for t in range(T):                                      # static unroll (small T)
        s = seq_ref[t * B:(t + 1) * B, :H2]                 # (B, 2H)
        last = last + jnp.where(lens == (t + 1), s, 0.0)
        mx = jnp.maximum(mx, jnp.where(lens > t, s, -1e30))

    # bn_layer (eval, folded to scale/bias) + ReLU on cat([out1, out2]);
    # the concat is avoided by splitting the first Linear along its input rows.
    p1 = jnp.maximum(last * bn0_s_ref[:, :H2] + bn0_b_ref[:, :H2], 0.0)
    p2 = jnp.maximum(mx * bn0_s_ref[:, H2:] + bn0_b_ref[:, H2:], 0.0)

    def dense(v, w_ref, b_ref):
        return jnp.dot(v.astype(bf16), w_ref[...], preferred_element_type=f32) + b_ref[...]

    m1 = (jnp.dot(p1.astype(bf16), w1_ref[:H2, :], preferred_element_type=f32)
          + jnp.dot(p2.astype(bf16), w1_ref[H2:, :], preferred_element_type=f32)
          + b1_ref[...])
    m1 = jnp.maximum(m1 * bn1_s_ref[...] + bn1_b_ref[...], 0.0)

    m2 = dense(m1, w2_ref, b2_ref)
    m2 = jnp.maximum(m2 * bn2_s_ref[...] + bn2_b_ref[...], 0.0)

    out_ref[...] = dense(m2, w3_ref, b3_ref)


# ============================================================================ parameters
def _pad_gate_cols(w, H, Hp):
    """(in, 3H) -> (in, 3Hp): zero-pad each r/z/n gate block to Hp lanes."""
    if Hp == H:
        return w
    blocks = [jnp.pad(w[:, g * H:(g + 1) * H], ((0, 0), (0, Hp - H))) for g in range(3)]
    return jnp.concatenate(blocks, axis=-1)


def _pad_gate_bias(b, H, Hp):
    """(3H,) -> (1, 3Hp) with per-gate zero padding."""
    if Hp == H:
        return b.reshape(1, -1)
    blocks = [jnp.pad(b[g * H:(g + 1) * H], (0, Hp - H)) for g in range(3)]
    return jnp.concatenate(blocks).reshape(1, -1)


def _gru_weights(key, in_dim, hidden, Hp):
    """Kernel-ready GRU params (PyTorch uniform init, gate order r,z,n), lane-padded."""
    k = hidden ** -0.5
    k1, k2, k3, k4 = jax.random.split(key, 4)
    wih = jax.random.uniform(k1, (in_dim, 3 * hidden), minval=-k, maxval=k, dtype=jnp.float32)
    whh = jax.random.uniform(k2, (hidden, 3 * hidden), minval=-k, maxval=k, dtype=jnp.float32)
    bih = jax.random.uniform(k3, (3 * hidden,), minval=-k, maxval=k, dtype=jnp.float32)
    bhh = jax.random.uniform(k4, (3 * hidden,), minval=-k, maxval=k, dtype=jnp.float32)
    wih_p = _pad_gate_cols(wih, hidden, Hp).astype(jnp.bfloat16)
    whh_p = _pad_gate_cols(jnp.pad(whh, ((0, Hp - hidden), (0, 0))), hidden, Hp).astype(jnp.bfloat16)
    return wih_p, _pad_gate_bias(bih, hidden, Hp), whh_p, _pad_gate_bias(bhh, hidden, Hp)


def _linear(key, in_dim, out_dim):
    k = in_dim ** -0.5
    k1, k2 = jax.random.split(key)
    w = jax.random.uniform(k1, (in_dim, out_dim), minval=-k, maxval=k, dtype=jnp.float32)
    b = jax.random.uniform(k2, (out_dim,), minval=-k, maxval=k, dtype=jnp.float32)
    return w.astype(jnp.bfloat16), b.reshape(1, -1)


def _bn_fold(num_features, eps=1e-5):
    """Eval-mode BatchNorm1d (default gamma=1, beta=0, mean=0, var=1) folded to scale/bias."""
    gamma = jnp.ones((num_features,), jnp.float32)
    beta = jnp.zeros((num_features,), jnp.float32)
    mean = jnp.zeros((num_features,), jnp.float32)
    var = jnp.ones((num_features,), jnp.float32)
    scale = gamma * lax.rsqrt(var + eps)
    return scale.reshape(1, -1), (beta - mean * scale).reshape(1, -1)


def init_params(key, embed_size, hidden_size, out_size):
    H = hidden_size
    H2 = 2 * H
    Hp = _round_up(H, 128)
    H2p = _round_up(H2, 128)
    ks = jax.random.split(key, 7)

    wih_f, bih_f, whh_f, bhh_f = _gru_weights(ks[0], embed_size, H, Hp)
    wih_b, bih_b, whh_b, bhh_b = _gru_weights(ks[1], embed_size, H, Hp)
    wih1, bih1, whh1, bhh1 = _gru_weights(ks[2], H2, H2, H2p)
    wih2, bih2, whh2, bhh2 = _gru_weights(ks[3], H2, H2, H2p)

    w1, b1 = _linear(ks[4], 4 * H, 16 * H)
    w2, b2 = _linear(ks[5], 16 * H, 4 * H)
    w3, b3 = _linear(ks[6], 4 * H, out_size)

    bn0_s, bn0_b = _bn_fold(4 * H)
    bn1_s, bn1_b = _bn_fold(16 * H)
    bn2_s, bn2_b = _bn_fold(4 * H)

    return dict(
        H=H, Hp=Hp, H2=H2, H2p=H2p, out_size=out_size,
        # bi-GRU: both directions' input projections fused into one matmul
        wih_bi=jnp.concatenate([wih_f, wih_b], axis=-1),
        bih_bi=jnp.concatenate([bih_f, bih_b], axis=-1),
        whh_f=whh_f, bhh_f=bhh_f, whh_b=whh_b, bhh_b=bhh_b,
        ln1_g=jnp.ones((1, H2), jnp.float32), ln1_b=jnp.zeros((1, H2), jnp.float32),
        wih1=wih1, bih1=bih1, whh1=whh1, bhh1=bhh1,
        ln2_g=jnp.ones((1, H2), jnp.float32), ln2_b=jnp.zeros((1, H2), jnp.float32),
        wih2=wih2, bih2=bih2, whh2=whh2, bhh2=bhh2,
        bn0_s=bn0_s, bn0_b=bn0_b,
        w1=w1, b1=b1, bn1_s=bn1_s, bn1_b=bn1_b,
        w2=w2, b2=b2, bn2_s=bn2_s, bn2_b=bn2_b,
        w3=w3, b3=b3,
    )


# ============================================================================ wrappers
def _run_extraction(x_tm, p, *, T, B):
    H, Hp, H2, H2p = p["H"], p["Hp"], p["H2"], p["H2p"]
    kernel = functools.partial(_extraction_kernel, T=T, B=B, H=H, Hp=Hp, H2=H2, H2p=H2p)
    vmem = pl.BlockSpec(memory_space=pltpu.MemorySpace.VMEM)
    return pl.pallas_call(
        kernel,
        out_shape=jax.ShapeDtypeStruct((T * B, H2p), jnp.float32),
        in_specs=[vmem] * 19,
        out_specs=vmem,
        scratch_shapes=[
            pltpu.VMEM((T * B, 6 * Hp), jnp.float32),    # bi-GRU gates_x (fwd | bwd)
            pltpu.VMEM((T * B, Hp), jnp.float32),        # fwd hidden sequence (padded)
            pltpu.VMEM((T * B, Hp), jnp.float32),        # bwd hidden sequence (padded)
            pltpu.VMEM((T * B, H2), jnp.float32),        # concatenated bi-GRU output
            pltpu.VMEM((T * B, 3 * H2p), jnp.float32),   # gru_1 gates_x
            pltpu.VMEM((T * B, H2p), jnp.float32),       # gru_1 hidden sequence (padded)
            pltpu.VMEM((T * B, 3 * H2p), jnp.float32),   # gru_2 gates_x
        ],
    )(x_tm,
      p["wih_bi"], p["bih_bi"], p["whh_f"], p["bhh_f"], p["whh_b"], p["bhh_b"],
      p["ln1_g"], p["ln1_b"], p["wih1"], p["bih1"], p["whh1"], p["bhh1"],
      p["ln2_g"], p["ln2_b"], p["wih2"], p["bih2"], p["whh2"], p["bhh2"])


def _run_head(seq, lens, p, *, T, B):
    kernel = functools.partial(_head_kernel, T=T, B=B, H2=p["H2"])
    vmem = pl.BlockSpec(memory_space=pltpu.MemorySpace.VMEM)
    return pl.pallas_call(
        kernel,
        out_shape=jax.ShapeDtypeStruct((B, p["out_size"]), jnp.float32),
        in_specs=[vmem] * 14,
        out_specs=vmem,
    )(seq, lens,
      p["bn0_s"], p["bn0_b"],
      p["w1"], p["b1"], p["bn1_s"], p["bn1_b"],
      p["w2"], p["b2"], p["bn2_s"], p["bn2_b"],
      p["w3"], p["b3"])


def final_gru_forward(params, inp, inp_len):
    B, T, _ = inp.shape
    # time-major, flattened (t, b) rows: per-step access is one contiguous (B, F) block
    x_tm = jnp.transpose(inp, (1, 0, 2)).reshape(T * B, -1).astype(jnp.float32)
    seq = _run_extraction(x_tm, params, T=T, B=B)           # (T*B, H2p), time-major
    lens = inp_len.reshape(B, 1).astype(jnp.int32)
    return _run_head(seq, lens, params, T=T, B=B)           # (B, out_size)


# ============================================================================ main
if __name__ == "__main__":
    B, T, E, H, OUT = 8, 8, 16, 16, 8     # batch, max_seq_len, embed_size, hidden_size, out_size
    key = jax.random.PRNGKey(0)
    kp, kx = jax.random.split(key)

    params = init_params(kp, E, H, OUT)
    inp = jax.random.normal(kx, (B, T, E), dtype=jnp.float32)
    inp_len = jnp.array([8, 5, 3, 8, 1, 6, 7, 2], dtype=jnp.int32)

    fwd = jax.jit(lambda x, l: final_gru_forward(params, x, l))
    out = jax.block_until_ready(fwd(inp, inp_len))

    assert out.shape == (B, OUT)
    assert bool(jnp.all(jnp.isfinite(out)))
    print("KERNEL_OK")
</pallas_src>

<mosaic_0001>
module attributes {stable_mosaic.version = 11 : i64} {
  func.func @_head_kernel(%arg0: memref<64x128xf32, #tpu.memory_space<vmem>>, %arg1: memref<8x1xi32, #tpu.memory_space<vmem>>, %arg2: memref<1x64xf32, #tpu.memory_space<vmem>>, %arg3: memref<1x64xf32, #tpu.memory_space<vmem>>, %arg4: memref<64x256xbf16, #tpu.memory_space<vmem>>, %arg5: memref<1x256xf32, #tpu.memory_space<vmem>>, %arg6: memref<1x256xf32, #tpu.memory_space<vmem>>, %arg7: memref<1x256xf32, #tpu.memory_space<vmem>>, %arg8: memref<256x64xbf16, #tpu.memory_space<vmem>>, %arg9: memref<1x64xf32, #tpu.memory_space<vmem>>, %arg10: memref<1x64xf32, #tpu.memory_space<vmem>>, %arg11: memref<1x64xf32, #tpu.memory_space<vmem>>, %arg12: memref<64x8xbf16, #tpu.memory_space<vmem>>, %arg13: memref<1x8xf32, #tpu.memory_space<vmem>>, %arg14: memref<8x8xf32, #tpu.memory_space<vmem>>) attributes {dimension_semantics = [], scalar_prefetch = 0 : i64, scratch_operands = 0 : i64, tpu.core_type = #tpu.core_type<tc>} {
    %c0 = arith.constant 0 : index
    %c0_0 = arith.constant 0 : index
    %0 = vector.load %arg1[%c0, %c0_0] : memref<8x1xi32, #tpu.memory_space<vmem>>, vector<8x1xi32>
    %cst = arith.constant 0.000000e+00 : f32
    %1 = vector.broadcast %cst : f32 to vector<8x32xf32>
    %cst_1 = arith.constant -1.000000e+30 : f32
    %2 = vector.broadcast %cst_1 : f32 to vector<8x32xf32>
    %c0_2 = arith.constant 0 : index
    %c0_3 = arith.constant 0 : index
    %3 = vector.load %arg0[%c0_2, %c0_3] : memref<64x128xf32, #tpu.memory_space<vmem>>, vector<8x32xf32>
    %c1_i32 = arith.constant 1 : i32
    %4 = vector.broadcast %c1_i32 : i32 to vector<8x1xi32>
    %5 = arith.cmpi eq, %0, %4 : vector<8x1xi32>
    %cst_4 = arith.constant 0.000000e+00 : f32
    %6 = vector.shape_cast %5 : vector<8x1xi1> to vector<8x1xi1>
    %7 = vector.broadcast %6 : vector<8x1xi1> to vector<8x32xi1>
    %8 = vector.broadcast %cst_4 : f32 to vector<8x32xf32>
    %9 = arith.select %7, %3, %8 : vector<8x32xi1>, vector<8x32xf32>
    %10 = arith.addf %1, %9 : vector<8x32xf32>
    %c0_i32 = arith.constant 0 : i32
    %11 = vector.broadcast %c0_i32 : i32 to vector<8x1xi32>
    %12 = arith.cmpi sgt, %0, %11 : vector<8x1xi32>
    %cst_5 = arith.constant -1.000000e+30 : f32
    %13 = vector.shape_cast %12 : vector<8x1xi1> to vector<8x1xi1>
    %14 = vector.broadcast %13 : vector<8x1xi1> to vector<8x32xi1>
    %15 = vector.broadcast %cst_5 : f32 to vector<8x32xf32>
    %16 = arith.select %14, %3, %15 : vector<8x32xi1>, vector<8x32xf32>
    %17 = arith.maximumf %2, %16 : vector<8x32xf32>
    %c8 = arith.constant 8 : index
    %c0_6 = arith.constant 0 : index
    %18 = vector.load %arg0[%c8, %c0_6] : memref<64x128xf32, #tpu.memory_space<vmem>>, vector<8x32xf32>
    %c2_i32 = arith.constant 2 : i32
    %19 = vector.broadcast %c2_i32 : i32 to vector<8x1xi32>
    %20 = arith.cmpi eq, %0, %19 : vector<8x1xi32>
    %cst_7 = arith.constant 0.000000e+00 : f32
    %21 = vector.shape_cast %20 : vector<8x1xi1> to vector<8x1xi1>
    %22 = vector.broadcast %21 : vector<8x1xi1> to vector<8x32xi1>
    %23 = vector.broadcast %cst_7 : f32 to vector<8x32xf32>
    %24 = arith.select %22, %18, %23 : vector<8x32xi1>, vector<8x32xf32>
    %25 = arith.addf %10, %24 : vector<8x32xf32>
    %c1_i32_8 = arith.constant 1 : i32
    %26 = vector.broadcast %c1_i32_8 : i32 to vector<8x1xi32>
    %27 = arith.cmpi sgt, %0, %26 : vector<8x1xi32>
    %cst_9 = arith.constant -1.000000e+30 : f32
    %28 = vector.shape_cast %27 : vector<8x1xi1> to vector<8x1xi1>
    %29 = vector.broadcast %28 : vector<8x1xi1> to vector<8x32xi1>
    %30 = vector.broadcast %cst_9 : f32 to vector<8x32xf32>
    %31 = arith.select %29, %18, %30 : vector<8x32xi1>, vector<8x32xf32>
    %32 = arith.maximumf %17, %31 : vector<8x32xf32>
    %c16 = arith.constant 16 : index
    %c0_10 = arith.constant 0 : index
    %33 = vector.load %arg0[%c16, %c0_10] : memref<64x128xf32, #tpu.memory_space<vmem>>, vector<8x32xf32>
    %c3_i32 = arith.constant 3 : i32
    %34 = vector.broadcast %c3_i32 : i32 to vector<8x1xi32>
    %35 = arith.cmpi eq, %0, %34 : vector<8x1xi32>
    %cst_11 = arith.constant 0.000000e+00 : f32
    %36 = vector.shape_cast %35 : vector<8x1xi1> to vector<8x1xi1>
    %37 = vector.broadcast %36 : vector<8x1xi1> to vector<8x32xi1>
    %38 = vector.broadcast %cst_11 : f32 to vector<8x32xf32>
    %39 = arith.select %37, %33, %38 : vector<8x32xi1>, vector<8x32xf32>
    %40 = arith.addf %25, %39 : vector<8x32xf32>
    %c2_i32_12 = arith.constant 2 : i32
    %41 = vector.broadcast %c2_i32_12 : i32 to vector<8x1xi32>
    %42 = arith.cmpi sgt, %0, %41 : vector<8x1xi32>
    %cst_13 = arith.constant -1.000000e+30 : f32
    %43 = vector.shape_cast %42 : vector<8x1xi1> to vector<8x1xi1>
    %44 = vector.broadcast %43 : vector<8x1xi1> to vector<8x32xi1>
    %45 = vector.broadcast %cst_13 : f32 to vector<8x32xf32>
    %46 = arith.select %44, %33, %45 : vector<8x32xi1>, vector<8x32xf32>
    %47 = arith.maximumf %32, %46 : vector<8x32xf32>
    %c24 = arith.constant 24 : index
    %c0_14 = arith.constant 0 : index
    %48 = vector.load %arg0[%c24, %c0_14] : memref<64x128xf32, #tpu.memory_space<vmem>>, vector<8x32xf32>
    %c4_i32 = arith.constant 4 : i32
    %49 = vector.broadcast %c4_i32 : i32 to vector<8x1xi32>
    %50 = arith.cmpi eq, %0, %49 : vector<8x1xi32>
    %cst_15 = arith.constant 0.000000e+00 : f32
    %51 = vector.shape_cast %50 : vector<8x1xi1> to vector<8x1xi1>
    %52 = vector.broadcast %51 : vector<8x1xi1> to vector<8x32xi1>
    %53 = vector.broadcast %cst_15 : f32 to vector<8x32xf32>
    %54 = arith.select %52, %48, %53 : vector<8x32xi1>, vector<8x32xf32>
    %55 = arith.addf %40, %54 : vector<8x32xf32>
    %c3_i32_16 = arith.constant 3 : i32
    %56 = vector.broadcast %c3_i32_16 : i32 to vector<8x1xi32>
    %57 = arith.cmpi sgt, %0, %56 : vector<8x1xi32>
    %cst_17 = arith.constant -1.000000e+30 : f32
    %58 = vector.shape_cast %57 : vector<8x1xi1> to vector<8x1xi1>
    %59 = vector.broadcast %58 : vector<8x1xi1> to vector<8x32xi1>
    %60 = vector.broadcast %cst_17 : f32 to vector<8x32xf32>
    %61 = arith.select %59, %48, %60 : vector<8x32xi1>, vector<8x32xf32>
    %62 = arith.maximumf %47, %61 : vector<8x32xf32>
    %c32 = arith.constant 32 : index
    %c0_18 = arith.constant 0 : index
    %63 = vector.load %arg0[%c32, %c0_18] : memref<64x128xf32, #tpu.memory_space<vmem>>, vector<8x32xf32>
    %c5_i32 = arith.constant 5 : i32
    %64 = vector.broadcast %c5_i32 : i32 to vector<8x1xi32>
    %65 = arith.cmpi eq, %0, %64 : vector<8x1xi32>
    %cst_19 = arith.constant 0.000000e+00 : f32
    %66 = vector.shape_cast %65 : vector<8x1xi1> to vector<8x1xi1>
    %67 = vector.broadcast %66 : vector<8x1xi1> to vector<8x32xi1>
    %68 = vector.broadcast %cst_19 : f32 to vector<8x32xf32>
    %69 = arith.select %67, %63, %68 : vector<8x32xi1>, vector<8x32xf32>
    %70 = arith.addf %55, %69 : vector<8x32xf32>
    %c4_i32_20 = arith.constant 4 : i32
    %71 = vector.broadcast %c4_i32_20 : i32 to vector<8x1xi32>
    %72 = arith.cmpi sgt, %0, %71 : vector<8x1xi32>
    %cst_21 = arith.constant -1.000000e+30 : f32
    %73 = vector.shape_cast %72 : vector<8x1xi1> to vector<8x1xi1>
    %74 = vector.broadcast %73 : vector<8x1xi1> to vector<8x32xi1>
    %75 = vector.broadcast %cst_21 : f32 to vector<8x32xf32>
    %76 = arith.select %74, %63, %75 : vector<8x32xi1>, vector<8x32xf32>
    %77 = arith.maximumf %62, %76 : vector<8x32xf32>
    %c40 = arith.constant 40 : index
    %c0_22 = arith.constant 0 : index
    %78 = vector.load %arg0[%c40, %c0_22] : memref<64x128xf32, #tpu.memory_space<vmem>>, vector<8x32xf32>
    %c6_i32 = arith.constant 6 : i32
    %79 = vector.broadcast %c6_i32 : i32 to vector<8x1xi32>
    %80 = arith.cmpi eq, %0, %79 : vector<8x1xi32>
    %cst_23 = arith.constant 0.000000e+00 : f32
    %81 = vector.shape_cast %80 : vector<8x1xi1> to vector<8x1xi1>
    %82 = vector.broadcast %81 : vector<8x1xi1> to vector<8x32xi1>
    %83 = vector.broadcast %cst_23 : f32 to vector<8x32xf32>
    %84 = arith.select %82, %78, %83 : vector<8x32xi1>, vector<8x32xf32>
    %85 = arith.addf %70, %84 : vector<8x32xf32>
    %c5_i32_24 = arith.constant 5 : i32
    %86 = vector.broadcast %c5_i32_24 : i32 to vector<8x1xi32>
    %87 = arith.cmpi sgt, %0, %86 : vector<8x1xi32>
    %cst_25 = arith.constant -1.000000e+30 : f32
    %88 = vector.shape_cast %87 : vector<8x1xi1> to vector<8x1xi1>
    %89 = vector.broadcast %88 : vector<8x1xi1> to vector<8x32xi1>
    %90 = vector.broadcast %cst_25 : f32 to vector<8x32xf32>
    %91 = arith.select %89, %78, %90 : vector<8x32xi1>, vector<8x32xf32>
    %92 = arith.maximumf %77, %91 : vector<8x32xf32>
    %c48 = arith.constant 48 : index
    %c0_26 = arith.constant 0 : index
    %93 = vector.load %arg0[%c48, %c0_26] : memref<64x128xf32, #tpu.memory_space<vmem>>, vector<8x32xf32>
    %c7_i32 = arith.constant 7 : i32
    %94 = vector.broadcast %c7_i32 : i32 to vector<8x1xi32>
    %95 = arith.cmpi eq, %0, %94 : vector<8x1xi32>
    %cst_27 = arith.constant 0.000000e+00 : f32
    %96 = vector.shape_cast %95 : vector<8x1xi1> to vector<8x1xi1>
    %97 = vector.broadcast %96 : vector<8x1xi1> to vector<8x32xi1>
    %98 = vector.broadcast %cst_27 : f32 to vector<8x32xf32>
    %99 = arith.select %97, %93, %98 : vector<8x32xi1>, vector<8x32xf32>
    %100 = arith.addf %85, %99 : vector<8x32xf32>
    %c6_i32_28 = arith.constant 6 : i32
    %101 = vector.broadcast %c6_i32_28 : i32 to vector<8x1xi32>
    %102 = arith.cmpi sgt, %0, %101 : vector<8x1xi32>
    %cst_29 = arith.constant -1.000000e+30 : f32
    %103 = vector.shape_cast %102 : vector<8x1xi1> to vector<8x1xi1>
    %104 = vector.broadcast %103 : vector<8x1xi1> to vector<8x32xi1>
    %105 = vector.broadcast %cst_29 : f32 to vector<8x32xf32>
    %106 = arith.select %104, %93, %105 : vector<8x32xi1>, vector<8x32xf32>
    %107 = arith.maximumf %92, %106 : vector<8x32xf32>
    %c56 = arith.constant 56 : index
    %c0_30 = arith.constant 0 : index
    %108 = vector.load %arg0[%c56, %c0_30] : memref<64x128xf32, #tpu.memory_space<vmem>>, vector<8x32xf32>
    %c8_i32 = arith.constant 8 : i32
    %109 = vector.broadcast %c8_i32 : i32 to vector<8x1xi32>
    %110 = arith.cmpi eq, %0, %109 : vector<8x1xi32>
    %cst_31 = arith.constant 0.000000e+00 : f32
    %111 = vector.shape_cast %110 : vector<8x1xi1> to vector<8x1xi1>
    %112 = vector.broadcast %111 : vector<8x1xi1> to vector<8x32xi1>
    %113 = vector.broadcast %cst_31 : f32 to vector<8x32xf32>
    %114 = arith.select %112, %108, %113 : vector<8x32xi1>, vector<8x32xf32>
    %115 = arith.addf %100, %114 : vector<8x32xf32>
    %c7_i32_32 = arith.constant 7 : i32
    %116 = vector.broadcast %c7_i32_32 : i32 to vector<8x1xi32>
    %117 = arith.cmpi sgt, %0, %116 : vector<8x1xi32>
    %cst_33 = arith.constant -1.000000e+30 : f32
    %118 = vector.shape_cast %117 : vector<8x1xi1> to vector<8x1xi1>
    %119 = vector.broadcast %118 : vector<8x1xi1> to vector<8x32xi1>
    %120 = vector.broadcast %cst_33 : f32 to vector<8x32xf32>
    %121 = arith.select %119, %108, %120 : vector<8x32xi1>, vector<8x32xf32>
    %122 = arith.maximumf %107, %121 : vector<8x32xf32>
    %c0_34 = arith.constant 0 : index
    %c0_35 = arith.constant 0 : index
    %123 = vector.load %arg2[%c0_34, %c0_35] : memref<1x64xf32, #tpu.memory_space<vmem>>, vector<1x32xf32>
    %124 = vector.broadcast %123 : vector<1x32xf32> to vector<8x32xf32>
    %125 = arith.mulf %115, %124 : vector<8x32xf32>
    %c0_36 = arith.constant 0 : index
    %c0_37 = arith.constant 0 : index
    %126 = vector.load %arg3[%c0_36, %c0_37] : memref<1x64xf32, #tpu.memory_space<vmem>>, vector<1x32xf32>
    %127 = vector.broadcast %126 : vector<1x32xf32> to vector<8x32xf32>
    %128 = arith.addf %125, %127 : vector<8x32xf32>
    %cst_38 = arith.constant 0.000000e+00 : f32
    %129 = vector.broadcast %cst_38 : f32 to vector<8x32xf32>
    %130 = arith.maximumf %128, %129 : vector<8x32xf32>
    %c0_39 = arith.constant 0 : index
    %c32_40 = arith.constant 32 : index
    %131 = vector.load %arg2[%c0_39, %c32_40] : memref<1x64xf32, #tpu.memory_space<vmem>>, vector<1x32xf32>
    %132 = vector.broadcast %131 : vector<1x32xf32> to vector<8x32xf32>
    %133 = arith.mulf %122, %132 : vector<8x32xf32>
    %c0_41 = arith.constant 0 : index
    %c32_42 = arith.constant 32 : index
    %134 = vector.load %arg3[%c0_41, %c32_42] : memref<1x64xf32, #tpu.memory_space<vmem>>, vector<1x32xf32>
    %135 = vector.broadcast %134 : vector<1x32xf32> to vector<8x32xf32>
    %136 = arith.addf %133, %135 : vector<8x32xf32>
    %cst_43 = arith.constant 0.000000e+00 : f32
    %137 = vector.broadcast %cst_43 : f32 to vector<8x32xf32>
    %138 = arith.maximumf %136, %137 : vector<8x32xf32>
    %139 = arith.truncf %130 : vector<8x32xf32> to vector<8x32xbf16>
    %c0_44 = arith.constant 0 : index
    %c0_45 = arith.constant 0 : index
    %140 = vector.load %arg4[%c0_44, %c0_45] : memref<64x256xbf16, #tpu.memory_space<vmem>>, vector<32x256xbf16>
    %cst_46 = arith.constant dense<0.000000e+00> : vector<8x256xf32>
    %141 = tpu.matmul %139, %140, %cst_46 {dimension_numbers = #tpu.dot_dimension_numbers<[1], [0], [0], [1], [0, 0, 1, 1], [], []>} : vector<8x32xbf16>, vector<32x256xbf16>, vector<8x256xf32> -> vector<8x256xf32>
    %142 = arith.truncf %138 : vector<8x32xf32> to vector<8x32xbf16>
    %c32_47 = arith.constant 32 : index
    %c0_48 = arith.constant 0 : index
    %143 = vector.load %arg4[%c32_47, %c0_48] : memref<64x256xbf16, #tpu.memory_space<vmem>>, vector<32x256xbf16>
    %cst_49 = arith.constant dense<0.000000e+00> : vector<8x256xf32>
    %144 = tpu.matmul %142, %143, %cst_49 {dimension_numbers = #tpu.dot_dimension_numbers<[1], [0], [0], [1], [0, 0, 1, 1], [], []>} : vector<8x32xbf16>, vector<32x256xbf16>, vector<8x256xf32> -> vector<8x256xf32>
    %145 = arith.addf %141, %144 : vector<8x256xf32>
    %c0_50 = arith.constant 0 : index
    %c0_51 = arith.constant 0 : index
    %146 = vector.load %arg5[%c0_50, %c0_51] : memref<1x256xf32, #tpu.memory_space<vmem>>, vector<1x256xf32>
    %147 = vector.broadcast %146 : vector<1x256xf32> to vector<8x256xf32>
    %148 = arith.addf %145, %147 : vector<8x256xf32>
    %c0_52 = arith.constant 0 : index
    %c0_53 = arith.constant 0 : index
    %149 = vector.load %arg6[%c0_52, %c0_53] : memref<1x256xf32, #tpu.memory_space<vmem>>, vector<1x256xf32>
    %150 = vector.broadcast %149 : vector<1x256xf32> to vector<8x256xf32>
    %151 = arith.mulf %148, %150 : vector<8x256xf32>
    %c0_54 = arith.constant 0 : index
    %c0_55 = arith.constant 0 : index
    %152 = vector.load %arg7[%c0_54, %c0_55] : memref<1x256xf32, #tpu.memory_space<vmem>>, vector<1x256xf32>
    %153 = vector.broadcast %152 : vector<1x256xf32> to vector<8x256xf32>
    %154 = arith.addf %151, %153 : vector<8x256xf32>
    %cst_56 = arith.constant 0.000000e+00 : f32
    %155 = vector.broadcast %cst_56 : f32 to vector<8x256xf32>
    %156 = arith.maximumf %154, %155 : vector<8x256xf32>
    %157 = arith.truncf %156 : vector<8x256xf32> to vector<8x256xbf16>
    %c0_57 = arith.constant 0 : index
    %c0_58 = arith.constant 0 : index
    %158 = vector.load %arg8[%c0_57, %c0_58] : memref<256x64xbf16, #tpu.memory_space<vmem>>, vector<256x64xbf16>
    %cst_59 = arith.constant dense<0.000000e+00> : vector<8x64xf32>
    %159 = tpu.matmul %157, %158, %cst_59 {dimension_numbers = #tpu.dot_dimension_numbers<[1], [0], [0], [1], [0, 0, 1, 1], [], []>} : vector<8x256xbf16>, vector<256x64xbf16>, vector<8x64xf32> -> vector<8x64xf32>
    %c0_60 = arith.constant 0 : index
    %c0_61 = arith.constant 0 : index
    %160 = vector.load %arg9[%c0_60, %c0_61] : memref<1x64xf32, #tpu.memory_space<vmem>>, vector<1x64xf32>
    %161 = vector.broadcast %160 : vector<1x64xf32> to vector<8x64xf32>
    %162 = arith.addf %159, %161 : vector<8x64xf32>
    %c0_62 = arith.constant 0 : index
    %c0_63 = arith.constant 0 : index
    %163 = vector.load %arg10[%c0_62, %c0_63] : memref<1x64xf32, #tpu.memory_space<vmem>>, vector<1x64xf32>
    %164 = vector.broadcast %163 : vector<1x64xf32> to vector<8x64xf32>
    %165 = arith.mulf %162, %164 : vector<8x64xf32>
    %c0_64 = arith.constant 0 : index
    %c0_65 = arith.constant 0 : index
    %166 = vector.load %arg11[%c0_64, %c0_65] : memref<1x64xf32, #tpu.memory_space<vmem>>, vector<1x64xf32>
    %167 = vector.broadcast %166 : vector<1x64xf32> to vector<8x64xf32>
    %168 = arith.addf %165, %167 : vector<8x64xf32>
    %cst_66 = arith.constant 0.000000e+00 : f32
    %169 = vector.broadcast %cst_66 : f32 to vector<8x64xf32>
    %170 = arith.maximumf %168, %169 : vector<8x64xf32>
    %171 = arith.truncf %170 : vector<8x64xf32> to vector<8x64xbf16>
    %c0_67 = arith.constant 0 : index
    %c0_68 = arith.constant 0 : index
    %172 = vector.load %arg12[%c0_67, %c0_68] : memref<64x8xbf16, #tpu.memory_space<vmem>>, vector<64x8xbf16>
    %cst_69 = arith.constant dense<0.000000e+00> : vector<8x8xf32>
    %173 = tpu.matmul %171, %172, %cst_69 {dimension_numbers = #tpu.dot_dimension_numbers<[1], [0], [0], [1], [0, 0, 1, 1], [], []>} : vector<8x64xbf16>, vector<64x8xbf16>, vector<8x8xf32> -> vector<8x8xf32>
    %c0_70 = arith.constant 0 : index
    %c0_71 = arith.constant 0 : index
    %174 = vector.load %arg13[%c0_70, %c0_71] : memref<1x8xf32, #tpu.memory_space<vmem>>, vector<1x8xf32>
    %175 = vector.broadcast %174 : vector<1x8xf32> to vector<8x8xf32>
    %176 = arith.addf %173, %175 : vector<8x8xf32>
    %c0_72 = arith.constant 0 : index
    %c0_73 = arith.constant 0 : index
    %177 = vector.load %arg14[%c0_72, %c0_73] : memref<8x8xf32, #tpu.memory_space<vmem>>, vector<8x8xf32>
    tpu.vector_store %arg14[%c0_72, %c0_73], %176 {strides = array<i32>} : memref<8x8xf32, #tpu.memory_space<vmem>>, vector<8x8xf32>,
    return
  }
}

module attributes {stable_mosaic.version = 11 : i64} {
  func.func @_extraction_kernel(%arg0: memref<64x16xf32, #tpu.memory_space<vmem>>, %arg1: memref<16x768xbf16, #tpu.memory_space<vmem>>, %arg2: memref<1x768xf32, #tpu.memory_space<vmem>>, %arg3: memref<128x384xbf16, #tpu.memory_space<vmem>>, %arg4: memref<1x384xf32, #tpu.memory_space<vmem>>, %arg5: memref<128x384xbf16, #tpu.memory_space<vmem>>, %arg6: memref<1x384xf32, #tpu.memory_space<vmem>>, %arg7: memref<1x32xf32, #tpu.memory_space<vmem>>, %arg8: memref<1x32xf32, #tpu.memory_space<vmem>>, %arg9: memref<32x384xbf16, #tpu.memory_space<vmem>>, %arg10: memref<1x384xf32, #tpu.memory_space<vmem>>, %arg11: memref<128x384xbf16, #tpu.memory_space<vmem>>, %arg12: memref<1x384xf32, #tpu.memory_space<vmem>>, %arg13: memref<1x32xf32, #tpu.memory_space<vmem>>, %arg14: memref<1x32xf32, #tpu.memory_space<vmem>>, %arg15: memref<32x384xbf16, #tpu.memory_space<vmem>>, %arg16: memref<1x384xf32, #tpu.memory_space<vmem>>, %arg17: memref<128x384xbf16, #tpu.memory_space<vmem>>, %arg18: memref<1x384xf32, #tpu.memory_space<vmem>>, %arg19: memref<64x128xf32, #tpu.memory_space<vmem>>, %arg20: memref<64x768xf32, #tpu.memory_space<vmem>>, %arg21: memref<64x128xf32, #tpu.memory_space<vmem>>, %arg22: memref<64x128xf32, #tpu.memory_space<vmem>>, %arg23: memref<64x32xf32, #tpu.memory_space<vmem>>, %arg24: memref<64x384xf32, #tpu.memory_space<vmem>>, %arg25: memref<64x128xf32, #tpu.memory_space<vmem>>, %arg26: memref<64x384xf32, #tpu.memory_space<vmem>>) attributes {dimension_semantics = [], scalar_prefetch = 0 : i64, scratch_operands = 7 : i64, tpu.core_type = #tpu.core_type<tc>} {
    %c0 = arith.constant 0 : index
    %c0_0 = arith.constant 0 : index
    %0 = vector.load %arg0[%c0, %c0_0] : memref<64x16xf32, #tpu.memory_space<vmem>>, vector<64x16xf32>
    %1 = arith.truncf %0 : vector<64x16xf32> to vector<64x16xbf16>
    %c0_1 = arith.constant 0 : index
    %c0_2 = arith.constant 0 : index
    %2 = vector.load %arg1[%c0_1, %c0_2] : memref<16x768xbf16, #tpu.memory_space<vmem>>, vector<16x768xbf16>
    %cst = arith.constant dense<0.000000e+00> : vector<64x768xf32>
    %3 = tpu.matmul %1, %2, %cst {dimension_numbers = #tpu.dot_dimension_numbers<[1], [0], [0], [1], [0, 0, 1, 1], [], []>} : vector<64x16xbf16>, vector<16x768xbf16>, vector<64x768xf32> -> vector<64x768xf32>
    %c0_3 = arith.constant 0 : index
    %c0_4 = arith.constant 0 : index
    %4 = vector.load %arg2[%c0_3, %c0_4] : memref<1x768xf32, #tpu.memory_space<vmem>>, vector<1x768xf32>
    %5 = vector.broadcast %4 : vector<1x768xf32> to vector<64x768xf32>
    %6 = arith.addf %3, %5 : vector<64x768xf32>
    %c0_5 = arith.constant 0 : index
    %c0_6 = arith.constant 0 : index
    %7 = vector.load %arg20[%c0_5, %c0_6] : memref<64x768xf32, #tpu.memory_space<vmem>>, vector<64x768xf32>
    tpu.vector_store %arg20[%c0_5, %c0_6], %6 {strides = array<i32>} : memref<64x768xf32, #tpu.memory_space<vmem>>, vector<64x768xf32>,
    %c0_7 = arith.constant 0 : index
    %c0_8 = arith.constant 0 : index
    %8 = vector.load %arg3[%c0_7, %c0_8] : memref<128x384xbf16, #tpu.memory_space<vmem>>, vector<128x384xbf16>
    %c0_9 = arith.constant 0 : index
    %c0_10 = arith.constant 0 : index
    %9 = vector.load %arg4[%c0_9, %c0_10] : memref<1x384xf32, #tpu.memory_space<vmem>>, vector<1x384xf32>
    %c0_11 = arith.constant 0 : index
    %c0_12 = arith.constant 0 : index
    %10 = vector.load %arg5[%c0_11, %c0_12] : memref<128x384xbf16, #tpu.memory_space<vmem>>, vector<128x384xbf16>
    %c0_13 = arith.constant 0 : index
    %c0_14 = arith.constant 0 : index
    %11 = vector.load %arg6[%c0_13, %c0_14] : memref<1x384xf32, #tpu.memory_space<vmem>>, vector<1x384xf32>
    %cst_15 = arith.constant 0.000000e+00 : f32
    %12 = vector.broadcast %cst_15 : f32 to vector<8x128xf32>
    %c0_i32 = arith.constant 0 : i32
    %c8_i32 = arith.constant 8 : i32
    %13 = arith.muli %c0_i32, %c8_i32 : i32
    %c7_i32 = arith.constant 7 : i32
    %14 = arith.subi %c7_i32, %c0_i32 : i32
    %c8_i32_16 = arith.constant 8 : i32
    %15 = arith.muli %14, %c8_i32_16 : i32
    %16 = arith.index_cast %13 : i32 to index
    %c0_17 = arith.constant 0 : index
    %17 = vector.load %arg20[%16, %c0_17] : memref<64x768xf32, #tpu.memory_space<vmem>>, vector<8x384xf32>
    %18 = arith.index_cast %15 : i32 to index
    %c384 = arith.constant 384 : index
    %19 = vector.load %arg20[%18, %c384] : memref<64x768xf32, #tpu.memory_space<vmem>>, vector<8x384xf32>
    %20 = arith.truncf %12 : vector<8x128xf32> to vector<8x128xbf16>
    %cst_18 = arith.constant dense<0.000000e+00> : vector<8x384xf32>
    %21 = tpu.matmul %20, %8, %cst_18 {dimension_numbers = #tpu.dot_dimension_numbers<[1], [0], [0], [1], [0, 0, 1, 1], [], []>} : vector<8x128xbf16>, vector<128x384xbf16>, vector<8x384xf32> -> vector<8x384xf32>
    %22 = vector.broadcast %9 : vector<1x384xf32> to vector<8x384xf32>
    %23 = arith.addf %21, %22 : vector<8x384xf32>
    %24 = vector.extract_strided_slice %17 {offsets = [0, 0], sizes = [8, 128], strides = [1, 1]} : vector<8x384xf32> to vector<8x128xf32>
    %25 = vector.extract_strided_slice %23 {offsets = [0, 0], sizes = [8, 128], strides = [1, 1]} : vector<8x384xf32> to vector<8x128xf32>
    %26 = arith.addf %24, %25 : vector<8x128xf32>
    %27 = arith.negf %26 : vector<8x128xf32>
    %28 = math.exp %27 : vector<8x128xf32>
    %cst_19 = arith.constant 1.000000e+00 : f32
    %29 = vector.broadcast %cst_19 : f32 to vector<8x128xf32>
    %30 = arith.addf %29, %28 : vector<8x128xf32>
    %31 = arith.divf %29, %30 : vector<8x128xf32>
    %32 = vector.extract_strided_slice %17 {offsets = [0, 128], sizes = [8, 128], strides = [1, 1]} : vector<8x384xf32> to vector<8x128xf32>
    %33 = vector.extract_strided_slice %23 {offsets = [0, 128], sizes = [8, 128], strides = [1, 1]} : vector<8x384xf32> to vector<8x128xf32>
    %34 = arith.addf %32, %33 : vector<8x128xf32>
    %35 = arith.negf %34 : vector<8x128xf32>
    %36 = math.exp %35 : vector<8x128xf32>
    %cst_20 = arith.constant 1.000000e+00 : f32
    %37 = vector.broadcast %cst_20 : f32 to vector<8x128xf32>
    %38 = arith.addf %37, %36 : vector<8x128xf32>
    %39 = arith.divf %37, %38 : vector<8x128xf32>
    %40 = vector.extract_strided_slice %17 {offsets = [0, 256], sizes = [8, 128], strides = [1, 1]} : vector<8x384xf32> to vector<8x128xf32>
    %41 = vector.extract_strided_slice %23 {offsets = [0, 256], sizes = [8, 128], strides = [1, 1]} : vector<8x384xf32> to vector<8x128xf32>
    %42 = arith.mulf %31, %41 : vector<8x128xf32>
    %43 = arith.addf %40, %42 : vector<8x128xf32>
    %44 = math.tanh %43 : vector<8x128xf32>
    %cst_21 = arith.constant 1.000000e+00 : f32
    %45 = vector.broadcast %cst_21 : f32 to vector<8x128xf32>
    %46 = arith.subf %45, %39 : vector<8x128xf32>
    %47 = arith.mulf %46, %44 : vector<8x128xf32>
    %48 = arith.mulf %39, %12 : vector<8x128xf32>
    %49 = arith.addf %47, %48 : vector<8x128xf32>
    %50 = arith.truncf %12 : vector<8x128xf32> to vector<8x128xbf16>
    %cst_22 = arith.constant dense<0.000000e+00> : vector<8x384xf32>
    %51 = tpu.matmul %50, %10, %cst_22 {dimension_numbers = #tpu.dot_dimension_numbers<[1], [0], [0], [1], [0, 0, 1, 1], [], []>} : vector<8x128xbf16>, vector<128x384xbf16>, vector<8x384xf32> -> vector<8x384xf32>
    %52 = vector.broadcast %11 : vector<1x384xf32> to vector<8x384xf32>
    %53 = arith.addf %51, %52 : vector<8x384xf32>
    %54 = vector.extract_strided_slice %19 {offsets = [0, 0], sizes = [8, 128], strides = [1, 1]} : vector<8x384xf32> to vector<8x128xf32>
    %55 = vector.extract_strided_slice %53 {offsets = [0, 0], sizes = [8, 128], strides = [1, 1]} : vector<8x384xf32> to vector<8x128xf32>
    %56 = arith.addf %54, %55 : vector<8x128xf32>
    %57 = arith.negf %56 : vector<8x128xf32>
    %58 = math.exp %57 : vector<8x128xf32>
    %cst_23 = arith.constant 1.000000e+00 : f32
    %59 = vector.broadcast %cst_23 : f32 to vector<8x128xf32>
    %60 = arith.addf %59, %58 : vector<8x128xf32>
    %61 = arith.divf %59, %60 : vector<8x128xf32>
    %62 = vector.extract_strided_slice %19 {offsets = [0, 128], sizes = [8, 128], strides = [1, 1]} : vector<8x384xf32> to vector<8x128xf32>
    %63 = vector.extract_strided_slice %53 {offsets = [0, 128], sizes = [8, 128], strides = [1, 1]} : vector<8x384xf32> to vector<8x128xf32>
    %64 = arith.addf %62, %63 : vector<8x128xf32>
    %65 = arith.negf %64 : vector<8x128xf32>
    %66 = math.exp %65 : vector<8x128xf32>
    %cst_24 = arith.constant 1.000000e+00 : f32
    %67 = vector.broadcast %cst_24 : f32 to vector<8x128xf32>
    %68 = arith.addf %67, %66 : vector<8x128xf32>
    %69 = arith.divf %67, %68 : vector<8x128xf32>
    %70 = vector.extract_strided_slice %19 {offsets = [0, 256], sizes = [8, 128], strides = [1, 1]} : vector<8x384xf32> to vector<8x128xf32>
    %71 = vector.extract_strided_slice %53 {offsets = [0, 256], sizes = [8, 128], strides = [1, 1]} : vector<8x384xf32> to vector<8x128xf32>
    %72 = arith.mulf %61, %71 : vector<8x128xf32>
    %73 = arith.addf %70, %72 : vector<8x128xf32>
    %74 = math.tanh %73 : vector<8x128xf32>
    %cst_25 = arith.constant 1.000000e+00 : f32
    %75 = vector.broadcast %cst_25 : f32 to vector<8x128xf32>
    %76 = arith.subf %75, %69 : vector<8x128xf32>
    %77 = arith.mulf %76, %74 : vector<8x128xf32>
    %78 = arith.mulf %69, %12 : vector<8x128xf32>
    %79 = arith.addf %77, %78 : vector<8x128xf32>
    %80 = arith.index_cast %13 : i32 to index
    %c0_26 = arith.constant 0 : index
    %81 = vector.load %arg21[%80, %c0_26] : memref<64x128xf32, #tpu.memory_space<vmem>>, vector<8x128xf32>
    tpu.vector_store %arg21[%80, %c0_26], %49 {strides = array<i32>} : memref<64x128xf32, #tpu.memory_space<vmem>>, vector<8x128xf32>,
    %82 = arith.index_cast %15 : i32 to index
    %c0_27 = arith.constant 0 : index
    %83 = vector.load %arg22[%82, %c0_27] : memref<64x128xf32, #tpu.memory_space<vmem>>, vector<8x128xf32>
    tpu.vector_store %arg22[%82, %c0_27], %79 {strides = array<i32>} : memref<64x128xf32, #tpu.memory_space<vmem>>, vector<8x128xf32>,
    %c1_i32 = arith.constant 1 : i32
    %c8_i32_28 = arith.constant 8 : i32
    %84 = arith.muli %c1_i32, %c8_i32_28 : i32
    %c7_i32_29 = arith.constant 7 : i32
    %85 = arith.subi %c7_i32_29, %c1_i32 : i32
    %c8_i32_30 = arith.constant 8 : i32
    %86 = arith.muli %85, %c8_i32_30 : i32
    %87 = arith.index_cast %84 : i32 to index
    %c0_31 = arith.constant 0 : index
    %88 = vector.load %arg20[%87, %c0_31] : memref<64x768xf32, #tpu.memory_space<vmem>>, vector<8x384xf32>
    %89 = arith.index_cast %86 : i32 to index
    %c384_32 = arith.constant 384 : index
    %90 = vector.load %arg20[%89, %c384_32] : memref<64x768xf32, #tpu.memory_space<vmem>>, vector<8x384xf32>
    %91 = arith.truncf %49 : vector<8x128xf32> to vector<8x128xbf16>
    %cst_33 = arith.constant dense<0.000000e+00> : vector<8x384xf32>
    %92 = tpu.matmul %91, %8, %cst_33 {dimension_numbers = #tpu.dot_dimension_numbers<[1], [0], [0], [1], [0, 0, 1, 1], [], []>} : vector<8x128xbf16>, vector<128x384xbf16>, vector<8x384xf32> -> vector<8x384xf32>
    %93 = vector.broadcast %9 : vector<1x384xf32> to vector<8x384xf32>
    %94 = arith.addf %92, %93 : vector<8x384xf32>
    %95 = vector.extract_strided_slice %88 {offsets = [0, 0], sizes = [8, 128], strides = [1, 1]} : vector<8x384xf32> to vector<8x128xf32>
    %96 = vector.extract_strided_slice %94 {offsets = [0, 0], sizes = [8, 128], strides = [1, 1]} : vector<8x384xf32> to vector<8x128xf32>
    %97 = arith.addf %95, %96 : vector<8x128xf32>
    %98 = arith.negf %97 : vector<8x128xf32>
    %99 = math.exp %98 : vector<8x128xf32>
    %cst_34 = arith.constant 1.000000e+00 : f32
    %100 = vector.broadcast %cst_34 : f32 to vector<8x128xf32>
    %101 = arith.addf %100, %99 : vector<8x128xf32>
    %102 = arith.divf %100, %101 : vector<8x128xf32>
    %103 = vector.extract_strided_slice %88 {offsets = [0, 128], sizes = [8, 128], strides = [1, 1]} : vector<8x384xf32> to vector<8x128xf32>
    %104 = vector.extract_strided_slice %94 {offsets = [0, 128], sizes = [8, 128], strides = [1, 1]} : vector<8x384xf32> to vector<8x128xf32>
    %105 = arith.addf %103, %104 : vector<8x128xf32>
    %106 = arith.negf %105 : vector<8x128xf32>
    %107 = math.exp %106 : vector<8x128xf32>
    %cst_35 = arith.constant 1.000000e+00 : f32
    %108 = vector.broadcast %cst_35 : f32 to vector<8x128xf32>
    %109 = arith.addf %108, %107 : vector<8x128xf32>
    %110 = arith.divf %108, %109 : vector<8x128xf32>
    %111 = vector.extract_strided_slice %88 {offsets = [0, 256], sizes = [8, 128], strides = [1, 1]} : vector<8x384xf32> to vector<8x128xf32>
    %112 = vector.extract_strided_slice %94 {offsets = [0, 256], sizes = [8, 128], strides = [1, 1]} : vector<8x384xf32> to vector<8x128xf32>
    %113 = arith.mulf %102, %112 : vector<8x128xf32>
    %114 = arith.addf %111, %113 : vector<8x128xf32>
    %115 = math.tanh %114 : vector<8x128xf32>
    %cst_36 = arith.constant 1.000000e+00 : f32
    %116 = vector.broadcast %cst_36 : f32 to vector<8x128xf32>
    %117 = arith.subf %116, %110 : vector<8x128xf32>
    %118 = arith.mulf %117, %115 : vector<8x128xf32>
    %119 = arith.mulf %110, %49 : vector<8x128xf32>
    %120 = arith.addf %118, %119 : vector<8x128xf32>
    %121 = arith.truncf %79 : vector<8x128xf32> to vector<8x128xbf16>
    %cst_37 = arith.constant dense<0.000000e+00> : vector<8x384xf32>
    %122 = tpu.matmul %121, %10, %cst_37 {dimension_numbers = #tpu.dot_dimension_numbers<[1], [0], [0], [1], [0, 0, 1, 1], [], []>} : vector<8x128xbf16>, vector<128x384xbf16>, vector<8x384xf32> -> vector<8x384xf32>
    %123 = vector.broadcast %11 : vector<1x384xf32> to vector<8x384xf32>
    %124 = arith.addf %122, %123 : vector<8x384xf32>
    %125 = vector.extract_strided_slice %90 {offsets = [0, 0], sizes = [8, 128], strides = [1, 1]} : vector<8x384xf32> to vector<8x128xf32>
    %126 = vector.extract_strided_slice %124 {offsets = [0, 0], sizes = [8, 128], strides = [1, 1]} : vector<8x384xf32> to vector<8x128xf32>
    %127 = arith.addf %125, %126 : vector<8x128xf32>
    %128 = arith.negf %127 : vector<8x128xf32>
    %129 = math.exp %128 : vector<8x128xf32>
    %cst_38 = arith.constant 1.000000e+00 : f32
    %130 = vector.broadcast %cst_38 : f32 to vector<8x128xf32>
    %131 = arith.addf %130, %129 : vector<8x128xf32>
    %132 = arith.divf %130, %131 : vector<8x128xf32>
    %133 = vector.extract_strided_slice %90 {offsets = [0, 128], sizes = [8, 128], strides = [1, 1]} : vector<8x384xf32> to vector<8x128xf32>
    %134 = vector.extract_strided_slice %124 {offsets = [0, 128], sizes = [8, 128], strides = [1, 1]} : vector<8x384xf32> to vector<8x128xf32>
    %135 = arith.addf %133, %134 : vector<8x128xf32>
    %136 = arith.negf %135 : vector<8x128xf32>
    %137 = math.exp %136 : vector<8x128xf32>
    %cst_39 = arith.constant 1.000000e+00 : f32
    %138 = vector.broadcast %cst_39 : f32 to vector<8x128xf32>
    %139 = arith.addf %138, %137 : vector<8x128xf32>
    %140 = arith.divf %138, %139 : vector<8x128xf32>
    %141 = vector.extract_strided_slice %90 {offsets = [0, 256], sizes = [8, 128], strides = [1, 1]} : vector<8x384xf32> to vector<8x128xf32>
    %142 = vector.extract_strided_slice %124 {offsets = [0, 256], sizes = [8, 128], strides = [1, 1]} : vector<8x384xf32> to vector<8x128xf32>
    %143 = arith.mulf %132, %142 : vector<8x128xf32>
    %144 = arith.addf %141, %143 : vector<8x128xf32>
    %145 = math.tanh %144 : vector<8x128xf32>
    %cst_40 = arith.constant 1.000000e+00 : f32
    %146 = vector.broadcast %cst_40 : f32 to vector<8x128xf32>
    %147 = arith.subf %146, %140 : vector<8x128xf32>
    %148 = arith.mulf %147, %145 : vector<8x128xf32>
    %149 = arith.mulf %140, %79 : vector<8x128xf32>
    %150 = arith.addf %148, %149 : vector<8x128xf32>
    %151 = arith.index_cast %84 : i32 to index
    %c0_41 = arith.constant 0 : index
    %152 = vector.load %arg21[%151, %c0_41] : memref<64x128xf32, #tpu.memory_space<vmem>>, vector<8x128xf32>
    tpu.vector_store %arg21[%151, %c0_41], %120 {strides = array<i32>} : memref<64x128xf32, #tpu.memory_space<vmem>>, vector<8x128xf32>,
    %153 = arith.index_cast %86 : i32 to index
    %c0_42 = arith.constant 0 : index
    %154 = vector.load %arg22[%153, %c0_42] : memref<64x128xf32, #tpu.memory_space<vmem>>, vector<8x128xf32>
    tpu.vector_store %arg22[%153, %c0_42], %150 {strides = array<i32>} : memref<64x128xf32, #tpu.memory_space<vmem>>, vector<8x128xf32>,
    %c2_i32 = arith.constant 2 : i32
    %c8_i32_43 = arith.constant 8 : i32
    %155 = arith.muli %c2_i32, %c8_i32_43 : i32
    %c7_i32_44 = arith.constant 7 : i32
    %156 = arith.subi %c7_i32_44, %c2_i32 : i32
    %c8_i32_45 = arith.constant 8 : i32
    %157 = arith.muli %156, %c8_i32_45 : i32
    %158 = arith.index_cast %155 : i32 to index
    %c0_46 = arith.constant 0 : index
    %159 = vector.load %arg20[%158, %c0_46] : memref<64x768xf32, #tpu.memory_space<vmem>>, vector<8x384xf32>
    %160 = arith.index_cast %157 : i32 to index
    %c384_47 = arith.constant 384 : index
    %161 = vector.load %arg20[%160, %c384_47] : memref<64x768xf32, #tpu.memory_space<vmem>>, vector<8x384xf32>
    %162 = arith.truncf %120 : vector<8x128xf32> to vector<8x128xbf16>
    %cst_48 = arith.constant dense<0.000000e+00> : vector<8x384xf32>
    %163 = tpu.matmul %162, %8, %cst_48 {dimension_numbers = #tpu.dot_dimension_numbers<[1], [0], [0], [1], [0, 0, 1, 1], [], []>} : vector<8x128xbf16>, vector<128x384xbf16>, vector<8x384xf32> -> vector<8x384xf32>
    %164 = vector.broadcast %9 : vector<1x384xf32> to vector<8x384xf32>
    %165 = arith.addf %163, %164 : vector<8x384xf32>
    %166 = vector.extract_strided_slice %159 {offsets = [0, 0], sizes = [8, 128], strides = [1, 1]} : vector<8x384xf32> to vector<8x128xf32>
    %167 = vector.extract_strided_slice %165 {offsets = [0, 0], sizes = [8, 128], strides = [1, 1]} : vector<8x384xf32> to vector<8x128xf32>
    %168 = arith.addf %166, %167 : vector<8x128xf32>
    %169 = arith.negf %168 : vector<8x128xf32>
    %170 = math.exp %169 : vector<8x128xf32>
    %cst_49 = arith.constant 1.000000e+00 : f32
    %171 = vector.broadcast %cst_49 : f32 to vector<8x128xf32>
    %172 = arith.addf %171, %170 : vector<8x128xf32>
    %173 = arith.divf %171, %172 : vector<8x128xf32>
    %174 = vector.extract_strided_slice %159 {offsets = [0, 128], sizes = [8, 128], strides = [1, 1]} : vector<8x384xf32> to vector<8x128xf32>
    %175 = vector.extract_strided_slice %165 {offsets = [0, 128], sizes = [8, 128], strides = [1, 1]} : vector<8x384xf32> to vector<8x128xf32>
    %176 = arith.addf %174, %175 : vector<8x128xf32>
    %177 = arith.negf %176 : vector<8x128xf32>
    %178 = math.exp %177 : vector<8x128xf32>
    %cst_50 = arith.constant 1.000000e+00 : f32
    %179 = vector.broadcast %cst_50 : f32 to vector<8x128xf32>
    %180 = arith.addf %179, %178 : vector<8x128xf32>
    %181 = arith.divf %179, %180 : vector<8x128xf32>
    %182 = vector.extract_strided_slice %159 {offsets = [0, 256], sizes = [8, 128], strides = [1, 1]} : vector<8x384xf32> to vector<8x128xf32>
    %183 = vector.extract_strided_slice %165 {offsets = [0, 256], sizes = [8, 128], strides = [1, 1]} : vector<8x384xf32> to vector<8x128xf32>
    %184 = arith.mulf %173, %183 : vector<8x128xf32>
    %185 = arith.addf %182, %184 : vector<8x128xf32>
    %186 = math.tanh %185 : vector<8x128xf32>
    %cst_51 = arith.constant 1.000000e+00 : f32
    %187 = vector.broadcast %cst_51 : f32 to vector<8x128xf32>
    %188 = arith.subf %187, %181 : vector<8x128xf32>
    %189 = arith.mulf %188, %186 : vector<8x128xf32>
    %190 = arith.mulf %181, %120 : vector<8x128xf32>
    %191 = arith.addf %189, %190 : vector<8x128xf32>
    %192 = arith.truncf %150 : vector<8x128xf32> to vector<8x128xbf16>
    %cst_52 = arith.constant dense<0.000000e+00> : vector<8x384xf32>
    %193 = tpu.matmul %192, %10, %cst_52 {dimension_numbers = #tpu.dot_dimension_numbers<[1], [0], [0], [1], [0, 0, 1, 1], [], []>} : vector<8x128xbf16>, vector<128x384xbf16>, vector<8x384xf32> -> vector<8x384xf32>
    %194 = vector.broadcast %11 : vector<1x384xf32> to vector<8x384xf32>
    %195 = arith.addf %193, %194 : vector<8x384xf32>
    %196 = vector.extract_strided_slice %161 {offsets = [0, 0], sizes = [8, 128], strides = [1, 1]} : vector<8x384xf32> to vector<8x128xf32>
    %197 = vector.extract_strided_slice %195 {offsets = [0, 0], sizes = [8, 128], strides = [1, 1]} : vector<8x384xf32> to vector<8x128xf32>
    %198 = arith.addf %196, %197 : vector<8x128xf32>
    %199 = arith.negf %198 : vector<8x128xf32>
    %200 = math.exp %199 : vector<8x128xf32>
    %cst_53 = arith.constant 1.000000e+00 : f32
    %201 = vector.broadcast %cst_53 : f32 to vector<8x128xf32>
    %202 = arith.addf %201, %200 : vector<8x128xf32>
    %203 = arith.divf %201, %202 : vector<8x128xf32>
    %204 = vector.extract_strided_slice %161 {offsets = [0, 128], sizes = [8, 128], strides = [1, 1]} : vector<8x384xf32> to vector<8x128xf32>
    %205 = vector.extract_strided_slice %195 {offsets = [0, 128], sizes = [8, 128], strides = [1, 1]} : vector<8x384xf32> to vector<8x128xf32>
    %206 = arith.addf %204, %205 : vector<8x128xf32>
    %207 = arith.negf %206 : vector<8x128xf32>
    %208 = math.exp %207 : vector<8x128xf32>
    %cst_54 = arith.constant 1.000000e+00 : f32
    %209 = vector.broadcast %cst_54 : f32 to vector<8x128xf32>
    %210 = arith.addf %209, %208 : vector<8x128xf32>
    %211 = arith.divf %209, %210 : vector<8x128xf32>
    %212 = vector.extract_strided_slice %161 {offsets = [0, 256], sizes = [8, 128], strides = [1, 1]} : vector<8x384xf32> to vector<8x128xf32>
    %213 = vector.extract_strided_slice %195 {offsets = [0, 256], sizes = [8, 128], strides = [1, 1]} : vector<8x384xf32> to vector<8x128xf32>
    %214 = arith.mulf %203, %213 : vector<8x128xf32>
    %215 = arith.addf %212, %214 : vector<8x128xf32>
    %216 = math.tanh %215 : vector<8x128xf32>
    %cst_55 = arith.constant 1.000000e+00 : f32
    %217 = vector.broadcast %cst_55 : f32 to vector<8x128xf32>
    %218 = arith.subf %217, %211 : vector<8x128xf32>
    %219 = arith.mulf %218, %216 : vector<8x128xf32>
    %220 = arith.mulf %211, %150 : vector<8x128xf32>
    %221 = arith.addf %219, %220 : vector<8x128xf32>
    %222 = arith.index_cast %155 : i32 to index
    %c0_56 = arith.constant 0 : index
    %223 = vector.load %arg21[%222, %c0_56] : memref<64x128xf32, #tpu.memory_space<vmem>>, vector<8x128xf32>
    tpu.vector_store %arg21[%222, %c0_56], %191 {strides = array<i32>} : memref<64x128xf32, #tpu.memory_space<vmem>>, vector<8x128xf32>,
    %224 = arith.index_cast %157 : i32 to index
    %c0_57 = arith.constant 0 : index
    %225 = vector.load %arg22[%224, %c0_57] : memref<64x128xf32, #tpu.memory_space<vmem>>, vector<8x128xf32>
    tpu.vector_store %arg22[%224, %c0_57], %221 {strides = array<i32>} : memref<64x128xf32, #tpu.memory_space<vmem>>, vector<8x128xf32>,
    %c3_i32 = arith.constant 3 : i32
    %c8_i32_58 = arith.constant 8 : i32
    %226 = arith.muli %c3_i32, %c8_i32_58 : i32
    %c7_i32_59 = arith.constant 7 : i32
    %227 = arith.subi %c7_i32_59, %c3_i32 : i32
    %c8_i32_60 = arith.constant 8 : i32
    %228 = arith.muli %227, %c8_i32_60 : i32
    %229 = arith.index_cast %226 : i32 to index
    %c0_61 = arith.constant 0 : index
    %230 = vector.load %arg20[%229, %c0_61] : memref<64x768xf32, #tpu.memory_space<vmem>>, vector<8x384xf32>
    %231 = arith.index_cast %228 : i32 to index
    %c384_62 = arith.constant 384 : index
    %232 = vector.load %arg20[%231, %c384_62] : memref<64x768xf32, #tpu.memory_space<vmem>>, vector<8x384xf32>
    %233 = arith.truncf %191 : vector<8x128xf32> to vector<8x128xbf16>
    %cst_63 = arith.constant dense<0.000000e+00> : vector<8x384xf32>
    %234 = tpu.matmul %233, %8, %cst_63 {dimension_numbers = #tpu.dot_dimension_numbers<[1], [0], [0], [1], [0, 0, 1, 1], [], []>} : vector<8x128xbf16>, vector<128x384xbf16>, vector<8x384xf32> -> vector<8x384xf32>
    %235 = vector.broadcast %9 : vector<1x384xf32> to vector<8x384xf32>
    %236 = arith.addf %234, %235 : vector<8x384xf32>
    %237 = vector.extract_strided_slice %230 {offsets = [0, 0], sizes = [8, 128], strides = [1, 1]} : vector<8x384xf32> to vector<8x128xf32>
    %238 = vector.extract_strided_slice %236 {offsets = [0, 0], sizes = [8, 128], strides = [1, 1]} : vector<8x384xf32> to vector<8x128xf32>
    %239 = arith.addf %237, %238 : vector<8x128xf32>
    %240 = arith.negf %239 : vector<8x128xf32>
    %241 = math.exp %240 : vector<8x128xf32>
    %cst_64 = arith.constant 1.000000e+00 : f32
    %242 = vector.broadcast %cst_64 : f32 to vector<8x128xf32>
    %243 = arith.addf %242, %241 : vector<8x128xf32>
    %244 = arith.divf %242, %243 : vector<8x128xf32>
    %245 = vector.extract_strided_slice %230 {offsets = [0, 128], sizes = [8, 128], strides = [1, 1]} : vector<8x384xf32> to vector<8x128xf32>
    %246 = vector.extract_strided_slice %236 {offsets = [0, 128], sizes = [8, 128], strides = [1, 1]} : vector<8x384xf32> to vector<8x128xf32>
    %247 = arith.addf %245, %246 : vector<8x128xf32>
    %248 = arith.negf %247 : vector<8x128xf32>
    %249 = math.exp %248 : vector<8x128xf32>
    %cst_65 = arith.constant 1.000000e+00 : f32
    %250 = vector.broadcast %cst_65 : f32 to vector<8x128xf32>
    %251 = arith.addf %250, %249 : vector<8x128xf32>
    %252 = arith.divf %250, %251 : vector<8x128xf32>
    %253 = vector.extract_strided_slice %230 {offsets = [0, 256], sizes = [8, 128], strides = [1, 1]} : vector<8x384xf32> to vector<8x128xf32>
    %254 = vector.extract_strided_slice %236 {offsets = [0, 256], sizes = [8, 128], strides = [1, 1]} : vector<8x384xf32> to vector<8x128xf32>
    %255 = arith.mulf %244, %254 : vector<8x128xf32>
    %256 = arith.addf %253, %255 : vector<8x128xf32>
    %257 = math.tanh %256 : vector<8x128xf32>
    %cst_66 = arith.constant 1.000000e+00 : f32
    %258 = vector.broadcast %cst_66 : f32 to vector<8x128xf32>
    %259 = arith.subf %258, %252 : vector<8x128xf32>
    %260 = arith.mulf %259, %257 : vector<8x128xf32>
    %261 = arith.mulf %252, %191 : vector<8x128xf32>
    %262 = arith.addf %260, %261 : vector<8x128xf32>
    %263 = arith.truncf %221 : vector<8x128xf32> to vector<8x128xbf16>
    %cst_67 = arith.constant dense<0.000000e+00> : vector<8x384xf32>
    %264 = tpu.matmul %263, %10, %cst_67 {dimension_numbers = #tpu.dot_dimension_numbers<[1], [0], [0], [1], [0, 0, 1, 1], [], []>} : vector<8x128xbf16>, vector<128x384xbf16>, vector<8x384xf32> -> vector<8x384xf32>
    %265 = vector.broadcast %11 : vector<1x384xf32> to vector<8x384xf32>
    %266 = arith.addf %264, %265 : vector<8x384xf32>
    %267 = vector.extract_strided_slice %232 {offsets = [0, 0], sizes = [8, 128], strides = [1, 1]} : vector<8x384xf32> to vector<8x128xf32>
    %268 = vector.extract_strided_slice %266 {offsets = [0, 0], sizes = [8, 128], strides = [1, 1]} : vector<8x384xf32> to vector<8x128xf32>
    %269 = arith.addf %267, %268 : vector<8x128xf32>
    %270 = arith.negf %269 : vector<8x128xf32>
    %271 = math.exp %270 : vector<8x128xf32>
    %cst_68 = arith.constant 1.000000e+00 : f32
    %272 = vector.broadcast %cst_68 : f32 to vector<8x128xf32>
    %273 = arith.addf %272, %271 : vector<8x128xf32>
    %274 = arith.divf %272, %273 : vector<8x128xf32>
    %275 = vector.extract_strided_slice %232 {offsets = [0, 128], sizes = [8, 128], strides = [1, 1]} : vector<8x384xf32> to vector<8x128xf32>
    %276 = vector.extract_strided_slice %266 {offsets = [0, 128], sizes = [8, 128], strides = [1, 1]} : vector<8x384xf32> to vector<8x128xf32>
    %277 = arith.addf %275, %276 : vector<8x128xf32>
    %278 = arith.negf %277 : vector<8x128xf32>
    %279 = math.exp %278 : vector<8x128xf32>
    %cst_69 = arith.constant 1.000000e+00 : f32
    %280 = vector.broadcast %cst_69 : f32 to vector<8x128xf32>
    %281 = arith.addf %280, %279 : vector<8x128xf32>
    %282 = arith.divf %280, %281 : vector<8x128xf32>
    %283 = vector.extract_strided_slice %232 {offsets = [0, 256], sizes = [8, 128], strides = [1, 1]} : vector<8x384xf32> to vector<8x128xf32>
    %284 = vector.extract_strided_slice %266 {offsets = [0, 256], sizes = [8, 128], strides = [1, 1]} : vector<8x384xf32> to vector<8x128xf32>
    %285 = arith.mulf %274, %284 : vector<8x128xf32>
    %286 = arith.addf %283, %285 : vector<8x128xf32>
    %287 = math.tanh %286 : vector<8x128xf32>
    %cst_70 = arith.constant 1.000000e+00 : f32
    %288 = vector.broadcast %cst_70 : f32 to vector<8x128xf32>
    %289 = arith.subf %288, %282 : vector<8x128xf32>
    %290 = arith.mulf %289, %287 : vector<8x128xf32>
    %291 = arith.mulf %282, %221 : vector<8x128xf32>
    %292 = arith.addf %290, %291 : vector<8x128xf32>
    %293 = arith.index_cast %226 : i32 to index
    %c0_71 = arith.constant 0 : index
    %294 = vector.load %arg21[%293, %c0_71] : memref<64x128xf32, #tpu.memory_space<vmem>>, vector<8x128xf32>
    tpu.vector_store %arg21[%293, %c0_71], %262 {strides = array<i32>} : memref<64x128xf32, #tpu.memory_space<vmem>>, vector<8x128xf32>,
    %295 = arith.index_cast %228 : i32 to index
    %c0_72 = arith.constant 0 : index
    %296 = vector.load %arg22[%295, %c0_72] : memref<64x128xf32, #tpu.memory_space<vmem>>, vector<8x128xf32>
    tpu.vector_store %arg22[%295, %c0_72], %292 {strides = array<i32>} : memref<64x128xf32, #tpu.memory_space<vmem>>, vector<8x128xf32>,
    %c4_i32 = arith.constant 4 : i32
    %c8_i32_73 = arith.constant 8 : i32
    %297 = arith.muli %c4_i32, %c8_i32_73 : i32
    %c7_i32_74 = arith.constant 7 : i32
    %298 = arith.subi %c7_i32_74, %c4_i32 : i32
    %c8_i32_75 = arith.constant 8 : i32
    %299 = arith.muli %298, %c8_i32_75 : i32
    %300 = arith.index_cast %297 : i32 to index
    %c0_76 = arith.constant 0 : index
    %301 = vector.load %arg20[%300, %c0_76] : memref<64x768xf32, #tpu.memory_space<vmem>>, vector<8x384xf32>
    %302 = arith.index_cast %299 : i32 to index
    %c384_77 = arith.constant 384 : index
    %303 = vector.load %arg20[%302, %c384_77] : memref<64x768xf32, #tpu.memory_space<vmem>>, vector<8x384xf32>
    %304 = arith.truncf %262 : vector<8x128xf32> to vector<8x128xbf16>
    %cst_78 = arith.constant dense<0.000000e+00> : vector<8x384xf32>
    %305 = tpu.matmul %304, %8, %cst_78 {dimension_numbers = #tpu.dot_dimension_numbers<[1], [0], [0], [1], [0, 0, 1, 1], [], []>} : vector<8x128xbf16>, vector<128x384xbf16>, vector<8x384xf32> -> vector<8x384xf32>
    %306 = vector.broadcast %9 : vector<1x384xf32> to vector<8x384xf32>
    %307 = arith.addf %305, %306 : vector<8x384xf32>
    %308 = vector.extract_strided_slice %301 {offsets = [0, 0], sizes = [8, 128], strides = [1, 1]} : vector<8x384xf32> to vector<8x128xf32>
    %309 = vector.extract_strided_slice %307 {offsets = [0, 0], sizes = [8, 128], strides = [1, 1]} : vector<8x384xf32> to vector<8x128xf32>
    %310 = arith.addf %308, %309 : vector<8x128xf32>
    %311 = arith.negf %310 : vector<8x128xf32>
    %312 = math.exp %311 : vector<8x128xf32>
    %cst_79 = arith.constant 1.000000e+00 : f32
    %313 = vector.broadcast %cst_79 : f32 to vector<8x128xf32>
    %314 = arith.addf %313, %312 : vector<8x128xf32>
    %315 = arith.divf %313, %314 : vector<8x128xf32>
    %316 = vector.extract_strided_slice %301 {offsets = [0, 128], sizes = [8, 128], strides = [1, 1]} : vector<8x384xf32> to vector<8x128xf32>
    %317 = vector.extract_strided_slice %307 {offsets = [0, 128], sizes = [8, 128], strides = [1, 1]} : vector<8x384xf32> to vector<8x128xf32>
    %318 = arith.addf %316, %317 : vector<8x128xf32>
    %319 = arith.negf %318 : vector<8x128xf32>
    %320 = math.exp %319 : vector<8x128xf32>
    %cst_80 = arith.constant 1.000000e+00 : f32
    %321 = vector.broadcast %cst_80 : f32 to vector<8x128xf32>
    %322 = arith.addf %321, %320 : vector<8x128xf32>
    %323 = arith.divf %321, %322 : vector<8x128xf32>
    %324 = vector.extract_strided_slice %301 {offsets = [0, 256], sizes = [8, 128], strides = [1, 1]} : vector<8x384xf32> to vector<8x128xf32>
    %325 = vector.extract_strided_slice %307 {offsets = [0, 256], sizes = [8, 128], strides = [1, 1]} : vector<8x384xf32> to vector<8x128xf32>
    %326 = arith.mulf %315, %325 : vector<8x128xf32>
    %327 = arith.addf %324, %326 : vector<8x128xf32>
    %328 = math.tanh %327 : vector<8x128xf32>
    %cst_81 = arith.constant 1.000000e+00 : f32
    %329 = vector.broadcast %cst_81 : f32 to vector<8x128xf32>
    %330 = arith.subf %329, %323 : vector<8x128xf32>
    %331 = arith.mulf %330, %328 : vector<8x128xf32>
    %332 = arith.mulf %323, %262 : vector<8x128xf32>
    %333 = arith.addf %331, %332 : vector<8x128xf32>
    %334 = arith.truncf %292 : vector<8x128xf32> to vector<8x128xbf16>
    %cst_82 = arith.constant dense<0.000000e+00> : vector<8x384xf32>
    %335 = tpu.matmul %334, %10, %cst_82 {dimension_numbers = #tpu.dot_dimension_numbers<[1], [0], [0], [1], [0, 0, 1, 1], [], []>} : vector<8x128xbf16>, vector<128x384xbf16>, vector<8x384xf32> -> vector<8x384xf32>
    %336 = vector.broadcast %11 : vector<1x384xf32> to vector<8x384xf32>
    %337 = arith.addf %335, %336 : vector<8x384xf32>
    %338 = vector.extract_strided_slice %303 {offsets = [0, 0], sizes = [8, 128], strides = [1, 1]} : vector<8x384xf32> to vector<8x128xf32>
    %339 = vector.extract_strided_slice %337 {offsets = [0, 0], sizes = [8, 128], strides = [1, 1]} : vector<8x384xf32> to vector<8x128xf32>
    %340 = arith.addf %338, %339 : vector<8x128xf32>
    %341 = arith.negf %340 : vector<8x128xf32>
    %342 = math.exp %341 : vector<8x128xf32>
    %cst_83 = arith.constant 1.000000e+00 : f32
    %343 = vector.broadcast %cst_83 : f32 to vector<8x128xf32>
    %344 = arith.addf %343, %342 : vector<8x128xf32>
    %345 = arith.divf %343, %344 : vector<8x128xf32>
    %346 = vector.extract_strided_slice %303 {offsets = [0, 128], sizes = [8, 128], strides = [1, 1]} : vector<8x384xf32> to vector<8x128xf32>
    %347 = vector.extract_strided_slice %337 {offsets = [0, 128], sizes = [8, 128], strides = [1, 1]} : vector<8x384xf32> to vector<8x128xf32>
    %348 = arith.addf %346, %347 : vector<8x128xf32>
    %349 = arith.negf %348 : vector<8x128xf32>
    %350 = math.exp %349 : vector<8x128xf32>
    %cst_84 = arith.constant 1.000000e+00 : f32
    %351 = vector.broadcast %cst_84 : f32 to vector<8x128xf32>
    %352 = arith.addf %351, %350 : vector<8x128xf32>
    %353 = arith.divf %351, %352 : vector<8x128xf32>
    %354 = vector.extract_strided_slice %303 {offsets = [0, 256], sizes = [8, 128], strides = [1, 1]} : vector<8x384xf32> to vector<8x128xf32>
    %355 = vector.extract_strided_slice %337 {offsets = [0, 256], sizes = [8, 128], strides = [1, 1]} : vector<8x384xf32> to vector<8x128xf32>
    %356 = arith.mulf %345, %355 : vector<8x128xf32>
    %357 = arith.addf %354, %356 : vector<8x128xf32>
    %358 = math.tanh %357 : vector<8x128xf32>
    %cst_85 = arith.constant 1.000000e+00 : f32
    %359 = vector.broadcast %cst_85 : f32 to vector<8x128xf32>
    %360 = arith.subf %359, %353 : vector<8x128xf32>
    %361 = arith.mulf %360, %358 : vector<8x128xf32>
    %362 = arith.mulf %353, %292 : vector<8x128xf32>
    %363 = arith.addf %361, %362 : vector<8x128xf32>
    %364 = arith.index_cast %297 : i32 to index
    %c0_86 = arith.constant 0 : index
    %365 = vector.load %arg21[%364, %c0_86] : memref<64x128xf32, #tpu.memory_space<vmem>>, vector<8x128xf32>
    tpu.vector_store %arg21[%364, %c0_86], %333 {strides = array<i32>} : memref<64x128xf32, #tpu.memory_space<vmem>>, vector<8x128xf32>,
    %366 = arith.index_cast %299 : i32 to index
    %c0_87 = arith.constant 0 : index
    %367 = vector.load %arg22[%366, %c0_87] : memref<64x128xf32, #tpu.memory_space<vmem>>, vector<8x128xf32>
    tpu.vector_store %arg22[%366, %c0_87], %363 {strides = array<i32>} : memref<64x128xf32, #tpu.memory_space<vmem>>, vector<8x128xf32>,
    %c5_i32 = arith.constant 5 : i32
    %c8_i32_88 = arith.constant 8 : i32
    %368 = arith.muli %c5_i32, %c8_i32_88 : i32
    %c7_i32_89 = arith.constant 7 : i32
    %369 = arith.subi %c7_i32_89, %c5_i32 : i32
    %c8_i32_90 = arith.constant 8 : i32
    %370 = arith.muli %369, %c8_i32_90 : i32
    %371 = arith.index_cast %368 : i32 to index
    %c0_91 = arith.constant 0 : index
    %372 = vector.load %arg20[%371, %c0_91] : memref<64x768xf32, #tpu.memory_space<vmem>>, vector<8x384xf32>
    %373 = arith.index_cast %370 : i32 to index
    %c384_92 = arith.constant 384 : index
    %374 = vector.load %arg20[%373, %c384_92] : memref<64x768xf32, #tpu.memory_space<vmem>>, vector<8x384xf32>
    %375 = arith.truncf %333 : vector<8x128xf32> to vector<8x128xbf16>
    %cst_93 = arith.constant dense<0.000000e+00> : vector<8x384xf32>
    %376 = tpu.matmul %375, %8, %cst_93 {dimension_numbers = #tpu.dot_dimension_numbers<[1], [0], [0], [1], [0, 0, 1, 1], [], []>} : vector<8x128xbf16>, vector<128x384xbf16>, vector<8x384xf32> -> vector<8x384xf32>
    %377 = vector.broadcast %9 : vector<1x384xf32> to vector<8x384xf32>
    %378 = arith.addf %376, %377 : vector<8x384xf32>
    %379 = vector.extract_strided_slice %372 {offsets = [0, 0], sizes = [8, 128], strides = [1, 1]} : vector<8x384xf32> to vector<8x128xf32>
    %380 = vector.extract_strided_slice %378 {offsets = [0, 0], sizes = [8, 128], strides = [1, 1]} : vector<8x384xf32> to vector<8x128xf32>
    %381 = arith.addf %379, %380 : vector<8x128xf32>
    %382 = arith.negf %381 : vector<8x128xf32>
    %383 = math.exp %382 : vector<8x128xf32>
    %cst_94 = arith.constant 1.000000e+00 : f32
    %384 = vector.broadcast %cst_94 : f32 to vector<8x128xf32>
    %385 = arith.addf %384, %383 : vector<8x128xf32>
    %386 = arith.divf %384, %385 : vector<8x128xf32>
    %387 = vector.extract_strided_slice %372 {offsets = [0, 128], sizes = [8, 128], strides = [1, 1]} : vector<8x384xf32> to vector<8x128xf32>
    %388 = vector.extract_strided_slice %378 {offsets = [0, 128], sizes = [8, 128], strides = [1, 1]} : vector<8x384xf32> to vector<8x128xf32>
    %389 = arith.addf %387, %388 : vector<8x128xf32>
    %390 = arith.negf %389 : vector<8x128xf32>
    %391 = math.exp %390 : vector<8x128xf32>
    %cst_95 = arith.constant 1.000000e+00 : f32
    %392 = vector.broadcast %cst_95 : f32 to vector<8x128xf32>
    %393 = arith.addf %392, %391 : vector<8x128xf32>
    %394 = arith.divf %392, %393 : vector<8x128xf32>
    %395 = vector.extract_strided_slice %372 {offsets = [0, 256], sizes = [8, 128], strides = [1, 1]} : vector<8x384xf32> to vector<8x128xf32>
    %396 = vector.extract_strided_slice %378 {offsets = [0, 256], sizes = [8, 128], strides = [1, 1]} : vector<8x384xf32> to vector<8x128xf32>
    %397 = arith.mulf %386, %396 : vector<8x128xf32>
    %398 = arith.addf %395, %397 : vector<8x128xf32>
    %399 = math.tanh %398 : vector<8x128xf32>
    %cst_96 = arith.constant 1.000000e+00 : f32
    %400 = vector.broadcast %cst_96 : f32 to vector<8x128xf32>
    %401 = arith.subf %400, %394 : vector<8x128xf32>
    %402 = arith.mulf %401, %399 : vector<8x128xf32>
    %403 = arith.mulf %394, %333 : vector<8x128xf32>
    %404 = arith.addf %402, %403 : vector<8x128xf32>
    %405 = arith.truncf %363 : vector<8x128xf32> to vector<8x128xbf16>
    %cst_97 = arith.constant dense<0.000000e+00> : vector<8x384xf32>
    %406 = tpu.matmul %405, %10, %cst_97 {dimension_numbers = #tpu.dot_dimension_numbers<[1], [0], [0], [1], [0, 0, 1, 1], [], []>} : vector<8x128xbf16>, vector<128x384xbf16>, vector<8x384xf32> -> vector<8x384xf32>
    %407 = vector.broadcast %11 : vector<1x384xf32> to vector<8x384xf32>
    %408 = arith.addf %406, %407 : vector<8x384xf32>
    %409 = vector.extract_strided_slice %374 {offsets = [0, 0], sizes = [8, 128], strides = [1, 1]} : vector<8x384xf32> to vector<8x128xf32>
    %410 = vector.extract_strided_slice %408 {offsets = [0, 0], sizes = [8, 128], strides = [1, 1]} : vector<8x384xf32> to vector<8x128xf32>
    %411 = arith.addf %409, %410 : vector<8x128xf32>
    %412 = arith.negf %411 : vector<8x128xf32>
    %413 = math.exp %412 : vector<8x128xf32>
    %cst_98 = arith.constant 1.000000e+00 : f32
    %414 = vector.broadcast %cst_98 : f32 to vector<8x128xf32>
    %415 = arith.addf %414, %413 : vector<8x128xf32>
    %416 = arith.divf %414, %415 : vector<8x128xf32>
    %417 = vector.extract_strided_slice %374 {offsets = [0, 128], sizes = [8, 128], strides = [1, 1]} : vector<8x384xf32> to vector<8x128xf32>
    %418 = vector.extract_strided_slice %408 {offsets = [0, 128], sizes = [8, 128], strides = [1, 1]} : vector<8x384xf32> to vector<8x128xf32>
    %419 = arith.addf %417, %418 : vector<8x128xf32>
    %420 = arith.negf %419 : vector<8x128xf32>
    %421 = math.exp %420 : vector<8x128xf32>
    %cst_99 = arith.constant 1.000000e+00 : f32
    %422 = vector.broadcast %cst_99 : f32 to vector<8x128xf32>
    %423 = arith.addf %422, %421 : vector<8x128xf32>
    %424 = arith.divf %422, %423 : vector<8x128xf32>
    %425 = vector.extract_strided_slice %374 {offsets = [0, 256], sizes = [8, 128], strides = [1, 1]} : vector<8x384xf32> to vector<8x128xf32>
    %426 = vector.extract_strided_slice %408 {offsets = [0, 256], sizes = [8, 128], strides = [1, 1]} : vector<8x384xf32> to vector<8x128xf32>
    %427 = arith.mulf %416, %426 : vector<8x128xf32>
    %428 = arith.addf %425, %427 : vector<8x128xf32>
    %429 = math.tanh %428 : vector<8x128xf32>
    %cst_100 = arith.constant 1.000000e+00 : f32
    %430 = vector.broadcast %cst_100 : f32 to vector<8x128xf32>
    %431 = arith.subf %430, %424 : vector<8x128xf32>
    %432 = arith.mulf %431, %429 : vector<8x128xf32>
    %433 = arith.mulf %424, %363 : vector<8x128xf32>
    %434 = arith.addf %432, %433 : vector<8x128xf32>
    %435 = arith.index_cast %368 : i32 to index
    %c0_101 = arith.constant 0 : index
    %436 = vector.load %arg21[%435, %c0_101] : memref<64x128xf32, #tpu.memory_space<vmem>>, vector<8x128xf32>
    tpu.vector_store %arg21[%435, %c0_101], %404 {strides = array<i32>} : memref<64x128xf32, #tpu.memory_space<vmem>>, vector<8x128xf32>,
    %437 = arith.index_cast %370 : i32 to index
    %c0_102 = arith.constant 0 : index
    %438 = vector.load %arg22[%437, %c0_102] : memref<64x128xf32, #tpu.memory_space<vmem>>, vector<8x128xf32>
    tpu.vector_store %arg22[%437, %c0_102], %434 {strides = array<i32>} : memref<64x128xf32, #tpu.memory_space<vmem>>, vector<8x128xf32>,
    %c6_i32 = arith.constant 6 : i32
    %c8_i32_103 = arith.constant 8 : i32
    %439 = arith.muli %c6_i32, %c8_i32_103 : i32
    %c7_i32_104 = arith.constant 7 : i32
    %440 = arith.subi %c7_i32_104, %c6_i32 : i32
    %c8_i32_105 = arith.constant 8 : i32
    %441 = arith.muli %440, %c8_i32_105 : i32
    %442 = arith.index_cast %439 : i32 to index
    %c0_106 = arith.constant 0 : index
    %443 = vector.load %arg20[%442, %c0_106] : memref<64x768xf32, #tpu.memory_space<vmem>>, vector<8x384xf32>
    %444 = arith.index_cast %441 : i32 to index
    %c384_107 = arith.constant 384 : index
    %445 = vector.load %arg20[%444, %c384_107] : memref<64x768xf32, #tpu.memory_space<vmem>>, vector<8x384xf32>
    %446 = arith.truncf %404 : vector<8x128xf32> to vector<8x128xbf16>
    %cst_108 = arith.constant dense<0.000000e+00> : vector<8x384xf32>
    %447 = tpu.matmul %446, %8, %cst_108 {dimension_numbers = #tpu.dot_dimension_numbers<[1], [0], [0], [1], [0, 0, 1, 1], [], []>} : vector<8x128xbf16>, vector<128x384xbf16>, vector<8x384xf32> -> vector<8x384xf32>
    %448 = vector.broadcast %9 : vector<1x384xf32> to vector<8x384xf32>
    %449 = arith.addf %447, %448 : vector<8x384xf32>
    %450 = vector.extract_strided_slice %443 {offsets = [0, 0], sizes = [8, 128], strides = [1, 1]} : vector<8x384xf32> to vector<8x128xf32>
    %451 = vector.extract_strided_slice %449 {offsets = [0, 0], sizes = [8, 128], strides = [1, 1]} : vector<8x384xf32> to vector<8x128xf32>
    %452 = arith.addf %450, %451 : vector<8x128xf32>
    %453 = arith.negf %452 : vector<8x128xf32>
    %454 = math.exp %453 : vector<8x128xf32>
    %cst_109 = arith.constant 1.000000e+00 : f32
    %455 = vector.broadcast %cst_109 : f32 to vector<8x128xf32>
    %456 = arith.addf %455, %454 : vector<8x128xf32>
    %457 = arith.divf %455, %456 : vector<8x128xf32>
    %458 = vector.extract_strided_slice %443 {offsets = [0, 128], sizes = [8, 128], strides = [1, 1]} : vector<8x384xf32> to vector<8x128xf32>
    %459 = vector.extract_strided_slice %449 {offsets = [0, 128], sizes = [8, 128], strides = [1, 1]} : vector<8x384xf32> to vector<8x128xf32>
    %460 = arith.addf %458, %459 : vector<8x128xf32>
    %461 = arith.negf %460 : vector<8x128xf32>
    %462 = math.exp %461 : vector<8x128xf32>
    %cst_110 = arith.constant 1.000000e+00 : f32
    %463 = vector.broadcast %cst_110 : f32 to vector<8x128xf32>
    %464 = arith.addf %463, %462 : vector<8x128xf32>
    %465 = arith.divf %463, %464 : vector<8x128xf32>
    %466 = vector.extract_strided_slice %443 {offsets = [0, 256], sizes = [8, 128], strides = [1, 1]} : vector<8x384xf32> to vector<8x128xf32>
    %467 = vector.extract_strided_slice %449 {offsets = [0, 256], sizes = [8, 128], strides = [1, 1]} : vector<8x384xf32> to vector<8x128xf32>
    %468 = arith.mulf %457, %467 : vector<8x128xf32>
    %469 = arith.addf %466, %468 : vector<8x128xf32>
    %470 = math.tanh %469 : vector<8x128xf32>
    %cst_111 = arith.constant 1.000000e+00 : f32
    %471 = vector.broadcast %cst_111 : f32 to vector<8x128xf32>
    %472 = arith.subf %471, %465 : vector<8x128xf32>
    %473 = arith.mulf %472, %470 : vector<8x128xf32>
    %474 = arith.mulf %465, %404 : vector<8x128xf32>
    %475 = arith.addf %473, %474 : vector<8x128xf32>
    %476 = arith.truncf %434 : vector<8x128xf32> to vector<8x128xbf16>
    %cst_112 = arith.constant dense<0.000000e+00> : vector<8x384xf32>
    %477 = tpu.matmul %476, %10, %cst_112 {dimension_numbers = #tpu.dot_dimension_numbers<[1], [0], [0], [1], [0, 0, 1, 1], [], []>} : vector<8x128xbf16>, vector<128x384xbf16>, vector<8x384xf32> -> vector<8x384xf32>
    %478 = vector.broadcast %11 : vector<1x384xf32> to vector<8x384xf32>
    %479 = arith.addf %477, %478 : vector<8x384xf32>
    %480 = vector.extract_strided_slice %445 {offsets = [0, 0], sizes = [8, 128], strides = [1, 1]} : vector<8x384xf32> to vector<8x128xf32>
    %481 = vector.extract_strided_slice %479 {offsets = [0, 0], sizes = [8, 128], strides = [1, 1]} : vector<8x384xf32> to vector<8x128xf32>
    %482 = arith.addf %480, %481 : vector<8x128xf32>
    %483 = arith.negf %482 : vector<8x128xf32>
    %484 = math.exp %483 : vector<8x128xf32>
    %cst_113 = arith.constant 1.000000e+00 : f32
    %485 = vector.broadcast %cst_113 : f32 to vector<8x128xf32>
    %486 = arith.addf %485, %484 : vector<8x128xf32>
    %487 = arith.divf %485, %486 : vector<8x128xf32>
    %488 = vector.extract_strided_slice %445 {offsets = [0, 128], sizes = [8, 128], strides = [1, 1]} : vector<8x384xf32> to vector<8x128xf32>
    %489 = vector.extract_strided_slice %479 {offsets = [0, 128], sizes = [8, 128], strides = [1, 1]} : vector<8x384xf32> to vector<8x128xf32>
    %490 = arith.addf %488, %489 : vector<8x128xf32>
    %491 = arith.negf %490 : vector<8x128xf32>
    %492 = math.exp %491 : vector<8x128xf32>
    %cst_114 = arith.constant 1.000000e+00 : f32
    %493 = vector.broadcast %cst_114 : f32 to vector<8x128xf32>
    %494 = arith.addf %493, %492 : vector<8x128xf32>
    %495 = arith.divf %493, %494 : vector<8x128xf32>
    %496 = vector.extract_strided_slice %445 {offsets = [0, 256], sizes = [8, 128], strides = [1, 1]} : vector<8x384xf32> to vector<8x128xf32>
    %497 = vector.extract_strided_slice %479 {offsets = [0, 256], sizes = [8, 128], strides = [1, 1]} : vector<8x384xf32> to vector<8x128xf32>
    %498 = arith.mulf %487, %497 : vector<8x128xf32>
    %499 = arith.addf %496, %498 : vector<8x128xf32>
    %500 = math.tanh %499 : vector<8x128xf32>
    %cst_115 = arith.constant 1.000000e+00 : f32
    %501 = vector.broadcast %cst_115 : f32 to vector<8x128xf32>
    %502 = arith.subf %501, %495 : vector<8x128xf32>
    %503 = arith.mulf %502, %500 : vector<8x128xf32>
    %504 = arith.mulf %495, %434 : vector<8x128xf32>
    %505 = arith.addf %503, %504 : vector<8x128xf32>
    %506 = arith.index_cast %439 : i32 to index
    %c0_116 = arith.constant 0 : index
    %507 = vector.load %arg21[%506, %c0_116] : memref<64x128xf32, #tpu.memory_space<vmem>>, vector<8x128xf32>
    tpu.vector_store %arg21[%506, %c0_116], %475 {strides = array<i32>} : memref<64x128xf32, #tpu.memory_space<vmem>>, vector<8x128xf32>,
    %508 = arith.index_cast %441 : i32 to index
    %c0_117 = arith.constant 0 : index
    %509 = vector.load %arg22[%508, %c0_117] : memref<64x128xf32, #tpu.memory_space<vmem>>, vector<8x128xf32>
    tpu.vector_store %arg22[%508, %c0_117], %505 {strides = array<i32>} : memref<64x128xf32, #tpu.memory_space<vmem>>, vector<8x128xf32>,
    %c7_i32_118 = arith.constant 7 : i32
    %c8_i32_119 = arith.constant 8 : i32
    %510 = arith.muli %c7_i32_118, %c8_i32_119 : i32
    %c7_i32_120 = arith.constant 7 : i32
    %511 = arith.subi %c7_i32_120, %c7_i32_118 : i32
    %c8_i32_121 = arith.constant 8 : i32
    %512 = arith.muli %511, %c8_i32_121 : i32
    %513 = arith.index_cast %510 : i32 to index
    %c0_122 = arith.constant 0 : index
    %514 = vector.load %arg20[%513, %c0_122] : memref<64x768xf32, #tpu.memory_space<vmem>>, vector<8x384xf32>
    %515 = arith.index_cast %512 : i32 to index
    %c384_123 = arith.constant 384 : index
    %516 = vector.load %arg20[%515, %c384_123] : memref<64x768xf32, #tpu.memory_space<vmem>>, vector<8x384xf32>
    %517 = arith.truncf %475 : vector<8x128xf32> to vector<8x128xbf16>
    %cst_124 = arith.constant dense<0.000000e+00> : vector<8x384xf32>
    %518 = tpu.matmul %517, %8, %cst_124 {dimension_numbers = #tpu.dot_dimension_numbers<[1], [0], [0], [1], [0, 0, 1, 1], [], []>} : vector<8x128xbf16>, vector<128x384xbf16>, vector<8x384xf32> -> vector<8x384xf32>
    %519 = vector.broadcast %9 : vector<1x384xf32> to vector<8x384xf32>
    %520 = arith.addf %518, %519 : vector<8x384xf32>
    %521 = vector.extract_strided_slice %514 {offsets = [0, 0], sizes = [8, 128], strides = [1, 1]} : vector<8x384xf32> to vector<8x128xf32>
    %522 = vector.extract_strided_slice %520 {offsets = [0, 0], sizes = [8, 128], strides = [1, 1]} : vector<8x384xf32> to vector<8x128xf32>
    %523 = arith.addf %521, %522 : vector<8x128xf32>
    %524 = arith.negf %523 : vector<8x128xf32>
    %525 = math.exp %524 : vector<8x128xf32>
    %cst_125 = arith.constant 1.000000e+00 : f32
    %526 = vector.broadcast %cst_125 : f32 to vector<8x128xf32>
    %527 = arith.addf %526, %525 : vector<8x128xf32>
    %528 = arith.divf %526, %527 : vector<8x128xf32>
    %529 = vector.extract_strided_slice %514 {offsets = [0, 128], sizes = [8, 128], strides = [1, 1]} : vector<8x384xf32> to vector<8x128xf32>
    %530 = vector.extract_strided_slice %520 {offsets = [0, 128], sizes = [8, 128], strides = [1, 1]} : vector<8x384xf32> to vector<8x128xf32>
    %531 = arith.addf %529, %530 : vector<8x128xf32>
    %532 = arith.negf %531 : vector<8x128xf32>
    %533 = math.exp %532 : vector<8x128xf32>
    %cst_126 = arith.constant 1.000000e+00 : f32
    %534 = vector.broadcast %cst_126 : f32 to vector<8x128xf32>
    %535 = arith.addf %534, %533 : vector<8x128xf32>
    %536 = arith.divf %534, %535 : vector<8x128xf32>
    %537 = vector.extract_strided_slice %514 {offsets = [0, 256], sizes = [8, 128], strides = [1, 1]} : vector<8x384xf32> to vector<8x128xf32>
    %538 = vector.extract_strided_slice %520 {offsets = [0, 256], sizes = [8, 128], strides = [1, 1]} : vector<8x384xf32> to vector<8x128xf32>
    %539 = arith.mulf %528, %538 : vector<8x128xf32>
    %540 = arith.addf %537, %539 : vector<8x128xf32>
    %541 = math.tanh %540 : vector<8x128xf32>
    %cst_127 = arith.constant 1.000000e+00 : f32
    %542 = vector.broadcast %cst_127 : f32 to vector<8x128xf32>
    %543 = arith.subf %542, %536 : vector<8x128xf32>
    %544 = arith.mulf %543, %541 : vector<8x128xf32>
    %545 = arith.mulf %536, %475 : vector<8x128xf32>
    %546 = arith.addf %544, %545 : vector<8x128xf32>
    %547 = arith.truncf %505 : vector<8x128xf32> to vector<8x128xbf16>
    %cst_128 = arith.constant dense<0.000000e+00> : vector<8x384xf32>
    %548 = tpu.matmul %547, %10, %cst_128 {dimension_numbers = #tpu.dot_dimension_numbers<[1], [0], [0], [1], [0, 0, 1, 1], [], []>} : vector<8x128xbf16>, vector<128x384xbf16>, vector<8x384xf32> -> vector<8x384xf32>
    %549 = vector.broadcast %11 : vector<1x384xf32> to vector<8x384xf32>
    %550 = arith.addf %548, %549 : vector<8x384xf32>
    %551 = vector.extract_strided_slice %516 {offsets = [0, 0], sizes = [8, 128], strides = [1, 1]} : vector<8x384xf32> to vector<8x128xf32>
    %552 = vector.extract_strided_slice %550 {offsets = [0, 0], sizes = [8, 128], strides = [1, 1]} : vector<8x384xf32> to vector<8x128xf32>
    %553 = arith.addf %551, %552 : vector<8x128xf32>
    %554 = arith.negf %553 : vector<8x128xf32>
    %555 = math.exp %554 : vector<8x128xf32>
    %cst_129 = arith.constant 1.000000e+00 : f32
    %556 = vector.broadcast %cst_129 : f32 to vector<8x128xf32>
    %557 = arith.addf %556, %555 : vector<8x128xf32>
    %558 = arith.divf %556, %557 : vector<8x128xf32>
    %559 = vector.extract_strided_slice %516 {offsets = [0, 128], sizes = [8, 128], strides = [1, 1]} : vector<8x384xf32> to vector<8x128xf32>
    %560 = vector.extract_strided_slice %550 {offsets = [0, 128], sizes = [8, 128], strides = [1, 1]} : vector<8x384xf32> to vector<8x128xf32>
    %561 = arith.addf %559, %560 : vector<8x128xf32>
    %562 = arith.negf %561 : vector<8x128xf32>
    %563 = math.exp %562 : vector<8x128xf32>
    %cst_130 = arith.constant 1.000000e+00 : f32
    %564 = vector.broadcast %cst_130 : f32 to vector<8x128xf32>
    %565 = arith.addf %564, %563 : vector<8x128xf32>
    %566 = arith.divf %564, %565 : vector<8x128xf32>
    %567 = vector.extract_strided_slice %516 {offsets = [0, 256], sizes = [8, 128], strides = [1, 1]} : vector<8x384xf32> to vector<8x128xf32>
    %568 = vector.extract_strided_slice %550 {offsets = [0, 256], sizes = [8, 128], strides = [1, 1]} : vector<8x384xf32> to vector<8x128xf32>
    %569 = arith.mulf %558, %568 : vector<8x128xf32>
    %570 = arith.addf %567, %569 : vector<8x128xf32>
    %571 = math.tanh %570 : vector<8x128xf32>
    %cst_131 = arith.constant 1.000000e+00 : f32
    %572 = vector.broadcast %cst_131 : f32 to vector<8x128xf32>
    %573 = arith.subf %572, %566 : vector<8x128xf32>
    %574 = arith.mulf %573, %571 : vector<8x128xf32>
    %575 = arith.mulf %566, %505 : vector<8x128xf32>
    %576 = arith.addf %574, %575 : vector<8x128xf32>
    %577 = arith.index_cast %510 : i32 to index
    %c0_132 = arith.constant 0 : index
    %578 = vector.load %arg21[%577, %c0_132] : memref<64x128xf32, #tpu.memory_space<vmem>>, vector<8x128xf32>
    tpu.vector_store %arg21[%577, %c0_132], %546 {strides = array<i32>} : memref<64x128xf32, #tpu.memory_space<vmem>>, vector<8x128xf32>,
    %579 = arith.index_cast %512 : i32 to index
    %c0_133 = arith.constant 0 : index
    %580 = vector.load %arg22[%579, %c0_133] : memref<64x128xf32, #tpu.memory_space<vmem>>, vector<8x128xf32>
    tpu.vector_store %arg22[%579, %c0_133], %576 {strides = array<i32>} : memref<64x128xf32, #tpu.memory_space<vmem>>, vector<8x128xf32>,
    %c8_i32_134 = arith.constant 8 : i32
    %c0_135 = arith.constant 0 : index
    %c0_136 = arith.constant 0 : index
    %581 = vector.load %arg21[%c0_135, %c0_136] : memref<64x128xf32, #tpu.memory_space<vmem>>, vector<64x16xf32>
    %c0_137 = arith.constant 0 : index
    %c0_138 = arith.constant 0 : index
    %582 = vector.load %arg23[%c0_137, %c0_138] : memref<64x32xf32, #tpu.memory_space<vmem>>, vector<64x16xf32>
    tpu.vector_store %arg23[%c0_137, %c0_138], %581 {strides = array<i32>} : memref<64x32xf32, #tpu.memory_space<vmem>>, vector<64x16xf32>,
    %c0_139 = arith.constant 0 : index
    %c0_140 = arith.constant 0 : index
    %583 = vector.load %arg22[%c0_139, %c0_140] : memref<64x128xf32, #tpu.memory_space<vmem>>, vector<64x16xf32>
    %c0_141 = arith.constant 0 : index
    %c16 = arith.constant 16 : index
    %584 = vector.load %arg23[%c0_141, %c16] : memref<64x32xf32, #tpu.memory_space<vmem>>, vector<64x16xf32>
    tpu.vector_store %arg23[%c0_141, %c16], %583 {strides = array<i32>} : memref<64x32xf32, #tpu.memory_space<vmem>>, vector<64x16xf32>,
    %c0_142 = arith.constant 0 : index
    %c0_143 = arith.constant 0 : index
    %585 = vector.load %arg23[%c0_142, %c0_143] : memref<64x32xf32, #tpu.memory_space<vmem>>, vector<64x32xf32>
    %c0_144 = arith.constant 0 : index
    %c0_145 = arith.constant 0 : index
    %586 = vector.load %arg7[%c0_144, %c0_145] : memref<1x32xf32, #tpu.memory_space<vmem>>, vector<1x32xf32>
    %c0_146 = arith.constant 0 : index
    %c0_147 = arith.constant 0 : index
    %587 = vector.load %arg8[%c0_146, %c0_147] : memref<1x32xf32, #tpu.memory_space<vmem>>, vector<1x32xf32>
    %cst_148 = arith.constant dense<0.000000e+00> : vector<64xf32>
    %588 = vector.multi_reduction <add>, %585, %cst_148 [1] : vector<64x32xf32> to vector<64xf32>
    %589 = vector.shape_cast %588 : vector<64xf32> to vector<64x1xf32>
    %cst_149 = arith.constant 3.200000e+01 : f32
    %590 = vector.broadcast %cst_149 : f32 to vector<64x1xf32>
    %591 = arith.divf %589, %590 : vector<64x1xf32>
    %592 = vector.broadcast %591 : vector<64x1xf32> to vector<64x32xf32>
    %593 = arith.subf %585, %592 : vector<64x32xf32>
    %594 = arith.mulf %593, %593 : vector<64x32xf32>
    %cst_150 = arith.constant dense<0.000000e+00> : vector<64xf32>
    %595 = vector.multi_reduction <add>, %594, %cst_150 [1] : vector<64x32xf32> to vector<64xf32>
    %596 = vector.shape_cast %595 : vector<64xf32> to vector<64x1xf32>
    %cst_151 = arith.constant 3.200000e+01 : f32
    %597 = vector.broadcast %cst_151 : f32 to vector<64x1xf32>
    %598 = arith.divf %596, %597 : vector<64x1xf32>
    %cst_152 = arith.constant 9.99999974E-6 : f32
    %599 = vector.broadcast %cst_152 : f32 to vector<64x1xf32>
    %600 = arith.addf %598, %599 : vector<64x1xf32>
    %601 = math.rsqrt %600 : vector<64x1xf32>
    %602 = vector.broadcast %601 : vector<64x1xf32> to vector<64x32xf32>
    %603 = arith.mulf %593, %602 : vector<64x32xf32>
    %604 = vector.broadcast %586 : vector<1x32xf32> to vector<64x32xf32>
    %605 = arith.mulf %603, %604 : vector<64x32xf32>
    %606 = vector.broadcast %587 : vector<1x32xf32> to vector<64x32xf32>
    %607 = arith.addf %605, %606 : vector<64x32xf32>
    %608 = arith.truncf %607 : vector<64x32xf32> to vector<64x32xbf16>
    %c0_153 = arith.constant 0 : index
    %c0_154 = arith.constant 0 : index
    %609 = vector.load %arg9[%c0_153, %c0_154] : memref<32x384xbf16, #tpu.memory_space<vmem>>, vector<32x384xbf16>
    %cst_155 = arith.constant dense<0.000000e+00> : vector<64x384xf32>
    %610 = tpu.matmul %608, %609, %cst_155 {dimension_numbers = #tpu.dot_dimension_numbers<[1], [0], [0], [1], [0, 0, 1, 1], [], []>} : vector<64x32xbf16>, vector<32x384xbf16>, vector<64x384xf32> -> vector<64x384xf32>
    %c0_156 = arith.constant 0 : index
    %c0_157 = arith.constant 0 : index
    %611 = vector.load %arg10[%c0_156, %c0_157] : memref<1x384xf32, #tpu.memory_space<vmem>>, vector<1x384xf32>
    %612 = vector.broadcast %611 : vector<1x384xf32> to vector<64x384xf32>
    %613 = arith.addf %610, %612 : vector<64x384xf32>
    %c0_158 = arith.constant 0 : index
    %c0_159 = arith.constant 0 : index
    %614 = vector.load %arg24[%c0_158, %c0_159] : memref<64x384xf32, #tpu.memory_space<vmem>>, vector<64x384xf32>
    tpu.vector_store %arg24[%c0_158, %c0_159], %613 {strides = array<i32>} : memref<64x384xf32, #tpu.memory_space<vmem>>, vector<64x384xf32>,
    %c0_160 = arith.constant 0 : index
    %c0_161 = arith.constant 0 : index
    %615 = vector.load %arg11[%c0_160, %c0_161] : memref<128x384xbf16, #tpu.memory_space<vmem>>, vector<128x384xbf16>
    %c0_162 = arith.constant 0 : index
    %c0_163 = arith.constant 0 : index
    %616 = vector.load %arg12[%c0_162, %c0_163] : memref<1x384xf32, #tpu.memory_space<vmem>>, vector<1x384xf32>
    %cst_164 = arith.constant 0.000000e+00 : f32
    %617 = vector.broadcast %cst_164 : f32 to vector<8x128xf32>
    %c0_i32_165 = arith.constant 0 : i32
    %c8_i32_166 = arith.constant 8 : i32
    %618 = arith.muli %c0_i32_165, %c8_i32_166 : i32
    %619 = arith.index_cast %618 : i32 to index
    %c0_167 = arith.constant 0 : index
    %620 = vector.load %arg24[%619, %c0_167] : memref<64x384xf32, #tpu.memory_space<vmem>>, vector<8x384xf32>
    %621 = arith.truncf %617 : vector<8x128xf32> to vector<8x128xbf16>
    %cst_168 = arith.constant dense<0.000000e+00> : vector<8x384xf32>
    %622 = tpu.matmul %621, %615, %cst_168 {dimension_numbers = #tpu.dot_dimension_numbers<[1], [0], [0], [1], [0, 0, 1, 1], [], []>} : vector<8x128xbf16>, vector<128x384xbf16>, vector<8x384xf32> -> vector<8x384xf32>
    %623 = vector.broadcast %616 : vector<1x384xf32> to vector<8x384xf32>
    %624 = arith.addf %622, %623 : vector<8x384xf32>
    %625 = vector.extract_strided_slice %620 {offsets = [0, 0], sizes = [8, 128], strides = [1, 1]} : vector<8x384xf32> to vector<8x128xf32>
    %626 = vector.extract_strided_slice %624 {offsets = [0, 0], sizes = [8, 128], strides = [1, 1]} : vector<8x384xf32> to vector<8x128xf32>
    %627 = arith.addf %625, %626 : vector<8x128xf32>
    %628 = arith.negf %627 : vector<8x128xf32>
    %629 = math.exp %628 : vector<8x128xf32>
    %cst_169 = arith.constant 1.000000e+00 : f32
    %630 = vector.broadcast %cst_169 : f32 to vector<8x128xf32>
    %631 = arith.addf %630, %629 : vector<8x128xf32>
    %632 = arith.divf %630, %631 : vector<8x128xf32>
    %633 = vector.extract_strided_slice %620 {offsets = [0, 128], sizes = [8, 128], strides = [1, 1]} : vector<8x384xf32> to vector<8x128xf32>
    %634 = vector.extract_strided_slice %624 {offsets = [0, 128], sizes = [8, 128], strides = [1, 1]} : vector<8x384xf32> to vector<8x128xf32>
    %635 = arith.addf %633, %634 : vector<8x128xf32>
    %636 = arith.negf %635 : vector<8x128xf32>
    %637 = math.exp %636 : vector<8x128xf32>
    %cst_170 = arith.constant 1.000000e+00 : f32
    %638 = vector.broadcast %cst_170 : f32 to vector<8x128xf32>
    %639 = arith.addf %638, %637 : vector<8x128xf32>
    %640 = arith.divf %638, %639 : vector<8x128xf32>
    %641 = vector.extract_strided_slice %620 {offsets = [0, 256], sizes = [8, 128], strides = [1, 1]} : vector<8x384xf32> to vector<8x128xf32>
    %642 = vector.extract_strided_slice %624 {offsets = [0, 256], sizes = [8, 128], strides = [1, 1]} : vector<8x384xf32> to vector<8x128xf32>
    %643 = arith.mulf %632, %642 : vector<8x128xf32>
    %644 = arith.addf %641, %643 : vector<8x128xf32>
    %645 = math.tanh %644 : vector<8x128xf32>
    %cst_171 = arith.constant 1.000000e+00 : f32
    %646 = vector.broadcast %cst_171 : f32 to vector<8x128xf32>
    %647 = arith.subf %646, %640 : vector<8x128xf32>
    %648 = arith.mulf %647, %645 : vector<8x128xf32>
    %649 = arith.mulf %640, %617 : vector<8x128xf32>
    %650 = arith.addf %648, %649 : vector<8x128xf32>
    %651 = arith.index_cast %618 : i32 to index
    %c0_172 = arith.constant 0 : index
    %652 = vector.load %arg25[%651, %c0_172] : memref<64x128xf32, #tpu.memory_space<vmem>>, vector<8x128xf32>
    tpu.vector_store %arg25[%651, %c0_172], %650 {strides = array<i32>} : memref<64x128xf32, #tpu.memory_space<vmem>>, vector<8x128xf32>,
    %c1_i32_173 = arith.constant 1 : i32
    %c8_i32_174 = arith.constant 8 : i32
    %653 = arith.muli %c1_i32_173, %c8_i32_174 : i32
    %654 = arith.index_cast %653 : i32 to index
    %c0_175 = arith.constant 0 : index
    %655 = vector.load %arg24[%654, %c0_175] : memref<64x384xf32, #tpu.memory_space<vmem>>, vector<8x384xf32>
    %656 = arith.truncf %650 : vector<8x128xf32> to vector<8x128xbf16>
    %cst_176 = arith.constant dense<0.000000e+00> : vector<8x384xf32>
    %657 = tpu.matmul %656, %615, %cst_176 {dimension_numbers = #tpu.dot_dimension_numbers<[1], [0], [0], [1], [0, 0, 1, 1], [], []>} : vector<8x128xbf16>, vector<128x384xbf16>, vector<8x384xf32> -> vector<8x384xf32>
    %658 = vector.broadcast %616 : vector<1x384xf32> to vector<8x384xf32>
    %659 = arith.addf %657, %658 : vector<8x384xf32>
    %660 = vector.extract_strided_slice %655 {offsets = [0, 0], sizes = [8, 128], strides = [1, 1]} : vector<8x384xf32> to vector<8x128xf32>
    %661 = vector.extract_strided_slice %659 {offsets = [0, 0], sizes = [8, 128], strides = [1, 1]} : vector<8x384xf32> to vector<8x128xf32>
    %662 = arith.addf %660, %661 : vector<8x128xf32>
    %663 = arith.negf %662 : vector<8x128xf32>
    %664 = math.exp %663 : vector<8x128xf32>
    %cst_177 = arith.constant 1.000000e+00 : f32
    %665 = vector.broadcast %cst_177 : f32 to vector<8x128xf32>
    %666 = arith.addf %665, %664 : vector<8x128xf32>
    %667 = arith.divf %665, %666 : vector<8x128xf32>
    %668 = vector.extract_strided_slice %655 {offsets = [0, 128], sizes = [8, 128], strides = [1, 1]} : vector<8x384xf32> to vector<8x128xf32>
    %669 = vector.extract_strided_slice %659 {offsets = [0, 128], sizes = [8, 128], strides = [1, 1]} : vector<8x384xf32> to vector<8x128xf32>
    %670 = arith.addf %668, %669 : vector<8x128xf32>
    %671 = arith.negf %670 : vector<8x128xf32>
    %672 = math.exp %671 : vector<8x128xf32>
    %cst_178 = arith.constant 1.000000e+00 : f32
    %673 = vector.broadcast %cst_178 : f32 to vector<8x128xf32>
    %674 = arith.addf %673, %672 : vector<8x128xf32>
    %675 = arith.divf %673, %674 : vector<8x128xf32>
    %676 = vector.extract_strided_slice %655 {offsets = [0, 256], sizes = [8, 128], strides = [1, 1]} : vector<8x384xf32> to vector<8x128xf32>
    %677 = vector.extract_strided_slice %659 {offsets = [0, 256], sizes = [8, 128], strides = [1, 1]} : vector<8x384xf32> to vector<8x128xf32>
    %678 = arith.mulf %667, %677 : vector<8x128xf32>
    %679 = arith.addf %676, %678 : vector<8x128xf32>
    %680 = math.tanh %679 : vector<8x128xf32>
    %cst_179 = arith.constant 1.000000e+00 : f32
    %681 = vector.broadcast %cst_179 : f32 to vector<8x128xf32>
    %682 = arith.subf %681, %675 : vector<8x128xf32>
    %683 = arith.mulf %682, %680 : vector<8x128xf32>
    %684 = arith.mulf %675, %650 : vector<8x128xf32>
    %685 = arith.addf %683, %684 : vector<8x128xf32>
    %686 = arith.index_cast %653 : i32 to index
    %c0_180 = arith.constant 0 : index
    %687 = vector.load %arg25[%686, %c0_180] : memref<64x128xf32, #tpu.memory_space<vmem>>, vector<8x128xf32>
    tpu.vector_store %arg25[%686, %c0_180], %685 {strides = array<i32>} : memref<64x128xf32, #tpu.memory_space<vmem>>, vector<8x128xf32>,
    %c2_i32_181 = arith.constant 2 : i32
    %c8_i32_182 = arith.constant 8 : i32
    %688 = arith.muli %c2_i32_181, %c8_i32_182 : i32
    %689 = arith.index_cast %688 : i32 to index
    %c0_183 = arith.constant 0 : index
    %690 = vector.load %arg24[%689, %c0_183] : memref<64x384xf32, #tpu.memory_space<vmem>>, vector<8x384xf32>
    %691 = arith.truncf %685 : vector<8x128xf32> to vector<8x128xbf16>
    %cst_184 = arith.constant dense<0.000000e+00> : vector<8x384xf32>
    %692 = tpu.matmul %691, %615, %cst_184 {dimension_numbers = #tpu.dot_dimension_numbers<[1], [0], [0], [1], [0, 0, 1, 1], [], []>} : vector<8x128xbf16>, vector<128x384xbf16>, vector<8x384xf32> -> vector<8x384xf32>
    %693 = vector.broadcast %616 : vector<1x384xf32> to vector<8x384xf32>
    %694 = arith.addf %692, %693 : vector<8x384xf32>
    %695 = vector.extract_strided_slice %690 {offsets = [0, 0], sizes = [8, 128], strides = [1, 1]} : vector<8x384xf32> to vector<8x128xf32>
    %696 = vector.extract_strided_slice %694 {offsets = [0, 0], sizes = [8, 128], strides = [1, 1]} : vector<8x384xf32> to vector<8x128xf32>
    %697 = arith.addf %695, %696 : vector<8x128xf32>
    %698 = arith.negf %697 : vector<8x128xf32>
    %699 = math.exp %698 : vector<8x128xf32>
    %cst_185 = arith.constant 1.000000e+00 : f32
    %700 = vector.broadcast %cst_185 : f32 to vector<8x128xf32>
    %701 = arith.addf %700, %699 : vector<8x128xf32>
    %702 = arith.divf %700, %701 : vector<8x128xf32>
    %703 = vector.extract_strided_slice %690 {offsets = [0, 128], sizes = [8, 128], strides = [1, 1]} : vector<8x384xf32> to vector<8x128xf32>
    %704 = vector.extract_strided_slice %694 {offsets = [0, 128], sizes = [8, 128], strides = [1, 1]} : vector<8x384xf32> to vector<8x128xf32>
    %705 = arith.addf %703, %704 : vector<8x128xf32>
    %706 = arith.negf %705 : vector<8x128xf32>
    %707 = math.exp %706 : vector<8x128xf32>
    %cst_186 = arith.constant 1.000000e+00 : f32
    %708 = vector.broadcast %cst_186 : f32 to vector<8x128xf32>
    %709 = arith.addf %708, %707 : vector<8x128xf32>
    %710 = arith.divf %708, %709 : vector<8x128xf32>
    %711 = vector.extract_strided_slice %690 {offsets = [0, 256], sizes = [8, 128], strides = [1, 1]} : vector<8x384xf32> to vector<8x128xf32>
    %712 = vector.extract_strided_slice %694 {offsets = [0, 256], sizes = [8, 128], strides = [1, 1]} : vector<8x384xf32> to vector<8x128xf32>
    %713 = arith.mulf %702, %712 : vector<8x128xf32>
    %714 = arith.addf %711, %713 : vector<8x128xf32>
    %715 = math.tanh %714 : vector<8x128xf32>
    %cst_187 = arith.constant 1.000000e+00 : f32
    %716 = vector.broadcast %cst_187 : f32 to vector<8x128xf32>
    %717 = arith.subf %716, %710 : vector<8x128xf32>
    %718 = arith.mulf %717, %715 : vector<8x128xf32>
    %719 = arith.mulf %710, %685 : vector<8x128xf32>
    %720 = arith.addf %718, %719 : vector<8x128xf32>
    %721 = arith.index_cast %688 : i32 to index
    %c0_188 = arith.constant 0 : index
    %722 = vector.load %arg25[%721, %c0_188] : memref<64x128xf32, #tpu.memory_space<vmem>>, vector<8x128xf32>
    tpu.vector_store %arg25[%721, %c0_188], %720 {strides = array<i32>} : memref<64x128xf32, #tpu.memory_space<vmem>>, vector<8x128xf32>,
    %c3_i32_189 = arith.constant 3 : i32
    %c8_i32_190 = arith.constant 8 : i32
    %723 = arith.muli %c3_i32_189, %c8_i32_190 : i32
    %724 = arith.index_cast %723 : i32 to index
    %c0_191 = arith.constant 0 : index
    %725 = vector.load %arg24[%724, %c0_191] : memref<64x384xf32, #tpu.memory_space<vmem>>, vector<8x384xf32>
    %726 = arith.truncf %720 : vector<8x128xf32> to vector<8x128xbf16>
    %cst_192 = arith.constant dense<0.000000e+00> : vector<8x384xf32>
    %727 = tpu.matmul %726, %615, %cst_192 {dimension_numbers = #tpu.dot_dimension_numbers<[1], [0], [0], [1], [0, 0, 1, 1], [], []>} : vector<8x128xbf16>, vector<128x384xbf16>, vector<8x384xf32> -> vector<8x384xf32>
    %728 = vector.broadcast %616 : vector<1x384xf32> to vector<8x384xf32>
    %729 = arith.addf %727, %728 : vector<8x384xf32>
    %730 = vector.extract_strided_slice %725 {offsets = [0, 0], sizes = [8, 128], strides = [1, 1]} : vector<8x384xf32> to vector<8x128xf32>
    %731 = vector.extract_strided_slice %729 {offsets = [0, 0], sizes = [8, 128], strides = [1, 1]} : vector<8x384xf32> to vector<8x128xf32>
    %732 = arith.addf %730, %731 : vector<8x128xf32>
    %733 = arith.negf %732 : vector<8x128xf32>
    %734 = math.exp %733 : vector<8x128xf32>
    %cst_193 = arith.constant 1.000000e+00 : f32
    %735 = vector.broadcast %cst_193 : f32 to vector<8x128xf32>
    %736 = arith.addf %735, %734 : vector<8x128xf32>
    %737 = arith.divf %735, %736 : vector<8x128xf32>
    %738 = vector.extract_strided_slice %725 {offsets = [0, 128], sizes = [8, 128], strides = [1, 1]} : vector<8x384xf32> to vector<8x128xf32>
    %739 = vector.extract_strided_slice %729 {offsets = [0, 128], sizes = [8, 128], strides = [1, 1]} : vector<8x384xf32> to vector<8x128xf32>
    %740 = arith.addf %738, %739 : vector<8x128xf32>
    %741 = arith.negf %740 : vector<8x128xf32>
    %742 = math.exp %741 : vector<8x128xf32>
    %cst_194 = arith.constant 1.000000e+00 : f32
    %743 = vector.broadcast %cst_194 : f32 to vector<8x128xf32>
    %744 = arith.addf %743, %742 : vector<8x128xf32>
    %745 = arith.divf %743, %744 : vector<8x128xf32>
    %746 = vector.extract_strided_slice %725 {offsets = [0, 256], sizes = [8, 128], strides = [1, 1]} : vector<8x384xf32> to vector<8x128xf32>
    %747 = vector.extract_strided_slice %729 {offsets = [0, 256], sizes = [8, 128], strides = [1, 1]} : vector<8x384xf32> to vector<8x128xf32>
    %748 = arith.mulf %737, %747 : vector<8x128xf32>
    %749 = arith.addf %746, %748 : vector<8x128xf32>
    %750 = math.tanh %749 : vector<8x128xf32>
    %cst_195 = arith.constant 1.000000e+00 : f32
    %751 = vector.broadcast %cst_195 : f32 to vector<8x128xf32>
    %752 = arith.subf %751, %745 : vector<8x128xf32>
    %753 = arith.mulf %752, %750 : vector<8x128xf32>
    %754 = arith.mulf %745, %720 : vector<8x128xf32>
    %755 = arith.addf %753, %754 : vector<8x128xf32>
    %756 = arith.index_cast %723 : i32 to index
    %c0_196 = arith.constant 0 : index
    %757 = vector.load %arg25[%756, %c0_196] : memref<64x128xf32, #tpu.memory_space<vmem>>, vector<8x128xf32>
    tpu.vector_store %arg25[%756, %c0_196], %755 {strides = array<i32>} : memref<64x128xf32, #tpu.memory_space<vmem>>, vector<8x128xf32>,
    %c4_i32_197 = arith.constant 4 : i32
    %c8_i32_198 = arith.constant 8 : i32
    %758 = arith.muli %c4_i32_197, %c8_i32_198 : i32
    %759 = arith.index_cast %758 : i32 to index
    %c0_199 = arith.constant 0 : index
    %760 = vector.load %arg24[%759, %c0_199] : memref<64x384xf32, #tpu.memory_space<vmem>>, vector<8x384xf32>
    %761 = arith.truncf %755 : vector<8x128xf32> to vector<8x128xbf16>
    %cst_200 = arith.constant dense<0.000000e+00> : vector<8x384xf32>
    %762 = tpu.matmul %761, %615, %cst_200 {dimension_numbers = #tpu.dot_dimension_numbers<[1], [0], [0], [1], [0, 0, 1, 1], [], []>} : vector<8x128xbf16>, vector<128x384xbf16>, vector<8x384xf32> -> vector<8x384xf32>
    %763 = vector.broadcast %616 : vector<1x384xf32> to vector<8x384xf32>
    %764 = arith.addf %762, %763 : vector<8x384xf32>
    %765 = vector.extract_strided_slice %760 {offsets = [0, 0], sizes = [8, 128], strides = [1, 1]} : vector<8x384xf32> to vector<8x128xf32>
    %766 = vector.extract_strided_slice %764 {offsets = [0, 0], sizes = [8, 128], strides = [1, 1]} : vector<8x384xf32> to vector<8x128xf32>
    %767 = arith.addf %765, %766 : vector<8x128xf32>
    %768 = arith.negf %767 : vector<8x128xf32>
    %769 = math.exp %768 : vector<8x128xf32>
    %cst_201 = arith.constant 1.000000e+00 : f32
    %770 = vector.broadcast %cst_201 : f32 to vector<8x128xf32>
    %771 = arith.addf %770, %769 : vector<8x128xf32>
    %772 = arith.divf %770, %771 : vector<8x128xf32>
    %773 = vector.extract_strided_slice %760 {offsets = [0, 128], sizes = [8, 128], strides = [1, 1]} : vector<8x384xf32> to vector<8x128xf32>
    %774 = vector.extract_strided_slice %764 {offsets = [0, 128], sizes = [8, 128], strides = [1, 1]} : vector<8x384xf32> to vector<8x128xf32>
    %775 = arith.addf %773, %774 : vector<8x128xf32>
    %776 = arith.negf %775 : vector<8x128xf32>
    %777 = math.exp %776 : vector<8x128xf32>
    %cst_202 = arith.constant 1.000000e+00 : f32
    %778 = vector.broadcast %cst_202 : f32 to vector<8x128xf32>
    %779 = arith.addf %778, %777 : vector<8x128xf32>
    %780 = arith.divf %778, %779 : vector<8x128xf32>
    %781 = vector.extract_strided_slice %760 {offsets = [0, 256], sizes = [8, 128], strides = [1, 1]} : vector<8x384xf32> to vector<8x128xf32>
    %782 = vector.extract_strided_slice %764 {offsets = [0, 256], sizes = [8, 128], strides = [1, 1]} : vector<8x384xf32> to vector<8x128xf32>
    %783 = arith.mulf %772, %782 : vector<8x128xf32>
    %784 = arith.addf %781, %783 : vector<8x128xf32>
    %785 = math.tanh %784 : vector<8x128xf32>
    %cst_203 = arith.constant 1.000000e+00 : f32
    %786 = vector.broadcast %cst_203 : f32 to vector<8x128xf32>
    %787 = arith.subf %786, %780 : vector<8x128xf32>
    %788 = arith.mulf %787, %785 : vector<8x128xf32>
    %789 = arith.mulf %780, %755 : vector<8x128xf32>
    %790 = arith.addf %788, %789 : vector<8x128xf32>
    %791 = arith.index_cast %758 : i32 to index
    %c0_204 = arith.constant 0 : index
    %792 = vector.load %arg25[%791, %c0_204] : memref<64x128xf32, #tpu.memory_space<vmem>>, vector<8x128xf32>
    tpu.vector_store %arg25[%791, %c0_204], %790 {strides = array<i32>} : memref<64x128xf32, #tpu.memory_space<vmem>>, vector<8x128xf32>,
    %c5_i32_205 = arith.constant 5 : i32
    %c8_i32_206 = arith.constant 8 : i32
    %793 = arith.muli %c5_i32_205, %c8_i32_206 : i32
    %794 = arith.index_cast %793 : i32 to index
    %c0_207 = arith.constant 0 : index
    %795 = vector.load %arg24[%794, %c0_207] : memref<64x384xf32, #tpu.memory_space<vmem>>, vector<8x384xf32>
    %796 = arith.truncf %790 : vector<8x128xf32> to vector<8x128xbf16>
    %cst_208 = arith.constant dense<0.000000e+00> : vector<8x384xf32>
    %797 = tpu.matmul %796, %615, %cst_208 {dimension_numbers = #tpu.dot_dimension_numbers<[1], [0], [0], [1], [0, 0, 1, 1], [], []>} : vector<8x128xbf16>, vector<128x384xbf16>, vector<8x384xf32> -> vector<8x384xf32>
    %798 = vector.broadcast %616 : vector<1x384xf32> to vector<8x384xf32>
    %799 = arith.addf %797, %798 : vector<8x384xf32>
    %800 = vector.extract_strided_slice %795 {offsets = [0, 0], sizes = [8, 128], strides = [1, 1]} : vector<8x384xf32> to vector<8x128xf32>
    %801 = vector.extract_strided_slice %799 {offsets = [0, 0], sizes = [8, 128], strides = [1, 1]} : vector<8x384xf32> to vector<8x128xf32>
    %802 = arith.addf %800, %801 : vector<8x128xf32>
    %803 = arith.negf %802 : vector<8x128xf32>
    %804 = math.exp %803 : vector<8x128xf32>
    %cst_209 = arith.constant 1.000000e+00 : f32
    %805 = vector.broadcast %cst_209 : f32 to vector<8x128xf32>
    %806 = arith.addf %805, %804 : vector<8x128xf32>
    %807 = arith.divf %805, %806 : vector<8x128xf32>
    %808 = vector.extract_strided_slice %795 {offsets = [0, 128], sizes = [8, 128], strides = [1, 1]} : vector<8x384xf32> to vector<8x128xf32>
    %809 = vector.extract_strided_slice %799 {offsets = [0, 128], sizes = [8, 128], strides = [1, 1]} : vector<8x384xf32> to vector<8x128xf32>
    %810 = arith.addf %808, %809 : vector<8x128xf32>
    %811 = arith.negf %810 : vector<8x128xf32>
    %812 = math.exp %811 : vector<8x128xf32>
    %cst_210 = arith.constant 1.000000e+00 : f32
    %813 = vector.broadcast %cst_210 : f32 to vector<8x128xf32>
    %814 = arith.addf %813, %812 : vector<8x128xf32>
    %815 = arith.divf %813, %814 : vector<8x128xf32>
    %816 = vector.extract_strided_slice %795 {offsets = [0, 256], sizes = [8, 128], strides = [1, 1]} : vector<8x384xf32> to vector<8x128xf32>
    %817 = vector.extract_strided_slice %799 {offsets = [0, 256], sizes = [8, 128], strides = [1, 1]} : vector<8x384xf32> to vector<8x128xf32>
    %818 = arith.mulf %807, %817 : vector<8x128xf32>
    %819 = arith.addf %816, %818 : vector<8x128xf32>
    %820 = math.tanh %819 : vector<8x128xf32>
    %cst_211 = arith.constant 1.000000e+00 : f32
    %821 = vector.broadcast %cst_211 : f32 to vector<8x128xf32>
    %822 = arith.subf %821, %815 : vector<8x128xf32>
    %823 = arith.mulf %822, %820 : vector<8x128xf32>
    %824 = arith.mulf %815, %790 : vector<8x128xf32>
    %825 = arith.addf %823, %824 : vector<8x128xf32>
    %826 = arith.index_cast %793 : i32 to index
    %c0_212 = arith.constant 0 : index
    %827 = vector.load %arg25[%826, %c0_212] : memref<64x128xf32, #tpu.memory_space<vmem>>, vector<8x128xf32>
    tpu.vector_store %arg25[%826, %c0_212], %825 {strides = array<i32>} : memref<64x128xf32, #tpu.memory_space<vmem>>, vector<8x128xf32>,
    %c6_i32_213 = arith.constant 6 : i32
    %c8_i32_214 = arith.constant 8 : i32
    %828 = arith.muli %c6_i32_213, %c8_i32_214 : i32
    %829 = arith.index_cast %828 : i32 to index
    %c0_215 = arith.constant 0 : index
    %830 = vector.load %arg24[%829, %c0_215] : memref<64x384xf32, #tpu.memory_space<vmem>>, vector<8x384xf32>
    %831 = arith.truncf %825 : vector<8x128xf32> to vector<8x128xbf16>
    %cst_216 = arith.constant dense<0.000000e+00> : vector<8x384xf32>
    %832 = tpu.matmul %831, %615, %cst_216 {dimension_numbers = #tpu.dot_dimension_numbers<[1], [0], [0], [1], [0, 0, 1, 1], [], []>} : vector<8x128xbf16>, vector<128x384xbf16>, vector<8x384xf32> -> vector<8x384xf32>
    %833 = vector.broadcast %616 : vector<1x384xf32> to vector<8x384xf32>
    %834 = arith.addf %832, %833 : vector<8x384xf32>
    %835 = vector.extract_strided_slice %830 {offsets = [0, 0], sizes = [8, 128], strides = [1, 1]} : vector<8x384xf32> to vector<8x128xf32>
    %836 = vector.extract_strided_slice %834 {offsets = [0, 0], sizes = [8, 128], strides = [1, 1]} : vector<8x384xf32> to vector<8x128xf32>
    %837 = arith.addf %835, %836 : vector<8x128xf32>
    %838 = arith.negf %837 : vector<8x128xf32>
    %839 = math.exp %838 : vector<8x128xf32>
    %cst_217 = arith.constant 1.000000e+00 : f32
    %840 = vector.broadcast %cst_217 : f32 to vector<8x128xf32>
    %841 = arith.addf %840, %839 : vector<8x128xf32>
    %842 = arith.divf %840, %841 : vector<8x128xf32>
    %843 = vector.extract_strided_slice %830 {offsets = [0, 128], sizes = [8, 128], strides = [1, 1]} : vector<8x384xf32> to vector<8x128xf32>
    %844 = vector.extract_strided_slice %834 {offsets = [0, 128], sizes = [8, 128], strides = [1, 1]} : vector<8x384xf32> to vector<8x128xf32>
    %845 = arith.addf %843, %844 : vector<8x128xf32>
    %846 = arith.negf %845 : vector<8x128xf32>
    %847 = math.exp %846 : vector<8x128xf32>
    %cst_218 = arith.constant 1.000000e+00 : f32
    %848 = vector.broadcast %cst_218 : f32 to vector<8x128xf32>
    %849 = arith.addf %848, %847 : vector<8x128xf32>
    %850 = arith.divf %848, %849 : vector<8x128xf32>
    %851 = vector.extract_strided_slice %830 {offsets = [0, 256], sizes = [8, 128], strides = [1, 1]} : vector<8x384xf32> to vector<8x128xf32>
    %852 = vector.extract_strided_slice %834 {offsets = [0, 256], sizes = [8, 128], strides = [1, 1]} : vector<8x384xf32> to vector<8x128xf32>
    %853 = arith.mulf %842, %852 : vector<8x128xf32>
    %854 = arith.addf %851, %853 : vector<8x128xf32>
    %855 = math.tanh %854 : vector<8x128xf32>
    %cst_219 = arith.constant 1.000000e+00 : f32
    %856 = vector.broadcast %cst_219 : f32 to vector<8x128xf32>
    %857 = arith.subf %856, %850 : vector<8x128xf32>
    %858 = arith.mulf %857, %855 : vector<8x128xf32>
    %859 = arith.mulf %850, %825 : vector<8x128xf32>
    %860 = arith.addf %858, %859 : vector<8x128xf32>
    %861 = arith.index_cast %828 : i32 to index
    %c0_220 = arith.constant 0 : index
    %862 = vector.load %arg25[%861, %c0_220] : memref<64x128xf32, #tpu.memory_space<vmem>>, vector<8x128xf32>
    tpu.vector_store %arg25[%861, %c0_220], %860 {strides = array<i32>} : memref<64x128xf32, #tpu.memory_space<vmem>>, vector<8x128xf32>,
    %c7_i32_221 = arith.constant 7 : i32
    %c8_i32_222 = arith.constant 8 : i32
    %863 = arith.muli %c7_i32_221, %c8_i32_222 : i32
    %864 = arith.index_cast %863 : i32 to index
    %c0_223 = arith.constant 0 : index
    %865 = vector.load %arg24[%864, %c0_223] : memref<64x384xf32, #tpu.memory_space<vmem>>, vector<8x384xf32>
    %866 = arith.truncf %860 : vector<8x128xf32> to vector<8x128xbf16>
    %cst_224 = arith.constant dense<0.000000e+00> : vector<8x384xf32>
    %867 = tpu.matmul %866, %615, %cst_224 {dimension_numbers = #tpu.dot_dimension_numbers<[1], [0], [0], [1], [0, 0, 1, 1], [], []>} : vector<8x128xbf16>, vector<128x384xbf16>, vector<8x384xf32> -> vector<8x384xf32>
    %868 = vector.broadcast %616 : vector<1x384xf32> to vector<8x384xf32>
    %869 = arith.addf %867, %868 : vector<8x384xf32>
    %870 = vector.extract_strided_slice %865 {offsets = [0, 0], sizes = [8, 128], strides = [1, 1]} : vector<8x384xf32> to vector<8x128xf32>
    %871 = vector.extract_strided_slice %869 {offsets = [0, 0], sizes = [8, 128], strides = [1, 1]} : vector<8x384xf32> to vector<8x128xf32>
    %872 = arith.addf %870, %871 : vector<8x128xf32>
    %873 = arith.negf %872 : vector<8x128xf32>
    %874 = math.exp %873 : vector<8x128xf32>
    %cst_225 = arith.constant 1.000000e+00 : f32
    %875 = vector.broadcast %cst_225 : f32 to vector<8x128xf32>
    %876 = arith.addf %875, %874 : vector<8x128xf32>
    %877 = arith.divf %875, %876 : vector<8x128xf32>
    %878 = vector.extract_strided_slice %865 {offsets = [0, 128], sizes = [8, 128], strides = [1, 1]} : vector<8x384xf32> to vector<8x128xf32>
    %879 = vector.extract_strided_slice %869 {offsets = [0, 128], sizes = [8, 128], strides = [1, 1]} : vector<8x384xf32> to vector<8x128xf32>
    %880 = arith.addf %878, %879 : vector<8x128xf32>
    %881 = arith.negf %880 : vector<8x128xf32>
    %882 = math.exp %881 : vector<8x128xf32>
    %cst_226 = arith.constant 1.000000e+00 : f32
    %883 = vector.broadcast %cst_226 : f32 to vector<8x128xf32>
    %884 = arith.addf %883, %882 : vector<8x128xf32>
    %885 = arith.divf %883, %884 : vector<8x128xf32>
    %886 = vector.extract_strided_slice %865 {offsets = [0, 256], sizes = [8, 128], strides = [1, 1]} : vector<8x384xf32> to vector<8x128xf32>
    %887 = vector.extract_strided_slice %869 {offsets = [0, 256], sizes = [8, 128], strides = [1, 1]} : vector<8x384xf32> to vector<8x128xf32>
    %888 = arith.mulf %877, %887 : vector<8x128xf32>
    %889 = arith.addf %886, %888 : vector<8x128xf32>
    %890 = math.tanh %889 : vector<8x128xf32>
    %cst_227 = arith.constant 1.000000e+00 : f32
    %891 = vector.broadcast %cst_227 : f32 to vector<8x128xf32>
    %892 = arith.subf %891, %885 : vector<8x128xf32>
    %893 = arith.mulf %892, %890 : vector<8x128xf32>
    %894 = arith.mulf %885, %860 : vector<8x128xf32>
    %895 = arith.addf %893, %894 : vector<8x128xf32>
    %896 = arith.index_cast %863 : i32 to index
    %c0_228 = arith.constant 0 : index
    %897 = vector.load %arg25[%896, %c0_228] : memref<64x128xf32, #tpu.memory_space<vmem>>, vector<8x128xf32>
    tpu.vector_store %arg25[%896, %c0_228], %895 {strides = array<i32>} : memref<64x128xf32, #tpu.memory_space<vmem>>, vector<8x128xf32>,
    %c8_i32_229 = arith.constant 8 : i32
    %c0_230 = arith.constant 0 : index
    %c0_231 = arith.constant 0 : index
    %898 = vector.load %arg25[%c0_230, %c0_231] : memref<64x128xf32, #tpu.memory_space<vmem>>, vector<64x32xf32>
    %899 = arith.addf %585, %898 : vector<64x32xf32>
    %c0_232 = arith.constant 0 : index
    %c0_233 = arith.constant 0 : index
    %900 = vector.load %arg13[%c0_232, %c0_233] : memref<1x32xf32, #tpu.memory_space<vmem>>, vector<1x32xf32>
    %c0_234 = arith.constant 0 : index
    %c0_235 = arith.constant 0 : index
    %901 = vector.load %arg14[%c0_234, %c0_235] : memref<1x32xf32, #tpu.memory_space<vmem>>, vector<1x32xf32>
    %cst_236 = arith.constant dense<0.000000e+00> : vector<64xf32>
    %902 = vector.multi_reduction <add>, %899, %cst_236 [1] : vector<64x32xf32> to vector<64xf32>
    %903 = vector.shape_cast %902 : vector<64xf32> to vector<64x1xf32>
    %cst_237 = arith.constant 3.200000e+01 : f32
    %904 = vector.broadcast %cst_237 : f32 to vector<64x1xf32>
    %905 = arith.divf %903, %904 : vector<64x1xf32>
    %906 = vector.broadcast %905 : vector<64x1xf32> to vector<64x32xf32>
    %907 = arith.subf %899, %906 : vector<64x32xf32>
    %908 = arith.mulf %907, %907 : vector<64x32xf32>
    %cst_238 = arith.constant dense<0.000000e+00> : vector<64xf32>
    %909 = vector.multi_reduction <add>, %908, %cst_238 [1] : vector<64x32xf32> to vector<64xf32>
    %910 = vector.shape_cast %909 : vector<64xf32> to vector<64x1xf32>
    %cst_239 = arith.constant 3.200000e+01 : f32
    %911 = vector.broadcast %cst_239 : f32 to vector<64x1xf32>
    %912 = arith.divf %910, %911 : vector<64x1xf32>
    %cst_240 = arith.constant 9.99999974E-6 : f32
    %913 = vector.broadcast %cst_240 : f32 to vector<64x1xf32>
    %914 = arith.addf %912, %913 : vector<64x1xf32>
    %915 = math.rsqrt %914 : vector<64x1xf32>
    %916 = vector.broadcast %915 : vector<64x1xf32> to vector<64x32xf32>
    %917 = arith.mulf %907, %916 : vector<64x32xf32>
    %918 = vector.broadcast %900 : vector<1x32xf32> to vector<64x32xf32>
    %919 = arith.mulf %917, %918 : vector<64x32xf32>
    %920 = vector.broadcast %901 : vector<1x32xf32> to vector<64x32xf32>
    %921 = arith.addf %919, %920 : vector<64x32xf32>
    %922 = arith.truncf %921 : vector<64x32xf32> to vector<64x32xbf16>
    %c0_241 = arith.constant 0 : index
    %c0_242 = arith.constant 0 : index
    %923 = vector.load %arg15[%c0_241, %c0_242] : memref<32x384xbf16, #tpu.memory_space<vmem>>, vector<32x384xbf16>
    %cst_243 = arith.constant dense<0.000000e+00> : vector<64x384xf32>
    %924 = tpu.matmul %922, %923, %cst_243 {dimension_numbers = #tpu.dot_dimension_numbers<[1], [0], [0], [1], [0, 0, 1, 1], [], []>} : vector<64x32xbf16>, vector<32x384xbf16>, vector<64x384xf32> -> vector<64x384xf32>
    %c0_244 = arith.constant 0 : index
    %c0_245 = arith.constant 0 : index
    %925 = vector.load %arg16[%c0_244, %c0_245] : memref<1x384xf32, #tpu.memory_space<vmem>>, vector<1x384xf32>
    %926 = vector.broadcast %925 : vector<1x384xf32> to vector<64x384xf32>
    %927 = arith.addf %924, %926 : vector<64x384xf32>
    %c0_246 = arith.constant 0 : index
    %c0_247 = arith.constant 0 : index
    %928 = vector.load %arg26[%c0_246, %c0_247] : memref<64x384xf32, #tpu.memory_space<vmem>>, vector<64x384xf32>
    tpu.vector_store %arg26[%c0_246, %c0_247], %927 {strides = array<i32>} : memref<64x384xf32, #tpu.memory_space<vmem>>, vector<64x384xf32>,
    %c0_248 = arith.constant 0 : index
    %c0_249 = arith.constant 0 : index
    %929 = vector.load %arg17[%c0_248, %c0_249] : memref<128x384xbf16, #tpu.memory_space<vmem>>, vector<128x384xbf16>
    %c0_250 = arith.constant 0 : index
    %c0_251 = arith.constant 0 : index
    %930 = vector.load %arg18[%c0_250, %c0_251] : memref<1x384xf32, #tpu.memory_space<vmem>>, vector<1x384xf32>
    %cst_252 = arith.constant 0.000000e+00 : f32
    %931 = vector.broadcast %cst_252 : f32 to vector<8x128xf32>
    %c0_i32_253 = arith.constant 0 : i32
    %c8_i32_254 = arith.constant 8 : i32
    %932 = arith.muli %c0_i32_253, %c8_i32_254 : i32
    %933 = arith.index_cast %932 : i32 to index
    %c0_255 = arith.constant 0 : index
    %934 = vector.load %arg26[%933, %c0_255] : memref<64x384xf32, #tpu.memory_space<vmem>>, vector<8x384xf32>
    %935 = arith.truncf %931 : vector<8x128xf32> to vector<8x128xbf16>
    %cst_256 = arith.constant dense<0.000000e+00> : vector<8x384xf32>
    %936 = tpu.matmul %935, %929, %cst_256 {dimension_numbers = #tpu.dot_dimension_numbers<[1], [0], [0], [1], [0, 0, 1, 1], [], []>} : vector<8x128xbf16>, vector<128x384xbf16>, vector<8x384xf32> -> vector<8x384xf32>
    %937 = vector.broadcast %930 : vector<1x384xf32> to vector<8x384xf32>
    %938 = arith.addf %936, %937 : vector<8x384xf32>
    %939 = vector.extract_strided_slice %934 {offsets = [0, 0], sizes = [8, 128], strides = [1, 1]} : vector<8x384xf32> to vector<8x128xf32>
    %940 = vector.extract_strided_slice %938 {offsets = [0, 0], sizes = [8, 128], strides = [1, 1]} : vector<8x384xf32> to vector<8x128xf32>
    %941 = arith.addf %939, %940 : vector<8x128xf32>
    %942 = arith.negf %941 : vector<8x128xf32>
    %943 = math.exp %942 : vector<8x128xf32>
    %cst_257 = arith.constant 1.000000e+00 : f32
    %944 = vector.broadcast %cst_257 : f32 to vector<8x128xf32>
    %945 = arith.addf %944, %943 : vector<8x128xf32>
    %946 = arith.divf %944, %945 : vector<8x128xf32>
    %947 = vector.extract_strided_slice %934 {offsets = [0, 128], sizes = [8, 128], strides = [1, 1]} : vector<8x384xf32> to vector<8x128xf32>
    %948 = vector.extract_strided_slice %938 {offsets = [0, 128], sizes = [8, 128], strides = [1, 1]} : vector<8x384xf32> to vector<8x128xf32>
    %949 = arith.addf %947, %948 : vector<8x128xf32>
    %950 = arith.negf %949 : vector<8x128xf32>
    %951 = math.exp %950 : vector<8x128xf32>
    %cst_258 = arith.constant 1.000000e+00 : f32
    %952 = vector.broadcast %cst_258 : f32 to vector<8x128xf32>
    %953 = arith.addf %952, %951 : vector<8x128xf32>
    %954 = arith.divf %952, %953 : vector<8x128xf32>
    %955 = vector.extract_strided_slice %934 {offsets = [0, 256], sizes = [8, 128], strides = [1, 1]} : vector<8x384xf32> to vector<8x128xf32>
    %956 = vector.extract_strided_slice %938 {offsets = [0, 256], sizes = [8, 128], strides = [1, 1]} : vector<8x384xf32> to vector<8x128xf32>
    %957 = arith.mulf %946, %956 : vector<8x128xf32>
    %958 = arith.addf %955, %957 : vector<8x128xf32>
    %959 = math.tanh %958 : vector<8x128xf32>
    %cst_259 = arith.constant 1.000000e+00 : f32
    %960 = vector.broadcast %cst_259 : f32 to vector<8x128xf32>
    %961 = arith.subf %960, %954 : vector<8x128xf32>
    %962 = arith.mulf %961, %959 : vector<8x128xf32>
    %963 = arith.mulf %954, %931 : vector<8x128xf32>
    %964 = arith.addf %962, %963 : vector<8x128xf32>
    %965 = arith.index_cast %932 : i32 to index
    %c0_260 = arith.constant 0 : index
    %966 = vector.load %arg19[%965, %c0_260] : memref<64x128xf32, #tpu.memory_space<vmem>>, vector<8x128xf32>
    tpu.vector_store %arg19[%965, %c0_260], %964 {strides = array<i32>} : memref<64x128xf32, #tpu.memory_space<vmem>>, vector<8x128xf32>,
    %c1_i32_261 = arith.constant 1 : i32
    %c8_i32_262 = arith.constant 8 : i32
    %967 = arith.muli %c1_i32_261, %c8_i32_262 : i32
    %968 = arith.index_cast %967 : i32 to index
    %c0_263 = arith.constant 0 : index
    %969 = vector.load %arg26[%968, %c0_263] : memref<64x384xf32, #tpu.memory_space<vmem>>, vector<8x384xf32>
    %970 = arith.truncf %964 : vector<8x128xf32> to vector<8x128xbf16>
    %cst_264 = arith.constant dense<0.000000e+00> : vector<8x384xf32>
    %971 = tpu.matmul %970, %929, %cst_264 {dimension_numbers = #tpu.dot_dimension_numbers<[1], [0], [0], [1], [0, 0, 1, 1], [], []>} : vector<8x128xbf16>, vector<128x384xbf16>, vector<8x384xf32> -> vector<8x384xf32>
    %972 = vector.broadcast %930 : vector<1x384xf32> to vector<8x384xf32>
    %973 = arith.addf %971, %972 : vector<8x384xf32>
    %974 = vector.extract_strided_slice %969 {offsets = [0, 0], sizes = [8, 128], strides = [1, 1]} : vector<8x384xf32> to vector<8x128xf32>
    %975 = vector.extract_strided_slice %973 {offsets = [0, 0], sizes = [8, 128], strides = [1, 1]} : vector<8x384xf32> to vector<8x128xf32>
    %976 = arith.addf %974, %975 : vector<8x128xf32>
    %977 = arith.negf %976 : vector<8x128xf32>
    %978 = math.exp %977 : vector<8x128xf32>
    %cst_265 = arith.constant 1.000000e+00 : f32
    %979 = vector.broadcast %cst_265 : f32 to vector<8x128xf32>
    %980 = arith.addf %979, %978 : vector<8x128xf32>
    %981 = arith.divf %979, %980 : vector<8x128xf32>
    %982 = vector.extract_strided_slice %969 {offsets = [0, 128], sizes = [8, 128], strides = [1, 1]} : vector<8x384xf32> to vector<8x128xf32>
    %983 = vector.extract_strided_slice %973 {offsets = [0, 128], sizes = [8, 128], strides = [1, 1]} : vector<8x384xf32> to vector<8x128xf32>
    %984 = arith.addf %982, %983 : vector<8x128xf32>
    %985 = arith.negf %984 : vector<8x128xf32>
    %986 = math.exp %985 : vector<8x128xf32>
    %cst_266 = arith.constant 1.000000e+00 : f32
    %987 = vector.broadcast %cst_266 : f32 to vector<8x128xf32>
    %988 = arith.addf %987, %986 : vector<8x128xf32>
    %989 = arith.divf %987, %988 : vector<8x128xf32>
    %990 = vector.extract_strided_slice %969 {offsets = [0, 256], sizes = [8, 128], strides = [1, 1]} : vector<8x384xf32> to vector<8x128xf32>
    %991 = vector.extract_strided_slice %973 {offsets = [0, 256], sizes = [8, 128], strides = [1, 1]} : vector<8x384xf32> to vector<8x128xf32>
    %992 = arith.mulf %981, %991 : vector<8x128xf32>
    %993 = arith.addf %990, %992 : vector<8x128xf32>
    %994 = math.tanh %993 : vector<8x128xf32>
    %cst_267 = arith.constant 1.000000e+00 : f32
    %995 = vector.broadcast %cst_267 : f32 to vector<8x128xf32>
    %996 = arith.subf %995, %989 : vector<8x128xf32>
    %997 = arith.mulf %996, %994 : vector<8x128xf32>
    %998 = arith.mulf %989, %964 : vector<8x128xf32>
    %999 = arith.addf %997, %998 : vector<8x128xf32>
    %1000 = arith.index_cast %967 : i32 to index
    %c0_268 = arith.constant 0 : index
    %1001 = vector.load %arg19[%1000, %c0_268] : memref<64x128xf32, #tpu.memory_space<vmem>>, vector<8x128xf32>
    tpu.vector_store %arg19[%1000, %c0_268], %999 {strides = array<i32>} : memref<64x128xf32, #tpu.memory_space<vmem>>, vector<8x128xf32>,
    %c2_i32_269 = arith.constant 2 : i32
    %c8_i32_270 = arith.constant 8 : i32
    %1002 = arith.muli %c2_i32_269, %c8_i32_270 : i32
    %1003 = arith.index_cast %1002 : i32 to index
    %c0_271 = arith.constant 0 : index
    %1004 = vector.load %arg26[%1003, %c0_271] : memref<64x384xf32, #tpu.memory_space<vmem>>, vector<8x384xf32>
    %1005 = arith.truncf %999 : vector<8x128xf32> to vector<8x128xbf16>
    %cst_272 = arith.constant dense<0.000000e+00> : vector<8x384xf32>
    %1006 = tpu.matmul %1005, %929, %cst_272 {dimension_numbers = #tpu.dot_dimension_numbers<[1], [0], [0], [1], [0, 0, 1, 1], [], []>} : vector<8x128xbf16>, vector<128x384xbf16>, vector<8x384xf32> -> vector<8x384xf32>
    %1007 = vector.broadcast %930 : vector<1x384xf32> to vector<8x384xf32>
    %1008 = arith.addf %1006, %1007 : vector<8x384xf32>
    %1009 = vector.extract_strided_slice %1004 {offsets = [0, 0], sizes = [8, 128], strides = [1, 1]} : vector<8x384xf32> to vector<8x128xf32>
    %1010 = vector.extract_strided_slice %1008 {offsets = [0, 0], sizes = [8, 128], strides = [1, 1]} : vector<8x384xf32> to vector<8x128xf32>
    %1011 = arith.addf %1009, %1010 : vector<8x128xf32>
    %1012 = arith.negf %1011 : vector<8x128xf32>
    %1013 = math.exp %1012 : vector<8x128xf32>
    %cst_273 = arith.constant 1.000000e+00 : f32
    %1014 = vector.broadcast %cst_273 : f32 to vector<8x128xf32>
    %1015 = arith.addf %1014, %1013 : vector<8x128xf32>
    %1016 = arith.divf %1014, %1015 : vector<8x128xf32>
    %1017 = vector.extract_strided_slice %1004 {offsets = [0, 128], sizes = [8, 128], strides = [1, 1]} : vector<8x384xf32> to vector<8x128xf32>
    %1018 = vector.extract_strided_slice %1008 {offsets = [0, 128], sizes = [8, 128], strides = [1, 1]} : vector<8x384xf32> to vector<8x128xf32>
    %1019 = arith.addf %1017, %1018 : vector<8x128xf32>
    %1020 = arith.negf %1019 : vector<8x128xf32>
    %1021 = math.exp %1020 : vector<8x128xf32>
    %cst_274 = arith.constant 1.000000e+00 : f32
    %1022 = vector.broadcast %cst_274 : f32 to vector<8x128xf32>
    %1023 = arith.addf %1022, %1021 : vector<8x128xf32>
    %1024 = arith.divf %1022, %1023 : vector<8x128xf32>
    %1025 = vector.extract_strided_slice %1004 {offsets = [0, 256], sizes = [8, 128], strides = [1, 1]} : vector<8x384xf32> to vector<8x128xf32>
    %1026 = vector.extract_strided_slice %1008 {offsets = [0, 256], sizes = [8, 128], strides = [1, 1]} : vector<8x384xf32> to vector<8x128xf32>
    %1027 = arith.mulf %1016, %1026 : vector<8x128xf32>
    %1028 = arith.addf %1025, %1027 : vector<8x128xf32>
    %1029 = math.tanh %1028 : vector<8x128xf32>
    %cst_275 = arith.constant 1.000000e+00 : f32
    %1030 = vector.broadcast %cst_275 : f32 to vector<8x128xf32>
    %1031 = arith.subf %1030, %1024 : vector<8x128xf32>
    %1032 = arith.mulf %1031, %1029 : vector<8x128xf32>
    %1033 = arith.mulf %1024, %999 : vector<8x128xf32>
    %1034 = arith.addf %1032, %1033 : vector<8x128xf32>
    %1035 = arith.index_cast %1002 : i32 to index
    %c0_276 = arith.constant 0 : index
    %1036 = vector.load %arg19[%1035, %c0_276] : memref<64x128xf32, #tpu.memory_space<vmem>>, vector<8x128xf32>
    tpu.vector_store %arg19[%1035, %c0_276], %1034 {strides = array<i32>} : memref<64x128xf32, #tpu.memory_space<vmem>>, vector<8x128xf32>,
    %c3_i32_277 = arith.constant 3 : i32
    %c8_i32_278 = arith.constant 8 : i32
    %1037 = arith.muli %c3_i32_277, %c8_i32_278 : i32
    %1038 = arith.index_cast %1037 : i32 to index
    %c0_279 = arith.constant 0 : index
    %1039 = vector.load %arg26[%1038, %c0_279] : memref<64x384xf32, #tpu.memory_space<vmem>>, vector<8x384xf32>
    %1040 = arith.truncf %1034 : vector<8x128xf32> to vector<8x128xbf16>
    %cst_280 = arith.constant dense<0.000000e+00> : vector<8x384xf32>
    %1041 = tpu.matmul %1040, %929, %cst_280 {dimension_numbers = #tpu.dot_dimension_numbers<[1], [0], [0], [1], [0, 0, 1, 1], [], []>} : vector<8x128xbf16>, vector<128x384xbf16>, vector<8x384xf32> -> vector<8x384xf32>
    %1042 = vector.broadcast %930 : vector<1x384xf32> to vector<8x384xf32>
    %1043 = arith.addf %1041, %1042 : vector<8x384xf32>
    %1044 = vector.extract_strided_slice %1039 {offsets = [0, 0], sizes = [8, 128], strides = [1, 1]} : vector<8x384xf32> to vector<8x128xf32>
    %1045 = vector.extract_strided_slice %1043 {offsets = [0, 0], sizes = [8, 128], strides = [1, 1]} : vector<8x384xf32> to vector<8x128xf32>
    %1046 = arith.addf %1044, %1045 : vector<8x128xf32>
    %1047 = arith.negf %1046 : vector<8x128xf32>
    %1048 = math.exp %1047 : vector<8x128xf32>
    %cst_281 = arith.constant 1.000000e+00 : f32
    %1049 = vector.broadcast %cst_281 : f32 to vector<8x128xf32>
    %1050 = arith.addf %1049, %1048 : vector<8x128xf32>
    %1051 = arith.divf %1049, %1050 : vector<8x128xf32>
    %1052 = vector.extract_strided_slice %1039 {offsets = [0, 128], sizes = [8, 128], strides = [1, 1]} : vector<8x384xf32> to vector<8x128xf32>
    %1053 = vector.extract_strided_slice %1043 {offsets = [0, 128], sizes = [8, 128], strides = [1, 1]} : vector<8x384xf32> to vector<8x128xf32>
    %1054 = arith.addf %1052, %1053 : vector<8x128xf32>
    %1055 = arith.negf %1054 : vector<8x128xf32>
    %1056 = math.exp %1055 : vector<8x128xf32>
    %cst_282 = arith.constant 1.000000e+00 : f32
    %1057 = vector.broadcast %cst_282 : f32 to vector<8x128xf32>
    %1058 = arith.addf %1057, %1056 : vector<8x128xf32>
    %1059 = arith.divf %1057, %1058 : vector<8x128xf32>
    %1060 = vector.extract_strided_slice %1039 {offsets = [0, 256], sizes = [8, 128], strides = [1, 1]} : vector<8x384xf32> to vector<8x128xf32>
    %1061 = vector.extract_strided_slice %1043 {offsets = [0, 256], sizes = [8, 128], strides = [1, 1]} : vector<8x384xf32> to vector<8x128xf32>
    %1062 = arith.mulf %1051, %1061 : vector<8x128xf32>
    %1063 = arith.addf %1060, %1062 : vector<8x128xf32>
    %1064 = math.tanh %1063 : vector<8x128xf32>
    %cst_283 = arith.constant 1.000000e+00 : f32
    %1065 = vector.broadcast %cst_283 : f32 to vector<8x128xf32>
    %1066 = arith.subf %1065, %1059 : vector<8x128xf32>
    %1067 = arith.mulf %1066, %1064 : vector<8x128xf32>
    %1068 = arith.mulf %1059, %1034 : vector<8x128xf32>
    %1069 = arith.addf %1067, %1068 : vector<8x128xf32>
    %1070 = arith.index_cast %1037 : i32 to index
    %c0_284 = arith.constant 0 : index
    %1071 = vector.load %arg19[%1070, %c0_284] : memref<64x128xf32, #tpu.memory_space<vmem>>, vector<8x128xf32>
    tpu.vector_store %arg19[%1070, %c0_284], %1069 {strides = array<i32>} : memref<64x128xf32, #tpu.memory_space<vmem>>, vector<8x128xf32>,
    %c4_i32_285 = arith.constant 4 : i32
    %c8_i32_286 = arith.constant 8 : i32
    %1072 = arith.muli %c4_i32_285, %c8_i32_286 : i32
    %1073 = arith.index_cast %1072 : i32 to index
    %c0_287 = arith.constant 0 : index
    %1074 = vector.load %arg26[%1073, %c0_287] : memref<64x384xf32, #tpu.memory_space<vmem>>, vector<8x384xf32>
    %1075 = arith.truncf %1069 : vector<8x128xf32> to vector<8x128xbf16>
    %cst_288 = arith.constant dense<0.000000e+00> : vector<8x384xf32>
    %1076 = tpu.matmul %1075, %929, %cst_288 {dimension_numbers = #tpu.dot_dimension_numbers<[1], [0], [0], [1], [0, 0, 1, 1], [], []>} : vector<8x128xbf16>, vector<128x384xbf16>, vector<8x384xf32> -> vector<8x384xf32>
    %1077 = vector.broadcast %930 : vector<1x384xf32> to vector<8x384xf32>
    %1078 = arith.addf %1076, %1077 : vector<8x384xf32>
    %1079 = vector.extract_strided_slice %1074 {offsets = [0, 0], sizes = [8, 128], strides = [1, 1]} : vector<8x384xf32> to vector<8x128xf32>
    %1080 = vector.extract_strided_slice %1078 {offsets = [0, 0], sizes = [8, 128], strides = [1, 1]} : vector<8x384xf32> to vector<8x128xf32>
    %1081 = arith.addf %1079, %1080 : vector<8x128xf32>
    %1082 = arith.negf %1081 : vector<8x128xf32>
    %1083 = math.exp %1082 : vector<8x128xf32>
    %cst_289 = arith.constant 1.000000e+00 : f32
    %1084 = vector.broadcast %cst_289 : f32 to vector<8x128xf32>
    %1085 = arith.addf %1084, %1083 : vector<8x128xf32>
    %1086 = arith.divf %1084, %1085 : vector<8x128xf32>
    %1087 = vector.extract_strided_slice %1074 {offsets = [0, 128], sizes = [8, 128], strides = [1, 1]} : vector<8x384xf32> to vector<8x128xf32>
    %1088 = vector.extract_strided_slice %1078 {offsets = [0, 128], sizes = [8, 128], strides = [1, 1]} : vector<8x384xf32> to vector<8x128xf32>
    %1089 = arith.addf %1087, %1088 : vector<8x128xf32>
    %1090 = arith.negf %1089 : vector<8x128xf32>
    %1091 = math.exp %1090 : vector<8x128xf32>
    %cst_290 = arith.constant 1.000000e+00 : f32
    %1092 = vector.broadcast %cst_290 : f32 to vector<8x128xf32>
    %1093 = arith.addf %1092, %1091 : vector<8x128xf32>
    %1094 = arith.divf %1092, %1093 : vector<8x128xf32>
    %1095 = vector.extract_strided_slice %1074 {offsets = [0, 256], sizes = [8, 128], strides = [1, 1]} : vector<8x384xf32> to vector<8x128xf32>
    %1096 = vector.extract_strided_slice %1078 {offsets = [0, 256], sizes = [8, 128], strides = [1, 1]} : vector<8x384xf32> to vector<8x128xf32>
    %1097 = arith.mulf %1086, %1096 : vector<8x128xf32>
    %1098 = arith.addf %1095, %1097 : vector<8x128xf32>
    %1099 = math.tanh %1098 : vector<8x128xf32>
    %cst_291 = arith.constant 1.000000e+00 : f32
    %1100 = vector.broadcast %cst_291 : f32 to vector<8x128xf32>
    %1101 = arith.subf %1100, %1094 : vector<8x128xf32>
    %1102 = arith.mulf %1101, %1099 : vector<8x128xf32>
    %1103 = arith.mulf %1094, %1069 : vector<8x128xf32>
    %1104 = arith.addf %1102, %1103 : vector<8x128xf32>
    %1105 = arith.index_cast %1072 : i32 to index
    %c0_292 = arith.constant 0 : index
    %1106 = vector.load %arg19[%1105, %c0_292] : memref<64x128xf32, #tpu.memory_space<vmem>>, vector<8x128xf32>
    tpu.vector_store %arg19[%1105, %c0_292], %1104 {strides = array<i32>} : memref<64x128xf32, #tpu.memory_space<vmem>>, vector<8x128xf32>,
    %c5_i32_293 = arith.constant 5 : i32
    %c8_i32_294 = arith.constant 8 : i32
    %1107 = arith.muli %c5_i32_293, %c8_i32_294 : i32
    %1108 = arith.index_cast %1107 : i32 to index
    %c0_295 = arith.constant 0 : index
    %1109 = vector.load %arg26[%1108, %c0_295] : memref<64x384xf32, #tpu.memory_space<vmem>>, vector<8x384xf32>
    %1110 = arith.truncf %1104 : vector<8x128xf32> to vector<8x128xbf16>
    %cst_296 = arith.constant dense<0.000000e+00> : vector<8x384xf32>
    %1111 = tpu.matmul %1110, %929, %cst_296 {dimension_numbers = #tpu.dot_dimension_numbers<[1], [0], [0], [1], [0, 0, 1, 1], [], []>} : vector<8x128xbf16>, vector<128x384xbf16>, vector<8x384xf32> -> vector<8x384xf32>
    %1112 = vector.broadcast %930 : vector<1x384xf32> to vector<8x384xf32>
    %1113 = arith.addf %1111, %1112 : vector<8x384xf32>
    %1114 = vector.extract_strided_slice %1109 {offsets = [0, 0], sizes = [8, 128], strides = [1, 1]} : vector<8x384xf32> to vector<8x128xf32>
    %1115 = vector.extract_strided_slice %1113 {offsets = [0, 0], sizes = [8, 128], strides = [1, 1]} : vector<8x384xf32> to vector<8x128xf32>
    %1116 = arith.addf %1114, %1115 : vector<8x128xf32>
    %1117 = arith.negf %1116 : vector<8x128xf32>
    %1118 = math.exp %1117 : vector<8x128xf32>
    %cst_297 = arith.constant 1.000000e+00 : f32
    %1119 = vector.broadcast %cst_297 : f32 to vector<8x128xf32>
    %1120 = arith.addf %1119, %1118 : vector<8x128xf32>
    %1121 = arith.divf %1119, %1120 : vector<8x128xf32>
    %1122 = vector.extract_strided_slice %1109 {offsets = [0, 128], sizes = [8, 128], strides = [1, 1]} : vector<8x384xf32> to vector<8x128xf32>
    %1123 = vector.extract_strided_slice %1113 {offsets = [0, 128], sizes = [8, 128], strides = [1, 1]} : vector<8x384xf32> to vector<8x128xf32>
    %1124 = arith.addf %1122, %1123 : vector<8x128xf32>
    %1125 = arith.negf %1124 : vector<8x128xf32>
    %1126 = math.exp %1125 : vector<8x128xf32>
    %cst_298 = arith.constant 1.000000e+00 : f32
    %1127 = vector.broadcast %cst_298 : f32 to vector<8x128xf32>
    %1128 = arith.addf %1127, %1126 : vector<8x128xf32>
    %1129 = arith.divf %1127, %1128 : vector<8x128xf32>
    %1130 = vector.extract_strided_slice %1109 {offsets = [0, 256], sizes = [8, 128], strides = [1, 1]} : vector<8x384xf32> to vector<8x128xf32>
    %1131 = vector.extract_strided_slice %1113 {offsets = [0, 256], sizes = [8, 128], strides = [1, 1]} : vector<8x384xf32> to vector<8x128xf32>
    %1132 = arith.mulf %1121, %1131 : vector<8x128xf32>
    %1133 = arith.addf %1130, %1132 : vector<8x128xf32>
    %1134 = math.tanh %1133 : vector<8x128xf32>
    %cst_299 = arith.constant 1.000000e+00 : f32
    %1135 = vector.broadcast %cst_299 : f32 to vector<8x128xf32>
    %1136 = arith.subf %1135, %1129 : vector<8x128xf32>
    %1137 = arith.mulf %1136, %1134 : vector<8x128xf32>
    %1138 = arith.mulf %1129, %1104 : vector<8x128xf32>
    %1139 = arith.addf %1137, %1138 : vector<8x128xf32>
    %1140 = arith.index_cast %1107 : i32 to index
    %c0_300 = arith.constant 0 : index
    %1141 = vector.load %arg19[%1140, %c0_300] : memref<64x128xf32, #tpu.memory_space<vmem>>, vector<8x128xf32>
    tpu.vector_store %arg19[%1140, %c0_300], %1139 {strides = array<i32>} : memref<64x128xf32, #tpu.memory_space<vmem>>, vector<8x128xf32>,
    %c6_i32_301 = arith.constant 6 : i32
    %c8_i32_302 = arith.constant 8 : i32
    %1142 = arith.muli %c6_i32_301, %c8_i32_302 : i32
    %1143 = arith.index_cast %1142 : i32 to index
    %c0_303 = arith.constant 0 : index
    %1144 = vector.load %arg26[%1143, %c0_303] : memref<64x384xf32, #tpu.memory_space<vmem>>, vector<8x384xf32>
    %1145 = arith.truncf %1139 : vector<8x128xf32> to vector<8x128xbf16>
    %cst_304 = arith.constant dense<0.000000e+00> : vector<8x384xf32>
    %1146 = tpu.matmul %1145, %929, %cst_304 {dimension_numbers = #tpu.dot_dimension_numbers<[1], [0], [0], [1], [0, 0, 1, 1], [], []>} : vector<8x128xbf16>, vector<128x384xbf16>, vector<8x384xf32> -> vector<8x384xf32>
    %1147 = vector.broadcast %930 : vector<1x384xf32> to vector<8x384xf32>
    %1148 = arith.addf %1146, %1147 : vector<8x384xf32>
    %1149 = vector.extract_strided_slice %1144 {offsets = [0, 0], sizes = [8, 128], strides = [1, 1]} : vector<8x384xf32> to vector<8x128xf32>
    %1150 = vector.extract_strided_slice %1148 {offsets = [0, 0], sizes = [8, 128], strides = [1, 1]} : vector<8x384xf32> to vector<8x128xf32>
    %1151 = arith.addf %1149, %1150 : vector<8x128xf32>
    %1152 = arith.negf %1151 : vector<8x128xf32>
    %1153 = math.exp %1152 : vector<8x128xf32>
    %cst_305 = arith.constant 1.000000e+00 : f32
    %1154 = vector.broadcast %cst_305 : f32 to vector<8x128xf32>
    %1155 = arith.addf %1154, %1153 : vector<8x128xf32>
    %1156 = arith.divf %1154, %1155 : vector<8x128xf32>
    %1157 = vector.extract_strided_slice %1144 {offsets = [0, 128], sizes = [8, 128], strides = [1, 1]} : vector<8x384xf32> to vector<8x128xf32>
    %1158 = vector.extract_strided_slice %1148 {offsets = [0, 128], sizes = [8, 128], strides = [1, 1]} : vector<8x384xf32> to vector<8x128xf32>
    %1159 = arith.addf %1157, %1158 : vector<8x128xf32>
    %1160 = arith.negf %1159 : vector<8x128xf32>
    %1161 = math.exp %1160 : vector<8x128xf32>
    %cst_306 = arith.constant 1.000000e+00 : f32
    %1162 = vector.broadcast %cst_306 : f32 to vector<8x128xf32>
    %1163 = arith.addf %1162, %1161 : vector<8x128xf32>
    %1164 = arith.divf %1162, %1163 : vector<8x128xf32>
    %1165 = vector.extract_strided_slice %1144 {offsets = [0, 256], sizes = [8, 128], strides = [1, 1]} : vector<8x384xf32> to vector<8x128xf32>
    %1166 = vector.extract_strided_slice %1148 {offsets = [0, 256], sizes = [8, 128], strides = [1, 1]} : vector<8x384xf32> to vector<8x128xf32>
    %1167 = arith.mulf %1156, %1166 : vector<8x128xf32>
    %1168 = arith.addf %1165, %1167 : vector<8x128xf32>
    %1169 = math.tanh %1168 : vector<8x128xf32>
    %cst_307 = arith.constant 1.000000e+00 : f32
    %1170 = vector.broadcast %cst_307 : f32 to vector<8x128xf32>
    %1171 = arith.subf %1170, %1164 : vector<8x128xf32>
    %1172 = arith.mulf %1171, %1169 : vector<8x128xf32>
    %1173 = arith.mulf %1164, %1139 : vector<8x128xf32>
    %1174 = arith.addf %1172, %1173 : vector<8x128xf32>
    %1175 = arith.index_cast %1142 : i32 to index
    %c0_308 = arith.constant 0 : index
    %1176 = vector.load %arg19[%1175, %c0_308] : memref<64x128xf32, #tpu.memory_space<vmem>>, vector<8x128xf32>
    tpu.vector_store %arg19[%1175, %c0_308], %1174 {strides = array<i32>} : memref<64x128xf32, #tpu.memory_space<vmem>>, vector<8x128xf32>,
    %c7_i32_309 = arith.constant 7 : i32
    %c8_i32_310 = arith.constant 8 : i32
    %1177 = arith.muli %c7_i32_309, %c8_i32_310 : i32
    %1178 = arith.index_cast %1177 : i32 to index
    %c0_311 = arith.constant 0 : index
    %1179 = vector.load %arg26[%1178, %c0_311] : memref<64x384xf32, #tpu.memory_space<vmem>>, vector<8x384xf32>
    %1180 = arith.truncf %1174 : vector<8x128xf32> to vector<8x128xbf16>
    %cst_312 = arith.constant dense<0.000000e+00> : vector<8x384xf32>
    %1181 = tpu.matmul %1180, %929, %cst_312 {dimension_numbers = #tpu.dot_dimension_numbers<[1], [0], [0], [1], [0, 0, 1, 1], [], []>} : vector<8x128xbf16>, vector<128x384xbf16>, vector<8x384xf32> -> vector<8x384xf32>
    %1182 = vector.broadcast %930 : vector<1x384xf32> to vector<8x384xf32>
    %1183 = arith.addf %1181, %1182 : vector<8x384xf32>
    %1184 = vector.extract_strided_slice %1179 {offsets = [0, 0], sizes = [8, 128], strides = [1, 1]} : vector<8x384xf32> to vector<8x128xf32>
    %1185 = vector.extract_strided_slice %1183 {offsets = [0, 0], sizes = [8, 128], strides = [1, 1]} : vector<8x384xf32> to vector<8x128xf32>
    %1186 = arith.addf %1184, %1185 : vector<8x128xf32>
    %1187 = arith.negf %1186 : vector<8x128xf32>
    %1188 = math.exp %1187 : vector<8x128xf32>
    %cst_313 = arith.constant 1.000000e+00 : f32
    %1189 = vector.broadcast %cst_313 : f32 to vector<8x128xf32>
    %1190 = arith.addf %1189, %1188 : vector<8x128xf32>
    %1191 = arith.divf %1189, %1190 : vector<8x128xf32>
    %1192 = vector.extract_strided_slice %1179 {offsets = [0, 128], sizes = [8, 128], strides = [1, 1]} : vector<8x384xf32> to vector<8x128xf32>
    %1193 = vector.extract_strided_slice %1183 {offsets = [0, 128], sizes = [8, 128], strides = [1, 1]} : vector<8x384xf32> to vector<8x128xf32>
    %1194 = arith.addf %1192, %1193 : vector<8x128xf32>
    %1195 = arith.negf %1194 : vector<8x128xf32>
    %1196 = math.exp %1195 : vector<8x128xf32>
    %cst_314 = arith.constant 1.000000e+00 : f32
    %1197 = vector.broadcast %cst_314 : f32 to vector<8x128xf32>
    %1198 = arith.addf %1197, %1196 : vector<8x128xf32>
    %1199 = arith.divf %1197, %1198 : vector<8x128xf32>
    %1200 = vector.extract_strided_slice %1179 {offsets = [0, 256], sizes = [8, 128], strides = [1, 1]} : vector<8x384xf32> to vector<8x128xf32>
    %1201 = vector.extract_strided_slice %1183 {offsets = [0, 256], sizes = [8, 128], strides = [1, 1]} : vector<8x384xf32> to vector<8x128xf32>
    %1202 = arith.mulf %1191, %1201 : vector<8x128xf32>
    %1203 = arith.addf %1200, %1202 : vector<8x128xf32>
    %1204 = math.tanh %1203 : vector<8x128xf32>
    %cst_315 = arith.constant 1.000000e+00 : f32
    %1205 = vector.broadcast %cst_315 : f32 to vector<8x128xf32>
    %1206 = arith.subf %1205, %1199 : vector<8x128xf32>
    %1207 = arith.mulf %1206, %1204 : vector<8x128xf32>
    %1208 = arith.mulf %1199, %1174 : vector<8x128xf32>
    %1209 = arith.addf %1207, %1208 : vector<8x128xf32>
    %1210 = arith.index_cast %1177 : i32 to index
    %c0_316 = arith.constant 0 : index
    %1211 = vector.load %arg19[%1210, %c0_316] : memref<64x128xf32, #tpu.memory_space<vmem>>, vector<8x128xf32>
    tpu.vector_store %arg19[%1210, %c0_316], %1209 {strides = array<i32>} : memref<64x128xf32, #tpu.memory_space<vmem>>, vector<8x128xf32>,
    %c8_i32_317 = arith.constant 8 : i32
    return
  }
}

</mosaic_0001>

<bundles_post_ra>
// kernel: _lambda_.3
= control target key start
LH: loop header
LB: loop body
LE: loop exit
PB: predicated region body
PF: predicated region fallthrough
CT: control target
= control target key end

     0   :  { %v828_v1 = vmov 0   ;;  %s1086_s0 = inlined_call_operand.vmem [shape: f32[64,128], index: 0, kind: input, shape index: {}]   ;;  %s1087_s1 = inlined_call_operand.vmem [shape: s32[8,1], index: 1, kind: input, shape index: {}]   ;;  %s1088_s2 = inlined_call_operand.vmem [shape: f32[1,64], index: 2, kind: input, shape index: {}, may-alias: {2,10}]   ;;  %s1089_s3 = inlined_call_operand.vmem [shape: f32[1,64], index: 3, kind: input, shape index: {}, may-alias: {3,11}]   ;;  %s1090_s4 = inlined_call_operand.vmem [shape: bf16[64,256], index: 4, kind: input, shape index: {}]   ;;  %s1091_s5 = inlined_call_operand.vmem [shape: f32[1,256], index: 5, kind: input, shape index: {}]   ;;  %s1092_s6 = inlined_call_operand.vmem [shape: f32[1,256], index: 6, kind: input, shape index: {}]   ;;  %s1093_s7 = inlined_call_operand.vmem [shape: f32[1,256], index: 7, kind: input, shape index: {}]   ;;  %s1094_s8 = inlined_call_operand.vmem [shape: bf16[256,64], index: 8, kind: input, shape index: {}]   ;;  %s1095_s9 = inlined_call_operand.vmem [shape: f32[1,64], index: 9, kind: input, shape index: {}]   ;;  %s1096_s10 = inlined_call_operand.vmem [shape: f32[1,64], index: 10, kind: input, shape index: {}, may-alias: {2,10}]   ;;  %s1097_s11 = inlined_call_operand.vmem [shape: f32[1,64], index: 11, kind: input, shape index: {}, may-alias: {3,11}]   ;;  %s1098_s12 = inlined_call_operand.vmem [shape: bf16[64,8], index: 12, kind: input, shape index: {}]   ;;  %s1099_s13 = inlined_call_operand.vmem [shape: f32[1,8], index: 13, kind: input, shape index: {}]   ;;  %s1100_s14 = inlined_call_operand.hbm [shape: f32[8,8], index: 14, kind: output, shape index: {}]  }
   0x1   :  { %v49_v0 = vld [vmem:[%s1087_s1] sm:$0xff]  ;;  %771 = vset.pattern.permute.xlu1 %v828_v1  ;;  %770 = vset.pattern.permute.xlu0 %v828_v1 }
   0x2   :  { %vm93_vm0 = vcmp.gt.s32.totalorder %v49_v0, 2  ;;  %vm59_vm1 = vcmp.gt.s32.totalorder %v49_v0, 0  ;;  %vm110_vm2 = vcmp.gt.s32.totalorder %v49_v0, 3  ;;  %vm76_vm3 = vcmp.gt.s32.totalorder %v49_v0, 1  ;;  %278 = vmatprep.mubr.bf16.mxu1 %v828_v1 }
   0x3   :  { %v94_v2 = vsel %vm93_vm0, 1, %v828_v1  ;;  %v60_v3 = vsel %vm59_vm1, 1, %v828_v1  ;;  %v111_v4 = vsel %vm110_vm2, 1, %v828_v1  ;;  %v77_v5 = vsel %vm76_vm3, 1, %v828_v1 }
   0x4   :  { %96 = vperm.xlu1 %771, %v94_v2   ;;  %62 = vperm.xlu0 %770, %v60_v3   ;;  %vm127_vm4 = vcmp.gt.s32.totalorder %v49_v0, 4  ;;  %vm51_vm5 = vcmp.eq.s32.totalorder %v49_v0, 1  ;;  %vm68_vm6 = vcmp.eq.s32.totalorder %v49_v0, 2  ;;  %vm144_vm7 = vcmp.gt.s32.totalorder %v49_v0, 5 }
   0x5   :  { %v128_v6 = vsel %vm127_vm4, 1, %v828_v1  ;;  %v52_v7 = vsel %vm51_vm5, 1, %v828_v1  ;;  %v69_v8 = vsel %vm68_vm6, 1, %v828_v1  ;;  %v145_v9 = vsel %vm144_vm7, 1, %v828_v1 }
   0x6   :  { %vm85_vm8 = vcmp.eq.s32.totalorder %v49_v0, 3  ;;  %vm161_vm9 = vcmp.gt.s32.totalorder %v49_v0, 6  ;;  %vm102_vm10 = vcmp.eq.s32.totalorder %v49_v0, 4  ;;  %vm178_vm11 = vcmp.gt.s32.totalorder %v49_v0, 7 }
   0x7   :  { %v86_v10 = vsel %vm85_vm8, 1, %v828_v1  ;;  %v162_v11 = vsel %vm161_vm9, 1, %v828_v1  ;;  %v103_v12 = vsel %vm102_vm10, 1, %v828_v1  ;;  %v179_v13 = vsel %vm178_vm11, 1, %v828_v1 }
   0x8   :  { %113 = vperm.xlu1 %771, %v111_v4   ;;  %79 = vperm.xlu0 %770, %v77_v5   ;;  %vm119_vm12 = vcmp.eq.s32.totalorder %v49_v0, 5  ;;  %vm136_vm13 = vcmp.eq.s32.totalorder %v49_v0, 6 }
   0xc   :  { %130 = vperm.xlu0 %770, %v128_v6   ;;  %54 = vperm.xlu1 %771, %v52_v7  }
  0x10   :  { %71 = vperm.xlu0 %770, %v69_v8   ;;  %147 = vperm.xlu1 %771, %v145_v9  }
  0x14   :  { %88 = vperm.xlu0 %770, %v86_v10   ;;  %164 = vperm.xlu1 %771, %v162_v11  }
  0x18   :  { %105 = vperm.xlu0 %770, %v103_v12   ;;  %181 = vperm.xlu1 %771, %v179_v13  }
  0x19   :  { %19 = vsyncpa [#allocation3], 0  ;;  %v120_v14 = vsel %vm119_vm12, 1, %v828_v1  ;;  %v137_v15 = vsel %vm136_vm13, 1, %v828_v1  ;;  %vm153_vm14 = vcmp.eq.s32.totalorder %v49_v0, 7  ;;  %vm170_vm15 = vcmp.eq.s32.totalorder %v49_v0, 8 }
  0x1a   :  { %v154_v16 = vsel %vm153_vm14, 1, %v828_v1  ;;  %v171_v17 = vsel %vm170_vm15, 1, %v828_v1  ;;  %v933_v18 = vld [vmem:[%s1088_s2] ss:$0 sm:$0xff]  ;;  %v772_v20 = vld [vmem:[%s1090_s4 + $0x24] ss:$8 sps:$4 sm:$0xff]  }
  0x1b   :  { %v938_v19 = vld [vmem:[%s1089_s3] ss:$0 sm:$0xff]  ;;  %s829_s22 = smov 96   ;;  %246 = vmatprep.subr.bf16.mxu1 %v772_v20  ;;  %v775_v22 = vld [vmem:[%s1090_s4 + $0x34] ss:$8 sps:$4 sm:$0xff]   ;;  %v786_v27 = vld [vmem:[%s1094_s8 + $0x48] sm:$0xff]  }
  0x1c   :  { %122 = vperm.xlu0 %770, %v120_v14   ;;  %139 = vperm.xlu1 %771, %v137_v15   ;;  %v774_v21 = vld [vmem:[%s1090_s4 + $0x20] ss:$8 sps:$4 sm:$0xff]   ;;  %v777_v23 = vld [vmem:[%s1090_s4 + $0x30] ss:$8 sps:$4 sm:$0xff]   ;;  %v780_v24 = vld [vmem:[%s1090_s4 + $0x4] ss:$8 sps:$4 sm:$0xff]  }
  0x1d   :  { %247 = vmatpush1.bf16.msra.mxu1 %v774_v21  ;;  %v784_v25 = vld [vmem:[%s1094_s8 + $0x40] sm:$0xff]   ;;  %v787_v28 = vld [vmem:[%s1094_s8 + $0x8] sm:$0xff]   ;;  %v788_v29 = vld [vmem:[%s1094_s8 + $0x50] sm:$0xff]   ;;  %s832_s18 = smov [#allocation2]  }
  0x1e   :  { %248 = vmatprep.subr.bf16.mxu1 %v775_v22  ;;  %v785_v26 = vld [vmem:[%s1094_s8] sm:$0xff]   ;;  %726 = vmatprep.subr.bf16.mxu0 %v784_v25  ;;  %v67_v35 = vld [vmem:[%s1086_s0 + $0x8] sm:$0xff]  ;;  %v84_v41 = vld [vmem:[%s1086_s0 + $0x10] sm:$0xff]  ;;  %s681_s19 = sshll.u32 %s832_s18, 4  ;;  %s682_s19 = int_to_ptr.vmem [resolvable:$true] %s681_s19 }
  0x1f   :  { %727 = vmatpush3.bf16.msra.mxu0 %v785_v26  ;;  %v50_v32 = vld [vmem:[%s1086_s0] sm:$0xff]  ;;  %v101_v46 = vld [vmem:[%s1086_s0 + $0x18] sm:$0xff]  ;;  %v135_v59 = vld [vmem:[%s1086_s0 + $0x28] sm:$0xff]  ;;  %p809_p1 = scmp.lt.s32.totalorder %s682_s19, %s682_s19 }
  0x20   :  { %156 = vperm.xlu0 %770, %v154_v16   ;;  %173 = vperm.xlu1 %771, %v171_v17   ;;  %v118_v53 = vld [vmem:[%s1086_s0 + $0x20] sm:$0xff]  ;;  %v152_v0 = vld [vmem:[%s1086_s0 + $0x30] sm:$0xff]  ;;  %v169_v6 = vld [vmem:[%s1086_s0 + $0x38] sm:$0xff] }
  0x21   :  { %249 = vmatpush1.bf16.msra.mxu1 %v777_v23  ;;  %728 = vmatprep.subr.bf16.mxu0 %v786_v27 }
  0x22   :  { %310 = vmatprep.subr.bf16.mxu1 %v780_v24 }
  0x23   :  { %729 = vmatpush3.bf16.msra.mxu0 %v787_v28 }
  0x24   :  { %203 = vrot.lane.b32.xlu0 %v933_v18, %s829_s22  ;;  %207 = vrot.lane.b32.xlu1 %v938_v19, %s829_s22 }
  0x25   :  { %730 = vmatprep.subr.bf16.mxu0 %v788_v29 }
  0x83   :  { %v97_v30 = vpop.permute.xlu1 %96  ;;  %v63_v31 = vpop.permute.xlu0 %62 }
  0x84   :  { %vm64_vm0 = vcmp.eq.s32.totalorder %v63_v31, 1  ;;  %vm98_vm2 = vcmp.eq.s32.totalorder %v97_v30, 1  ;;  %v778_v30 = vld [vmem:[%s1090_s4] ss:$8 sps:$4 sm:$0xff]  }
  0x85   :  { %v65_v36 = vsel %vm64_vm0, %v50_v32, -1e+30  ;;  %v99_v45 = vsel %vm98_vm2, %v84_v41, -1e+30  ;;  %vm242_vm0 = vcmask 261120   ;;  %vm629_vm2 = vcmask 523264  }
  0x86   :  { %v66_v40 = vmax.f32 %v65_v36, -1e+30  ;;  %v790_v36 = vld [vmem:[%s1094_s8 + $0x58] sm:$0xff]  }
  0x87   :  { %v114_v33 = vpop.permute.xlu1 %113  ;;  %v80_v34 = vpop.permute.xlu0 %79 }
  0x88   :  { %vm81_vm1 = vcmp.eq.s32.totalorder %v80_v34, 1  ;;  %vm115_vm3 = vcmp.eq.s32.totalorder %v114_v33, 1  ;;  %v783_v33 = vld [vmem:[%s1090_s4 + $0x14] ss:$8 sps:$4 sm:$0xff]  }
  0x89   :  { %v82_v37 = vsel %vm81_vm1, %v67_v35, -1e+30  ;;  %v116_v50 = vsel %vm115_vm3, %v101_v46, -1e+30  ;;  %vm831_vm1 = vmmov 0   ;;  %vm673_vm3 = vcmask 64512  }
  0x8a   :  { %v83_v42 = vmax.f32 %v66_v40, %v82_v37  ;;  %v791_v37 = vld [vmem:[%s1094_s8 + $0x18] sm:$0xff]   ;;  %v795_v40 = vld [vmem:[%s1094_s8 + $0x28] sm:$0xff]  }
  0x8b   :  { %v131_v38 = vpop.permute.xlu0 %130  ;;  %v55_v39 = vpop.permute.xlu1 %54 }
  0x8c   :  { %v100_v47 = vmax.f32 %v83_v42, %v99_v45  ;;  %vm56_vm5 = vcmp.eq.s32.totalorder %v55_v39, 1  ;;  %vm132_vm7 = vcmp.eq.s32.totalorder %v131_v38, 1  ;;  %v793_v38 = vld [vmem:[%s1094_s8 + $0x20] sm:$0xff]   ;;  %v794_v39 = vld [vmem:[%s1094_s8 + $0x68] sm:$0xff]   ;;  %v797_v42 = vld [vmem:[%s1094_s8 + $0x30] sm:$0xff]  }
  0x8d   :  { %v57_v54 = vsel %vm56_vm5, %v50_v32, 0.0  ;;  %v133_v60 = vsel %vm132_vm7, %v118_v53, -1e+30  ;;  %v800_v45 = vld [vmem:[%s1098_s12] sm:$0xff]  }
  0x8e   :  { %v117_v52 = vmax.f32 %v100_v47, %v116_v50  ;;  %v353_v47 = vlaneseq }
  0x8f   :  { %v72_v43 = vpop.permute.xlu0 %71  ;;  %v148_v44 = vpop.permute.xlu1 %147 }
  0x90   :  { %vm73_vm4 = vcmp.eq.s32.totalorder %v72_v43, 1  ;;  %vm149_vm8 = vcmp.eq.s32.totalorder %v148_v44, 1  ;;  %v134_v62 = vmax.f32 %v117_v52, %v133_v60  ;;  %v798_v43 = vld [vmem:[%s1094_s8 + $0x78] sm:$0xff]   ;;  %v379_v60 = vld [vmem:[%s1093_s7] sm:$0x3] }
  0x91   :  { %v74_v51 = vsel %vm73_vm4, %v67_v35, 0.0  ;;  %v150_v2 = vsel %vm149_vm8, %v135_v59, -1e+30  ;;  %v799_v44 = vld [vmem:[%s1094_s8 + $0x38] sm:$0xff]  }
  0x92   :  { %v75_v58 = vadd.f32 %v74_v51, %v57_v54  ;;  %v151_v9 = vmax.f32 %v134_v62, %v150_v2  ;;  %v351_v54 = vld [vmem:[%s1091_s5] sm:$0x3] }
  0x93   :  { %v89_v48 = vpop.permute.xlu0 %88  ;;  %v165_v49 = vpop.permute.xlu1 %164 }
  0x94   :  { %vm90_vm6 = vcmp.eq.s32.totalorder %v89_v48, 1  ;;  %vm166_vm10 = vcmp.eq.s32.totalorder %v165_v49, 1  ;;  %v354_v48 = vshrl.u32 %v353_v47, 7 }
  0x95   :  { %v91_v55 = vsel %vm90_vm6, %v84_v41, 0.0  ;;  %v167_v7 = vsel %vm166_vm10, %v152_v0, -1e+30  ;;  %v796_v41 = vld [vmem:[%s1094_s8 + $0x70] sm:$0xff]  }
  0x96   :  { %v92_v63 = vadd.f32 %v91_v55, %v75_v58  ;;  %v168_v15 = vmax.f32 %v151_v9, %v167_v7  ;;  %v359_v55 = vsub.s32 1, %v354_v48 }
  0x97   :  { %v106_v56 = vpop.permute.xlu0 %105  ;;  %v182_v57 = vpop.permute.xlu1 %181 }
  0x98   :  { %vm107_vm9 = vcmp.eq.s32.totalorder %v106_v56, 1  ;;  %vm183_vm11 = vcmp.eq.s32.totalorder %v182_v57, 1  ;;  %v365_v56 = vld [vmem:[%s1092_s6] sm:$0x3] }
  0x99   :  { %v108_v61 = vsel %vm107_vm9, %v101_v46, 0.0  ;;  %v184_v11 = vsel %vm183_vm11, %v169_v6, -1e+30  ;;  %v830_v46 = vmov 0.0  }
  0x9a   :  { %v109_v5 = vadd.f32 %v108_v61, %v92_v63  ;;  %v185_v21 = vmax.f32 %v168_v15, %v184_v11 }
  0x9b   :  { %v123_v3 = vpop.permute.xlu0 %122  ;;  %v140_v4 = vpop.permute.xlu1 %139 }
  0x9c   :  { %vm124_vm12 = vcmp.eq.s32.totalorder %v123_v3, 1  ;;  %vm141_vm13 = vcmp.eq.s32.totalorder %v140_v4, 1  ;;  %v374_v3 = vrot.slane %v365_v56, %v359_v55 }
  0x9d   :  { %v125_v8 = vsel %vm124_vm12, %v118_v53, 0.0  ;;  %v142_v12 = vsel %vm141_vm13, %v135_v59, 0.0  ;;  %v355_v53 = vsub.s32 0, %v354_v48  ;;  %v360_v59 = vrot.slane %v351_v54, %v359_v55 }
  0x9e   :  { %v126_v10 = vadd.f32 %v125_v8, %v109_v5  ;;  %v388_v8 = vrot.slane %v379_v60, %v359_v55 }
  0x9f   :  { %v157_v13 = vpop.permute.xlu0 %156  ;;  %v174_v14 = vpop.permute.xlu1 %173  ;;  %v356_v57 = vrot.slane %v351_v54, %v355_v53  ;;  %v370_v62 = vrot.slane %v365_v56, %v355_v53 }
  0xa0   :  { %v143_v16 = vadd.f32 %v142_v12, %v126_v10  ;;  %vm158_vm14 = vcmp.eq.s32.totalorder %v157_v13, 1  ;;  %vm175_vm15 = vcmp.eq.s32.totalorder %v174_v14, 1 }
  0xa1   :  { %v159_v17 = vsel %vm158_vm14, %v152_v0, 0.0  ;;  %v176_v22 = vsel %vm175_vm15, %v169_v6, 0.0  ;;  %v384_v6 = vrot.slane %v379_v60, %v355_v53 }
  0xa2   :  { %v160_v20 = vadd.f32 %v159_v17, %v143_v16  ;;  %v801_v17 = vld [vmem:[%s1098_s12 + $0x8] sm:$0xff]  }
  0xa3   :  { %v204_v23 = vpop.permute.xlu0 %203  ;;  %v208_v24 = vpop.permute.xlu1 %207 }
  0xa4   :  { %v177_v25 = vadd.f32 %v176_v22, %v160_v20  ;;  %v206_v26 = vmul.f32 %v204_v23, %v185_v21  ;;  %v802_v20 = vld [vmem:[%s1098_s12 + $0x10] sm:$0xff]   ;;  %v803_v21 = vld [vmem:[%s1098_s12 + $0x18] sm:$0xff]   ;;  %v701_v23 = vld [vmem:[%s1095_s9] ss:$0 sm:$0xff] }
  0xa6   :  { %v193_v27 = vmul.f32 %v933_v18, %v177_v25  ;;  %v210_v28 = vadd.f32 %v208_v24, %v206_v26  ;;  %v781_v18 = vld [vmem:[%s1090_s4 + $0x10] ss:$8 sps:$4 sm:$0xff]  }
  0xa8   :  { %v211_v29 = vmax.f32 %v210_v28, 0.0  ;;  %v201_v31 = vadd.f32 %v938_v19, %v193_v27  ;;  %v789_v19 = vld [vmem:[%s1094_s8 + $0x10] sm:$0xff]   ;;  %v718_v27 = vld [vmem:[%s1096_s10] ss:$0 sm:$0xff]  ;;  %s804_s10 = scalar_lea.vmem %s682_s19, 128 }
  0xa9   :  { %731 = vmatpush3.bf16.msra.mxu0 %v789_v19  ;;  %p805_p0 = scmp.ne.s32.totalorder %s682_s19, %s804_s10  ;;  %p810_p2 = scmp.lt.s32.totalorder %s804_s10, %s804_s10 }
  0xaa   :  { %v217_v32 = vpack.c.bf16 %v211_v29, %v211_v29  ;;  %v202_v34 = vmax.f32 %v201_v31, 0.0  ;;  %732 = vmatprep.subr.bf16.mxu0 %v790_v36 }
  0xab   :  { %p811_p3 = por %p810_p2, %p809_p1 }
  0xac   :  { %695 = vmatmul.mubr.msk.bf16.vlgmr.msra.gmra.mrb[0].mxu1 %vm242_vm0, %v217_v32  ;;  %v212_v35 = vpack.c.bf16 %v202_v34, %v202_v34  ;;  %v720_v34 = vld [vmem:[%s1099_s13] ss:$0 sm:$0xff] }
  0xad   :  { %311 = vmatpush1.bf16.msra.mxu1 %v778_v30  ;;  %342 = vmatprep.mubr.bf16.mxu1 %v828_v1  ;;  %v792_v1 = vld [vmem:[%s1094_s8 + $0x60] sm:$0xff]   ;;  %p812_p4 = pnand %p811_p3, %p805_p0 }
  0xae   :  { %312 = vmatprep.subr.bf16.mxu1 %v783_v33  ;;  %733 = vmatpush3.bf16.msra.mxu0 %v791_v37  ;;  %v719_v30 = vld [vmem:[%s1097_s11] ss:$0 sm:$0xff] }
  0xaf   :  { %734 = vmatprep.subr.bf16.mxu0 %v792_v1 }
  0xb1   :  { %313 = vmatpush1.bf16.msra.mxu1 %v781_v18 }
  0xb2   :  { %735 = vmatpush3.bf16.msra.mxu0 %v793_v38  ;;  %753 = vmatprep.subr.bf16.mxu1 %v830_v46 }
  0xb3   :  { %736 = vmatprep.subr.bf16.mxu0 %v794_v39 }
  0xb4   :  { %700 = vmatmul.mubr.msk.bf16.vlgmr.msra.gmra.mrb[4].mxu1 %vm242_vm0, %v212_v35 }
  0xb5   :  { %754 = vmatpush3.bf16.msra.mxu1 %v800_v45  ;;  %761 = vmatprep.mubr.msk.bf16.mxu1 %vm831_vm1, %v830_v46 }
  0xb6   :  { %737 = vmatpush3.bf16.msra.mxu0 %v795_v40  ;;  %755 = vmatprep.subr.bf16.mxu1 %v830_v46 }
  0xb7   :  { %738 = vmatprep.subr.bf16.mxu0 %v796_v41 }
  0xb9   :  { %756 = vmatpush3.bf16.msra.mxu1 %v801_v17 }
  0xba   :  { %739 = vmatpush3.bf16.msra.mxu0 %v797_v42  ;;  %757 = vmatprep.subr.bf16.mxu1 %v830_v46 }
  0xbb   :  { %740 = vmatprep.subr.bf16.mxu0 %v798_v43 }
  0xbd   :  { %758 = vmatpush3.bf16.msra.mxu1 %v802_v20 }
  0xbe   :  { %741 = vmatpush3.bf16.msra.mxu0 %v799_v44  ;;  %759 = vmatprep.subr.bf16.mxu1 %v830_v46 }
  0xc1   :  { %760 = vmatpush3.bf16.msra.mxu1 %v803_v21 }
 0x17f   :  { %v280_v49 = vpop.f32.mrb[0].mxu1 }
 0x180   :  { %v282_v50 = vpop.f32.mrb[1].mxu1 }
 0x181   :  { %v284_v51 = vpop.f32.mrb[2].mxu1 }
 0x182   :  { %v285_v52 = vpop.f32.mrb[3].mxu1 }
 0x187   :  { %v344_v58 = vpop.f32.mrb[4].mxu1 }
 0x188   :  { %v345_v61 = vadd.f32 %v344_v58, %v280_v49  ;;  %v346_v63 = vpop.f32.mrb[5].mxu1 }
 0x189   :  { %v347_v0 = vadd.f32 %v346_v63, %v282_v50  ;;  %v348_v2 = vpop.f32.mrb[6].mxu1 }
 0x18a   :  { %v363_v4 = vadd.f32 %v356_v57, %v345_v61  ;;  %v349_v5 = vpop.f32.mrb[7].mxu1 }
 0x18b   :  { %v364_v7 = vadd.f32 %v360_v59, %v347_v0 }
 0x18c   :  { %v377_v9 = vmul.f32 %v370_v62, %v363_v4 }
 0x18d   :  { %v378_v10 = vmul.f32 %v374_v3, %v364_v7 }
 0x18e   :  { %v391_v11 = vadd.f32 %v384_v6, %v377_v9 }
 0x18f   :  { %v392_v12 = vadd.f32 %v388_v8, %v378_v10 }
 0x190   :  { %v393_v13 = vmax.f32 %v391_v11, 0.0 }
 0x191   :  { %v394_v14 = vmax.f32 %v392_v12, 0.0 }
 0x192   :  { %v395_v16 = vpack.c.bf16 %v393_v13, %v393_v13 }
 0x193   :  { %v396_v15 = vpack.c.bf16 %v394_v14, %v394_v14 }
 0x195   :  { %564 = vmatprep.mubr.bf16.mxu0 %v396_v15 }
 0x196   :  { %565 = vmatmul.mubr.bf16.vlgmr.msra.gmra.mrb[0].mxu0 %v395_v16 }
 0x269   :  { %v742_v22 = vpop.f32.mrb[0].mxu0 }
 0x26a   :  { %v743_v24 = vpop.f32.mrb[1].mxu0 }
 0x26b   :  { %v744_v25 = vadd.f32 %v743_v24, %v742_v22  ;;  %v745_v26 = vpop.f32.mrb[2].mxu0 }
 0x26c   :  { %v746_v28 = vpop.f32.mrb[3].mxu0 }
 0x26d   :  { %v567_v29 = vadd.f32 %v744_v25, %v701_v23 }
 0x26f   :  { %v579_v31 = vmul.f32 %v718_v27, %v567_v29 }
 0x271   :  { %v587_v32 = vadd.f32 %v719_v30, %v579_v31 }
 0x273   :  { %v588_v33 = vmax.f32 %v587_v32, 0.0 }
 0x275   :  { %v589_v18 = vpack.c.bf16 %v588_v33, %v588_v33 }
 0x277   :  { %762 = vmatmul.mubr.msk.bf16.vlgmr.msra.gmra.mrb[8].mxu1 %vm629_vm2, %v589_v18 }
 0x34a   :  { %v667_v35 = vpop.f32.mrb[8].mxu1 }
 0x34b   :  { %v668_v19 = vadd.f32 %v720_v34, %v667_v35  ;;  %v763_v36 = vpop.f32.mrb[9].mxu1 }
 0x34c   :  { %v670_v37 = vpop.f32.mrb[10].mxu1 }
 0x34d   :  { %v764_v1 = vpop.f32.mrb[11].mxu1  ;;  %674 = vst.msk [vmem:[#allocation2] sm:$0xff] %vm673_vm3, %v668_v19 }
 0x34e   :  { %815 = shalt.err (!%p812_p4)
}
 0x34f   :  { %s816_s13 = scalar_lea.hbm %s1100_s14, 128 }
 0x350   :  { %p817_p5 = scmp.ne.s32.totalorder %s1100_s14, %s816_s13  ;;  %p820_p6 = scmp.lt.u32.totalorder %s816_s13, %s1100_s14 }
 0x352   :  { %p822_p7 = pnand %p820_p6, %p817_p5 }
 0x354   :  { %825 = shalt.err (!%p822_p7)
}
 0x355   :  { %684 = dma.vmem_to_hbm [thread:$0]  %s682_s19, 128, %s1100_s14, [#allocation3]  }
 0x356   :  { %826 = dma.done.wait [#allocation3], 128  }
 0x357   :  { %827 = vsyncadd [#allocation3], 4294967168 }
 0x358   :  { %688 = vsyncpa [#allocation3], 1 }

// kernel: _lambda_.2
= control target key start
LH: loop header
LB: loop body
LE: loop exit
PB: predicated region body
PF: predicated region fallthrough
CT: control target
= control target key end

     0   :  { %v10440_v1 = vmov 0   ;;  %vm143_vm0 = vcmask 130048   ;;  %v10442_v20 = vmov 0.0   ;;  %vm7217_vm1 = vmmov 0   ;;  %s10416_s1 = inlined_call_operand.vmem [shape: bf16[16,768], index: 1, kind: input, shape index: {}]   ;;  %s10417_s0 = inlined_call_operand.vmem [shape: f32[64,16], index: 0, kind: input, shape index: {}]   ;;  %s10418_s3 = inlined_call_operand.vmem [shape: bf16[128,384], index: 3, kind: input, shape index: {}]   ;;  %s10419_s5 = inlined_call_operand.vmem [shape: bf16[128,384], index: 5, kind: input, shape index: {}]   ;;  %s10420_s2 = inlined_call_operand.vmem [shape: f32[1,768], index: 2, kind: input, shape index: {}]   ;;  %s10421_s4 = inlined_call_operand.vmem [shape: f32[1,384], index: 4, kind: input, shape index: {}]   ;;  %s10422_s6 = inlined_call_operand.vmem [shape: f32[1,384], index: 6, kind: input, shape index: {}]   ;;  %s10423_s9 = inlined_call_operand.vmem [shape: bf16[32,384], index: 9, kind: input, shape index: {}]   ;;  %s10424_s11 = inlined_call_operand.vmem [shape: bf16[128,384], index: 11, kind: input, shape index: {}]   ;;  %s10425_s7 = inlined_call_operand.vmem [shape: f32[1,32], index: 7, kind: input, shape index: {}, may-alias: {7,13}]   ;;  %s10426_s8 = inlined_call_operand.vmem [shape: f32[1,32], index: 8, kind: input, shape index: {}, may-alias: {8,14}]   ;;  %s10427_s10 = inlined_call_operand.vmem [shape: f32[1,384], index: 10, kind: input, shape index: {}]   ;;  %s10428_s12 = inlined_call_operand.vmem [shape: f32[1,384], index: 12, kind: input, shape index: {}]   ;;  %s10429_s15 = inlined_call_operand.vmem [shape: bf16[32,384], index: 15, kind: input, shape index: {}]   ;;  %s10430_s17 = inlined_call_operand.vmem [shape: bf16[128,384], index: 17, kind: input, shape index: {}]   ;;  %s10431_s13 = inlined_call_operand.vmem [shape: f32[1,32], index: 13, kind: input, shape index: {}, may-alias: {7,13}]   ;;  %s10432_s14 = inlined_call_operand.vmem [shape: f32[1,32], index: 14, kind: input, shape index: {}, may-alias: {8,14}]   ;;  %s10433_s16 = inlined_call_operand.vmem [shape: f32[1,384], index: 16, kind: input, shape index: {}]   ;;  %s10434_s18 = inlined_call_operand.vmem [shape: f32[1,384], index: 18, kind: input, shape index: {}]   ;;  %s10435_s19 = inlined_call_operand.vmem [shape: f32[64,128], index: 19, kind: output, shape index: {}]  }
   0x1   :  { %10505 = sst [smem:[#allocation75_spill]] %s10416_s1  ;;  %208 = vmatprep.mubr.bf16.mxu1 %v10440_v1  ;;  %188 = vmatprep.mubr.bf16.mxu0 %v10440_v1  ;;  %vm2543_vm2 = vcmask 261248   ;;  %vm2562_vm3 = vcmask 261120  }
   0x2   :  { %10506 = sst [smem:[#allocation76_spill]] %s10417_s0  ;;  %s10509_s20 = sld [smem:[#allocation75_spill]] }
   0x3   :  { %10507 = sst [smem:[#allocation77_spill]] %s10418_s3  ;;  %s10510_s23 = sld [smem:[#allocation76_spill]] }
   0x4   :  { %10508 = sst [smem:[#allocation78_spill]] %s10419_s5  ;;  %s10511_s30 = sld [smem:[#allocation77_spill]] }
   0x5   :  { %s10528_s5 = sld [smem:[#allocation78_spill]] }
   0x8   :  { %v6564_v0 = vld [vmem:[%s10509_s20 + $0x4] ss:$24 sps:$4 sm:$0xff]   ;;  %v6566_v2 = vld [vmem:[%s10509_s20] ss:$24 sps:$4 sm:$0xff]   ;;  %v6581_v17 = vld [vmem:[%s10509_s20 + $0x10] ss:$24 sps:$4 sm:$0xff]  }
   0x9   :  { %v67_v3 = vld [vmem:[%s10510_s23 + $0x20] sm:$0xff]  ;;  %v68_v4 = vld [vmem:[%s10510_s23 + $0x28] sm:$0xff]  ;;  %6558 = vmatprep.subr.bf16.mxu1 %v6564_v0  ;;  %156 = vmatprep.subr.bf16.mxu0 %v6564_v0  ;;  %v69_v11 = vld [vmem:[%s10510_s23 + $0x30] sm:$0xff] }
   0xa   :  { %v7333_v5 = vpack.c.bf16 %v68_v4, %v67_v3  ;;  %6559 = vmatpush1.bf16.msra.mxu1 %v6566_v2  ;;  %v6567_v6 = vld [vmem:[%s10509_s20 + $0x8] ss:$24 sps:$4 sm:$0xff]   ;;  %v6569_v7 = vld [vmem:[%s10509_s20 + $0xc] ss:$24 sps:$4 sm:$0xff]   ;;  %157 = vmatpush1.bf16.msra.mxu0 %v6566_v2  ;;  %v70_v13 = vld [vmem:[%s10510_s23 + $0x38] sm:$0xff] }
   0xb   :  { %v7344_v8 = vld [vmem:[%s10511_s30 + $0x4] ss:$12 sps:$4 sm:$0xff]   ;;  %229 = vmatprep.subr.bf16.mxu1 %v6569_v7  ;;  %v64_v10 = vld [vmem:[%s10510_s23 + $0x8] sm:$0xff]  ;;  %v7364_v14 = vpack.c.bf16 %v70_v13, %v69_v11  ;;  %v66_v16 = vld [vmem:[%s10510_s23 + $0x18] sm:$0xff] }
   0xc   :  { %v63_v9 = vld [vmem:[%s10510_s23] sm:$0xff]  ;;  %v65_v15 = vld [vmem:[%s10510_s23 + $0x10] sm:$0xff]  ;;  %v7392_v22 = vld [vmem:[%s10511_s30 + $0x1c] ss:$12 sps:$4 sm:$0xff]  }
   0xd   :  { %5392 = vmatmul.mubr.msk.bf16.vlgmr.msra.gmra.mrb[0].mxu1 %vm143_vm0, %v7333_v5  ;;  %v71_v12 = vpack.c.bf16 %v64_v10, %v63_v9  ;;  %v6583_v18 = vld [vmem:[%s10509_s20 + $0x14] ss:$24 sps:$4 sm:$0xff]   ;;  %v72_v19 = vpack.c.bf16 %v66_v16, %v65_v15  ;;  %v7404_v24 = vld [vmem:[%s10511_s30 + $0x18] ss:$12 sps:$4 sm:$0xff]   ;;  %v7426_v27 = vld [vmem:[%s10511_s30 + $0x30] ss:$12 sps:$4 sm:$0xff]  }
   0xe   :  { %230 = vmatpush1.bf16.msra.mxu1 %v6567_v6  ;;  %218 = vmatprep.mubr.bf16.mxu1 %v10440_v1  ;;  %v7387_v21 = vld [vmem:[%s10511_s30] ss:$12 sps:$4 sm:$0xff]   ;;  %v7397_v23 = vld [vmem:[%s10511_s30 + $0x8] ss:$12 sps:$4 sm:$0xff]   ;;  %10512 = vst [vmem:[#allocation9_spill] sm:$0xff] %v7426_v27 }
   0xf   :  { %639 = vmatprep.subr.bf16.mxu1 %v7344_v8  ;;  %5390 = vmatmul.mubr.msk.bf16.vlgmr.msra.gmra.mrb[0].mxu0 %vm143_vm0, %v71_v12  ;;  %v7411_v25 = vld [vmem:[%s10511_s30 + $0x34] ss:$12 sps:$4 sm:$0xff]   ;;  %v7432_v28 = vld [vmem:[%s10511_s30 + $0x4c] ss:$12 sps:$4 sm:$0xff]   ;;  %v7453_v31 = vld [vmem:[%s10511_s30 + $0x64] ss:$12 sps:$4 sm:$0xff]  }
  0x10   :  { %198 = vmatprep.mubr.bf16.mxu0 %v10440_v1  ;;  %302 = vmatprep.subr.bf16.mxu0 %v6583_v18  ;;  %v7418_v26 = vld [vmem:[%s10511_s30 + $0x20] ss:$12 sps:$4 sm:$0xff]   ;;  %10513 = vst [vmem:[#allocation10_spill] sm:$0xff] %v7432_v28  ;;  %v7438_v29 = vld [vmem:[%s10511_s30 + $0x38] ss:$12 sps:$4 sm:$0xff]   ;;  %10516 = vst [vmem:[#allocation13_spill] sm:$0xff] %v7453_v31 }
  0x11   :  { %303 = vmatpush1.bf16.msra.mxu0 %v6581_v17  ;;  %10514 = vst [vmem:[#allocation11_spill] sm:$0xff] %v7438_v29  ;;  %v7446_v30 = vld [vmem:[%s10511_s30 + $0x48] ss:$12 sps:$4 sm:$0xff]   ;;  %v7460_v32 = vld [vmem:[%s10511_s30 + $0x50] ss:$12 sps:$4 sm:$0xff]  }
  0x12   :  { %5894 = vmatprep.subr.bf16.mxu0 %v10442_v20  ;;  %10515 = vst [vmem:[#allocation12_spill] sm:$0xff] %v7446_v30  ;;  %10517 = vst [vmem:[#allocation14_spill] sm:$0xff] %v7460_v32  ;;  %v7468_v33 = vld [vmem:[%s10511_s30 + $0x60] ss:$12 sps:$4 sm:$0xff]   ;;  %v7474_v34 = vld [vmem:[%s10511_s30 + $0x7c] ss:$12 sps:$4 sm:$0xff]  }
  0x13   :  { %10518 = vst [vmem:[#allocation15_spill] sm:$0xff] %v7468_v33  ;;  %10519 = vst [vmem:[#allocation16_spill] sm:$0xff] %v7474_v34  ;;  %v7480_v35 = vld [vmem:[%s10511_s30 + $0x68] ss:$12 sps:$4 sm:$0xff]   ;;  %v7489_v36 = vld [vmem:[%s10511_s30 + $0x78] ss:$12 sps:$4 sm:$0xff]  }
  0x14   :  { %10520 = vst [vmem:[#allocation17_spill] sm:$0xff] %v7480_v35  ;;  %10521 = vst [vmem:[#allocation18_spill] sm:$0xff] %v7489_v36  ;;  %v7496_v37 = vld [vmem:[%s10511_s30 + $0x94] ss:$12 sps:$4 sm:$0xff]   ;;  %v7512_v39 = vld [vmem:[%s10511_s30 + $0x90] ss:$12 sps:$4 sm:$0xff]  }
  0x15   :  { %5393 = vmatmul.mubr.msk.bf16.gmra.mrb[4].mxu1 %vm143_vm0, %v7364_v14  ;;  %10522 = vst [vmem:[#allocation19_spill] sm:$0xff] %v7496_v37  ;;  %v7504_v38 = vld [vmem:[%s10511_s30 + $0x80] ss:$12 sps:$4 sm:$0xff]   ;;  %10524 = vst [vmem:[#allocation21_spill] sm:$0xff] %v7512_v39  ;;  %v7524_v41 = vld [vmem:[%s10511_s30 + $0x98] ss:$12 sps:$4 sm:$0xff]  }
  0x16   :  { %261 = vmatprep.mubr.bf16.mxu1 %v10440_v1  ;;  %10523 = vst [vmem:[#allocation20_spill] sm:$0xff] %v7504_v38  ;;  %v7518_v40 = vld [vmem:[%s10511_s30 + $0xac] ss:$12 sps:$4 sm:$0xff]   ;;  %10526 = vst [vmem:[#allocation23_spill] sm:$0xff] %v7524_v41  ;;  %v7533_v42 = vld [vmem:[%s10511_s30 + $0xa8] ss:$12 sps:$4 sm:$0xff]  }
  0x17   :  { %5391 = vmatmul.mubr.msk.bf16.gmra.mrb[4].mxu0 %vm143_vm0, %v72_v19  ;;  %10525 = vst [vmem:[#allocation22_spill] sm:$0xff] %v7518_v40  ;;  %10527 = vst [vmem:[#allocation24_spill] sm:$0xff] %v7533_v42  ;;  %v7540_v43 = vld [vmem:[%s10528_s5 + $0x4] ss:$12 sps:$4 sm:$0xff]   ;;  %v7557_v45 = vld [vmem:[%s10528_s5] ss:$12 sps:$4 sm:$0xff]  }
  0x18   :  { %334 = vmatprep.mubr.bf16.mxu0 %v10440_v1  ;;  %10529 = vst [vmem:[#allocation25_spill] sm:$0xff] %v7540_v43  ;;  %v7548_v44 = vld [vmem:[%s10511_s30 + $0xb0] ss:$12 sps:$4 sm:$0xff]   ;;  %v7569_v47 = vld [vmem:[%s10528_s5 + $0x8] ss:$12 sps:$4 sm:$0xff]  }
  0x19   :  { %10530 = vst [vmem:[#allocation26_spill] sm:$0xff] %v7548_v44  ;;  %v7563_v46 = vld [vmem:[%s10528_s5 + $0x1c] ss:$12 sps:$4 sm:$0xff]   ;;  %v7577_v48 = vld [vmem:[%s10528_s5 + $0x18] ss:$12 sps:$4 sm:$0xff]  }
  0x1a   :  { %v7584_v49 = vld [vmem:[%s10528_s5 + $0x34] ss:$12 sps:$4 sm:$0xff]   ;;  %v7600_v51 = vld [vmem:[%s10528_s5 + $0x30] ss:$12 sps:$4 sm:$0xff]   ;;  %v7606_v52 = vld [vmem:[%s10528_s5 + $0x4c] ss:$12 sps:$4 sm:$0xff]  }
  0x1b   :  { %v7591_v50 = vld [vmem:[%s10528_s5 + $0x20] ss:$12 sps:$4 sm:$0xff]   ;;  %v7612_v53 = vld [vmem:[%s10528_s5 + $0x38] ss:$12 sps:$4 sm:$0xff]   ;;  %v7619_v54 = vld [vmem:[%s10528_s5 + $0x48] ss:$12 sps:$4 sm:$0xff]  }
  0x1c   :  { %v7625_v55 = vld [vmem:[%s10528_s5 + $0x64] ss:$12 sps:$4 sm:$0xff]   ;;  %v7638_v57 = vld [vmem:[%s10528_s5 + $0x60] ss:$12 sps:$4 sm:$0xff]   ;;  %v7644_v58 = vld [vmem:[%s10528_s5 + $0x7c] ss:$12 sps:$4 sm:$0xff]  }
  0x1d   :  { %5394 = vmatmul.mubr.msk.bf16.vlgmr.msra.gmra.mrb[8].mxu1 %vm143_vm0, %v71_v12  ;;  %v7631_v56 = vld [vmem:[%s10528_s5 + $0x50] ss:$12 sps:$4 sm:$0xff]   ;;  %v7650_v59 = vld [vmem:[%s10528_s5 + $0x68] ss:$12 sps:$4 sm:$0xff]   ;;  %v7657_v60 = vld [vmem:[%s10528_s5 + $0x78] ss:$12 sps:$4 sm:$0xff]  }
  0x1e   :  { %640 = vmatpush1.bf16.msra.mxu1 %v7387_v21  ;;  %271 = vmatprep.mubr.bf16.mxu1 %v10440_v1  ;;  %v7663_v61 = vld [vmem:[%s10528_s5 + $0x94] ss:$12 sps:$4 sm:$0xff]   ;;  %v7676_v63 = vld [vmem:[%s10528_s5 + $0x90] ss:$12 sps:$4 sm:$0xff]   ;;  %v7682_v0 = vld [vmem:[%s10528_s5 + $0xac] ss:$12 sps:$4 sm:$0xff]  }
  0x1f   :  { %641 = vmatprep.subr.bf16.mxu1 %v7392_v22  ;;  %5398 = vmatmul.mubr.msk.bf16.vlgmr.msra.gmra.mrb[8].mxu0 %vm143_vm0, %v71_v12  ;;  %v7669_v62 = vld [vmem:[%s10528_s5 + $0x80] ss:$12 sps:$4 sm:$0xff]   ;;  %v7688_v2 = vld [vmem:[%s10528_s5 + $0x98] ss:$12 sps:$4 sm:$0xff]   ;;  %v7695_v3 = vld [vmem:[%s10528_s5 + $0xa8] ss:$12 sps:$4 sm:$0xff]  }
  0x20   :  { %5895 = vmatpush3.bf16.msra.mxu0 %v7397_v23  ;;  %344 = vmatprep.mubr.bf16.mxu0 %v10440_v1  ;;  %v7702_v4 = vld [vmem:[%s10528_s5 + $0xb0] ss:$12 sps:$4 sm:$0xff]   ;;  %v81_v9 = vld [vmem:[%s10420_s2] sm:$0x3f] }
  0x21   :  { %5896 = vmatprep.subr.bf16.mxu0 %v10442_v20 }
  0x22   :  { %642 = vmatpush1.bf16.msra.mxu1 %v7404_v24 }
  0x23   :  { %643 = vmatprep.subr.bf16.mxu1 %v7411_v25 }
  0x24   :  { %5897 = vmatpush3.bf16.msra.mxu0 %v7418_v26 }
  0x25   :  { %5395 = vmatmul.mubr.msk.bf16.gmra.mrb[12].mxu1 %vm143_vm0, %v72_v19  ;;  %5898 = vmatprep.subr.bf16.mxu0 %v10442_v20 }
  0x26   :  { %644 = vmatpush1.bf16.msra.mxu1 %v7426_v27  ;;  %281 = vmatprep.mubr.bf16.mxu1 %v10440_v1 }
  0x27   :  { %645 = vmatprep.subr.bf16.mxu1 %v7432_v28  ;;  %5399 = vmatmul.mubr.msk.bf16.gmra.mrb[12].mxu0 %vm143_vm0, %v72_v19 }
  0x28   :  { %5899 = vmatpush3.bf16.msra.mxu0 %v7438_v29  ;;  %354 = vmatprep.mubr.bf16.mxu0 %v10440_v1 }
  0x29   :  { %5900 = vmatprep.subr.bf16.mxu0 %v10442_v20 }
  0x2a   :  { %646 = vmatpush1.bf16.msra.mxu1 %v7446_v30 }
  0x2b   :  { %647 = vmatprep.subr.bf16.mxu1 %v7453_v31 }
  0x2c   :  { %5901 = vmatpush3.bf16.msra.mxu0 %v7460_v32 }
  0x2d   :  { %5396 = vmatmul.mubr.msk.bf16.gmra.mrb[16].mxu1 %vm143_vm0, %v7333_v5  ;;  %5902 = vmatprep.subr.bf16.mxu0 %v10442_v20 }
  0x2e   :  { %648 = vmatpush1.bf16.msra.mxu1 %v7468_v33  ;;  %291 = vmatprep.mubr.bf16.mxu1 %v10440_v1 }
  0x2f   :  { %649 = vmatprep.subr.bf16.mxu1 %v7474_v34  ;;  %5400 = vmatmul.mubr.msk.bf16.gmra.mrb[16].mxu0 %vm143_vm0, %v7333_v5  ;;  %v83_v5 = vlaneseq }
  0x30   :  { %5903 = vmatpush3.bf16.msra.mxu0 %v7480_v35  ;;  %364 = vmatprep.mubr.bf16.mxu0 %v10440_v1 }
  0x31   :  { %5904 = vmatprep.subr.bf16.mxu0 %v10442_v20  ;;  %v84_v6 = vshrl.u32 %v83_v5, 7 }
  0x32   :  { %650 = vmatpush1.bf16.msra.mxu1 %v7489_v36 }
  0x33   :  { %651 = vmatprep.subr.bf16.mxu1 %v7496_v37  ;;  %v7746_v7 = vsub.s32 0, %v84_v6  ;;  %v7751_v10 = vsub.s32 1, %v84_v6 }
  0x34   :  { %5905 = vmatpush3.bf16.msra.mxu0 %v7504_v38 }
  0x35   :  { %5397 = vmatmul.mubr.msk.bf16.gmra.mrb[20].mxu1 %vm143_vm0, %v7364_v14  ;;  %5906 = vmatprep.subr.bf16.mxu0 %v10442_v20  ;;  %10531 = vst [vmem:[#allocation27_spill] sm:$0xff] %v7746_v7  ;;  %10532 = vst [vmem:[#allocation28_spill] sm:$0xff] %v7751_v10  ;;  %v7754_v11 = vrot.slane %v81_v9, %v7746_v7  ;;  %v7757_v12 = vrot.slane %v81_v9, %v7751_v10 }
  0x36   :  { %652 = vmatpush1.bf16.msra.mxu1 %v7512_v39  ;;  %671 = vmatprep.mubr.bf16.mxu1 %v10440_v1 }
  0x37   :  { %653 = vmatprep.subr.bf16.mxu1 %v7518_v40  ;;  %5401 = vmatmul.mubr.msk.bf16.gmra.mrb[20].mxu0 %vm143_vm0, %v7364_v14 }
  0x38   :  { %5907 = vmatpush3.bf16.msra.mxu0 %v7524_v41  ;;  %5910 = vmatprep.mubr.msk.bf16.mxu0 %vm7217_vm1, %v10442_v20 }
  0x39   :  { %5908 = vmatprep.subr.bf16.mxu0 %v10442_v20 }
  0x3a   :  { %654 = vmatpush1.bf16.msra.mxu1 %v7533_v42 }
  0x3b   :  { %885 = vmatprep.subr.bf16.mxu1 %v7540_v43 }
  0x3c   :  { %5909 = vmatpush3.bf16.msra.mxu0 %v7548_v44 }
  0x3d   :  { %672 = vmatmul.mubr.bf16.vlgmr.msra.gmra.mrb[24].mxu1 %v10440_v1  ;;  %5914 = vmatprep.subr.bf16.mxu0 %v10442_v20 }
  0x3e   :  { %886 = vmatpush1.bf16.msra.mxu1 %v7557_v45  ;;  %917 = vmatprep.mubr.bf16.mxu1 %v10440_v1 }
  0x3f   :  { %887 = vmatprep.subr.bf16.mxu1 %v7563_v46  ;;  %5911 = vmatmul.mubr.bf16.vlgmr.msra.gmra.mrb[24].mxu0 %v10440_v1 }
  0x40   :  { %5915 = vmatpush3.bf16.msra.mxu0 %v7569_v47  ;;  %5930 = vmatprep.mubr.msk.bf16.mxu0 %vm7217_vm1, %v10442_v20 }
  0x41   :  { %5916 = vmatprep.subr.bf16.mxu0 %v10442_v20 }
  0x42   :  { %888 = vmatpush1.bf16.msra.mxu1 %v7577_v48 }
  0x43   :  { %889 = vmatprep.subr.bf16.mxu1 %v7584_v49 }
  0x44   :  { %5917 = vmatpush3.bf16.msra.mxu0 %v7591_v50 }
  0x45   :  { %5918 = vmatprep.subr.bf16.mxu0 %v10442_v20 }
  0x46   :  { %890 = vmatpush1.bf16.msra.mxu1 %v7600_v51 }
  0x47   :  { %891 = vmatprep.subr.bf16.mxu1 %v7606_v52 }
  0x48   :  { %5919 = vmatpush3.bf16.msra.mxu0 %v7612_v53 }
  0x49   :  { %5920 = vmatprep.subr.bf16.mxu0 %v10442_v20 }
  0x4a   :  { %892 = vmatpush1.bf16.msra.mxu1 %v7619_v54 }
  0x4b   :  { %893 = vmatprep.subr.bf16.mxu1 %v7625_v55 }
  0x4c   :  { %5921 = vmatpush3.bf16.msra.mxu0 %v7631_v56 }
  0x4d   :  { %5922 = vmatprep.subr.bf16.mxu0 %v10442_v20 }
  0x4e   :  { %894 = vmatpush1.bf16.msra.mxu1 %v7638_v57 }
  0x4f   :  { %895 = vmatprep.subr.bf16.mxu1 %v7644_v58 }
  0x50   :  { %5923 = vmatpush3.bf16.msra.mxu0 %v7650_v59 }
  0x51   :  { %5924 = vmatprep.subr.bf16.mxu0 %v10442_v20 }
  0x52   :  { %896 = vmatpush1.bf16.msra.mxu1 %v7657_v60 }
  0x53   :  { %897 = vmatprep.subr.bf16.mxu1 %v7663_v61 }
  0x54   :  { %5925 = vmatpush3.bf16.msra.mxu0 %v7669_v62 }
  0x55   :  { %5926 = vmatprep.subr.bf16.mxu0 %v10442_v20 }
  0x56   :  { %898 = vmatpush1.bf16.msra.mxu1 %v7676_v63 }
  0x57   :  { %899 = vmatprep.subr.bf16.mxu1 %v7682_v0 }
  0x58   :  { %5927 = vmatpush3.bf16.msra.mxu0 %v7688_v2 }
  0x59   :  { %5928 = vmatprep.subr.bf16.mxu0 %v10442_v20 }
  0x5a   :  { %900 = vmatpush1.bf16.msra.mxu1 %v7695_v3 }
  0x5b   :  { %996 = vmatprep.subr.bf16.mxu1 %v7344_v8 }
  0x5c   :  { %5929 = vmatpush3.bf16.msra.mxu0 %v7702_v4 }
  0x5d   :  { %918 = vmatmul.mubr.bf16.vlgmr.msra.gmra.mrb[28].mxu1 %v10440_v1  ;;  %5934 = vmatprep.subr.bf16.mxu0 %v10442_v20 }
  0x5e   :  { %997 = vmatpush1.bf16.msra.mxu1 %v7387_v21  ;;  %1028 = vmatprep.mubr.bf16.mxu1 %v10440_v1 }
  0x5f   :  { %5931 = vmatmul.mubr.bf16.vlgmr.msra.gmra.mrb[28].mxu0 %v10440_v1  ;;  %998 = vmatprep.subr.bf16.mxu1 %v7392_v22 }
  0x60   :  { %5935 = vmatpush3.bf16.msra.mxu0 %v7397_v23  ;;  %5950 = vmatprep.mubr.msk.bf16.mxu0 %vm7217_vm1, %v10442_v20 }
  0x61   :  { %5936 = vmatprep.subr.bf16.mxu0 %v10442_v20 }
  0x62   :  { %999 = vmatpush1.bf16.msra.mxu1 %v7404_v24 }
  0x63   :  { %1000 = vmatprep.subr.bf16.mxu1 %v7411_v25 }
  0x64   :  { %5937 = vmatpush3.bf16.msra.mxu0 %v7418_v26 }
  0x65   :  { %5938 = vmatprep.subr.bf16.mxu0 %v10442_v20 }
  0x66   :  { %1001 = vmatpush1.bf16.msra.mxu1 %v7426_v27 }
  0x67   :  { %1002 = vmatprep.subr.bf16.mxu1 %v7432_v28 }
  0x68   :  { %5939 = vmatpush3.bf16.msra.mxu0 %v7438_v29 }
  0x69   :  { %5940 = vmatprep.subr.bf16.mxu0 %v10442_v20 }
  0x6a   :  { %1003 = vmatpush1.bf16.msra.mxu1 %v7446_v30 }
  0x6b   :  { %1004 = vmatprep.subr.bf16.mxu1 %v7453_v31 }
  0x6c   :  { %5941 = vmatpush3.bf16.msra.mxu0 %v7460_v32 }
  0x6d   :  { %5942 = vmatprep.subr.bf16.mxu0 %v10442_v20 }
  0x6e   :  { %1005 = vmatpush1.bf16.msra.mxu1 %v7468_v33 }
  0x6f   :  { %1006 = vmatprep.subr.bf16.mxu1 %v7474_v34 }
  0x70   :  { %5943 = vmatpush3.bf16.msra.mxu0 %v7480_v35 }
  0x71   :  { %5944 = vmatprep.subr.bf16.mxu0 %v10442_v20 }
  0x72   :  { %1007 = vmatpush1.bf16.msra.mxu1 %v7489_v36 }
  0x73   :  { %1008 = vmatprep.subr.bf16.mxu1 %v7496_v37 }
  0x74   :  { %5945 = vmatpush3.bf16.msra.mxu0 %v7504_v38 }
  0x75   :  { %5946 = vmatprep.subr.bf16.mxu0 %v10442_v20 }
  0x76   :  { %1009 = vmatpush1.bf16.msra.mxu1 %v7512_v39 }
  0x77   :  { %1010 = vmatprep.subr.bf16.mxu1 %v7518_v40  ;;  %v97_v40 = vsub.s32 3, %v84_v6 }
  0x78   :  { %5947 = vmatpush3.bf16.msra.mxu0 %v7524_v41 }
  0x79   :  { %5948 = vmatprep.subr.bf16.mxu0 %v10442_v20 }
  0x7a   :  { %1011 = vmatpush1.bf16.msra.mxu1 %v7533_v42 }
  0x7b   :  { %1099 = vmatprep.subr.bf16.mxu1 %v7540_v43 }
  0x7c   :  { %5949 = vmatpush3.bf16.msra.mxu0 %v7548_v44 }
  0x7d   :  { %5954 = vmatprep.subr.bf16.mxu0 %v10442_v20 }
  0xe0   :  { %v210_v13 = vpop.f32.mrb[0].mxu1 }
  0xe1   :  { %v7760_v14 = vadd.f32 %v210_v13, %v7754_v11  ;;  %v212_v15 = vpop.f32.mrb[1].mxu1 }
  0xe2   :  { %v7763_v16 = vadd.f32 %v212_v15, %v7757_v12  ;;  %v214_v17 = vpop.f32.mrb[2].mxu1  ;;  %v7765_v18 = vpop.f32.mrb[0].mxu0 }
  0xe3   :  { %10533 = vst [vmem:[#allocation29_spill] sm:$0xff] %v7760_v14  ;;  %v7768_v19 = vadd.f32 %v214_v17, %v7754_v11  ;;  %v216_v5 = vpop.f32.mrb[3].mxu1  ;;  %v7770_v1 = vpop.f32.mrb[1].mxu0 }
  0xe4   :  { %10534 = vst [vmem:[#allocation30_spill] sm:$0xff] %v7763_v16  ;;  %v7773_v20 = vadd.f32 %v216_v5, %v7757_v12  ;;  %v194_v43 = vpop.f32.mrb[2].mxu0 }
  0xe5   :  { %10535 = vst [vmem:[#allocation31_spill] sm:$0xff] %v7768_v19  ;;  %v7776_v13 = vadd.f32 %v194_v43, %v7754_v11  ;;  %v196_v14 = vpop.f32.mrb[3].mxu0 }
  0xe6   :  { %10536 = vst [vmem:[#allocation32_spill] sm:$0xff] %v7773_v20  ;;  %v7779_v15 = vadd.f32 %v196_v14, %v7757_v12 }
  0xe7   :  { %10537 = vst [vmem:[#allocation33_spill] sm:$0xff] %v7776_v13 }
  0xe8   :  { %10538 = vst [vmem:[#allocation34_spill] sm:$0xff] %v7779_v15  ;;  %v220_v16 = vpop.f32.mrb[4].mxu1  ;;  %v101_v15 = vsub.s32 4, %v84_v6 }
  0xe9   :  { %v7782_v44 = vadd.f32 %v220_v16, %v7754_v11  ;;  %v222_v17 = vpop.f32.mrb[5].mxu1 }
  0xea   :  { %v7785_v19 = vadd.f32 %v222_v17, %v7757_v12  ;;  %v224_v42 = vpop.f32.mrb[6].mxu1  ;;  %v200_v5 = vpop.f32.mrb[4].mxu0 }
  0xeb   :  { %10539 = vst [vmem:[#allocation35_spill] sm:$0xff] %v7782_v44  ;;  %v7788_v20 = vadd.f32 %v224_v42, %v7754_v11  ;;  %v226_v43 = vpop.f32.mrb[7].mxu1  ;;  %v7791_v13 = vadd.f32 %v200_v5, %v7754_v11  ;;  %v202_v14 = vpop.f32.mrb[5].mxu0  ;;  %v7799_v44 = vsub.s32 2, %v84_v6 }
  0xec   :  { %10540 = vst [vmem:[#allocation36_spill] sm:$0xff] %v7785_v19  ;;  %v7794_v41 = vadd.f32 %v226_v43, %v7757_v12  ;;  %v7797_v16 = vadd.f32 %v202_v14, %v7757_v12  ;;  %v204_v17 = vpop.f32.mrb[6].mxu0  ;;  %v105_v19 = vsub.s32 5, %v84_v6 }
  0xed   :  { %10541 = vst [vmem:[#allocation37_spill] sm:$0xff] %v7788_v20  ;;  %10542 = vst [vmem:[#allocation38_spill] sm:$0xff] %v7791_v13  ;;  %v7802_v39 = vadd.f32 %v204_v17, %v7754_v11  ;;  %v206_v42 = vpop.f32.mrb[7].mxu0  ;;  %v7804_v20 = vrot.slane %v81_v9, %v97_v40  ;;  %v7809_v13 = vrot.slane %v81_v9, %v101_v15 }
  0xee   :  { %10543 = vst [vmem:[#allocation39_spill] sm:$0xff] %v7794_v41  ;;  %10544 = vst [vmem:[#allocation40_spill] sm:$0xff] %v7797_v16  ;;  %v7807_v5 = vadd.f32 %v206_v42, %v7757_v12  ;;  %v7813_v41 = vrot.slane %v81_v9, %v105_v19  ;;  %v7816_v14 = vrot.slane %v81_v9, %v7799_v44 }
  0xef   :  { %10545 = vst [vmem:[#allocation41_spill] sm:$0xff] %v7799_v44  ;;  %10546 = vst [vmem:[#allocation42_spill] sm:$0xff] %v7802_v39 }
  0xf0   :  { %10547 = vst [vmem:[#allocation43_spill] sm:$0xff] %v7807_v5  ;;  %v7811_v43 = vpop.f32.mrb[8].mxu1 }
  0xf1   :  { %v265_v6 = vpop.f32.mrb[9].mxu1 }
  0xf2   :  { %v7819_v16 = vadd.f32 %v265_v6, %v7804_v20  ;;  %v267_v17 = vpop.f32.mrb[10].mxu1  ;;  %v336_v39 = vpop.f32.mrb[8].mxu0 }
  0xf3   :  { %v7822_v40 = vadd.f32 %v267_v17, %v7816_v14  ;;  %v269_v42 = vpop.f32.mrb[11].mxu1  ;;  %v7825_v15 = vadd.f32 %v336_v39, %v7809_v13  ;;  %v338_v5 = vpop.f32.mrb[9].mxu0 }
  0xf4   :  { %10548 = vst [vmem:[#allocation44_spill] sm:$0xff] %v7819_v16  ;;  %v7828_v19 = vadd.f32 %v269_v42, %v7804_v20  ;;  %v7831_v9 = vadd.f32 %v338_v5, %v7813_v41  ;;  %v340_v37 = vpop.f32.mrb[10].mxu0 }
  0xf5   :  { %10549 = vst [vmem:[#allocation45_spill] sm:$0xff] %v7822_v40  ;;  %10550 = vst [vmem:[#allocation46_spill] sm:$0xff] %v7825_v15  ;;  %v7834_v6 = vadd.f32 %v340_v37, %v7809_v13  ;;  %v342_v16 = vpop.f32.mrb[11].mxu0 }
  0xf6   :  { %10551 = vst [vmem:[#allocation47_spill] sm:$0xff] %v7828_v19  ;;  %10552 = vst [vmem:[#allocation48_spill] sm:$0xff] %v7831_v9  ;;  %v7837_v38 = vadd.f32 %v342_v16, %v7813_v41 }
  0xf7   :  { %10553 = vst [vmem:[#allocation49_spill] sm:$0xff] %v7834_v6 }
  0xf8   :  { %10554 = vst [vmem:[#allocation50_spill] sm:$0xff] %v7837_v38  ;;  %v273_v17 = vpop.f32.mrb[12].mxu1 }
  0xf9   :  { %v7840_v40 = vadd.f32 %v273_v17, %v7816_v14  ;;  %v275_v39 = vpop.f32.mrb[13].mxu1 }
  0xfa   :  { %v7843_v15 = vadd.f32 %v275_v39, %v7804_v20  ;;  %v277_v42 = vpop.f32.mrb[14].mxu1  ;;  %v346_v19 = vpop.f32.mrb[12].mxu0 }
  0xfb   :  { %10555 = vst [vmem:[#allocation51_spill] sm:$0xff] %v7840_v40  ;;  %v7846_v5 = vadd.f32 %v277_v42, %v7816_v14  ;;  %v279_v9 = vpop.f32.mrb[15].mxu1  ;;  %v7849_v37 = vadd.f32 %v346_v19, %v7809_v13  ;;  %v348_v6 = vpop.f32.mrb[13].mxu0 }
  0xfc   :  { %10556 = vst [vmem:[#allocation52_spill] sm:$0xff] %v7843_v15  ;;  %v7852_v16 = vadd.f32 %v279_v9, %v7804_v20  ;;  %v7855_v17 = vadd.f32 %v348_v6, %v7813_v41  ;;  %v350_v38 = vpop.f32.mrb[14].mxu0 }
  0xfd   :  { %10557 = vst [vmem:[#allocation53_spill] sm:$0xff] %v7846_v5  ;;  %10558 = vst [vmem:[#allocation54_spill] sm:$0xff] %v7849_v37  ;;  %v7858_v39 = vadd.f32 %v350_v38, %v7809_v13  ;;  %v352_v15 = vpop.f32.mrb[15].mxu0 }
  0xfe   :  { %10559 = vst [vmem:[#allocation55_spill] sm:$0xff] %v7852_v16  ;;  %10560 = vst [vmem:[#allocation56_spill] sm:$0xff] %v7855_v17  ;;  %v7861_v40 = vadd.f32 %v352_v15, %v7813_v41 }
  0xff   :  { %10561 = vst [vmem:[#allocation57_spill] sm:$0xff] %v7858_v39 }
 0x100   :  { %10562 = vst [vmem:[#allocation58_spill] sm:$0xff] %v7861_v40  ;;  %v283_v42 = vpop.f32.mrb[16].mxu1 }
 0x101   :  { %v7864_v5 = vadd.f32 %v283_v42, %v7816_v14  ;;  %v285_v19 = vpop.f32.mrb[17].mxu1 }
 0x102   :  { %v7867_v37 = vadd.f32 %v285_v19, %v7804_v20  ;;  %v287_v9 = vpop.f32.mrb[18].mxu1  ;;  %v356_v16 = vpop.f32.mrb[16].mxu0 }
 0x103   :  { %10563 = vst [vmem:[#allocation59_spill] sm:$0xff] %v7864_v5  ;;  %v7870_v6 = vadd.f32 %v287_v9, %v7816_v14  ;;  %v289_v17 = vpop.f32.mrb[19].mxu1  ;;  %v7873_v38 = vadd.f32 %v356_v16, %v7809_v13  ;;  %v358_v39 = vpop.f32.mrb[17].mxu0 }
 0x104   :  { %10564 = vst [vmem:[#allocation60_spill] sm:$0xff] %v7867_v37  ;;  %v7876_v15 = vadd.f32 %v289_v17, %v7804_v20  ;;  %v7879_v42 = vadd.f32 %v358_v39, %v7813_v41  ;;  %v360_v40 = vpop.f32.mrb[18].mxu0  ;;  %v455_v39 = vld [vmem:[%s10421_s4] sm:$0x7] }
 0x105   :  { %10565 = vst [vmem:[#allocation61_spill] sm:$0xff] %v7870_v6  ;;  %10566 = vst [vmem:[#allocation62_spill] sm:$0xff] %v7873_v38  ;;  %v7882_v19 = vadd.f32 %v360_v40, %v7809_v13  ;;  %v362_v5 = vpop.f32.mrb[19].mxu0 }
 0x106   :  { %10567 = vst [vmem:[#allocation63_spill] sm:$0xff] %v7876_v15  ;;  %10568 = vst [vmem:[#allocation64_spill] sm:$0xff] %v7879_v42  ;;  %v7885_v37 = vadd.f32 %v362_v5, %v7813_v41 }
 0x107   :  { %10569 = vst [vmem:[#allocation65_spill] sm:$0xff] %v7882_v19 }
 0x108   :  { %10570 = vst [vmem:[#allocation66_spill] sm:$0xff] %v7885_v37  ;;  %v293_v9 = vpop.f32.mrb[20].mxu1 }
 0x109   :  { %v7888_v6 = vadd.f32 %v293_v9, %v7816_v14  ;;  %v295_v16 = vpop.f32.mrb[21].mxu1 }
 0x10a   :  { %v7891_v38 = vadd.f32 %v295_v16, %v7804_v20  ;;  %v297_v17 = vpop.f32.mrb[22].mxu1  ;;  %v366_v42 = vpop.f32.mrb[20].mxu0  ;;  %v7906_v16 = vrot.slane %v455_v39, %v7746_v7 }
 0x10b   :  { %10571 = vst [vmem:[#allocation67_spill] sm:$0xff] %v7888_v6  ;;  %v7897_v40 = vadd.f32 %v297_v17, %v7816_v14  ;;  %v299_v19 = vpop.f32.mrb[23].mxu1  ;;  %v7900_v5 = vadd.f32 %v366_v42, %v7809_v13  ;;  %v368_v37 = vpop.f32.mrb[21].mxu0  ;;  %v191_v17 = vadd.f32 %v7765_v18, %v7754_v11  ;;  %v7920_v18 = vrot.slane %v455_v39, %v7799_v44 }
 0x10c   :  { %10572 = vst [vmem:[#allocation68_spill] sm:$0xff] %v7891_v38  ;;  %v7903_v9 = vadd.f32 %v368_v37, %v7813_v41  ;;  %v370_v6 = vpop.f32.mrb[22].mxu0  ;;  %10576 = vst [vmem:[#allocation72_spill] sm:$0xff] %v7906_v16  ;;  %v7911_v38 = vrot.slane %v455_v39, %v7751_v10  ;;  %v193_v37 = vadd.f32 %v7770_v1, %v7757_v12  ;;  %v488_v12 = vld [vmem:[%s10422_s6] sm:$0x7]  ;;  %s7218_s6 = smov 16  }
 0x10d   :  { %10573 = vst [vmem:[#allocation69_spill] sm:$0xff] %v7897_v40  ;;  %10574 = vst [vmem:[#allocation70_spill] sm:$0xff] %v7900_v5  ;;  %v7908_v15 = vpop.f32.mrb[23].mxu0  ;;  %v300_v39 = vadd.f32 %v299_v19, %v7804_v20 }
 0x10e   :  { %10575 = vst [vmem:[#allocation71_spill] sm:$0xff] %v7903_v9  ;;  %10577 = vst [vmem:[#allocation73_spill] sm:$0xff] %v7920_v18 }
 0x110   :  { %v673_v36 = vpop.f32.mrb[24].mxu1 }
 0x111   :  { %v674_v42 = vadd.f32 %v673_v36, %v7906_v16  ;;  %v675_v40 = vpop.f32.mrb[25].mxu1 }
 0x112   :  { %v676_v9 = vadd.f32 %v675_v40, %v7911_v38  ;;  %v677_v5 = vpop.f32.mrb[26].mxu1  ;;  %v714_v34 = vpop.f32.mrb[24].mxu0 }
 0x113   :  { %v720_v35 = vadd.f32 %v674_v42, %v191_v17  ;;  %v678_v33 = vpop.f32.mrb[27].mxu1  ;;  %v5912_v31 = vpop.f32.mrb[25].mxu0 }
 0x114   :  { %v727_v32 = vadd.f32 %v676_v9, %v193_v37  ;;  %v717_v30 = vpop.f32.mrb[26].mxu0  ;;  %v715_v31 = vadd.f32 %v714_v34, %v7920_v18  ;;  %v371_v34 = vadd.f32 %v370_v6, %v7809_v13 }
 0x115   :  { %v5426_v28 = vmul.f32 -1.442695, %v720_v35  ;;  %v5913_v29 = vpop.f32.mrb[27].mxu0  ;;  %v7927_v30 = vrot.slane %v488_v12, %v7746_v7 }
 0x116   :  { %v5427_v27 = vmul.f32 -1.442695, %v727_v32  ;;  %v264_v29 = vadd.f32 %v7811_v43, %v7816_v14 }
 0x117   :  { %6717 = vpow2.f32 %v5426_v28 }
 0x118   :  { %6719 = vpow2.f32 %v5427_v27  ;;  %v7930_v27 = vrot.slane %v488_v12, %v7751_v10 }
 0x121   :  { %v6718_v11 = vpop.eup %6717 }
 0x122   :  { %v724_v36 = vadd.f32 1.0, %v6718_v11  ;;  %v6720_v1 = vpop.eup %6719 }
 0x123   :  { %v731_v33 = vadd.f32 1.0, %v6720_v1 }
 0x124   :  { %6721 = vrcp.f32 %v724_v36 }
 0x125   :  { %6723 = vrcp.f32 %v731_v33 }
 0x12e   :  { %v6722_v28 = vpop.eup %6721 }
 0x12f   :  { %v734_v32 = vmul.f32 %v6722_v28, %v715_v31  ;;  %v6724_v20 = vpop.eup %6723 }
 0x130   :  { %v919_v35 = vpop.f32.mrb[28].mxu1  ;;  %v737_v28 = vsub.f32 1.0, %v6724_v20  ;;  %v739_v13 = vmul.f32 0.0, %v6724_v20 }
 0x131   :  { %v735_v40 = vadd.f32 %v734_v32, %v264_v29  ;;  %v920_v5 = vadd.f32 %v919_v35, %v7927_v30  ;;  %v921_v9 = vpop.f32.mrb[29].mxu1 }
 0x132   :  { %v922_v17 = vadd.f32 %v921_v9, %v7930_v27  ;;  %v923_v42 = vpop.f32.mrb[30].mxu1  ;;  %v960_v37 = vpop.f32.mrb[28].mxu0 }
 0x133   :  { %6725 = vtanh.f32 %v735_v40  ;;  %v966_v11 = vadd.f32 %v920_v5, %v300_v39  ;;  %v924_v36 = vpop.f32.mrb[31].mxu1  ;;  %v5932_v1 = vpop.f32.mrb[29].mxu0  ;;  %v10578_v40 = vmov 0.0   ;;  %v7949_v5 = vrot.slane %v488_v12, %v7799_v44 }
 0x134   :  { %v973_v43 = vadd.f32 %v922_v17, %v371_v34  ;;  %v963_v14 = vpop.f32.mrb[30].mxu0  ;;  %v10579_v34 = vmov 0   ;;  %v373_v36 = vadd.f32 %v7908_v15, %v7813_v41 }
 0x135   :  { %v5452_v33 = vmul.f32 -1.442695, %v966_v11  ;;  %v5933_v31 = vpop.f32.mrb[31].mxu0  ;;  %v961_v11 = vadd.f32 %v960_v37, %v7949_v5 }
 0x136   :  { %v5453_v19 = vmul.f32 -1.442695, %v973_v43 }
 0x137   :  { %6727 = vpow2.f32 %v5452_v33 }
 0x138   :  { %6729 = vpow2.f32 %v5453_v19  ;;  %v10585_v19 = vld [vmem:[#allocation14_spill] sm:$0xff] }
 0x13d   :  { %v6726_v29 = vpop.eup %6725 }
 0x13e   :  { %v738_v32 = vmul.f32 %v6726_v29, %v737_v28  ;;  %v10586_v28 = vld [vmem:[#allocation13_spill] sm:$0xff]  ;;  %v10590_v29 = vld [vmem:[#allocation18_spill] sm:$0xff] }
 0x140   :  { %v7938_v6 = vadd.f32 %v739_v13, %v738_v32  ;;  %v10591_v32 = vld [vmem:[#allocation20_spill] sm:$0xff]  ;;  %v10592_v13 = vld [vmem:[#allocation19_spill] sm:$0xff] }
 0x141   :  { %v6728_v35 = vpop.eup %6727 }
 0x142   :  { %v970_v9 = vadd.f32 1.0, %v6728_v35  ;;  %v995_v39 = vpack.c.bf16 %v7938_v6, %v7938_v6  ;;  %2495 = vst.msk [vmem:[#allocation5] sm:$0xff] %vm143_vm0, %v7938_v6  ;;  %v6730_v17 = vpop.eup %6729  ;;  %v10593_v35 = vld [vmem:[#allocation21_spill] sm:$0xff] }
 0x143   :  { %v977_v42 = vadd.f32 1.0, %v6730_v17  ;;  %v10596_v17 = vld [vmem:[#allocation24_spill] sm:$0xff] }
 0x144   :  { %6731 = vrcp.f32 %v970_v9  ;;  %1029 = vmatmul.mubr.bf16.vlgmr.msra.gmra.mrb[32].mxu1 %v995_v39  ;;  %5951 = vmatmul.mubr.bf16.vlgmr.msra.gmra.mrb[32].mxu0 %v995_v39  ;;  %v10594_v9 = vld [vmem:[#allocation23_spill] sm:$0xff]  ;;  %v10595_v39 = vld [vmem:[#allocation22_spill] sm:$0xff] }
 0x145   :  { %1100 = vmatpush1.bf16.msra.mxu1 %v7557_v45  ;;  %5955 = vmatpush3.bf16.msra.mxu0 %v7569_v47  ;;  %6733 = vrcp.f32 %v977_v42  ;;  %v10597_v42 = vld [vmem:[#allocation26_spill] sm:$0xff] }
 0x146   :  { %1101 = vmatprep.subr.bf16.mxu1 %v7563_v46  ;;  %5956 = vmatprep.subr.bf16.mxu0 %v10578_v40 }
 0x147   :  { %1131 = vmatprep.mubr.bf16.mxu1 %v10579_v34  ;;  %5970 = vmatprep.mubr.msk.bf16.mxu0 %vm7217_vm1, %v10578_v40 }
 0x149   :  { %1102 = vmatpush1.bf16.msra.mxu1 %v7577_v48  ;;  %5957 = vmatpush3.bf16.msra.mxu0 %v7591_v50 }
 0x14a   :  { %1103 = vmatprep.subr.bf16.mxu1 %v7584_v49  ;;  %5958 = vmatprep.subr.bf16.mxu0 %v10578_v40 }
 0x14d   :  { %1104 = vmatpush1.bf16.msra.mxu1 %v7600_v51  ;;  %5959 = vmatpush3.bf16.msra.mxu0 %v7612_v53 }
 0x14e   :  { %v6732_v12 = vpop.eup %6731  ;;  %1105 = vmatprep.subr.bf16.mxu1 %v7606_v52  ;;  %5960 = vmatprep.subr.bf16.mxu0 %v10578_v40 }
 0x14f   :  { %v980_v1 = vmul.f32 %v6732_v12, %v961_v11  ;;  %v6734_v41 = vpop.eup %6733  ;;  %v10598_v11 = vld [vmem:[#allocation25_spill] sm:$0xff] }
 0x150   :  { %v983_v15 = vsub.f32 1.0, %v6734_v41  ;;  %v985_v33 = vmul.f32 0.0, %v6734_v41 }
 0x151   :  { %v981_v43 = vadd.f32 %v980_v1, %v373_v36  ;;  %1106 = vmatpush1.bf16.msra.mxu1 %v7619_v54  ;;  %5961 = vmatpush3.bf16.msra.mxu0 %v7631_v56 }
 0x152   :  { %1107 = vmatprep.subr.bf16.mxu1 %v7625_v55  ;;  %5962 = vmatprep.subr.bf16.mxu0 %v10578_v40 }
 0x153   :  { %6735 = vtanh.f32 %v981_v43 }
 0x155   :  { %1108 = vmatpush1.bf16.msra.mxu1 %v7638_v57  ;;  %5963 = vmatpush3.bf16.msra.mxu0 %v7650_v59 }
 0x156   :  { %1109 = vmatprep.subr.bf16.mxu1 %v7644_v58  ;;  %5964 = vmatprep.subr.bf16.mxu0 %v10578_v40 }
 0x159   :  { %1110 = vmatpush1.bf16.msra.mxu1 %v7657_v60  ;;  %5965 = vmatpush3.bf16.msra.mxu0 %v7669_v62 }
 0x15a   :  { %1111 = vmatprep.subr.bf16.mxu1 %v7663_v61  ;;  %5966 = vmatprep.subr.bf16.mxu0 %v10578_v40 }
 0x15d   :  { %v6736_v37 = vpop.eup %6735  ;;  %1112 = vmatpush1.bf16.msra.mxu1 %v7676_v63  ;;  %5967 = vmatpush3.bf16.msra.mxu0 %v7688_v2 }
 0x15e   :  { %1113 = vmatprep.subr.bf16.mxu1 %v7682_v0  ;;  %5968 = vmatprep.subr.bf16.mxu0 %v10578_v40  ;;  %v984_v14 = vmul.f32 %v6736_v37, %v983_v15 }
 0x160   :  { %v7981_v31 = vadd.f32 %v985_v33, %v984_v14  ;;  %v10599_v33 = vld [vmem:[#allocation33_spill] sm:$0xff] }
 0x161   :  { %1114 = vmatpush1.bf16.msra.mxu1 %v7695_v3  ;;  %5969 = vmatpush3.bf16.msra.mxu0 %v7702_v4 }
 0x162   :  { %10580 = vst [vmem:[#allocation74_spill] sm:$0xff] %v7981_v31  ;;  %v1098_v20 = vpack.c.bf16 %v7981_v31, %v7981_v31  ;;  %1210 = vmatprep.subr.bf16.mxu1 %v7344_v8  ;;  %5974 = vmatprep.subr.bf16.mxu0 %v10578_v40  ;;  %v10581_v8 = vld [vmem:[#allocation9_spill] sm:$0xff] }
 0x164   :  { %1132 = vmatmul.mubr.bf16.vlgmr.msra.gmra.mrb[36].mxu1 %v1098_v20  ;;  %5971 = vmatmul.mubr.bf16.vlgmr.msra.gmra.mrb[36].mxu0 %v1098_v20 }
 0x165   :  { %1211 = vmatpush1.bf16.msra.mxu1 %v7387_v21  ;;  %5975 = vmatpush3.bf16.msra.mxu0 %v7397_v23  ;;  %v10582_v21 = vld [vmem:[#allocation11_spill] sm:$0xff]  ;;  %v10584_v23 = vld [vmem:[#allocation12_spill] sm:$0xff] }
 0x166   :  { %1212 = vmatprep.subr.bf16.mxu1 %v7392_v22  ;;  %5976 = vmatprep.subr.bf16.mxu0 %v10578_v40  ;;  %v10583_v22 = vld [vmem:[#allocation10_spill] sm:$0xff] }
 0x167   :  { %1242 = vmatprep.mubr.bf16.mxu1 %v10579_v34  ;;  %5990 = vmatprep.mubr.msk.bf16.mxu0 %vm7217_vm1, %v10578_v40 }
 0x169   :  { %1213 = vmatpush1.bf16.msra.mxu1 %v7404_v24  ;;  %5977 = vmatpush3.bf16.msra.mxu0 %v7418_v26  ;;  %v10587_v24 = vld [vmem:[#allocation15_spill] sm:$0xff]  ;;  %v10589_v26 = vld [vmem:[#allocation16_spill] sm:$0xff] }
 0x16a   :  { %1214 = vmatprep.subr.bf16.mxu1 %v7411_v25  ;;  %5978 = vmatprep.subr.bf16.mxu0 %v10578_v40  ;;  %v10588_v25 = vld [vmem:[#allocation17_spill] sm:$0xff] }
 0x16d   :  { %1215 = vmatpush1.bf16.msra.mxu1 %v10581_v8  ;;  %5979 = vmatpush3.bf16.msra.mxu0 %v10582_v21 }
 0x16e   :  { %1216 = vmatprep.subr.bf16.mxu1 %v10583_v22  ;;  %5980 = vmatprep.subr.bf16.mxu0 %v10578_v40  ;;  %v10600_v22 = vld [vmem:[#allocation34_spill] sm:$0xff] }
 0x171   :  { %1217 = vmatpush1.bf16.msra.mxu1 %v10584_v23  ;;  %5981 = vmatpush3.bf16.msra.mxu0 %v10585_v19 }
 0x172   :  { %1218 = vmatprep.subr.bf16.mxu1 %v10586_v28  ;;  %5982 = vmatprep.subr.bf16.mxu0 %v10578_v40 }
 0x175   :  { %1219 = vmatpush1.bf16.msra.mxu1 %v10587_v24  ;;  %5983 = vmatpush3.bf16.msra.mxu0 %v10588_v25 }
 0x176   :  { %1220 = vmatprep.subr.bf16.mxu1 %v10589_v26  ;;  %5984 = vmatprep.subr.bf16.mxu0 %v10578_v40 }
 0x179   :  { %1221 = vmatpush1.bf16.msra.mxu1 %v10590_v29  ;;  %5985 = vmatpush3.bf16.msra.mxu0 %v10591_v32 }
 0x17a   :  { %1222 = vmatprep.subr.bf16.mxu1 %v10592_v13  ;;  %5986 = vmatprep.subr.bf16.mxu0 %v10578_v40 }
 0x17d   :  { %1223 = vmatpush1.bf16.msra.mxu1 %v10593_v35  ;;  %5987 = vmatpush3.bf16.msra.mxu0 %v10594_v9 }
 0x17e   :  { %1224 = vmatprep.subr.bf16.mxu1 %v10595_v39  ;;  %5988 = vmatprep.subr.bf16.mxu0 %v10578_v40 }
 0x181   :  { %1225 = vmatpush1.bf16.msra.mxu1 %v10596_v17  ;;  %5989 = vmatpush3.bf16.msra.mxu0 %v10597_v42 }
 0x182   :  { %1313 = vmatprep.subr.bf16.mxu1 %v10598_v11  ;;  %5994 = vmatprep.subr.bf16.mxu0 %v10578_v40 }
 0x217   :  { %v1030_v12 = vpop.f32.mrb[32].mxu1  ;;  %v1071_v36 = vpop.f32.mrb[32].mxu0 }
 0x218   :  { %v1031_v1 = vadd.f32 %v1030_v12, %v7906_v16  ;;  %v1032_v43 = vpop.f32.mrb[33].mxu1  ;;  %v5952_v41 = vpop.f32.mrb[33].mxu0  ;;  %v1072_v32 = vadd.f32 %v1071_v36, %v7920_v18 }
 0x219   :  { %v1033_v15 = vadd.f32 %v1032_v43, %v7911_v38  ;;  %v1034_v37 = vpop.f32.mrb[34].mxu1  ;;  %v1074_v14 = vpop.f32.mrb[34].mxu0 }
 0x21a   :  { %v1077_v20 = vadd.f32 %v1031_v1, %v10599_v33  ;;  %v1035_v8 = vpop.f32.mrb[35].mxu1  ;;  %v5953_v21 = vpop.f32.mrb[35].mxu0  ;;  %v10601_v1 = vld [vmem:[#allocation45_spill] sm:$0xff] }
 0x21b   :  { %v1084_v23 = vadd.f32 %v1033_v15, %v10600_v22  ;;  %v10602_v8 = vld [vmem:[#allocation68_spill] sm:$0xff] }
 0x21c   :  { %v5454_v19 = vmul.f32 -1.442695, %v1077_v20 }
 0x21d   :  { %v5455_v28 = vmul.f32 -1.442695, %v1084_v23  ;;  %v10603_v23 = vld [vmem:[#allocation70_spill] sm:$0xff] }
 0x21e   :  { %6737 = vpow2.f32 %v5454_v19 }
 0x21f   :  { %6739 = vpow2.f32 %v5455_v28 }
 0x228   :  { %v6738_v24 = vpop.eup %6737 }
 0x229   :  { %v1081_v25 = vadd.f32 1.0, %v6738_v24  ;;  %v6740_v26 = vpop.eup %6739 }
 0x22a   :  { %v1088_v29 = vadd.f32 1.0, %v6740_v26 }
 0x22b   :  { %6741 = vrcp.f32 %v1081_v25 }
 0x22c   :  { %6743 = vrcp.f32 %v1088_v29 }
 0x235   :  { %v6742_v13 = vpop.eup %6741 }
 0x236   :  { %v1091_v35 = vmul.f32 %v6742_v13, %v1072_v32  ;;  %v6744_v24 = vpop.eup %6743 }
 0x237   :  { %v1133_v39 = vpop.f32.mrb[36].mxu1  ;;  %v1174_v12 = vpop.f32.mrb[36].mxu0  ;;  %v1094_v26 = vsub.f32 1.0, %v6744_v24  ;;  %v1096_v13 = vmul.f32 %v6744_v24, %v7938_v6 }
 0x238   :  { %v1092_v43 = vadd.f32 %v1091_v35, %v10601_v1  ;;  %v1134_v41 = vadd.f32 %v1133_v39, %v7927_v30  ;;  %v1135_v15 = vpop.f32.mrb[37].mxu1  ;;  %v5972_v37 = vpop.f32.mrb[37].mxu0 }
 0x239   :  { %v1136_v14 = vadd.f32 %v1135_v15, %v7930_v27  ;;  %v1137_v33 = vpop.f32.mrb[38].mxu1  ;;  %v1177_v20 = vpop.f32.mrb[38].mxu0  ;;  %v8163_v15 = vld [vmem:[%s10511_s30 + $0x64] ss:$12 sps:$4 sm:$0xff]   ;;  %v8170_v37 = vld [vmem:[%s10511_s30 + $0x60] ss:$12 sps:$4 sm:$0xff]  }
 0x23a   :  { %6745 = vtanh.f32 %v1092_v43  ;;  %v1180_v21 = vadd.f32 %v1134_v41, %v10602_v8  ;;  %v1138_v22 = vpop.f32.mrb[39].mxu1  ;;  %v5973_v36 = vpop.f32.mrb[39].mxu0  ;;  %10606 = vst [vmem:[#allocation11_spill] sm:$0xff] %v8170_v37  ;;  %v8182_v33 = vld [vmem:[%s10511_s30 + $0x7c] ss:$12 sps:$4 sm:$0xff]  }
 0x23b   :  { %v1187_v19 = vadd.f32 %v1136_v14, %v10603_v23  ;;  %v8176_v14 = vld [vmem:[%s10511_s30 + $0x68] ss:$12 sps:$4 sm:$0xff]   ;;  %10608 = vst [vmem:[#allocation12_spill] sm:$0xff] %v8182_v33  ;;  %v8189_v20 = vld [vmem:[%s10511_s30 + $0x78] ss:$12 sps:$4 sm:$0xff]  }
 0x23c   :  { %v5456_v28 = vmul.f32 -1.442695, %v1180_v21  ;;  %10607 = vst [vmem:[#allocation10_spill] sm:$0xff] %v8176_v14  ;;  %10609 = vst [vmem:[#allocation14_spill] sm:$0xff] %v8189_v20  ;;  %v8195_v8 = vld [vmem:[%s10511_s30 + $0x80] ss:$12 sps:$4 sm:$0xff]  }
 0x23d   :  { %v5457_v25 = vmul.f32 -1.442695, %v1187_v19  ;;  %10610 = vst [vmem:[#allocation13_spill] sm:$0xff] %v8195_v8  ;;  %v8201_v21 = vld [vmem:[%s10511_s30 + $0x94] ss:$12 sps:$4 sm:$0xff]  }
 0x23e   :  { %6747 = vpow2.f32 %v5456_v28  ;;  %10611 = vst [vmem:[#allocation15_spill] sm:$0xff] %v8201_v21  ;;  %v8208_v22 = vld [vmem:[%s10511_s30 + $0x90] ss:$12 sps:$4 sm:$0xff]   ;;  %v8215_v36 = vld [vmem:[%s10511_s30 + $0xac] ss:$12 sps:$4 sm:$0xff]  }
 0x23f   :  { %6749 = vpow2.f32 %v5457_v25  ;;  %10612 = vst [vmem:[#allocation17_spill] sm:$0xff] %v8208_v22  ;;  %10613 = vst [vmem:[#allocation16_spill] sm:$0xff] %v8215_v36 }
 0x244   :  { %v6746_v29 = vpop.eup %6745 }
 0x245   :  { %v1095_v32 = vmul.f32 %v6746_v29, %v1094_v26 }
 0x247   :  { %v8035_v35 = vadd.f32 %v1096_v13, %v1095_v32  ;;  %v10614_v32 = vld [vmem:[#allocation38_spill] sm:$0xff] }
 0x248   :  { %v6748_v39 = vpop.eup %6747 }
 0x249   :  { %v1184_v1 = vadd.f32 1.0, %v6748_v39  ;;  %v1209_v43 = vpack.c.bf16 %v8035_v35, %v8035_v35  ;;  %2496 = vst.msk [vmem:[#allocation5 + $0x8] sm:$0xff] %vm143_vm0, %v8035_v35  ;;  %v6750_v6 = vpop.eup %6749 }
 0x24b   :  { %6751 = vrcp.f32 %v1184_v1  ;;  %1243 = vmatmul.mubr.bf16.vlgmr.msra.gmra.mrb[40].mxu1 %v1209_v43  ;;  %5991 = vmatmul.mubr.bf16.vlgmr.msra.gmra.mrb[40].mxu0 %v1209_v43  ;;  %v10615_v1 = vld [vmem:[#allocation40_spill] sm:$0xff] }
 0x24c   :  { %1314 = vmatpush1.bf16.msra.mxu1 %v7557_v45  ;;  %5995 = vmatpush3.bf16.msra.mxu0 %v7569_v47  ;;  %v1191_v45 = vadd.f32 1.0, %v6750_v6  ;;  %v1175_v47 = vadd.f32 %v1174_v12, %v7949_v5  ;;  %v8157_v12 = vld [vmem:[%s10511_s30 + $0x50] ss:$12 sps:$4 sm:$0xff]  }
 0x24d   :  { %1315 = vmatprep.subr.bf16.mxu1 %v7563_v46  ;;  %5996 = vmatprep.subr.bf16.mxu0 %v10578_v40 }
 0x24e   :  { %1345 = vmatprep.mubr.bf16.mxu1 %v10579_v34  ;;  %6010 = vmatprep.mubr.msk.bf16.mxu0 %vm7217_vm1, %v10578_v40  ;;  %6753 = vrcp.f32 %v1191_v45 }
 0x250   :  { %1316 = vmatpush1.bf16.msra.mxu1 %v7577_v48  ;;  %5997 = vmatpush3.bf16.msra.mxu0 %v7591_v50  ;;  %v10604_v48 = vld [vmem:[#allocation71_spill] sm:$0xff] }
 0x251   :  { %1317 = vmatprep.subr.bf16.mxu1 %v7584_v49  ;;  %5998 = vmatprep.subr.bf16.mxu0 %v10578_v40 }
 0x254   :  { %1318 = vmatpush1.bf16.msra.mxu1 %v7600_v51  ;;  %5999 = vmatpush3.bf16.msra.mxu0 %v7612_v53 }
 0x255   :  { %v6752_v46 = vpop.eup %6751  ;;  %1319 = vmatprep.subr.bf16.mxu1 %v7606_v52  ;;  %6000 = vmatprep.subr.bf16.mxu0 %v10578_v40 }
 0x256   :  { %v1194_v41 = vmul.f32 %v6752_v46, %v1175_v47 }
 0x258   :  { %v1195_v50 = vadd.f32 %v1194_v41, %v10604_v48  ;;  %1320 = vmatpush1.bf16.msra.mxu1 %v7619_v54  ;;  %6001 = vmatpush3.bf16.msra.mxu0 %v7631_v56  ;;  %v6754_v49 = vpop.eup %6753 }
 0x259   :  { %1321 = vmatprep.subr.bf16.mxu1 %v7625_v55  ;;  %6002 = vmatprep.subr.bf16.mxu0 %v10578_v40  ;;  %v1197_v51 = vsub.f32 1.0, %v6754_v49  ;;  %v1199_v54 = vmul.f32 %v6754_v49, %v7981_v31 }
 0x25a   :  { %6755 = vtanh.f32 %v1195_v50 }
 0x25c   :  { %1322 = vmatpush1.bf16.msra.mxu1 %v7638_v57  ;;  %6003 = vmatpush3.bf16.msra.mxu0 %v7650_v59  ;;  %v8084_v57 = vld [vmem:[%s10511_s30 + $0x4] ss:$12 sps:$4 sm:$0xff]   ;;  %v8097_v59 = vld [vmem:[%s10511_s30 + $0x8] ss:$12 sps:$4 sm:$0xff]  }
 0x25d   :  { %1323 = vmatprep.subr.bf16.mxu1 %v7644_v58  ;;  %6004 = vmatprep.subr.bf16.mxu0 %v10578_v40  ;;  %v8091_v58 = vld [vmem:[%s10511_s30] ss:$12 sps:$4 sm:$0xff]  }
 0x260   :  { %1324 = vmatpush1.bf16.msra.mxu1 %v7657_v60  ;;  %6005 = vmatpush3.bf16.msra.mxu0 %v7669_v62  ;;  %v8103_v60 = vld [vmem:[%s10511_s30 + $0x1c] ss:$12 sps:$4 sm:$0xff]   ;;  %v8119_v62 = vld [vmem:[%s10511_s30 + $0x20] ss:$12 sps:$4 sm:$0xff]  }
 0x261   :  { %1325 = vmatprep.subr.bf16.mxu1 %v7663_v61  ;;  %6006 = vmatprep.subr.bf16.mxu0 %v10578_v40  ;;  %v8113_v61 = vld [vmem:[%s10511_s30 + $0x18] ss:$12 sps:$4 sm:$0xff]  }
 0x264   :  { %v6756_v52 = vpop.eup %6755  ;;  %1326 = vmatpush1.bf16.msra.mxu1 %v7676_v63  ;;  %6007 = vmatpush3.bf16.msra.mxu0 %v7688_v2  ;;  %v8125_v63 = vld [vmem:[%s10511_s30 + $0x34] ss:$12 sps:$4 sm:$0xff]   ;;  %v8138_v2 = vld [vmem:[%s10511_s30 + $0x38] ss:$12 sps:$4 sm:$0xff]  }
 0x265   :  { %1327 = vmatprep.subr.bf16.mxu1 %v7682_v0  ;;  %6008 = vmatprep.subr.bf16.mxu0 %v10578_v40  ;;  %v1198_v53 = vmul.f32 %v6756_v52, %v1197_v51  ;;  %v8132_v0 = vld [vmem:[%s10511_s30 + $0x30] ss:$12 sps:$4 sm:$0xff]  }
 0x266   :  { %v10616_v52 = vld [vmem:[#allocation51_spill] sm:$0xff] }
 0x267   :  { %v8075_v55 = vadd.f32 %v1199_v54, %v1198_v53 }
 0x268   :  { %1328 = vmatpush1.bf16.msra.mxu1 %v7695_v3  ;;  %6009 = vmatpush3.bf16.msra.mxu0 %v7702_v4  ;;  %v8144_v3 = vld [vmem:[%s10511_s30 + $0x4c] ss:$12 sps:$4 sm:$0xff]   ;;  %v8151_v4 = vld [vmem:[%s10511_s30 + $0x48] ss:$12 sps:$4 sm:$0xff]  }
 0x269   :  { %10605 = vst [vmem:[#allocation9_spill] sm:$0xff] %v8075_v55  ;;  %v1312_v56 = vpack.c.bf16 %v8075_v55, %v8075_v55  ;;  %1424 = vmatprep.subr.bf16.mxu1 %v8084_v57  ;;  %6014 = vmatprep.subr.bf16.mxu0 %v10578_v40 }
 0x26b   :  { %1346 = vmatmul.mubr.bf16.vlgmr.msra.gmra.mrb[44].mxu1 %v1312_v56  ;;  %6011 = vmatmul.mubr.bf16.vlgmr.msra.gmra.mrb[44].mxu0 %v1312_v56 }
 0x26c   :  { %1425 = vmatpush1.bf16.msra.mxu1 %v8091_v58  ;;  %6015 = vmatpush3.bf16.msra.mxu0 %v8097_v59 }
 0x26d   :  { %1426 = vmatprep.subr.bf16.mxu1 %v8103_v60  ;;  %6016 = vmatprep.subr.bf16.mxu0 %v10578_v40 }
 0x26e   :  { %1456 = vmatprep.mubr.bf16.mxu1 %v10579_v34  ;;  %6030 = vmatprep.mubr.msk.bf16.mxu0 %vm7217_vm1, %v10578_v40 }
 0x270   :  { %1427 = vmatpush1.bf16.msra.mxu1 %v8113_v61  ;;  %6017 = vmatpush3.bf16.msra.mxu0 %v8119_v62 }
 0x271   :  { %1428 = vmatprep.subr.bf16.mxu1 %v8125_v63  ;;  %6018 = vmatprep.subr.bf16.mxu0 %v10578_v40 }
 0x274   :  { %1429 = vmatpush1.bf16.msra.mxu1 %v8132_v0  ;;  %6019 = vmatpush3.bf16.msra.mxu0 %v8138_v2 }
 0x275   :  { %1430 = vmatprep.subr.bf16.mxu1 %v8144_v3  ;;  %6020 = vmatprep.subr.bf16.mxu0 %v10578_v40 }
 0x278   :  { %1431 = vmatpush1.bf16.msra.mxu1 %v8151_v4  ;;  %6021 = vmatpush3.bf16.msra.mxu0 %v8157_v12 }
 0x279   :  { %1432 = vmatprep.subr.bf16.mxu1 %v8163_v15  ;;  %6022 = vmatprep.subr.bf16.mxu0 %v10578_v40 }
 0x27c   :  { %1433 = vmatpush1.bf16.msra.mxu1 %v8170_v37  ;;  %6023 = vmatpush3.bf16.msra.mxu0 %v8176_v14 }
 0x27d   :  { %1434 = vmatprep.subr.bf16.mxu1 %v8182_v33  ;;  %6024 = vmatprep.subr.bf16.mxu0 %v10578_v40 }
 0x280   :  { %1435 = vmatpush1.bf16.msra.mxu1 %v8189_v20  ;;  %6025 = vmatpush3.bf16.msra.mxu0 %v8195_v8 }
 0x281   :  { %1436 = vmatprep.subr.bf16.mxu1 %v8201_v21  ;;  %6026 = vmatprep.subr.bf16.mxu0 %v10578_v40 }
 0x284   :  { %1437 = vmatpush1.bf16.msra.mxu1 %v8208_v22  ;;  %6027 = vmatpush3.bf16.msra.mxu0 %v10594_v9 }
 0x285   :  { %1438 = vmatprep.subr.bf16.mxu1 %v8215_v36  ;;  %6028 = vmatprep.subr.bf16.mxu0 %v10578_v40 }
 0x288   :  { %1439 = vmatpush1.bf16.msra.mxu1 %v10596_v17  ;;  %6029 = vmatpush3.bf16.msra.mxu0 %v10597_v42 }
 0x289   :  { %1527 = vmatprep.subr.bf16.mxu1 %v10598_v11  ;;  %6034 = vmatprep.subr.bf16.mxu0 %v10578_v40 }
 0x31e   :  { %v1244_v23 = vpop.f32.mrb[40].mxu1  ;;  %v1285_v19 = vpop.f32.mrb[40].mxu0 }
 0x31f   :  { %v1245_v9 = vadd.f32 %v1244_v23, %v7906_v16  ;;  %v1246_v28 = vpop.f32.mrb[41].mxu1  ;;  %v5992_v24 = vpop.f32.mrb[41].mxu0  ;;  %v1286_v41 = vadd.f32 %v1285_v19, %v7920_v18 }
 0x320   :  { %v1247_v25 = vadd.f32 %v1246_v28, %v7911_v38  ;;  %v1248_v26 = vpop.f32.mrb[42].mxu1  ;;  %v1288_v29 = vpop.f32.mrb[42].mxu0 }
 0x321   :  { %v1291_v13 = vadd.f32 %v1245_v9, %v10614_v32  ;;  %v1249_v39 = vpop.f32.mrb[43].mxu1  ;;  %v5993_v17 = vpop.f32.mrb[43].mxu0  ;;  %v10618_v32 = vld [vmem:[#allocation65_spill] sm:$0xff] }
 0x322   :  { %v1298_v42 = vadd.f32 %v1247_v25, %v10615_v1  ;;  %v10617_v25 = vld [vmem:[#allocation63_spill] sm:$0xff] }
 0x323   :  { %v5458_v43 = vmul.f32 -1.442695, %v1291_v13 }
 0x324   :  { %v5459_v11 = vmul.f32 -1.442695, %v1298_v42 }
 0x325   :  { %6757 = vpow2.f32 %v5458_v43 }
 0x326   :  { %6759 = vpow2.f32 %v5459_v11 }
 0x32f   :  { %v6758_v6 = vpop.eup %6757 }
 0x330   :  { %v1295_v45 = vadd.f32 1.0, %v6758_v6  ;;  %v6760_v47 = vpop.eup %6759 }
 0x331   :  { %v1302_v46 = vadd.f32 1.0, %v6760_v47 }
 0x332   :  { %6761 = vrcp.f32 %v1295_v45 }
 0x333   :  { %6763 = vrcp.f32 %v1302_v46 }
 0x33c   :  { %v6762_v48 = vpop.eup %6761 }
 0x33d   :  { %v1305_v50 = vmul.f32 %v6762_v48, %v1286_v41  ;;  %v6764_v17 = vpop.eup %6763  ;;  %v8243_v48 = vld [vmem:[%s10528_s5] ss:$12 sps:$4 sm:$0xff]  }
 0x33e   :  { %v1347_v49 = vpop.f32.mrb[44].mxu1  ;;  %v1388_v51 = vpop.f32.mrb[44].mxu0  ;;  %v1308_v42 = vsub.f32 1.0, %v6764_v17  ;;  %v1310_v6 = vmul.f32 %v6764_v17, %v8035_v35  ;;  %v8249_v35 = vld [vmem:[%s10528_s5 + $0x8] ss:$12 sps:$4 sm:$0xff]  }
 0x33f   :  { %v1306_v53 = vadd.f32 %v1305_v50, %v10616_v52  ;;  %v1348_v54 = vadd.f32 %v1347_v49, %v7927_v30  ;;  %v1349_v56 = vpop.f32.mrb[45].mxu1  ;;  %v6012_v23 = vpop.f32.mrb[45].mxu0  ;;  %v8255_v50 = vld [vmem:[%s10528_s5 + $0x1c] ss:$12 sps:$4 sm:$0xff]   ;;  %v8265_v52 = vld [vmem:[%s10528_s5 + $0x18] ss:$12 sps:$4 sm:$0xff]  }
 0x340   :  { %v1350_v9 = vadd.f32 %v1349_v56, %v7930_v27  ;;  %v1351_v28 = vpop.f32.mrb[46].mxu1  ;;  %v1391_v24 = vpop.f32.mrb[46].mxu0  ;;  %v1389_v23 = vadd.f32 %v1388_v51, %v7949_v5  ;;  %v8330_v17 = vld [vmem:[%s10528_s5 + $0x68] ss:$12 sps:$4 sm:$0xff]  }
 0x341   :  { %6765 = vtanh.f32 %v1306_v53  ;;  %v1394_v26 = vadd.f32 %v1348_v54, %v10617_v25  ;;  %v1352_v29 = vpop.f32.mrb[47].mxu1  ;;  %v6013_v19 = vpop.f32.mrb[47].mxu0  ;;  %v8271_v53 = vld [vmem:[%s10528_s5 + $0x20] ss:$12 sps:$4 sm:$0xff]   ;;  %v8291_v28 = vld [vmem:[%s10528_s5 + $0x38] ss:$12 sps:$4 sm:$0xff]  }
 0x342   :  { %v1401_v13 = vadd.f32 %v1350_v9, %v10618_v32  ;;  %v8277_v54 = vld [vmem:[%s10528_s5 + $0x34] ss:$12 sps:$4 sm:$0xff]   ;;  %v8285_v9 = vld [vmem:[%s10528_s5 + $0x30] ss:$12 sps:$4 sm:$0xff]   ;;  %v8297_v25 = vld [vmem:[%s10528_s5 + $0x4c] ss:$12 sps:$4 sm:$0xff]  }
 0x343   :  { %v5460_v39 = vmul.f32 -1.442695, %v1394_v26  ;;  %v10619_v26 = vld [vmem:[#allocation66_spill] sm:$0xff]  ;;  %v8311_v32 = vld [vmem:[%s10528_s5 + $0x50] ss:$12 sps:$4 sm:$0xff]  }
 0x344   :  { %v5461_v1 = vmul.f32 -1.442695, %v1401_v13  ;;  %v8305_v19 = vld [vmem:[%s10528_s5 + $0x48] ss:$12 sps:$4 sm:$0xff]   ;;  %v8317_v13 = vld [vmem:[%s10528_s5 + $0x64] ss:$12 sps:$4 sm:$0xff]  }
 0x345   :  { %6767 = vpow2.f32 %v5460_v39  ;;  %v8324_v39 = vld [vmem:[%s10528_s5 + $0x60] ss:$12 sps:$4 sm:$0xff]  }
 0x346   :  { %6769 = vpow2.f32 %v5461_v1  ;;  %v8336_v1 = vld [vmem:[%s10528_s5 + $0x7c] ss:$12 sps:$4 sm:$0xff]  }
 0x34b   :  { %v6766_v43 = vpop.eup %6765 }
 0x34c   :  { %v1309_v11 = vmul.f32 %v6766_v43, %v1308_v42  ;;  %v8343_v43 = vld [vmem:[%s10528_s5 + $0x78] ss:$12 sps:$4 sm:$0xff]  }
 0x34e   :  { %v8234_v45 = vadd.f32 %v1310_v6, %v1309_v11  ;;  %v8349_v11 = vld [vmem:[%s10528_s5 + $0x80] ss:$12 sps:$4 sm:$0xff]  }
 0x34f   :  { %v6768_v47 = vpop.eup %6767  ;;  %v8355_v6 = vld [vmem:[%s10528_s5 + $0x94] ss:$12 sps:$4 sm:$0xff]  }
 0x350   :  { %v1398_v46 = vadd.f32 1.0, %v6768_v47  ;;  %v1423_v41 = vpack.c.bf16 %v8234_v45, %v8234_v45  ;;  %2497 = vst.msk [vmem:[#allocation5 + $0x10] sm:$0xff] %vm143_vm0, %v8234_v45  ;;  %v6770_v49 = vpop.eup %6769 }
 0x351   :  { %v1405_v56 = vadd.f32 1.0, %v6770_v49  ;;  %v8368_v49 = vld [vmem:[%s10528_s5 + $0x98] ss:$12 sps:$4 sm:$0xff]  }
 0x352   :  { %6771 = vrcp.f32 %v1398_v46  ;;  %1457 = vmatmul.mubr.bf16.vlgmr.msra.gmra.mrb[48].mxu1 %v1423_v41  ;;  %6031 = vmatmul.mubr.bf16.vlgmr.msra.gmra.mrb[48].mxu0 %v1423_v41  ;;  %v8362_v41 = vld [vmem:[%s10528_s5 + $0x90] ss:$12 sps:$4 sm:$0xff]  }
 0x353   :  { %1528 = vmatpush1.bf16.msra.mxu1 %v8243_v48  ;;  %6035 = vmatpush3.bf16.msra.mxu0 %v8249_v35  ;;  %6773 = vrcp.f32 %v1405_v56  ;;  %v8374_v56 = vld [vmem:[%s10528_s5 + $0xac] ss:$12 sps:$4 sm:$0xff]  }
 0x354   :  { %1529 = vmatprep.subr.bf16.mxu1 %v8255_v50  ;;  %6036 = vmatprep.subr.bf16.mxu0 %v10578_v40 }
 0x355   :  { %1559 = vmatprep.mubr.bf16.mxu1 %v10579_v34  ;;  %6050 = vmatprep.mubr.msk.bf16.mxu0 %vm7217_vm1, %v10578_v40 }
 0x357   :  { %1530 = vmatpush1.bf16.msra.mxu1 %v8265_v52  ;;  %6037 = vmatpush3.bf16.msra.mxu0 %v8271_v53 }
 0x358   :  { %1531 = vmatprep.subr.bf16.mxu1 %v8277_v54  ;;  %6038 = vmatprep.subr.bf16.mxu0 %v10578_v40 }
 0x35b   :  { %1532 = vmatpush1.bf16.msra.mxu1 %v8285_v9  ;;  %6039 = vmatpush3.bf16.msra.mxu0 %v8291_v28 }
 0x35c   :  { %v6772_v24 = vpop.eup %6771  ;;  %1533 = vmatprep.subr.bf16.mxu1 %v8297_v25  ;;  %6040 = vmatprep.subr.bf16.mxu0 %v10578_v40 }
 0x35d   :  { %v1408_v51 = vmul.f32 %v6772_v24, %v1389_v23  ;;  %v6774_v42 = vpop.eup %6773 }
 0x35e   :  { %v1411_v47 = vsub.f32 1.0, %v6774_v42  ;;  %v1413_v24 = vmul.f32 %v6774_v42, %v8075_v55  ;;  %v8428_v42 = vld [vmem:[%s10511_s30 + $0x98] ss:$12 sps:$4 sm:$0xff]  }
 0x35f   :  { %v1409_v29 = vadd.f32 %v1408_v51, %v10619_v26  ;;  %1534 = vmatpush1.bf16.msra.mxu1 %v8305_v19  ;;  %6041 = vmatpush3.bf16.msra.mxu0 %v8311_v32  ;;  %v8384_v26 = vld [vmem:[%s10528_s5 + $0xa8] ss:$12 sps:$4 sm:$0xff]   ;;  %10621 = vst [vmem:[#allocation20_spill] sm:$0xff] %v8428_v42 }
 0x360   :  { %1535 = vmatprep.subr.bf16.mxu1 %v8317_v13  ;;  %6042 = vmatprep.subr.bf16.mxu0 %v10578_v40 }
 0x361   :  { %6775 = vtanh.f32 %v1409_v29  ;;  %v8390_v29 = vld [vmem:[%s10528_s5 + $0xb0] ss:$12 sps:$4 sm:$0xff]  }
 0x363   :  { %1536 = vmatpush1.bf16.msra.mxu1 %v8324_v39  ;;  %6043 = vmatpush3.bf16.msra.mxu0 %v8330_v17 }
 0x364   :  { %1537 = vmatprep.subr.bf16.mxu1 %v8336_v1  ;;  %6044 = vmatprep.subr.bf16.mxu0 %v10578_v40 }
 0x367   :  { %1538 = vmatpush1.bf16.msra.mxu1 %v8343_v43  ;;  %6045 = vmatpush3.bf16.msra.mxu0 %v8349_v11 }
 0x368   :  { %1539 = vmatprep.subr.bf16.mxu1 %v8355_v6  ;;  %6046 = vmatprep.subr.bf16.mxu0 %v10578_v40 }
 0x36b   :  { %v6776_v46 = vpop.eup %6775  ;;  %1540 = vmatpush1.bf16.msra.mxu1 %v8362_v41  ;;  %6047 = vmatpush3.bf16.msra.mxu0 %v8368_v49 }
 0x36c   :  { %1541 = vmatprep.subr.bf16.mxu1 %v8374_v56  ;;  %6048 = vmatprep.subr.bf16.mxu0 %v10578_v40  ;;  %v1412_v23 = vmul.f32 %v6776_v46, %v1411_v47  ;;  %v8436_v46 = vld [vmem:[%s10511_s30 + $0xa8] ss:$12 sps:$4 sm:$0xff]  }
 0x36d   :  { %10622 = vst [vmem:[#allocation19_spill] sm:$0xff] %v8436_v46 }
 0x36e   :  { %v8379_v51 = vadd.f32 %v1413_v24, %v1412_v23  ;;  %v8442_v23 = vld [vmem:[%s10511_s30 + $0xb0] ss:$12 sps:$4 sm:$0xff]  }
 0x36f   :  { %1542 = vmatpush1.bf16.msra.mxu1 %v8384_v26  ;;  %6049 = vmatpush3.bf16.msra.mxu0 %v8390_v29  ;;  %10623 = vst [vmem:[#allocation21_spill] sm:$0xff] %v8442_v23  ;;  %v8448_v24 = vld [vmem:[%s10528_s5 + $0x4] ss:$12 sps:$4 sm:$0xff]  }
 0x370   :  { %10620 = vst [vmem:[#allocation18_spill] sm:$0xff] %v8379_v51  ;;  %v1526_v47 = vpack.c.bf16 %v8379_v51, %v8379_v51  ;;  %1638 = vmatprep.subr.bf16.mxu1 %v8084_v57  ;;  %6054 = vmatprep.subr.bf16.mxu0 %v10578_v40  ;;  %10624 = vst [vmem:[#allocation23_spill] sm:$0xff] %v8448_v24 }
 0x372   :  { %1560 = vmatmul.mubr.bf16.vlgmr.msra.gmra.mrb[52].mxu1 %v1526_v47  ;;  %6051 = vmatmul.mubr.bf16.vlgmr.msra.gmra.mrb[52].mxu0 %v1526_v47 }
 0x373   :  { %1639 = vmatpush1.bf16.msra.mxu1 %v8091_v58  ;;  %6055 = vmatpush3.bf16.msra.mxu0 %v8097_v59 }
 0x374   :  { %1640 = vmatprep.subr.bf16.mxu1 %v8103_v60  ;;  %6056 = vmatprep.subr.bf16.mxu0 %v10578_v40 }
 0x375   :  { %1670 = vmatprep.mubr.bf16.mxu1 %v10579_v34  ;;  %6070 = vmatprep.mubr.msk.bf16.mxu0 %vm7217_vm1, %v10578_v40 }
 0x377   :  { %1641 = vmatpush1.bf16.msra.mxu1 %v8113_v61  ;;  %6057 = vmatpush3.bf16.msra.mxu0 %v8119_v62 }
 0x378   :  { %1642 = vmatprep.subr.bf16.mxu1 %v8125_v63  ;;  %6058 = vmatprep.subr.bf16.mxu0 %v10578_v40 }
 0x37b   :  { %1643 = vmatpush1.bf16.msra.mxu1 %v8132_v0  ;;  %6059 = vmatpush3.bf16.msra.mxu0 %v8138_v2 }
 0x37c   :  { %1644 = vmatprep.subr.bf16.mxu1 %v8144_v3  ;;  %6060 = vmatprep.subr.bf16.mxu0 %v10578_v40 }
 0x37f   :  { %1645 = vmatpush1.bf16.msra.mxu1 %v8151_v4  ;;  %6061 = vmatpush3.bf16.msra.mxu0 %v8157_v12 }
 0x380   :  { %1646 = vmatprep.subr.bf16.mxu1 %v8163_v15  ;;  %6062 = vmatprep.subr.bf16.mxu0 %v10578_v40 }
 0x383   :  { %1647 = vmatpush1.bf16.msra.mxu1 %v8170_v37  ;;  %6063 = vmatpush3.bf16.msra.mxu0 %v8176_v14 }
 0x384   :  { %1648 = vmatprep.subr.bf16.mxu1 %v8182_v33  ;;  %6064 = vmatprep.subr.bf16.mxu0 %v10578_v40 }
 0x387   :  { %1649 = vmatpush1.bf16.msra.mxu1 %v8189_v20  ;;  %6065 = vmatpush3.bf16.msra.mxu0 %v8195_v8  ;;  %v10626_v8 = vld [vmem:[#allocation43_spill] sm:$0xff] }
 0x388   :  { %1650 = vmatprep.subr.bf16.mxu1 %v8201_v21  ;;  %6066 = vmatprep.subr.bf16.mxu0 %v10578_v40 }
 0x38b   :  { %1651 = vmatpush1.bf16.msra.mxu1 %v8208_v22  ;;  %6067 = vmatpush3.bf16.msra.mxu0 %v8428_v42 }
 0x38c   :  { %1652 = vmatprep.subr.bf16.mxu1 %v8215_v36  ;;  %6068 = vmatprep.subr.bf16.mxu0 %v10578_v40 }
 0x38f   :  { %1653 = vmatpush1.bf16.msra.mxu1 %v8436_v46  ;;  %6069 = vmatpush3.bf16.msra.mxu0 %v8442_v23  ;;  %v10625_v23 = vld [vmem:[#allocation42_spill] sm:$0xff] }
 0x390   :  { %1741 = vmatprep.subr.bf16.mxu1 %v8448_v24  ;;  %6074 = vmatprep.subr.bf16.mxu0 %v10578_v40 }
 0x425   :  { %v1458_v47 = vpop.f32.mrb[48].mxu1  ;;  %v1499_v10 = vpop.f32.mrb[48].mxu0 }
 0x426   :  { %v1459_v44 = vadd.f32 %v1458_v47, %v7906_v16  ;;  %v1460_v7 = vpop.f32.mrb[49].mxu1  ;;  %v6032_v55 = vpop.f32.mrb[49].mxu0 }
 0x427   :  { %v1461_v31 = vadd.f32 %v1460_v7, %v7911_v38  ;;  %v1462_v46 = vpop.f32.mrb[50].mxu1  ;;  %v1502_v36 = vpop.f32.mrb[50].mxu0  ;;  %v1500_v55 = vadd.f32 %v1499_v10, %v7920_v18 }
 0x428   :  { %v1505_v42 = vadd.f32 %v1459_v44, %v10625_v23  ;;  %v1463_v22 = vpop.f32.mrb[51].mxu1  ;;  %v6033_v21 = vpop.f32.mrb[51].mxu0 }
 0x429   :  { %v1512_v20 = vadd.f32 %v1461_v31, %v10626_v8  ;;  %v10627_v22 = vld [vmem:[#allocation53_spill] sm:$0xff] }
 0x42a   :  { %v5462_v33 = vmul.f32 -1.442695, %v1505_v42 }
 0x42b   :  { %v5463_v24 = vmul.f32 -1.442695, %v1512_v20 }
 0x42c   :  { %6777 = vpow2.f32 %v5462_v33 }
 0x42d   :  { %6779 = vpow2.f32 %v5463_v24 }
 0x436   :  { %v6778_v14 = vpop.eup %6777 }
 0x437   :  { %v1509_v37 = vadd.f32 1.0, %v6778_v14  ;;  %v6780_v47 = vpop.eup %6779 }
 0x438   :  { %v1516_v16 = vadd.f32 1.0, %v6780_v47  ;;  %v10629_v47 = vld [vmem:[#allocation62_spill] sm:$0xff] }
 0x439   :  { %6781 = vrcp.f32 %v1509_v37  ;;  %v10628_v37 = vld [vmem:[#allocation60_spill] sm:$0xff] }
 0x43a   :  { %6783 = vrcp.f32 %v1516_v16 }
 0x443   :  { %v6782_v7 = vpop.eup %6781 }
 0x444   :  { %v1519_v46 = vmul.f32 %v6782_v7, %v1500_v55  ;;  %v6784_v7 = vpop.eup %6783 }
 0x445   :  { %v1561_v36 = vpop.f32.mrb[52].mxu1  ;;  %v1602_v44 = vpop.f32.mrb[52].mxu0 }
 0x446   :  { %v1520_v21 = vadd.f32 %v1519_v46, %v10627_v22  ;;  %v1562_v31 = vadd.f32 %v1561_v36, %v7927_v30  ;;  %v1563_v8 = vpop.f32.mrb[53].mxu1  ;;  %v6052_v33 = vpop.f32.mrb[53].mxu0  ;;  %v1522_v46 = vsub.f32 1.0, %v6784_v7 }
 0x447   :  { %v1564_v20 = vadd.f32 %v1563_v8, %v7930_v27  ;;  %v1565_v42 = vpop.f32.mrb[54].mxu1  ;;  %v1605_v14 = vpop.f32.mrb[54].mxu0  ;;  %v1524_v33 = vmul.f32 %v6784_v7, %v8234_v45 }
 0x448   :  { %6785 = vtanh.f32 %v1520_v21  ;;  %v1608_v23 = vadd.f32 %v1562_v31, %v10628_v37  ;;  %v1566_v24 = vpop.f32.mrb[55].mxu1  ;;  %v6053_v10 = vpop.f32.mrb[55].mxu0 }
 0x449   :  { %v1615_v55 = vadd.f32 %v1564_v20, %v10629_v47  ;;  %v1603_v20 = vadd.f32 %v1602_v44, %v7949_v5 }
 0x44a   :  { %v5464_v16 = vmul.f32 -1.442695, %v1608_v23  ;;  %v10630_v23 = vld [vmem:[#allocation64_spill] sm:$0xff] }
 0x44b   :  { %v5465_v18 = vmul.f32 -1.442695, %v1615_v55 }
 0x44c   :  { %6787 = vpow2.f32 %v5464_v16 }
 0x44d   :  { %6789 = vpow2.f32 %v5465_v18 }
 0x452   :  { %v6786_v22 = vpop.eup %6785 }
 0x453   :  { %v1523_v36 = vmul.f32 %v6786_v22, %v1522_v46  ;;  %v10631_v22 = vld [vmem:[#allocation11_spill] sm:$0xff] }
 0x455   :  { %v8463_v8 = vadd.f32 %v1524_v33, %v1523_v36  ;;  %v10632_v36 = vld [vmem:[#allocation10_spill] sm:$0xff]  ;;  %v10633_v33 = vld [vmem:[#allocation12_spill] sm:$0xff] }
 0x456   :  { %v6788_v42 = vpop.eup %6787 }
 0x457   :  { %v1612_v21 = vadd.f32 1.0, %v6788_v42  ;;  %v1637_v31 = vpack.c.bf16 %v8463_v8, %v8463_v8  ;;  %2498 = vst.msk [vmem:[#allocation5 + $0x18] sm:$0xff] %vm143_vm0, %v8463_v8  ;;  %v6790_v18 = vpop.eup %6789  ;;  %v10634_v42 = vld [vmem:[#allocation14_spill] sm:$0xff] }
 0x458   :  { %v1619_v45 = vadd.f32 1.0, %v6790_v18  ;;  %v10637_v18 = vld [vmem:[#allocation17_spill] sm:$0xff] }
 0x459   :  { %6791 = vrcp.f32 %v1612_v21  ;;  %1671 = vmatmul.mubr.bf16.vlgmr.msra.gmra.mrb[56].mxu1 %v1637_v31  ;;  %6071 = vmatmul.mubr.bf16.vlgmr.msra.gmra.mrb[56].mxu0 %v1637_v31  ;;  %v10635_v21 = vld [vmem:[#allocation13_spill] sm:$0xff]  ;;  %v10636_v31 = vld [vmem:[#allocation15_spill] sm:$0xff] }
 0x45a   :  { %1742 = vmatpush1.bf16.msra.mxu1 %v8243_v48  ;;  %6075 = vmatpush3.bf16.msra.mxu0 %v8249_v35  ;;  %6793 = vrcp.f32 %v1619_v45  ;;  %v10638_v45 = vld [vmem:[#allocation20_spill] sm:$0xff] }
 0x45b   :  { %1743 = vmatprep.subr.bf16.mxu1 %v8255_v50  ;;  %6076 = vmatprep.subr.bf16.mxu0 %v10578_v40 }
 0x45c   :  { %1773 = vmatprep.mubr.bf16.mxu1 %v10579_v34  ;;  %6090 = vmatprep.mubr.msk.bf16.mxu0 %vm7217_vm1, %v10578_v40 }
 0x45e   :  { %1744 = vmatpush1.bf16.msra.mxu1 %v8265_v52  ;;  %6077 = vmatpush3.bf16.msra.mxu0 %v8271_v53 }
 0x45f   :  { %1745 = vmatprep.subr.bf16.mxu1 %v8277_v54  ;;  %6078 = vmatprep.subr.bf16.mxu0 %v10578_v40 }
 0x462   :  { %1746 = vmatpush1.bf16.msra.mxu1 %v8285_v9  ;;  %6079 = vmatpush3.bf16.msra.mxu0 %v8291_v28 }
 0x463   :  { %v6792_v14 = vpop.eup %6791  ;;  %1747 = vmatprep.subr.bf16.mxu1 %v8297_v25  ;;  %6080 = vmatprep.subr.bf16.mxu0 %v10578_v40 }
 0x464   :  { %v1622_v37 = vmul.f32 %v6792_v14, %v1603_v20  ;;  %v6794_v44 = vpop.eup %6793  ;;  %v10639_v20 = vld [vmem:[#allocation16_spill] sm:$0xff]  ;;  %v10640_v14 = vld [vmem:[#allocation19_spill] sm:$0xff] }
 0x465   :  { %v1625_v10 = vsub.f32 1.0, %v6794_v44  ;;  %v1627_v16 = vmul.f32 %v6794_v44, %v8379_v51 }
 0x466   :  { %v1623_v24 = vadd.f32 %v1622_v37, %v10630_v23  ;;  %1748 = vmatpush1.bf16.msra.mxu1 %v8305_v19  ;;  %6081 = vmatpush3.bf16.msra.mxu0 %v8311_v32  ;;  %v10641_v37 = vld [vmem:[#allocation21_spill] sm:$0xff]  ;;  %v10642_v23 = vld [vmem:[#allocation23_spill] sm:$0xff] }
 0x467   :  { %1749 = vmatprep.subr.bf16.mxu1 %v8317_v13  ;;  %6082 = vmatprep.subr.bf16.mxu0 %v10578_v40 }
 0x468   :  { %6795 = vtanh.f32 %v1623_v24 }
 0x46a   :  { %1750 = vmatpush1.bf16.msra.mxu1 %v8324_v39  ;;  %6083 = vmatpush3.bf16.msra.mxu0 %v8330_v17 }
 0x46b   :  { %1751 = vmatprep.subr.bf16.mxu1 %v8336_v1  ;;  %6084 = vmatprep.subr.bf16.mxu0 %v10578_v40 }
 0x46e   :  { %1752 = vmatpush1.bf16.msra.mxu1 %v8343_v43  ;;  %6085 = vmatpush3.bf16.msra.mxu0 %v8349_v11 }
 0x46f   :  { %1753 = vmatprep.subr.bf16.mxu1 %v8355_v6  ;;  %6086 = vmatprep.subr.bf16.mxu0 %v10578_v40 }
 0x472   :  { %v6796_v47 = vpop.eup %6795  ;;  %1754 = vmatpush1.bf16.msra.mxu1 %v8362_v41  ;;  %6087 = vmatpush3.bf16.msra.mxu0 %v8368_v49 }
 0x473   :  { %1755 = vmatprep.subr.bf16.mxu1 %v8374_v56  ;;  %6088 = vmatprep.subr.bf16.mxu0 %v10578_v40  ;;  %v1626_v55 = vmul.f32 %v6796_v47, %v1625_v10  ;;  %v10643_v10 = vld [vmem:[#allocation72_spill] sm:$0xff] }
 0x475   :  { %v8503_v7 = vadd.f32 %v1627_v16, %v1626_v55 }
 0x476   :  { %1756 = vmatpush1.bf16.msra.mxu1 %v8384_v26  ;;  %6089 = vmatpush3.bf16.msra.mxu0 %v8390_v29 }
 0x477   :  { %v1740_v46 = vpack.c.bf16 %v8503_v7, %v8503_v7  ;;  %1852 = vmatprep.subr.bf16.mxu1 %v8084_v57  ;;  %6094 = vmatprep.subr.bf16.mxu0 %v10578_v40 }
 0x479   :  { %1774 = vmatmul.mubr.bf16.vlgmr.msra.gmra.mrb[60].mxu1 %v1740_v46  ;;  %6091 = vmatmul.mubr.bf16.vlgmr.msra.gmra.mrb[60].mxu0 %v1740_v46 }
 0x47a   :  { %1853 = vmatpush1.bf16.msra.mxu1 %v8091_v58  ;;  %6095 = vmatpush3.bf16.msra.mxu0 %v8097_v59 }
 0x47b   :  { %1854 = vmatprep.subr.bf16.mxu1 %v8103_v60  ;;  %6096 = vmatprep.subr.bf16.mxu0 %v10578_v40 }
 0x47c   :  { %1884 = vmatprep.mubr.bf16.mxu1 %v10579_v34  ;;  %6110 = vmatprep.mubr.msk.bf16.mxu0 %vm7217_vm1, %v10578_v40 }
 0x47e   :  { %1855 = vmatpush1.bf16.msra.mxu1 %v8113_v61  ;;  %6097 = vmatpush3.bf16.msra.mxu0 %v8119_v62 }
 0x47f   :  { %1856 = vmatprep.subr.bf16.mxu1 %v8125_v63  ;;  %6098 = vmatprep.subr.bf16.mxu0 %v10578_v40 }
 0x482   :  { %1857 = vmatpush1.bf16.msra.mxu1 %v8132_v0  ;;  %6099 = vmatpush3.bf16.msra.mxu0 %v8138_v2 }
 0x483   :  { %1858 = vmatprep.subr.bf16.mxu1 %v8144_v3  ;;  %6100 = vmatprep.subr.bf16.mxu0 %v10578_v40 }
 0x486   :  { %1859 = vmatpush1.bf16.msra.mxu1 %v8151_v4  ;;  %6101 = vmatpush3.bf16.msra.mxu0 %v8157_v12 }
 0x487   :  { %1860 = vmatprep.subr.bf16.mxu1 %v8163_v15  ;;  %6102 = vmatprep.subr.bf16.mxu0 %v10578_v40 }
 0x48a   :  { %1861 = vmatpush1.bf16.msra.mxu1 %v10631_v22  ;;  %6103 = vmatpush3.bf16.msra.mxu0 %v10632_v36 }
 0x48b   :  { %1862 = vmatprep.subr.bf16.mxu1 %v10633_v33  ;;  %6104 = vmatprep.subr.bf16.mxu0 %v10578_v40 }
 0x48e   :  { %1863 = vmatpush1.bf16.msra.mxu1 %v10634_v42  ;;  %6105 = vmatpush3.bf16.msra.mxu0 %v10635_v21  ;;  %v10645_v21 = vld [vmem:[#allocation30_spill] sm:$0xff] }
 0x48f   :  { %1864 = vmatprep.subr.bf16.mxu1 %v10636_v31  ;;  %6106 = vmatprep.subr.bf16.mxu0 %v10578_v40 }
 0x492   :  { %1865 = vmatpush1.bf16.msra.mxu1 %v10637_v18  ;;  %6107 = vmatpush3.bf16.msra.mxu0 %v10638_v45  ;;  %v10644_v45 = vld [vmem:[#allocation29_spill] sm:$0xff] }
 0x493   :  { %1866 = vmatprep.subr.bf16.mxu1 %v10639_v20  ;;  %6108 = vmatprep.subr.bf16.mxu0 %v10578_v40 }
 0x496   :  { %1867 = vmatpush1.bf16.msra.mxu1 %v10640_v14  ;;  %6109 = vmatpush3.bf16.msra.mxu0 %v10641_v37 }
 0x497   :  { %1955 = vmatprep.subr.bf16.mxu1 %v10642_v23  ;;  %6114 = vmatprep.subr.bf16.mxu0 %v10578_v40 }
 0x52c   :  { %v1672_v24 = vpop.f32.mrb[56].mxu1  ;;  %v1713_v44 = vpop.f32.mrb[56].mxu0 }
 0x52d   :  { %v1673_v47 = vadd.f32 %v1672_v24, %v10643_v10  ;;  %v1674_v55 = vpop.f32.mrb[57].mxu1  ;;  %v6072_v16 = vpop.f32.mrb[57].mxu0 }
 0x52e   :  { %v1675_v46 = vadd.f32 %v1674_v55, %v7911_v38  ;;  %v1676_v51 = vpop.f32.mrb[58].mxu1  ;;  %v1716_v20 = vpop.f32.mrb[58].mxu0  ;;  %v10646_v16 = vld [vmem:[#allocation73_spill] sm:$0xff] }
 0x52f   :  { %v1719_v18 = vadd.f32 %v1673_v47, %v10644_v45  ;;  %v1677_v31 = vpop.f32.mrb[59].mxu1  ;;  %v6073_v14 = vpop.f32.mrb[59].mxu0  ;;  %v1714_v22 = vadd.f32 %v1713_v44, %v10646_v16 }
 0x530   :  { %v1726_v37 = vadd.f32 %v1675_v46, %v10645_v21  ;;  %v10647_v31 = vld [vmem:[#allocation59_spill] sm:$0xff] }
 0x531   :  { %v5466_v42 = vmul.f32 -1.442695, %v1719_v18 }
 0x532   :  { %v5467_v23 = vmul.f32 -1.442695, %v1726_v37 }
 0x533   :  { %6797 = vpow2.f32 %v5466_v42 }
 0x534   :  { %6799 = vpow2.f32 %v5467_v23 }
 0x53d   :  { %v6798_v33 = vpop.eup %6797 }
 0x53e   :  { %v1723_v36 = vadd.f32 1.0, %v6798_v33  ;;  %v6800_v24 = vpop.eup %6799 }
 0x53f   :  { %v1730_v10 = vadd.f32 1.0, %v6800_v24  ;;  %v10649_v24 = vld [vmem:[#allocation57_spill] sm:$0xff] }
 0x540   :  { %6801 = vrcp.f32 %v1723_v36  ;;  %v10648_v36 = vld [vmem:[#allocation55_spill] sm:$0xff] }
 0x541   :  { %6803 = vrcp.f32 %v1730_v10 }
 0x54a   :  { %v6802_v55 = vpop.eup %6801 }
 0x54b   :  { %v1733_v51 = vmul.f32 %v6802_v55, %v1714_v22  ;;  %v6804_v55 = vpop.eup %6803 }
 0x54c   :  { %v1775_v20 = vpop.f32.mrb[60].mxu1  ;;  %v1816_v45 = vpop.f32.mrb[60].mxu0 }
 0x54d   :  { %v1734_v14 = vadd.f32 %v1733_v51, %v10647_v31  ;;  %v1776_v21 = vadd.f32 %v1775_v20, %v7927_v30  ;;  %v1777_v18 = vpop.f32.mrb[61].mxu1  ;;  %v6092_v42 = vpop.f32.mrb[61].mxu0  ;;  %v1736_v51 = vsub.f32 1.0, %v6804_v55 }
 0x54e   :  { %v1778_v37 = vadd.f32 %v1777_v18, %v7930_v27  ;;  %v1779_v23 = vpop.f32.mrb[62].mxu1  ;;  %v1819_v33 = vpop.f32.mrb[62].mxu0  ;;  %v1738_v42 = vmul.f32 %v6804_v55, %v8463_v8 }
 0x54f   :  { %6805 = vtanh.f32 %v1734_v14  ;;  %v1822_v47 = vadd.f32 %v1776_v21, %v10648_v36  ;;  %v1780_v46 = vpop.f32.mrb[63].mxu1  ;;  %v6093_v44 = vpop.f32.mrb[63].mxu0 }
 0x550   :  { %v1829_v22 = vadd.f32 %v1778_v37, %v10649_v24  ;;  %v1817_v37 = vadd.f32 %v1816_v45, %v7949_v5 }
 0x551   :  { %v5468_v10 = vmul.f32 -1.442695, %v1822_v47  ;;  %v10650_v47 = vld [vmem:[#allocation58_spill] sm:$0xff] }
 0x552   :  { %v5469_v16 = vmul.f32 -1.442695, %v1829_v22 }
 0x553   :  { %6807 = vpow2.f32 %v5468_v10 }
 0x554   :  { %6809 = vpow2.f32 %v5469_v16 }
 0x559   :  { %v6806_v31 = vpop.eup %6805 }
 0x55a   :  { %v1737_v20 = vmul.f32 %v6806_v31, %v1736_v51 }
 0x55c   :  { %v8557_v18 = vadd.f32 %v1738_v42, %v1737_v20  ;;  %v10663_v20 = vld [vmem:[#allocation72_spill] sm:$0xff] }
 0x55d   :  { %v6808_v23 = vpop.eup %6807 }
 0x55e   :  { %v1826_v14 = vadd.f32 1.0, %v6808_v23  ;;  %v1851_v21 = vpack.c.bf16 %v8557_v18, %v8557_v18  ;;  %2499 = vst.msk [vmem:[#allocation5 + $0x20] sm:$0xff] %vm143_vm0, %v8557_v18  ;;  %v6810_v8 = vpop.eup %6809 }
 0x55f   :  { %v1833_v16 = vadd.f32 1.0, %v6810_v8 }
 0x560   :  { %6811 = vrcp.f32 %v1826_v14  ;;  %1885 = vmatmul.mubr.bf16.vlgmr.msra.gmra.mrb[64].mxu1 %v1851_v21  ;;  %6111 = vmatmul.mubr.bf16.vlgmr.msra.gmra.mrb[64].mxu0 %v1851_v21 }
 0x561   :  { %1956 = vmatpush1.bf16.msra.mxu1 %v8243_v48  ;;  %6115 = vmatpush3.bf16.msra.mxu0 %v8249_v35  ;;  %6813 = vrcp.f32 %v1833_v16 }
 0x562   :  { %1957 = vmatprep.subr.bf16.mxu1 %v8255_v50  ;;  %6116 = vmatprep.subr.bf16.mxu0 %v10578_v40 }
 0x563   :  { %1987 = vmatprep.mubr.bf16.mxu1 %v10579_v34  ;;  %6130 = vmatprep.mubr.msk.bf16.mxu0 %vm7217_vm1, %v10578_v40 }
 0x565   :  { %1958 = vmatpush1.bf16.msra.mxu1 %v8265_v52  ;;  %6117 = vmatpush3.bf16.msra.mxu0 %v8271_v53 }
 0x566   :  { %1959 = vmatprep.subr.bf16.mxu1 %v8277_v54  ;;  %6118 = vmatprep.subr.bf16.mxu0 %v10578_v40 }
 0x569   :  { %1960 = vmatpush1.bf16.msra.mxu1 %v8285_v9  ;;  %6119 = vmatpush3.bf16.msra.mxu0 %v8291_v28 }
 0x56a   :  { %v6812_v33 = vpop.eup %6811  ;;  %1961 = vmatprep.subr.bf16.mxu1 %v8297_v25  ;;  %6120 = vmatprep.subr.bf16.mxu0 %v10578_v40 }
 0x56b   :  { %v1836_v36 = vmul.f32 %v6812_v33, %v1817_v37  ;;  %v6814_v45 = vpop.eup %6813  ;;  %v10664_v37 = vld [vmem:[#allocation31_spill] sm:$0xff] }
 0x56c   :  { %v1839_v44 = vsub.f32 1.0, %v6814_v45  ;;  %v1841_v10 = vmul.f32 %v6814_v45, %v8503_v7 }
 0x56d   :  { %v1837_v46 = vadd.f32 %v1836_v36, %v10650_v47  ;;  %1962 = vmatpush1.bf16.msra.mxu1 %v8305_v19  ;;  %6121 = vmatpush3.bf16.msra.mxu0 %v8311_v32 }
 0x56e   :  { %1963 = vmatprep.subr.bf16.mxu1 %v8317_v13  ;;  %6122 = vmatprep.subr.bf16.mxu0 %v10578_v40 }
 0x56f   :  { %6815 = vtanh.f32 %v1837_v46  ;;  %v10665_v46 = vld [vmem:[#allocation32_spill] sm:$0xff] }
 0x571   :  { %1964 = vmatpush1.bf16.msra.mxu1 %v8324_v39  ;;  %6123 = vmatpush3.bf16.msra.mxu0 %v8330_v17 }
 0x572   :  { %1965 = vmatprep.subr.bf16.mxu1 %v8336_v1  ;;  %6124 = vmatprep.subr.bf16.mxu0 %v10578_v40 }
 0x575   :  { %1966 = vmatpush1.bf16.msra.mxu1 %v8343_v43  ;;  %6125 = vmatpush3.bf16.msra.mxu0 %v8349_v11 }
 0x576   :  { %1967 = vmatprep.subr.bf16.mxu1 %v8355_v6  ;;  %6126 = vmatprep.subr.bf16.mxu0 %v10578_v40 }
 0x579   :  { %v6816_v24 = vpop.eup %6815  ;;  %1968 = vmatpush1.bf16.msra.mxu1 %v8362_v41  ;;  %6127 = vmatpush3.bf16.msra.mxu0 %v8368_v49 }
 0x57a   :  { %1969 = vmatprep.subr.bf16.mxu1 %v8374_v56  ;;  %6128 = vmatprep.subr.bf16.mxu0 %v10578_v40  ;;  %v1840_v22 = vmul.f32 %v6816_v24, %v1839_v44 }
 0x57c   :  { %v8597_v55 = vadd.f32 %v1841_v10, %v1840_v22 }
 0x57d   :  { %1970 = vmatpush1.bf16.msra.mxu1 %v8384_v26  ;;  %6129 = vmatpush3.bf16.msra.mxu0 %v8390_v29 }
 0x57e   :  { %v1954_v51 = vpack.c.bf16 %v8597_v55, %v8597_v55  ;;  %2066 = vmatprep.subr.bf16.mxu1 %v8084_v57  ;;  %6134 = vmatprep.subr.bf16.mxu0 %v10578_v40  ;;  %v10651_v57 = vld [vmem:[#allocation11_spill] sm:$0xff] }
 0x580   :  { %1988 = vmatmul.mubr.bf16.vlgmr.msra.gmra.mrb[68].mxu1 %v1954_v51  ;;  %6131 = vmatmul.mubr.bf16.vlgmr.msra.gmra.mrb[68].mxu0 %v1954_v51 }
 0x581   :  { %2067 = vmatpush1.bf16.msra.mxu1 %v8091_v58  ;;  %6135 = vmatpush3.bf16.msra.mxu0 %v8097_v59  ;;  %v10652_v58 = vld [vmem:[#allocation10_spill] sm:$0xff]  ;;  %v10653_v59 = vld [vmem:[#allocation12_spill] sm:$0xff] }
 0x582   :  { %2068 = vmatprep.subr.bf16.mxu1 %v8103_v60  ;;  %6136 = vmatprep.subr.bf16.mxu0 %v10578_v40  ;;  %v10654_v60 = vld [vmem:[#allocation14_spill] sm:$0xff] }
 0x583   :  { %2098 = vmatprep.mubr.bf16.mxu1 %v10579_v34  ;;  %6150 = vmatprep.mubr.msk.bf16.mxu0 %vm7217_vm1, %v10578_v40 }
 0x585   :  { %2069 = vmatpush1.bf16.msra.mxu1 %v8113_v61  ;;  %6137 = vmatpush3.bf16.msra.mxu0 %v8119_v62  ;;  %v10655_v61 = vld [vmem:[#allocation13_spill] sm:$0xff]  ;;  %v10656_v62 = vld [vmem:[#allocation15_spill] sm:$0xff] }
 0x586   :  { %2070 = vmatprep.subr.bf16.mxu1 %v8125_v63  ;;  %6138 = vmatprep.subr.bf16.mxu0 %v10578_v40  ;;  %v10657_v63 = vld [vmem:[#allocation17_spill] sm:$0xff] }
 0x589   :  { %2071 = vmatpush1.bf16.msra.mxu1 %v8132_v0  ;;  %6139 = vmatpush3.bf16.msra.mxu0 %v8138_v2  ;;  %v10658_v0 = vld [vmem:[#allocation20_spill] sm:$0xff] }
 0x58a   :  { %2072 = vmatprep.subr.bf16.mxu1 %v8144_v3  ;;  %6140 = vmatprep.subr.bf16.mxu0 %v10578_v40  ;;  %v10659_v2 = vld [vmem:[#allocation16_spill] sm:$0xff]  ;;  %v10660_v3 = vld [vmem:[#allocation19_spill] sm:$0xff] }
 0x58d   :  { %2073 = vmatpush1.bf16.msra.mxu1 %v8151_v4  ;;  %6141 = vmatpush3.bf16.msra.mxu0 %v8157_v12  ;;  %v10661_v4 = vld [vmem:[#allocation21_spill] sm:$0xff]  ;;  %v10662_v12 = vld [vmem:[#allocation23_spill] sm:$0xff] }
 0x58e   :  { %2074 = vmatprep.subr.bf16.mxu1 %v8163_v15  ;;  %6142 = vmatprep.subr.bf16.mxu0 %v10578_v40 }
 0x591   :  { %2075 = vmatpush1.bf16.msra.mxu1 %v10651_v57  ;;  %6143 = vmatpush3.bf16.msra.mxu0 %v10652_v58  ;;  %v10666_v58 = vld [vmem:[#allocation73_spill] sm:$0xff] }
 0x592   :  { %2076 = vmatprep.subr.bf16.mxu1 %v10653_v59  ;;  %6144 = vmatprep.subr.bf16.mxu0 %v10578_v40 }
 0x595   :  { %2077 = vmatpush1.bf16.msra.mxu1 %v10654_v60  ;;  %6145 = vmatpush3.bf16.msra.mxu0 %v10655_v61 }
 0x596   :  { %2078 = vmatprep.subr.bf16.mxu1 %v10656_v62  ;;  %6146 = vmatprep.subr.bf16.mxu0 %v10578_v40 }
 0x599   :  { %2079 = vmatpush1.bf16.msra.mxu1 %v10657_v63  ;;  %6147 = vmatpush3.bf16.msra.mxu0 %v10658_v0 }
 0x59a   :  { %2080 = vmatprep.subr.bf16.mxu1 %v10659_v2  ;;  %6148 = vmatprep.subr.bf16.mxu0 %v10578_v40  ;;  %v10667_v2 = vld [vmem:[#allocation61_spill] sm:$0xff] }
 0x59d   :  { %2081 = vmatpush1.bf16.msra.mxu1 %v10660_v3  ;;  %6149 = vmatpush3.bf16.msra.mxu0 %v10661_v4 }
 0x59e   :  { %2169 = vmatprep.subr.bf16.mxu1 %v10662_v12  ;;  %6154 = vmatprep.subr.bf16.mxu0 %v10578_v40 }
 0x633   :  { %v1886_v15 = vpop.f32.mrb[64].mxu1  ;;  %v1927_v31 = vpop.f32.mrb[64].mxu0 }
 0x634   :  { %v1887_v42 = vadd.f32 %v1886_v15, %v10663_v20  ;;  %v1888_v23 = vpop.f32.mrb[65].mxu1  ;;  %v6112_v14 = vpop.f32.mrb[65].mxu0  ;;  %v1928_v59 = vadd.f32 %v1927_v31, %v10666_v58 }
 0x635   :  { %v1889_v21 = vadd.f32 %v1888_v23, %v7911_v38  ;;  %v1890_v8 = vpop.f32.mrb[66].mxu1  ;;  %v1930_v16 = vpop.f32.mrb[66].mxu0 }
 0x636   :  { %v1933_v33 = vadd.f32 %v1887_v42, %v10664_v37  ;;  %v1891_v36 = vpop.f32.mrb[67].mxu1  ;;  %v6113_v47 = vpop.f32.mrb[67].mxu0  ;;  %v10668_v37 = vld [vmem:[#allocation52_spill] sm:$0xff] }
 0x637   :  { %v1940_v45 = vadd.f32 %v1889_v21, %v10665_v46  ;;  %v10669_v47 = vld [vmem:[#allocation54_spill] sm:$0xff] }
 0x638   :  { %v5470_v44 = vmul.f32 -1.442695, %v1933_v33 }
 0x639   :  { %v5471_v24 = vmul.f32 -1.442695, %v1940_v45 }
 0x63a   :  { %6817 = vpow2.f32 %v5470_v44 }
 0x63b   :  { %6819 = vpow2.f32 %v5471_v24 }
 0x644   :  { %v6818_v22 = vpop.eup %6817 }
 0x645   :  { %v1937_v10 = vadd.f32 1.0, %v6818_v22  ;;  %v6820_v51 = vpop.eup %6819 }
 0x646   :  { %v1944_v57 = vadd.f32 1.0, %v6820_v51 }
 0x647   :  { %6821 = vrcp.f32 %v1937_v10 }
 0x648   :  { %6823 = vrcp.f32 %v1944_v57 }
 0x651   :  { %v6822_v60 = vpop.eup %6821 }
 0x652   :  { %v1947_v61 = vmul.f32 %v6822_v60, %v1928_v59  ;;  %v6824_v44 = vpop.eup %6823 }
 0x653   :  { %v1989_v62 = vpop.f32.mrb[68].mxu1  ;;  %v2030_v63 = vpop.f32.mrb[68].mxu0  ;;  %v1950_v22 = vsub.f32 1.0, %v6824_v44  ;;  %v1952_v57 = vmul.f32 %v6824_v44, %v8557_v18 }
 0x654   :  { %v1948_v15 = vadd.f32 %v1947_v61, %v10667_v2  ;;  %v1990_v42 = vadd.f32 %v1989_v62, %v7927_v30  ;;  %v1991_v23 = vpop.f32.mrb[69].mxu1  ;;  %v6132_v14 = vpop.f32.mrb[69].mxu0 }
 0x655   :  { %v1992_v21 = vadd.f32 %v1991_v23, %v7930_v27  ;;  %v1993_v8 = vpop.f32.mrb[70].mxu1  ;;  %v2033_v16 = vpop.f32.mrb[70].mxu0  ;;  %v7130_v23 = vld [vmem:[%s10511_s30 + $0x60] ss:$12 sps:$4 sm:$0xff]   ;;  %v7131_v14 = vld [vmem:[%s10511_s30 + $0x68] ss:$12 sps:$4 sm:$0xff]  }
 0x656   :  { %6825 = vtanh.f32 %v1948_v15  ;;  %v2036_v33 = vadd.f32 %v1990_v42, %v10668_v37  ;;  %v1994_v36 = vpop.f32.mrb[71].mxu1  ;;  %v6133_v31 = vpop.f32.mrb[71].mxu0  ;;  %v7128_v15 = vld [vmem:[%s10511_s30 + $0x50] ss:$12 sps:$4 sm:$0xff]   ;;  %v7133_v8 = vld [vmem:[%s10511_s30 + $0x78] ss:$12 sps:$4 sm:$0xff]  }
 0x657   :  { %v2043_v46 = vadd.f32 %v1992_v21, %v10669_v47  ;;  %v7129_v42 = vld [vmem:[%s10511_s30 + $0x64] ss:$12 sps:$4 sm:$0xff]   ;;  %v7132_v21 = vld [vmem:[%s10511_s30 + $0x7c] ss:$12 sps:$4 sm:$0xff]   ;;  %v7134_v16 = vld [vmem:[%s10511_s30 + $0x80] ss:$12 sps:$4 sm:$0xff]  }
 0x658   :  { %v5472_v45 = vmul.f32 -1.442695, %v2036_v33  ;;  %v7135_v37 = vld [vmem:[%s10511_s30 + $0x94] ss:$12 sps:$4 sm:$0xff]   ;;  %v7136_v33 = vld [vmem:[%s10511_s30 + $0x90] ss:$12 sps:$4 sm:$0xff]  }
 0x659   :  { %v5473_v24 = vmul.f32 -1.442695, %v2043_v46  ;;  %v7137_v36 = vld [vmem:[%s10511_s30 + $0xac] ss:$12 sps:$4 sm:$0xff]  }
 0x65a   :  { %6827 = vpow2.f32 %v5472_v45 }
 0x65b   :  { %6829 = vpow2.f32 %v5473_v24 }
 0x660   :  { %v6826_v10 = vpop.eup %6825 }
 0x661   :  { %v1951_v51 = vmul.f32 %v6826_v10, %v1950_v22  ;;  %v10673_v10 = vld [vmem:[#allocation35_spill] sm:$0xff] }
 0x663   :  { %v8651_v59 = vadd.f32 %v1952_v57, %v1951_v51 }
 0x664   :  { %v6828_v60 = vpop.eup %6827 }
 0x665   :  { %v2040_v61 = vadd.f32 1.0, %v6828_v60  ;;  %v2065_v62 = vpack.c.bf16 %v8651_v59, %v8651_v59  ;;  %2500 = vst.msk [vmem:[#allocation5 + $0x28] sm:$0xff] %vm143_vm0, %v8651_v59  ;;  %v6830_v18 = vpop.eup %6829 }
 0x667   :  { %6831 = vrcp.f32 %v2040_v61  ;;  %2099 = vmatmul.mubr.bf16.vlgmr.msra.gmra.mrb[72].mxu1 %v2065_v62  ;;  %6151 = vmatmul.mubr.bf16.vlgmr.msra.gmra.mrb[72].mxu0 %v2065_v62  ;;  %v10674_v61 = vld [vmem:[#allocation36_spill] sm:$0xff] }
 0x668   :  { %2170 = vmatpush1.bf16.msra.mxu1 %v8243_v48  ;;  %6155 = vmatpush3.bf16.msra.mxu0 %v8249_v35  ;;  %v2047_v48 = vadd.f32 1.0, %v6830_v18  ;;  %v2031_v35 = vadd.f32 %v2030_v63, %v7949_v5  ;;  %v7127_v63 = vld [vmem:[%s10511_s30 + $0x48] ss:$12 sps:$4 sm:$0xff]  }
 0x669   :  { %2171 = vmatprep.subr.bf16.mxu1 %v8255_v50  ;;  %6156 = vmatprep.subr.bf16.mxu0 %v10578_v40 }
 0x66a   :  { %2201 = vmatprep.mubr.bf16.mxu1 %v10579_v34  ;;  %6170 = vmatprep.mubr.msk.bf16.mxu0 %vm7217_vm1, %v10578_v40  ;;  %6833 = vrcp.f32 %v2047_v48 }
 0x66c   :  { %2172 = vmatpush1.bf16.msra.mxu1 %v8265_v52  ;;  %6157 = vmatpush3.bf16.msra.mxu0 %v8271_v53  ;;  %v10670_v52 = vld [vmem:[#allocation56_spill] sm:$0xff] }
 0x66d   :  { %2173 = vmatprep.subr.bf16.mxu1 %v8277_v54  ;;  %6158 = vmatprep.subr.bf16.mxu0 %v10578_v40 }
 0x670   :  { %2174 = vmatpush1.bf16.msra.mxu1 %v8285_v9  ;;  %6159 = vmatpush3.bf16.msra.mxu0 %v8291_v28 }
 0x671   :  { %v6832_v50 = vpop.eup %6831  ;;  %2175 = vmatprep.subr.bf16.mxu1 %v8297_v25  ;;  %6160 = vmatprep.subr.bf16.mxu0 %v10578_v40 }
 0x672   :  { %v2050_v2 = vmul.f32 %v6832_v50, %v2031_v35 }
 0x674   :  { %v2051_v53 = vadd.f32 %v2050_v2, %v10670_v52  ;;  %2176 = vmatpush1.bf16.msra.mxu1 %v8305_v19  ;;  %6161 = vmatpush3.bf16.msra.mxu0 %v8311_v32  ;;  %v6834_v54 = vpop.eup %6833 }
 0x675   :  { %2177 = vmatprep.subr.bf16.mxu1 %v8317_v13  ;;  %6162 = vmatprep.subr.bf16.mxu0 %v10578_v40  ;;  %v2053_v9 = vsub.f32 1.0, %v6834_v54  ;;  %v2055_v19 = vmul.f32 %v6834_v54, %v8597_v55 }
 0x676   :  { %6835 = vtanh.f32 %v2051_v53 }
 0x678   :  { %2178 = vmatpush1.bf16.msra.mxu1 %v8324_v39  ;;  %6163 = vmatpush3.bf16.msra.mxu0 %v8330_v17  ;;  %v7117_v39 = vld [vmem:[%s10511_s30 + $0x4] ss:$12 sps:$4 sm:$0xff]   ;;  %v7118_v17 = vld [vmem:[%s10511_s30] ss:$12 sps:$4 sm:$0xff]  }
 0x679   :  { %2179 = vmatprep.subr.bf16.mxu1 %v8336_v1  ;;  %6164 = vmatprep.subr.bf16.mxu0 %v10578_v40  ;;  %v7119_v1 = vld [vmem:[%s10511_s30 + $0x8] ss:$12 sps:$4 sm:$0xff]  }
 0x67c   :  { %2180 = vmatpush1.bf16.msra.mxu1 %v8343_v43  ;;  %6165 = vmatpush3.bf16.msra.mxu0 %v8349_v11  ;;  %v7120_v43 = vld [vmem:[%s10511_s30 + $0x1c] ss:$12 sps:$4 sm:$0xff]   ;;  %v7121_v11 = vld [vmem:[%s10511_s30 + $0x18] ss:$12 sps:$4 sm:$0xff]  }
 0x67d   :  { %2181 = vmatprep.subr.bf16.mxu1 %v8355_v6  ;;  %6166 = vmatprep.subr.bf16.mxu0 %v10578_v40  ;;  %v7122_v6 = vld [vmem:[%s10511_s30 + $0x20] ss:$12 sps:$4 sm:$0xff]  }
 0x680   :  { %v6836_v28 = vpop.eup %6835  ;;  %2182 = vmatpush1.bf16.msra.mxu1 %v8362_v41  ;;  %6167 = vmatpush3.bf16.msra.mxu0 %v8368_v49  ;;  %v10671_v41 = vld [vmem:[#allocation18_spill] sm:$0xff]  ;;  %v7123_v49 = vld [vmem:[%s10511_s30 + $0x34] ss:$12 sps:$4 sm:$0xff]  }
 0x681   :  { %2183 = vmatprep.subr.bf16.mxu1 %v8374_v56  ;;  %6168 = vmatprep.subr.bf16.mxu0 %v10578_v40  ;;  %v2054_v25 = vmul.f32 %v6836_v28, %v2053_v9  ;;  %v7124_v56 = vld [vmem:[%s10511_s30 + $0x30] ss:$12 sps:$4 sm:$0xff]  }
 0x683   :  { %v8691_v32 = vadd.f32 %v2055_v19, %v2054_v25  ;;  %v10675_v19 = vld [vmem:[#allocation67_spill] sm:$0xff] }
 0x684   :  { %2184 = vmatpush1.bf16.msra.mxu1 %v8384_v26  ;;  %6169 = vmatpush3.bf16.msra.mxu0 %v8390_v29  ;;  %v7125_v26 = vld [vmem:[%s10511_s30 + $0x38] ss:$12 sps:$4 sm:$0xff]   ;;  %v10672_v29 = vld [vmem:[#allocation74_spill] sm:$0xff] }
 0x685   :  { %2523 = vrot.lane.b32.xlu1 %v8691_v32, %s7218_s6  ;;  %v2168_v13 = vpack.c.bf16 %v8691_v32, %v8691_v32  ;;  %2280 = vmatprep.subr.bf16.mxu1 %v7117_v39 }
 0x686   :  { %6174 = vmatprep.subr.bf16.mxu0 %v10578_v40 }
 0x687   :  { %2202 = vmatmul.mubr.bf16.vlgmr.msra.gmra.mrb[76].mxu1 %v2168_v13  ;;  %6171 = vmatmul.mubr.bf16.vlgmr.msra.gmra.mrb[76].mxu0 %v2168_v13 }
 0x688   :  { %2281 = vmatpush1.bf16.msra.mxu1 %v7118_v17  ;;  %6175 = vmatpush3.bf16.msra.mxu0 %v7119_v1 }
 0x689   :  { %2525 = vrot.lane.b32.xlu1 %v8597_v55, %s7218_s6  ;;  %2282 = vmatprep.subr.bf16.mxu1 %v7120_v43  ;;  %v7126_v55 = vld [vmem:[%s10511_s30 + $0x4c] ss:$12 sps:$4 sm:$0xff]  }
 0x68a   :  { %6176 = vmatprep.subr.bf16.mxu0 %v10578_v40  ;;  %2312 = vmatprep.mubr.bf16.mxu1 %v10579_v34 }
 0x68b   :  { %6190 = vmatprep.mubr.msk.bf16.mxu0 %vm7217_vm1, %v10578_v40 }
 0x68c   :  { %2283 = vmatpush1.bf16.msra.mxu1 %v7121_v11  ;;  %6177 = vmatpush3.bf16.msra.mxu0 %v7122_v6 }
 0x68d   :  { %2529 = vrot.lane.b32.xlu1 %v10671_v41, %s7218_s6  ;;  %2284 = vmatprep.subr.bf16.mxu1 %v7123_v49  ;;  %v10676_v41 = vld [vmem:[#allocation47_spill] sm:$0xff] }
 0x68e   :  { %6178 = vmatprep.subr.bf16.mxu0 %v10578_v40 }
 0x690   :  { %2285 = vmatpush1.bf16.msra.mxu1 %v7124_v56  ;;  %6179 = vmatpush3.bf16.msra.mxu0 %v7125_v26 }
 0x691   :  { %2533 = vrot.lane.b32.xlu1 %v10672_v29, %s7218_s6  ;;  %2286 = vmatprep.subr.bf16.mxu1 %v7126_v55  ;;  %v10677_v29 = vld [vmem:[#allocation49_spill] sm:$0xff] }
 0x692   :  { %6180 = vmatprep.subr.bf16.mxu0 %v10578_v40 }
 0x694   :  { %2287 = vmatpush1.bf16.msra.mxu1 %v7127_v63  ;;  %6181 = vmatpush3.bf16.msra.mxu0 %v7128_v15 }
 0x695   :  { %2288 = vmatprep.subr.bf16.mxu1 %v7129_v42  ;;  %6182 = vmatprep.subr.bf16.mxu0 %v10578_v40 }
 0x698   :  { %2289 = vmatpush1.bf16.msra.mxu1 %v7130_v23  ;;  %6183 = vmatpush3.bf16.msra.mxu0 %v7131_v14 }
 0x699   :  { %2290 = vmatprep.subr.bf16.mxu1 %v7132_v21  ;;  %6184 = vmatprep.subr.bf16.mxu0 %v10578_v40 }
 0x69c   :  { %2291 = vmatpush1.bf16.msra.mxu1 %v7133_v8  ;;  %6185 = vmatpush3.bf16.msra.mxu0 %v7134_v16 }
 0x69d   :  { %2292 = vmatprep.subr.bf16.mxu1 %v7135_v37  ;;  %6186 = vmatprep.subr.bf16.mxu0 %v10578_v40 }
 0x6a0   :  { %2293 = vmatpush1.bf16.msra.mxu1 %v7136_v33  ;;  %6187 = vmatpush3.bf16.msra.mxu0 %v10658_v0 }
 0x6a1   :  { %2294 = vmatprep.subr.bf16.mxu1 %v7137_v36  ;;  %6188 = vmatprep.subr.bf16.mxu0 %v10578_v40 }
 0x6a4   :  { %2295 = vmatpush1.bf16.msra.mxu1 %v10660_v3  ;;  %6189 = vmatpush3.bf16.msra.mxu0 %v10661_v4 }
 0x6a5   :  { %2383 = vmatprep.subr.bf16.mxu1 %v10662_v12  ;;  %6194 = vmatprep.subr.bf16.mxu0 %v10578_v40 }
 0x6f7   :  { %v2524_v31 = vpop.permute.xlu1 %2523 }
 0x6f8   :  { %2546 = vst.msk [vmem:[#allocation5 + $0x10] sm:$0xff] %vm2543_vm2, %v2524_v31  ;;  %v7138_v31 = vld [vmem:[%s10528_s5] ss:$12 sps:$4 sm:$0xff]  }
 0x6fb   :  { %v2526_v0 = vpop.permute.xlu1 %2525 }
 0x6fc   :  { %2547 = vst.msk [vmem:[#allocation5 + $0x18] sm:$0xff] %vm2543_vm2, %v2526_v0  ;;  %v7140_v0 = vld [vmem:[%s10528_s5 + $0x1c] ss:$12 sps:$4 sm:$0xff]  }
 0x6ff   :  { %v2530_v47 = vpop.permute.xlu1 %2529 }
 0x700   :  { %2549 = vst.msk [vmem:[#allocation5 + $0x28] sm:$0xff] %vm2543_vm2, %v2530_v47 }
 0x73a   :  { %v2100_v46 = vpop.f32.mrb[72].mxu1  ;;  %v2141_v45 = vpop.f32.mrb[72].mxu0 }
 0x73b   :  { %v2101_v3 = vadd.f32 %v2100_v46, %v10663_v20  ;;  %v2102_v44 = vpop.f32.mrb[73].mxu1  ;;  %v6152_v4 = vpop.f32.mrb[73].mxu0  ;;  %v2142_v53 = vadd.f32 %v2141_v45, %v10666_v58  ;;  %v7141_v46 = vld [vmem:[%s10528_s5 + $0x18] ss:$12 sps:$4 sm:$0xff]   ;;  %v7142_v45 = vld [vmem:[%s10528_s5 + $0x20] ss:$12 sps:$4 sm:$0xff]  }
 0x73c   :  { %v2103_v12 = vadd.f32 %v2102_v44, %v7911_v38  ;;  %v2104_v24 = vpop.f32.mrb[74].mxu1  ;;  %v2144_v22 = vpop.f32.mrb[74].mxu0 }
 0x73d   :  { %v2147_v51 = vadd.f32 %v2101_v3, %v10673_v10  ;;  %v2105_v57 = vpop.f32.mrb[75].mxu1  ;;  %v6153_v60 = vpop.f32.mrb[75].mxu0  ;;  %v7143_v3 = vld [vmem:[%s10528_s5 + $0x34] ss:$12 sps:$4 sm:$0xff]   ;;  %v7145_v24 = vld [vmem:[%s10528_s5 + $0x38] ss:$12 sps:$4 sm:$0xff]  }
 0x73e   :  { %v2154_v62 = vadd.f32 %v2103_v12, %v10674_v61  ;;  %v7144_v12 = vld [vmem:[%s10528_s5 + $0x30] ss:$12 sps:$4 sm:$0xff]   ;;  %v7146_v10 = vld [vmem:[%s10528_s5 + $0x4c] ss:$12 sps:$4 sm:$0xff]   ;;  %v7147_v61 = vld [vmem:[%s10528_s5 + $0x48] ss:$12 sps:$4 sm:$0xff]  }
 0x73f   :  { %v5474_v18 = vmul.f32 -1.442695, %v2147_v51  ;;  %v10678_v57 = vld [vmem:[#allocation50_spill] sm:$0xff] }
 0x740   :  { %v5475_v48 = vmul.f32 -1.442695, %v2154_v62  ;;  %v7148_v62 = vld [vmem:[%s10528_s5 + $0x50] ss:$12 sps:$4 sm:$0xff]  }
 0x741   :  { %6837 = vpow2.f32 %v5474_v18  ;;  %v7149_v18 = vld [vmem:[%s10528_s5 + $0x64] ss:$12 sps:$4 sm:$0xff]  }
 0x742   :  { %6839 = vpow2.f32 %v5475_v48  ;;  %v7150_v48 = vld [vmem:[%s10528_s5 + $0x60] ss:$12 sps:$4 sm:$0xff]  }
 0x74b   :  { %v6838_v35 = vpop.eup %6837 }
 0x74c   :  { %v2151_v50 = vadd.f32 1.0, %v6838_v35  ;;  %v6840_v2 = vpop.eup %6839  ;;  %v7151_v35 = vld [vmem:[%s10528_s5 + $0x68] ss:$12 sps:$4 sm:$0xff]  }
 0x74d   :  { %v2158_v52 = vadd.f32 1.0, %v6840_v2 }
 0x74e   :  { %6841 = vrcp.f32 %v2151_v50  ;;  %v7152_v50 = vld [vmem:[%s10528_s5 + $0x7c] ss:$12 sps:$4 sm:$0xff]  }
 0x74f   :  { %6843 = vrcp.f32 %v2158_v52  ;;  %v7153_v52 = vld [vmem:[%s10528_s5 + $0x78] ss:$12 sps:$4 sm:$0xff]  }
 0x758   :  { %v6842_v54 = vpop.eup %6841 }
 0x759   :  { %v2161_v9 = vmul.f32 %v6842_v54, %v2142_v53  ;;  %v6844_v15 = vpop.eup %6843  ;;  %v7154_v53 = vld [vmem:[%s10528_s5 + $0x80] ss:$12 sps:$4 sm:$0xff]  }
 0x75a   :  { %v2203_v28 = vpop.f32.mrb[76].mxu1  ;;  %v2244_v25 = vpop.f32.mrb[76].mxu0  ;;  %v2164_v23 = vsub.f32 1.0, %v6844_v15  ;;  %v2166_v8 = vmul.f32 %v6844_v15, %v8651_v59  ;;  %v7139_v59 = vld [vmem:[%s10528_s5 + $0x8] ss:$12 sps:$4 sm:$0xff]   ;;  %v10679_v15 = vld [vmem:[#allocation37_spill] sm:$0xff] }
 0x75b   :  { %v2162_v13 = vadd.f32 %v2161_v9, %v10675_v19  ;;  %v2204_v39 = vadd.f32 %v2203_v28, %v7927_v30  ;;  %v2205_v17 = vpop.f32.mrb[77].mxu1  ;;  %v6172_v1 = vpop.f32.mrb[77].mxu0  ;;  %v2245_v4 = vadd.f32 %v2244_v25, %v7949_v5  ;;  %v7155_v54 = vld [vmem:[%s10528_s5 + $0x94] ss:$12 sps:$4 sm:$0xff]   ;;  %v7156_v25 = vld [vmem:[%s10528_s5 + $0x90] ss:$12 sps:$4 sm:$0xff]  }
 0x75c   :  { %v2206_v43 = vadd.f32 %v2205_v17, %v7930_v27  ;;  %v2207_v11 = vpop.f32.mrb[78].mxu1  ;;  %v2247_v6 = vpop.f32.mrb[78].mxu0  ;;  %v7157_v19 = vld [vmem:[%s10528_s5 + $0x98] ss:$12 sps:$4 sm:$0xff]  }
 0x75d   :  { %6845 = vtanh.f32 %v2162_v13  ;;  %v2250_v49 = vadd.f32 %v2204_v39, %v10676_v41  ;;  %v2208_v56 = vpop.f32.mrb[79].mxu1  ;;  %v6173_v26 = vpop.f32.mrb[79].mxu0  ;;  %v7158_v13 = vld [vmem:[%s10528_s5 + $0xac] ss:$12 sps:$4 sm:$0xff]   ;;  %v7160_v11 = vld [vmem:[%s10528_s5 + $0xb0] ss:$12 sps:$4 sm:$0xff]  }
 0x75e   :  { %v2257_v55 = vadd.f32 %v2206_v43, %v10677_v29  ;;  %v7159_v43 = vld [vmem:[%s10528_s5 + $0xa8] ss:$12 sps:$4 sm:$0xff]  }
 0x75f   :  { %v5476_v63 = vmul.f32 -1.442695, %v2250_v49 }
 0x760   :  { %v5477_v42 = vmul.f32 -1.442695, %v2257_v55 }
 0x761   :  { %6847 = vpow2.f32 %v5476_v63 }
 0x762   :  { %6849 = vpow2.f32 %v5477_v42 }
 0x767   :  { %v6846_v14 = vpop.eup %6845 }
 0x768   :  { %v2165_v21 = vmul.f32 %v6846_v14, %v2164_v23 }
 0x76a   :  { %v8798_v16 = vadd.f32 %v2166_v8, %v2165_v21  ;;  %v10680_v21 = vld [vmem:[#allocation39_spill] sm:$0xff] }
 0x76b   :  { %v6848_v37 = vpop.eup %6847 }
 0x76c   :  { %v2254_v33 = vadd.f32 1.0, %v6848_v37  ;;  %v2279_v36 = vpack.c.bf16 %v8798_v16, %v8798_v16  ;;  %2501 = vst.msk [vmem:[#allocation5 + $0x30] sm:$0xff] %vm143_vm0, %v8798_v16  ;;  %v6850_v47 = vpop.eup %6849 }
 0x76d   :  { %v2261_v44 = vadd.f32 1.0, %v6850_v47 }
 0x76e   :  { %6851 = vrcp.f32 %v2254_v33  ;;  %2313 = vmatmul.mubr.bf16.vlgmr.msra.gmra.mrb[80].mxu1 %v2279_v36  ;;  %6191 = vmatmul.mubr.bf16.vlgmr.msra.gmra.mrb[80].mxu0 %v2279_v36 }
 0x76f   :  { %2384 = vmatpush1.bf16.msra.mxu1 %v7138_v31  ;;  %6195 = vmatpush3.bf16.msra.mxu0 %v7139_v59  ;;  %6853 = vrcp.f32 %v2261_v44 }
 0x770   :  { %2385 = vmatprep.subr.bf16.mxu1 %v7140_v0  ;;  %6196 = vmatprep.subr.bf16.mxu0 %v10578_v40 }
 0x771   :  { %2415 = vmatprep.mubr.bf16.mxu1 %v10579_v34  ;;  %6210 = vmatprep.mubr.msk.bf16.mxu0 %vm7217_vm1, %v10578_v40 }
 0x773   :  { %2386 = vmatpush1.bf16.msra.mxu1 %v7141_v46  ;;  %6197 = vmatpush3.bf16.msra.mxu0 %v7142_v45 }
 0x774   :  { %2387 = vmatprep.subr.bf16.mxu1 %v7143_v3  ;;  %6198 = vmatprep.subr.bf16.mxu0 %v10578_v40  ;;  %v10681_v3 = vld [vmem:[#allocation69_spill] sm:$0xff] }
 0x777   :  { %2388 = vmatpush1.bf16.msra.mxu1 %v7144_v12  ;;  %6199 = vmatpush3.bf16.msra.mxu0 %v7145_v24 }
 0x778   :  { %v6852_v22 = vpop.eup %6851  ;;  %2389 = vmatprep.subr.bf16.mxu1 %v7146_v10  ;;  %6200 = vmatprep.subr.bf16.mxu0 %v10578_v40 }
 0x779   :  { %v2264_v51 = vmul.f32 %v6852_v22, %v2245_v4  ;;  %v6854_v2 = vpop.eup %6853 }
 0x77a   :  { %v2267_v9 = vsub.f32 1.0, %v6854_v2  ;;  %v2269_v17 = vmul.f32 %v6854_v2, %v8691_v32 }
 0x77b   :  { %v2265_v60 = vadd.f32 %v2264_v51, %v10678_v57  ;;  %2390 = vmatpush1.bf16.msra.mxu1 %v7147_v61  ;;  %6201 = vmatpush3.bf16.msra.mxu0 %v7148_v62  ;;  %v10682_v57 = vld [vmem:[#allocation44_spill] sm:$0xff]  ;;  %v10683_v62 = vld [vmem:[#allocation46_spill] sm:$0xff] }
 0x77c   :  { %2391 = vmatprep.subr.bf16.mxu1 %v7149_v18  ;;  %6202 = vmatprep.subr.bf16.mxu0 %v10578_v40 }
 0x77d   :  { %6855 = vtanh.f32 %v2265_v60 }
 0x77f   :  { %2392 = vmatpush1.bf16.msra.mxu1 %v7150_v48  ;;  %6203 = vmatpush3.bf16.msra.mxu0 %v7151_v35 }
 0x780   :  { %2393 = vmatprep.subr.bf16.mxu1 %v7152_v50  ;;  %6204 = vmatprep.subr.bf16.mxu0 %v10578_v40 }
 0x783   :  { %2394 = vmatpush1.bf16.msra.mxu1 %v7153_v52  ;;  %6205 = vmatpush3.bf16.msra.mxu0 %v7154_v53 }
 0x784   :  { %2395 = vmatprep.subr.bf16.mxu1 %v7155_v54  ;;  %6206 = vmatprep.subr.bf16.mxu0 %v10578_v40 }
 0x787   :  { %v6856_v28 = vpop.eup %6855  ;;  %2396 = vmatpush1.bf16.msra.mxu1 %v7156_v25  ;;  %6207 = vmatpush3.bf16.msra.mxu0 %v7157_v19 }
 0x788   :  { %2397 = vmatprep.subr.bf16.mxu1 %v7158_v13  ;;  %6208 = vmatprep.subr.bf16.mxu0 %v10578_v40  ;;  %v2268_v39 = vmul.f32 %v6856_v28, %v2267_v9  ;;  %v2534_v9 = vpop.permute.xlu1 %2533 }
 0x78a   :  { %v8880_v1 = vadd.f32 %v2269_v17, %v2268_v39 }
 0x78b   :  { %2398 = vmatpush1.bf16.msra.mxu1 %v7159_v43  ;;  %6209 = vmatpush3.bf16.msra.mxu0 %v7160_v11  ;;  %v10684_v43 = vld [vmem:[#allocation48_spill] sm:$0xff] }
 0x78c   :  { %v2382_v6 = vpack.c.bf16 %v8880_v1, %v8880_v1 }
 0x78e   :  { %2416 = vmatmul.mubr.bf16.vlgmr.msra.gmra.mrb[84].mxu1 %v2382_v6  ;;  %6211 = vmatmul.mubr.bf16.vlgmr.msra.gmra.mrb[84].mxu0 %v2382_v6 }
 0x78f   :  { %2801 = vmatprep.mubr.bf16.mxu1 %v10579_v34 }
 0x841   :  { %v2314_v32 = vpop.f32.mrb[80].mxu1  ;;  %v2355_v41 = vpop.f32.mrb[80].mxu0 }
 0x842   :  { %v2315_v49 = vadd.f32 %v2314_v32, %v10663_v20  ;;  %v2316_v56 = vpop.f32.mrb[81].mxu1  ;;  %v6192_v26 = vpop.f32.mrb[81].mxu0  ;;  %v2356_v0 = vadd.f32 %v2355_v41, %v10666_v58 }
 0x843   :  { %v2317_v29 = vadd.f32 %v2316_v56, %v7911_v38  ;;  %v2318_v55 = vpop.f32.mrb[82].mxu1  ;;  %v2358_v63 = vpop.f32.mrb[82].mxu0 }
 0x844   :  { %v2361_v42 = vadd.f32 %v2315_v49, %v10679_v15  ;;  %v2319_v23 = vpop.f32.mrb[83].mxu1  ;;  %v6193_v14 = vpop.f32.mrb[83].mxu0 }
 0x845   :  { %v2368_v8 = vadd.f32 %v2317_v29, %v10680_v21  ;;  %v2555_v21 = vld [vmem:[#allocation5 + $0x18] sm:$0xff] }
 0x846   :  { %v5478_v37 = vmul.f32 -1.442695, %v2361_v42 }
 0x847   :  { %v5479_v33 = vmul.f32 -1.442695, %v2368_v8 }
 0x848   :  { %6857 = vpow2.f32 %v5478_v37  ;;  %v2572_v37 = vsel %vm2562_vm3, %v2555_v21, 0.0 }
 0x849   :  { %6859 = vpow2.f32 %v5479_v33 }
 0x852   :  { %v6858_v36 = vpop.eup %6857 }
 0x853   :  { %v2365_v31 = vadd.f32 1.0, %v6858_v36  ;;  %v6860_v20 = vpop.eup %6859  ;;  %v2557_v36 = vld [vmem:[#allocation5 + $0x28] sm:$0xff] }
 0x854   :  { %v2372_v59 = vadd.f32 1.0, %v6860_v20  ;;  %v2578_v20 = vsel %vm2562_vm3, %v2557_v36, 0.0 }
 0x855   :  { %6861 = vrcp.f32 %v2365_v31 }
 0x856   :  { %6863 = vrcp.f32 %v2372_v59 }
 0x85f   :  { %v6862_v38 = vpop.eup %6861 }
 0x860   :  { %v2375_v47 = vmul.f32 %v6862_v38, %v2356_v0  ;;  %v6864_v35 = vpop.eup %6863 }
 0x861   :  { %v2417_v46 = vpop.f32.mrb[84].mxu1  ;;  %v2458_v45 = vpop.f32.mrb[84].mxu0  ;;  %v2378_v2 = vsub.f32 1.0, %v6864_v35  ;;  %v2380_v53 = vmul.f32 %v6864_v35, %v8798_v16 }
 0x862   :  { %v2376_v44 = vadd.f32 %v2375_v47, %v10681_v3  ;;  %v2418_v4 = vadd.f32 %v2417_v46, %v7927_v30  ;;  %v2419_v12 = vpop.f32.mrb[85].mxu1  ;;  %v6212_v24 = vpop.f32.mrb[85].mxu0  ;;  %v2459_v13 = vadd.f32 %v2458_v45, %v7949_v5  ;;  %v10685_v5 = vld [vmem:[#allocation9_spill] sm:$0xff] }
 0x863   :  { %v2420_v22 = vadd.f32 %v2419_v12, %v7930_v27  ;;  %v2421_v10 = vpop.f32.mrb[86].mxu1  ;;  %v2461_v51 = vpop.f32.mrb[86].mxu0 }
 0x864   :  { %6865 = vtanh.f32 %v2376_v44  ;;  %v2464_v60 = vadd.f32 %v2418_v4, %v10682_v57  ;;  %v2422_v61 = vpop.f32.mrb[87].mxu1  ;;  %v6213_v58 = vpop.f32.mrb[87].mxu0 }
 0x865   :  { %v2471_v18 = vadd.f32 %v2420_v22, %v10683_v62 }
 0x866   :  { %v5480_v48 = vmul.f32 -1.442695, %v2464_v60 }
 0x867   :  { %v5481_v50 = vmul.f32 -1.442695, %v2471_v18 }
 0x868   :  { %6867 = vpow2.f32 %v5480_v48 }
 0x869   :  { %6869 = vpow2.f32 %v5481_v50 }
 0x86e   :  { %v6866_v52 = vpop.eup %6865 }
 0x86f   :  { %v2379_v30 = vmul.f32 %v6866_v52, %v2378_v2 }
 0x871   :  { %v2381_v27 = vadd.f32 %v2380_v53, %v2379_v30 }
 0x872   :  { %v6868_v54 = vpop.eup %6867 }
 0x873   :  { %2502 = vst.msk [vmem:[#allocation5 + $0x38] sm:$0xff] %vm143_vm0, %v2381_v27  ;;  %v2468_v28 = vadd.f32 1.0, %v6868_v54  ;;  %v6870_v25 = vpop.eup %6869 }
 0x874   :  { %2551 = vst.msk [vmem:[#allocation5 + $0x38] sm:$0xff] %vm2543_vm2, %v2534_v9  ;;  %v2475_v19 = vadd.f32 1.0, %v6870_v25 }
 0x875   :  { %6871 = vrcp.f32 %v2468_v28 }
 0x876   :  { %6873 = vrcp.f32 %v2475_v19 }
 0x87b   :  { %v2559_v0 = vld [vmem:[#allocation5 + $0x38] sm:$0xff] }
 0x87c   :  { %v2584_v38 = vsel %vm2562_vm3, %v2559_v0, 0.0 }
 0x87f   :  { %v6872_v39 = vpop.eup %6871 }
 0x880   :  { %v2478_v17 = vmul.f32 %v6872_v39, %v2459_v13  ;;  %v6874_v16 = vpop.eup %6873 }
 0x881   :  { %v2481_v6 = vsub.f32 1.0, %v6874_v16  ;;  %v2483_v49 = vmul.f32 %v6874_v16, %v8880_v1 }
 0x882   :  { %v2479_v11 = vadd.f32 %v2478_v17, %v10684_v43 }
 0x884   :  { %6875 = vtanh.f32 %v2479_v11 }
 0x88e   :  { %v6876_v32 = vpop.eup %6875 }
 0x88f   :  { %v2482_v41 = vmul.f32 %v6876_v32, %v2481_v6 }
 0x891   :  { %v2484_v56 = vadd.f32 %v2483_v49, %v2482_v41 }
 0x893   :  { %2519 = vrot.lane.b32.xlu0 %v2484_v56, %s7218_s6  ;;  %v6639_v56 = vld [vmem:[%s10423_s9 + $0x4] ss:$12 sps:$4 sm:$0xff]  }
 0x894   :  { %2769 = vmatprep.subr.bf16.mxu1 %v6639_v56 }
 0x897   :  { %2521 = vrot.lane.b32.xlu0 %v8880_v1, %s7218_s6 }
 0x89b   :  { %2527 = vrot.lane.b32.xlu0 %v8503_v7, %s7218_s6  ;;  %v2554_v7 = vld [vmem:[#allocation5 + $0x10] sm:$0xff] }
 0x89c   :  { %v2569_v23 = vsel %vm2562_vm3, %v2554_v7, 0.0 }
 0x89f   :  { %2531 = vrot.lane.b32.xlu0 %v10685_v5, %s7218_s6  ;;  %v6637_v5 = vld [vmem:[%s10423_s9] ss:$12 sps:$4 sm:$0xff]  }
 0x8a0   :  { %2770 = vmatpush1.bf16.msra.mxu1 %v6637_v5 }
 0x905   :  { %v2520_v26 = vpop.permute.xlu0 %2519 }
 0x906   :  { %2544 = vst.msk [vmem:[#allocation5] sm:$0xff] %vm2543_vm2, %v2520_v26  ;;  %v6642_v26 = vld [vmem:[%s10423_s9 + $0x1c] ss:$12 sps:$4 sm:$0xff]  }
 0x907   :  { %2771 = vmatprep.subr.bf16.mxu1 %v6642_v26  ;;  %v9028_v26 = vld [vmem:[%s10424_s11 + $0x18] ss:$12 sps:$4 sm:$0xff]  }
 0x909   :  { %v2522_v29 = vpop.permute.xlu0 %2521 }
 0x90a   :  { %2545 = vst.msk [vmem:[#allocation5 + $0x8] sm:$0xff] %vm2543_vm2, %v2522_v29  ;;  %v6643_v29 = vld [vmem:[%s10423_s9 + $0x8] ss:$12 sps:$4 sm:$0xff]  }
 0x90b   :  { %6214 = vmatprep.subr.bf16.mxu0 %v6643_v29 }
 0x90c   :  { %6215 = vmatpush3.bf16.msra.mxu0 %v6643_v29 }
 0x90d   :  { %v2528_v55 = vpop.permute.xlu0 %2527  ;;  %v8916_v63 = vld [vmem:[#allocation5] sm:$0xff] }
 0x90e   :  { %2548 = vst.msk [vmem:[#allocation5 + $0x20] sm:$0xff] %vm2543_vm2, %v2528_v55  ;;  %v2563_v1 = vsel %vm2562_vm3, %v8916_v63, 0.0  ;;  %v6640_v55 = vld [vmem:[%s10423_s9 + $0x18] ss:$12 sps:$4 sm:$0xff]  }
 0x90f   :  { %2564 = vadd.xlane.f32.xlu0 %v2563_v1  ;;  %2772 = vmatpush1.bf16.msra.mxu1 %v6640_v55  ;;  %v6644_v1 = vld [vmem:[%s10423_s9 + $0x20] ss:$12 sps:$4 sm:$0xff]  }
 0x910   :  { %6216 = vmatprep.subr.bf16.mxu0 %v6644_v1 }
 0x911   :  { %v2532_v15 = vpop.permute.xlu0 %2531  ;;  %v8921_v42 = vld [vmem:[#allocation5 + $0x8] sm:$0xff]  ;;  %6217 = vmatpush3.bf16.msra.mxu0 %v6644_v1  ;;  %v9040_v1 = vld [vmem:[%s10424_s11 + $0x34] ss:$12 sps:$4 sm:$0xff]  }
 0x912   :  { %2550 = vst.msk [vmem:[#allocation5 + $0x30] sm:$0xff] %vm2543_vm2, %v2532_v15  ;;  %v2566_v14 = vsel %vm2562_vm3, %v8921_v42, 0.0  ;;  %6226 = vmatprep.subr.bf16.mxu0 %v10578_v40 }
 0x913   :  { %2570 = vadd.xlane.f32.xlu0 %v2569_v23  ;;  %2567 = vadd.xlane.f32.xlu1 %v2566_v14 }
 0x915   :  { %v2556_v8 = vld [vmem:[#allocation5 + $0x20] sm:$0xff] }
 0x916   :  { %v2575_v33 = vsel %vm2562_vm3, %v2556_v8, 0.0 }
 0x917   :  { %2573 = vadd.xlane.f32.xlu0 %v2572_v37  ;;  %2576 = vadd.xlane.f32.xlu1 %v2575_v33 }
 0x919   :  { %v2558_v31 = vld [vmem:[#allocation5 + $0x30] sm:$0xff] }
 0x91a   :  { %v2581_v59 = vsel %vm2562_vm3, %v2558_v31, 0.0 }
 0x91b   :  { %2579 = vadd.xlane.f32.xlu0 %v2578_v20  ;;  %2582 = vadd.xlane.f32.xlu1 %v2581_v59 }
 0x91f   :  { %2585 = vadd.xlane.f32.xlu0 %v2584_v38 }
 0x99c   :  { %v2565_v47 = vpop.xlane.xlu0 %2564 }
 0x99d   :  { %v2588_v46 = vmul.f32 0.03125, %v2565_v47 }
 0x99f   :  { %v8933_v45 = vsub.f32 %v8916_v63, %v2588_v46 }
 0x9a0   :  { %v2568_v3 = vpop.xlane.xlu1 %2567  ;;  %v2571_v44 = vpop.xlane.xlu0 %2570 }
 0x9a1   :  { %v2589_v4 = vmul.f32 0.03125, %v2568_v3  ;;  %v2590_v12 = vmul.f32 0.03125, %v2571_v44  ;;  %v2604_v24 = vmul.f32 %v8933_v45, %v8933_v45 }
 0x9a3   :  { %v8938_v22 = vsub.f32 %v8921_v42, %v2589_v4  ;;  %v8940_v10 = vsub.f32 %v2554_v7, %v2590_v12  ;;  %v2612_v51 = vsel %vm2562_vm3, %v2604_v24, 0.0  ;;  %v8995_v7 = vld [vmem:[%s10424_s11 + $0x4] ss:$12 sps:$4 sm:$0xff]  }
 0x9a4   :  { %v2577_v57 = vpop.xlane.xlu1 %2576  ;;  %2613 = vadd.xlane.f32.xlu1 %v2612_v51  ;;  %v2574_v60 = vpop.xlane.xlu0 %2573  ;;  %3111 = vmatprep.subr.bf16.mxu1 %v8995_v7 }
 0x9a5   :  { %v2592_v61 = vmul.f32 0.03125, %v2577_v57  ;;  %v2591_v58 = vmul.f32 0.03125, %v2574_v60  ;;  %v2606_v62 = vmul.f32 %v8940_v10, %v8940_v10  ;;  %v2605_v18 = vmul.f32 %v8938_v22, %v8938_v22 }
 0x9a7   :  { %v8947_v48 = vsub.f32 %v2556_v8, %v2592_v61  ;;  %v8949_v35 = vsub.f32 %v2555_v21, %v2591_v58  ;;  %v2618_v50 = vsel %vm2562_vm3, %v2606_v62, 0.0  ;;  %v2615_v2 = vsel %vm2562_vm3, %v2605_v18, 0.0  ;;  %v5482_v62 = vld [vmem:[%s10425_s7] ss:$0 sm:$0xff] }
 0x9a8   :  { %v2583_v52 = vpop.xlane.xlu1 %2582  ;;  %2619 = vadd.xlane.f32.xlu1 %v2618_v50  ;;  %v2580_v30 = vpop.xlane.xlu0 %2579  ;;  %2616 = vadd.xlane.f32.xlu0 %v2615_v2 }
 0x9a9   :  { %v2594_v53 = vmul.f32 0.03125, %v2583_v52  ;;  %v2593_v27 = vmul.f32 0.03125, %v2580_v30  ;;  %v2608_v54 = vmul.f32 %v8947_v48, %v8947_v48  ;;  %v2607_v9 = vmul.f32 %v8949_v35, %v8949_v35 }
 0x9ab   :  { %v8957_v28 = vsub.f32 %v2558_v31, %v2594_v53  ;;  %v8959_v25 = vsub.f32 %v2557_v36, %v2593_v27  ;;  %v2624_v19 = vsel %vm2562_vm3, %v2608_v54, 0.0  ;;  %v2621_v13 = vsel %vm2562_vm3, %v2607_v9, 0.0 }
 0x9ac   :  { %2625 = vadd.xlane.f32.xlu1 %v2624_v19  ;;  %2622 = vadd.xlane.f32.xlu0 %v2621_v13  ;;  %v2586_v39 = vpop.xlane.xlu0 %2585 }
 0x9ad   :  { %v2595_v17 = vmul.f32 0.03125, %v2586_v39  ;;  %v2610_v43 = vmul.f32 %v8957_v28, %v8957_v28  ;;  %v2609_v11 = vmul.f32 %v8959_v25, %v8959_v25 }
 0x9af   :  { %v8967_v16 = vsub.f32 %v2559_v0, %v2595_v17  ;;  %v2630_v6 = vsel %vm2562_vm3, %v2610_v43, 0.0  ;;  %v2627_v32 = vsel %vm2562_vm3, %v2609_v11, 0.0 }
 0x9b0   :  { %2631 = vadd.xlane.f32.xlu1 %v2630_v6  ;;  %2628 = vadd.xlane.f32.xlu0 %v2627_v32  ;;  %v9018_v32 = vld [vmem:[%s10424_s11 + $0x1c] ss:$12 sps:$4 sm:$0xff]  }
 0x9b1   :  { %v2611_v41 = vmul.f32 %v8967_v16, %v8967_v16 }
 0x9b3   :  { %v2633_v49 = vsel %vm2562_vm3, %v2611_v41, 0.0 }
 0x9b4   :  { %2634 = vadd.xlane.f32.xlu0 %v2633_v49 }
 0xa31   :  { %v2614_v15 = vpop.xlane.xlu1 %2613 }
 0xa32   :  { %v2636_v23 = vmul.f32 0.03125, %v2614_v15 }
 0xa34   :  { %v2644_v14 = vadd.f32 1e-05, %v2636_v23 }
 0xa35   :  { %v2620_v21 = vpop.xlane.xlu1 %2619  ;;  %v2617_v8 = vpop.xlane.xlu0 %2616 }
 0xa36   :  { %6877 = vrsqrt.f32 %v2644_v14  ;;  %v2638_v37 = vmul.f32 0.03125, %v2620_v21  ;;  %v2637_v33 = vmul.f32 0.03125, %v2617_v8  ;;  %v9048_v8 = vld [vmem:[%s10424_s11 + $0x30] ss:$12 sps:$4 sm:$0xff]  }
 0xa38   :  { %v2646_v36 = vadd.f32 1e-05, %v2638_v37  ;;  %v2645_v31 = vadd.f32 1e-05, %v2637_v33 }
 0xa39   :  { %v2626_v20 = vpop.xlane.xlu1 %2625  ;;  %v2623_v59 = vpop.xlane.xlu0 %2622 }
 0xa3a   :  { %6879 = vrsqrt.f32 %v2646_v36  ;;  %v2640_v0 = vmul.f32 0.03125, %v2626_v20  ;;  %v2639_v38 = vmul.f32 0.03125, %v2623_v59  ;;  %v9061_v36 = vld [vmem:[%s10424_s11 + $0x20] ss:$12 sps:$4 sm:$0xff]  }
 0xa3b   :  { %6881 = vrsqrt.f32 %v2645_v31 }
 0xa3c   :  { %v2648_v47 = vadd.f32 1e-05, %v2640_v0  ;;  %v2647_v46 = vadd.f32 1e-05, %v2639_v38  ;;  %v9069_v0 = vld [vmem:[%s10424_s11 + $0x48] ss:$12 sps:$4 sm:$0xff]  }
 0xa3d   :  { %v2632_v3 = vpop.xlane.xlu1 %2631  ;;  %v2629_v44 = vpop.xlane.xlu0 %2628  ;;  %v9076_v38 = vld [vmem:[%s10424_s11 + $0x64] ss:$12 sps:$4 sm:$0xff]  }
 0xa3e   :  { %6883 = vrsqrt.f32 %v2648_v47  ;;  %v2642_v4 = vmul.f32 0.03125, %v2632_v3  ;;  %v2641_v12 = vmul.f32 0.03125, %v2629_v44  ;;  %v9082_v47 = vld [vmem:[%s10424_s11 + $0x38] ss:$12 sps:$4 sm:$0xff]   ;;  %v9098_v3 = vld [vmem:[%s10424_s11 + $0x7c] ss:$12 sps:$4 sm:$0xff]  }
 0xa3f   :  { %6885 = vrsqrt.f32 %v2647_v46  ;;  %v9090_v46 = vld [vmem:[%s10424_s11 + $0x60] ss:$12 sps:$4 sm:$0xff]   ;;  %v9104_v44 = vld [vmem:[%s10424_s11 + $0x50] ss:$12 sps:$4 sm:$0xff]  }
 0xa40   :  { %v6878_v24 = vpop.eup %6877  ;;  %v2650_v51 = vadd.f32 1e-05, %v2642_v4  ;;  %v2649_v57 = vadd.f32 1e-05, %v2641_v12  ;;  %v9112_v4 = vld [vmem:[%s10424_s11 + $0x78] ss:$12 sps:$4 sm:$0xff]  }
 0xa41   :  { %v2635_v60 = vpop.xlane.xlu0 %2634  ;;  %v2660_v61 = vmul.f32 %v6878_v24, %v8933_v45  ;;  %v5483_v45 = vld [vmem:[%s10426_s8] ss:$0 sm:$0xff]  ;;  %v9125_v24 = vld [vmem:[%s10424_s11 + $0x68] ss:$12 sps:$4 sm:$0xff]  }
 0xa42   :  { %6887 = vrsqrt.f32 %v2650_v51  ;;  %v2643_v58 = vmul.f32 0.03125, %v2635_v60  ;;  %v9119_v12 = vld [vmem:[%s10424_s11 + $0x94] ss:$12 sps:$4 sm:$0xff]   ;;  %v9132_v51 = vld [vmem:[%s10424_s11 + $0x90] ss:$12 sps:$4 sm:$0xff]  }
 0xa43   :  { %6889 = vrsqrt.f32 %v2649_v57  ;;  %v2674_v30 = vmul.f32 %v5482_v62, %v2660_v61  ;;  %v9138_v57 = vld [vmem:[%s10424_s11 + $0xac] ss:$12 sps:$4 sm:$0xff]   ;;  %v9152_v61 = vld [vmem:[%s10424_s11 + $0xa8] ss:$12 sps:$4 sm:$0xff]  }
 0xa44   :  { %v6880_v18 = vpop.eup %6879  ;;  %v2651_v50 = vadd.f32 1e-05, %v2643_v58  ;;  %v9144_v60 = vld [vmem:[%s10424_s11 + $0x80] ss:$12 sps:$4 sm:$0xff]   ;;  %v9160_v58 = vld [vmem:[%s10424_s11 + $0x98] ss:$12 sps:$4 sm:$0xff]  }
 0xa45   :  { %v6882_v2 = vpop.eup %6881  ;;  %v2662_v52 = vmul.f32 %v6880_v18, %v8940_v10  ;;  %v2688_v17 = vadd.f32 %v5483_v45, %v2674_v30  ;;  %v9013_v10 = vld [vmem:[%s10424_s11] ss:$12 sps:$4 sm:$0xff]  }
 0xa46   :  { %v2661_v53 = vmul.f32 %v6882_v2, %v8938_v22  ;;  %6891 = vrsqrt.f32 %v2651_v50  ;;  %v2708_v18 = vld [vmem:[%s10427_s10] sm:$0x7]  ;;  %v10686_v2 = vld [vmem:[#allocation27_spill] sm:$0xff] }
 0xa47   :  { %v2676_v19 = vmul.f32 %v5482_v62, %v2662_v52  ;;  %v2713_v52 = vrot.slane %v2708_v18, %v10686_v2 }
 0xa48   :  { %v6884_v27 = vpop.eup %6883  ;;  %v2675_v54 = vmul.f32 %v5482_v62, %v2661_v53  ;;  %v10687_v53 = vld [vmem:[#allocation41_spill] sm:$0xff] }
 0xa49   :  { %v6886_v9 = vpop.eup %6885  ;;  %v2664_v13 = vmul.f32 %v6884_v27, %v8947_v48  ;;  %v2690_v49 = vadd.f32 %v5483_v45, %v2676_v19  ;;  %v10688_v27 = vld [vmem:[#allocation28_spill] sm:$0xff] }
 0xa4a   :  { %v2663_v39 = vmul.f32 %v6886_v9, %v8949_v35  ;;  %v2689_v43 = vadd.f32 %v5483_v45, %v2675_v54  ;;  %v2717_v54 = vrot.slane %v2708_v18, %v10688_v27 }
 0xa4b   :  { %v2678_v5 = vmul.f32 %v5482_v62, %v2664_v13 }
 0xa4c   :  { %v6888_v22 = vpop.eup %6887  ;;  %v2677_v11 = vmul.f32 %v5482_v62, %v2663_v39  ;;  %v2696_v6 = vpack.c.bf16 %v2689_v43, %v2688_v17 }
 0xa4d   :  { %v6890_v41 = vpop.eup %6889  ;;  %v2666_v48 = vmul.f32 %v6888_v22, %v8957_v28  ;;  %v9034_v28 = vld [vmem:[%s10424_s11 + $0x8] ss:$12 sps:$4 sm:$0xff]   ;;  %v2692_v14 = vadd.f32 %v5483_v45, %v2678_v5 }
 0xa4e   :  { %v2665_v35 = vmul.f32 %v6890_v41, %v8959_v25  ;;  %5490 = vmatmul.mubr.msk.bf16.vlgmr.msra.gmra.mrb[88].mxu1 %vm2562_vm3, %v2696_v6  ;;  %6218 = vmatprep.mubr.msk.bf16.mxu0 %vm2562_vm3, %v2696_v6  ;;  %v2691_v56 = vadd.f32 %v5483_v45, %v2677_v11 }
 0xa4f   :  { %3112 = vmatpush1.bf16.msra.mxu1 %v9013_v10  ;;  %2811 = vmatprep.mubr.bf16.mxu1 %v10579_v34  ;;  %v2680_v23 = vmul.f32 %v5482_v62, %v2666_v48 }
 0xa50   :  { %v6892_v25 = vpop.eup %6891  ;;  %v2697_v29 = vpack.c.bf16 %v2691_v56, %v2690_v49  ;;  %3113 = vmatprep.subr.bf16.mxu1 %v9018_v32  ;;  %v2679_v55 = vmul.f32 %v5482_v62, %v2665_v35 }
 0xa51   :  { %v2667_v15 = vmul.f32 %v6892_v25, %v8967_v16  ;;  %v9055_v16 = vld [vmem:[%s10424_s11 + $0x4c] ss:$12 sps:$4 sm:$0xff]   ;;  %v2694_v31 = vadd.f32 %v5483_v45, %v2680_v23 }
 0xa52   :  { %6219 = vmatmul.mubr.msk.bf16.vlgmr.msra.gmra.mrb[88].mxu0 %vm2562_vm3, %v2697_v29  ;;  %v2693_v21 = vadd.f32 %v5483_v45, %v2679_v55 }
 0xa53   :  { %3114 = vmatpush1.bf16.msra.mxu1 %v9028_v26  ;;  %v2681_v37 = vmul.f32 %v5482_v62, %v2667_v15  ;;  %6227 = vmatpush3.bf16.msra.mxu0 %v9034_v28  ;;  %v9168_v62 = vld [vmem:[%s10424_s11 + $0xb0] ss:$12 sps:$4 sm:$0xff]  }
 0xa54   :  { %v2698_v33 = vpack.c.bf16 %v2693_v21, %v2692_v14  ;;  %3115 = vmatprep.subr.bf16.mxu1 %v9040_v1  ;;  %6228 = vmatprep.subr.bf16.mxu0 %v10578_v40 }
 0xa55   :  { %v2695_v20 = vadd.f32 %v5483_v45, %v2681_v37  ;;  %v9216_v45 = vrot.slane %v2708_v18, %v10687_v53 }
 0xa56   :  { %5491 = vmatmul.mubr.msk.bf16.gmra.mrb[92].mxu1 %vm2562_vm3, %v2697_v29  ;;  %6222 = vmatprep.mubr.msk.bf16.mxu0 %vm2562_vm3, %v2698_v33 }
 0xa57   :  { %3116 = vmatpush1.bf16.msra.mxu1 %v9048_v8  ;;  %v2699_v59 = vpack.c.bf16 %v2695_v20, %v2694_v31  ;;  %2821 = vmatprep.mubr.bf16.mxu1 %v10579_v34 }
 0xa58   :  { %3117 = vmatprep.subr.bf16.mxu1 %v9055_v16  ;;  %6229 = vmatpush3.bf16.msra.mxu0 %v9061_v36 }
 0xa59   :  { %6230 = vmatprep.subr.bf16.mxu0 %v10578_v40 }
 0xa5a   :  { %6223 = vmatmul.mubr.msk.bf16.gmra.mrb[92].mxu0 %vm2562_vm3, %v2699_v59 }
 0xa5b   :  { %3118 = vmatpush1.bf16.msra.mxu1 %v9069_v0  ;;  %6242 = vmatprep.mubr.msk.bf16.mxu0 %vm7217_vm1, %v10578_v40 }
 0xa5c   :  { %3119 = vmatprep.subr.bf16.mxu1 %v9076_v38  ;;  %6231 = vmatpush3.bf16.msra.mxu0 %v9082_v47 }
 0xa5d   :  { %6232 = vmatprep.subr.bf16.mxu0 %v10578_v40 }
 0xa5e   :  { %5492 = vmatmul.mubr.msk.bf16.gmra.mrb[96].mxu1 %vm2562_vm3, %v2698_v33 }
 0xa5f   :  { %3120 = vmatpush1.bf16.msra.mxu1 %v9090_v46  ;;  %2831 = vmatprep.mubr.bf16.mxu1 %v10579_v34 }
 0xa60   :  { %3121 = vmatprep.subr.bf16.mxu1 %v9098_v3  ;;  %6233 = vmatpush3.bf16.msra.mxu0 %v9104_v44 }
 0xa61   :  { %6234 = vmatprep.subr.bf16.mxu0 %v10578_v40 }
 0xa63   :  { %3122 = vmatpush1.bf16.msra.mxu1 %v9112_v4 }
 0xa64   :  { %3123 = vmatprep.subr.bf16.mxu1 %v9119_v12  ;;  %6235 = vmatpush3.bf16.msra.mxu0 %v9125_v24 }
 0xa65   :  { %6236 = vmatprep.subr.bf16.mxu0 %v10578_v40 }
 0xa66   :  { %5493 = vmatmul.mubr.msk.bf16.gmra.mrb[100].mxu1 %vm2562_vm3, %v2699_v59 }
 0xa67   :  { %3124 = vmatpush1.bf16.msra.mxu1 %v9132_v51  ;;  %3143 = vmatprep.mubr.bf16.mxu1 %v10579_v34 }
 0xa68   :  { %3125 = vmatprep.subr.bf16.mxu1 %v9138_v57  ;;  %6237 = vmatpush3.bf16.msra.mxu0 %v9144_v60 }
 0xa69   :  { %6238 = vmatprep.subr.bf16.mxu0 %v10578_v40 }
 0xa6b   :  { %3126 = vmatpush1.bf16.msra.mxu1 %v9152_v61 }
 0xa6c   :  { %6239 = vmatpush3.bf16.msra.mxu0 %v9160_v58  ;;  %3218 = vmatprep.subr.bf16.mxu1 %v8995_v7 }
 0xa6d   :  { %6240 = vmatprep.subr.bf16.mxu0 %v10578_v40 }
 0xa6e   :  { %3144 = vmatmul.mubr.bf16.vlgmr.msra.gmra.mrb[104].mxu1 %v10579_v34 }
 0xa6f   :  { %3219 = vmatpush1.bf16.msra.mxu1 %v9013_v10  ;;  %3250 = vmatprep.mubr.bf16.mxu1 %v10579_v34 }
 0xa70   :  { %6241 = vmatpush3.bf16.msra.mxu0 %v9168_v62  ;;  %3220 = vmatprep.subr.bf16.mxu1 %v9018_v32 }
 0xa71   :  { %6246 = vmatprep.subr.bf16.mxu0 %v10578_v40 }
 0xa73   :  { %6243 = vmatmul.mubr.bf16.vlgmr.msra.gmra.mrb[96].mxu0 %v10579_v34  ;;  %3221 = vmatpush1.bf16.msra.mxu1 %v9028_v26 }
 0xa74   :  { %6247 = vmatpush3.bf16.msra.mxu0 %v9034_v28  ;;  %3222 = vmatprep.subr.bf16.mxu1 %v9040_v1 }
 0xa75   :  { %6248 = vmatprep.subr.bf16.mxu0 %v10578_v40  ;;  %6262 = vmatprep.mubr.msk.bf16.mxu0 %vm7217_vm1, %v10578_v40 }
 0xa77   :  { %3223 = vmatpush1.bf16.msra.mxu1 %v9048_v8 }
 0xa78   :  { %6249 = vmatpush3.bf16.msra.mxu0 %v9061_v36  ;;  %3224 = vmatprep.subr.bf16.mxu1 %v9055_v16 }
 0xa79   :  { %6250 = vmatprep.subr.bf16.mxu0 %v10578_v40 }
 0xa7b   :  { %3225 = vmatpush1.bf16.msra.mxu1 %v9069_v0 }
 0xa7c   :  { %6251 = vmatpush3.bf16.msra.mxu0 %v9082_v47  ;;  %3226 = vmatprep.subr.bf16.mxu1 %v9076_v38 }
 0xa7d   :  { %6252 = vmatprep.subr.bf16.mxu0 %v10578_v40 }
 0xa7f   :  { %3227 = vmatpush1.bf16.msra.mxu1 %v9090_v46 }
 0xa80   :  { %6253 = vmatpush3.bf16.msra.mxu0 %v9104_v44  ;;  %3228 = vmatprep.subr.bf16.mxu1 %v9098_v3 }
 0xa81   :  { %6254 = vmatprep.subr.bf16.mxu0 %v10578_v40 }
 0xa83   :  { %3229 = vmatpush1.bf16.msra.mxu1 %v9112_v4 }
 0xa84   :  { %6255 = vmatpush3.bf16.msra.mxu0 %v9125_v24  ;;  %3230 = vmatprep.subr.bf16.mxu1 %v9119_v12 }
 0xa85   :  { %6256 = vmatprep.subr.bf16.mxu0 %v10578_v40 }
 0xa87   :  { %3231 = vmatpush1.bf16.msra.mxu1 %v9132_v51 }
 0xa88   :  { %6257 = vmatpush3.bf16.msra.mxu0 %v9144_v60  ;;  %3232 = vmatprep.subr.bf16.mxu1 %v9138_v57 }
 0xa89   :  { %6258 = vmatprep.subr.bf16.mxu0 %v10578_v40 }
 0xa8b   :  { %3233 = vmatpush1.bf16.msra.mxu1 %v9152_v61 }
 0xa8c   :  { %6259 = vmatpush3.bf16.msra.mxu0 %v9160_v58  ;;  %3325 = vmatprep.subr.bf16.mxu1 %v8995_v7 }
 0xa8d   :  { %6260 = vmatprep.subr.bf16.mxu0 %v10578_v40 }
 0xa90   :  { %6261 = vmatpush3.bf16.msra.mxu0 %v9168_v62 }
 0xa91   :  { %6266 = vmatprep.subr.bf16.mxu0 %v10578_v40 }
 0xb21   :  { %v2803_v50 = vpop.f32.mrb[88].mxu1 }
 0xb22   :  { %v2805_v30 = vpop.f32.mrb[89].mxu1 }
 0xb23   :  { %v2807_v9 = vpop.f32.mrb[90].mxu1 }
 0xb24   :  { %v9219_v19 = vadd.f32 %v2807_v9, %v2713_v52  ;;  %v2809_v13 = vpop.f32.mrb[91].mxu1 }
 0xb25   :  { %v9221_v39 = vadd.f32 %v2809_v13, %v2717_v54  ;;  %v6220_v17 = vpop.f32.mrb[88].mxu0 }
 0xb26   :  { %v9224_v43 = vadd.f32 %v6220_v17, %v9216_v45  ;;  %v9226_v22 = vpop.f32.mrb[89].mxu0 }
 0xb27   :  { %v6221_v11 = vpop.f32.mrb[90].mxu0 }
 0xb28   :  { %v9229_v6 = vadd.f32 %v6221_v11, %v9216_v45  ;;  %v2879_v41 = vpop.f32.mrb[91].mxu0 }
 0xb29   :  { %v9232_v48 = vadd.f32 %v2879_v41, %v9216_v45  ;;  %v2813_v49 = vpop.f32.mrb[92].mxu1 }
 0xb2a   :  { %v9234_v35 = vadd.f32 %v2813_v49, %v2713_v52  ;;  %v2815_v56 = vpop.f32.mrb[93].mxu1 }
 0xb2b   :  { %v9236_v5 = vadd.f32 %v2815_v56, %v2717_v54  ;;  %v2817_v25 = vpop.f32.mrb[94].mxu1 }
 0xb2c   :  { %v9238_v29 = vadd.f32 %v2817_v25, %v2713_v52  ;;  %v2819_v55 = vpop.f32.mrb[95].mxu1 }
 0xb2d   :  { %v9240_v15 = vadd.f32 %v2819_v55, %v2717_v54  ;;  %v6224_v23 = vpop.f32.mrb[92].mxu0 }
 0xb2e   :  { %v9243_v14 = vadd.f32 %v6224_v23, %v9216_v45  ;;  %v2892_v21 = vpop.f32.mrb[93].mxu0 }
 0xb2f   :  { %v9246_v37 = vadd.f32 %v2892_v21, %v9216_v45  ;;  %v6225_v33 = vpop.f32.mrb[94].mxu0 }
 0xb30   :  { %10689 = vst [vmem:[#allocation22_spill] sm:$0xff] %v9243_v14  ;;  %v9249_v31 = vadd.f32 %v6225_v33, %v9216_v45  ;;  %v2895_v20 = vpop.f32.mrb[95].mxu0  ;;  %v2804_v14 = vadd.f32 %v2803_v50, %v2713_v52 }
 0xb31   :  { %10690 = vst [vmem:[#allocation24_spill] sm:$0xff] %v9246_v37  ;;  %v9252_v59 = vadd.f32 %v2895_v20, %v9216_v45  ;;  %v2823_v18 = vpop.f32.mrb[96].mxu1  ;;  %v2963_v20 = vld [vmem:[%s10428_s12] sm:$0x7] }
 0xb32   :  { %10691 = vst [vmem:[#allocation26_spill] sm:$0xff] %v9249_v31  ;;  %v9254_v9 = vadd.f32 %v2823_v18, %v2713_v52  ;;  %v2825_v13 = vpop.f32.mrb[97].mxu1 }
 0xb33   :  { %10692 = vst [vmem:[#allocation25_spill] sm:$0xff] %v9252_v59  ;;  %v9256_v17 = vadd.f32 %v2825_v13, %v2717_v54  ;;  %v2827_v11 = vpop.f32.mrb[98].mxu1 }
 0xb34   :  { %10693 = vst [vmem:[#allocation33_spill] sm:$0xff] %v9254_v9  ;;  %v9258_v41 = vadd.f32 %v2827_v11, %v2713_v52  ;;  %v2829_v49 = vpop.f32.mrb[99].mxu1  ;;  %v9274_v11 = vrot.slane %v2963_v20, %v10686_v2 }
 0xb35   :  { %10694 = vst [vmem:[#allocation34_spill] sm:$0xff] %v9256_v17  ;;  %v9260_v56 = vadd.f32 %v2829_v49, %v2717_v54  ;;  %v9277_v49 = vrot.slane %v2963_v20, %v10688_v27 }
 0xb36   :  { %10695 = vst [vmem:[#allocation45_spill] sm:$0xff] %v9258_v41 }
 0xb37   :  { %10696 = vst [vmem:[#allocation68_spill] sm:$0xff] %v9260_v56 }
 0xb39   :  { %v2833_v25 = vpop.f32.mrb[100].mxu1 }
 0xb3a   :  { %v9262_v55 = vadd.f32 %v2833_v25, %v2713_v52  ;;  %v2835_v23 = vpop.f32.mrb[101].mxu1 }
 0xb3b   :  { %v9264_v21 = vadd.f32 %v2835_v23, %v2717_v54  ;;  %v2837_v33 = vpop.f32.mrb[102].mxu1 }
 0xb3c   :  { %10697 = vst [vmem:[#allocation70_spill] sm:$0xff] %v9262_v55  ;;  %v9269_v18 = vadd.f32 %v2837_v33, %v2713_v52  ;;  %v2839_v13 = vpop.f32.mrb[103].mxu1  ;;  %v2806_v55 = vadd.f32 %v2805_v30, %v2717_v54  ;;  %v9282_v52 = vrot.slane %v2963_v20, %v10687_v53 }
 0xb3d   :  { %10698 = vst [vmem:[#allocation71_spill] sm:$0xff] %v9264_v21  ;;  %v9271_v31 = vadd.f32 %v2839_v13, %v2717_v54 }
 0xb3e   :  { %10699 = vst [vmem:[#allocation38_spill] sm:$0xff] %v9269_v18 }
 0xb3f   :  { %10700 = vst [vmem:[#allocation40_spill] sm:$0xff] %v9271_v31 }
 0xb41   :  { %v3145_v25 = vpop.f32.mrb[104].mxu1 }
 0xb42   :  { %v3146_v23 = vadd.f32 %v3145_v25, %v9274_v11  ;;  %v3147_v21 = vpop.f32.mrb[105].mxu1 }
 0xb43   :  { %v3148_v59 = vadd.f32 %v3147_v21, %v9277_v49  ;;  %v3149_v56 = vpop.f32.mrb[106].mxu1 }
 0xb44   :  { %v3192_v33 = vadd.f32 %v3146_v23, %v2804_v14  ;;  %v3150_v18 = vpop.f32.mrb[107].mxu1 }
 0xb45   :  { %v3199_v41 = vadd.f32 %v3148_v59, %v2806_v55  ;;  %v2877_v59 = vadd.f32 %v9226_v22, %v9216_v45 }
 0xb46   :  { %v5522_v13 = vmul.f32 -1.442695, %v3192_v33  ;;  %v3186_v31 = vpop.f32.mrb[96].mxu0 }
 0xb47   :  { %v6244_v37 = vpop.f32.mrb[97].mxu0  ;;  %v5523_v27 = vmul.f32 -1.442695, %v3199_v41  ;;  %v3187_v14 = vadd.f32 %v3186_v31, %v9282_v52 }
 0xb48   :  { %6893 = vpow2.f32 %v5522_v13  ;;  %v3189_v2 = vpop.f32.mrb[98].mxu0 }
 0xb49   :  { %v6245_v17 = vpop.f32.mrb[99].mxu0  ;;  %6895 = vpow2.f32 %v5523_v27 }
 0xb52   :  { %v6894_v9 = vpop.eup %6893 }
 0xb53   :  { %v3196_v50 = vadd.f32 1.0, %v6894_v9  ;;  %v6896_v30 = vpop.eup %6895 }
 0xb54   :  { %v3203_v54 = vadd.f32 1.0, %v6896_v30 }
 0xb55   :  { %6897 = vrcp.f32 %v3196_v50 }
 0xb56   :  { %6899 = vrcp.f32 %v3203_v54 }
 0xb5f   :  { %v6898_v56 = vpop.eup %6897 }
 0xb60   :  { %v3206_v37 = vmul.f32 %v6898_v56, %v3187_v14  ;;  %v6900_v17 = vpop.eup %6899 }
 0xb61   :  { %v3209_v27 = vsub.f32 1.0, %v6900_v17  ;;  %v3211_v55 = vmul.f32 0.0, %v6900_v17 }
 0xb62   :  { %v3207_v2 = vadd.f32 %v3206_v37, %v2877_v59 }
 0xb64   :  { %6901 = vtanh.f32 %v3207_v2 }
 0xb6e   :  { %v6902_v41 = vpop.eup %6901 }
 0xb6f   :  { %v3210_v9 = vmul.f32 %v6902_v41, %v3209_v27 }
 0xb71   :  { %v9287_v21 = vadd.f32 %v3211_v55, %v3210_v9 }
 0xb73   :  { %v3217_v20 = vpack.c.bf16 %v9287_v21, %v9287_v21  ;;  %v9293_v31 = vadd.f32 %v9287_v21, %v8916_v63 }
 0xb75   :  { %3251 = vmatmul.mubr.bf16.vlgmr.msra.gmra.mrb[108].mxu1 %v3217_v20  ;;  %6263 = vmatmul.mubr.bf16.vlgmr.msra.gmra.mrb[100].mxu0 %v3217_v20  ;;  %v3981_v45 = vsel %vm2562_vm3, %v9293_v31, 0.0 }
 0xb76   :  { %3982 = vadd.xlane.f32.xlu1 %v3981_v45  ;;  %3326 = vmatpush1.bf16.msra.mxu1 %v9013_v10 }
 0xb77   :  { %6267 = vmatpush3.bf16.msra.mxu0 %v9034_v28  ;;  %3327 = vmatprep.subr.bf16.mxu1 %v9018_v32 }
 0xb78   :  { %6268 = vmatprep.subr.bf16.mxu0 %v10578_v40  ;;  %3357 = vmatprep.mubr.bf16.mxu1 %v10579_v34 }
 0xb79   :  { %6282 = vmatprep.mubr.msk.bf16.mxu0 %vm7217_vm1, %v10578_v40 }
 0xb7a   :  { %3328 = vmatpush1.bf16.msra.mxu1 %v9028_v26 }
 0xb7b   :  { %6269 = vmatpush3.bf16.msra.mxu0 %v9061_v36  ;;  %3329 = vmatprep.subr.bf16.mxu1 %v9040_v1 }
 0xb7c   :  { %6270 = vmatprep.subr.bf16.mxu0 %v10578_v40 }
 0xb7e   :  { %3330 = vmatpush1.bf16.msra.mxu1 %v9048_v8 }
 0xb7f   :  { %6271 = vmatpush3.bf16.msra.mxu0 %v9082_v47  ;;  %3331 = vmatprep.subr.bf16.mxu1 %v9055_v16 }
 0xb80   :  { %6272 = vmatprep.subr.bf16.mxu0 %v10578_v40 }
 0xb82   :  { %3332 = vmatpush1.bf16.msra.mxu1 %v9069_v0 }
 0xb83   :  { %6273 = vmatpush3.bf16.msra.mxu0 %v9104_v44  ;;  %3333 = vmatprep.subr.bf16.mxu1 %v9076_v38 }
 0xb84   :  { %6274 = vmatprep.subr.bf16.mxu0 %v10578_v40 }
 0xb86   :  { %3334 = vmatpush1.bf16.msra.mxu1 %v9090_v46 }
 0xb87   :  { %6275 = vmatpush3.bf16.msra.mxu0 %v9125_v24  ;;  %3335 = vmatprep.subr.bf16.mxu1 %v9098_v3 }
 0xb88   :  { %6276 = vmatprep.subr.bf16.mxu0 %v10578_v40 }
 0xb8a   :  { %3336 = vmatpush1.bf16.msra.mxu1 %v9112_v4 }
 0xb8b   :  { %6277 = vmatpush3.bf16.msra.mxu0 %v9144_v60  ;;  %3337 = vmatprep.subr.bf16.mxu1 %v9119_v12 }
 0xb8c   :  { %6278 = vmatprep.subr.bf16.mxu0 %v10578_v40 }
 0xb8e   :  { %3338 = vmatpush1.bf16.msra.mxu1 %v9132_v51 }
 0xb8f   :  { %6279 = vmatpush3.bf16.msra.mxu0 %v9160_v58  ;;  %3339 = vmatprep.subr.bf16.mxu1 %v9138_v57 }
 0xb90   :  { %6280 = vmatprep.subr.bf16.mxu0 %v10578_v40 }
 0xb92   :  { %3340 = vmatpush1.bf16.msra.mxu1 %v9152_v61 }
 0xb93   :  { %6281 = vmatpush3.bf16.msra.mxu0 %v9168_v62  ;;  %3432 = vmatprep.subr.bf16.mxu1 %v8995_v7 }
 0xb94   :  { %6286 = vmatprep.subr.bf16.mxu0 %v10578_v40 }
 0xc48   :  { %v3252_v63 = vpop.f32.mrb[108].mxu1  ;;  %v3293_v22 = vpop.f32.mrb[100].mxu0 }
 0xc49   :  { %v3253_v18 = vadd.f32 %v3252_v63, %v9274_v11  ;;  %v3254_v25 = vpop.f32.mrb[109].mxu1  ;;  %v6264_v23 = vpop.f32.mrb[101].mxu0  ;;  %v3294_v9 = vadd.f32 %v3293_v22, %v9282_v52 }
 0xc4a   :  { %v3255_v33 = vadd.f32 %v3254_v25, %v9277_v49  ;;  %v3256_v13 = vpop.f32.mrb[110].mxu1  ;;  %v3296_v50 = vpop.f32.mrb[102].mxu0 }
 0xc4b   :  { %v3299_v30 = vadd.f32 %v3253_v18, %v9219_v19  ;;  %v3257_v54 = vpop.f32.mrb[111].mxu1  ;;  %v6265_v14 = vpop.f32.mrb[103].mxu0 }
 0xc4c   :  { %v3306_v56 = vadd.f32 %v3255_v33, %v9221_v39 }
 0xc4d   :  { %v5524_v59 = vmul.f32 -1.442695, %v3299_v30 }
 0xc4e   :  { %v5525_v37 = vmul.f32 -1.442695, %v3306_v56 }
 0xc4f   :  { %6903 = vpow2.f32 %v5524_v59 }
 0xc50   :  { %6905 = vpow2.f32 %v5525_v37 }
 0xc59   :  { %v6904_v2 = vpop.eup %6903 }
 0xc5a   :  { %v3303_v17 = vadd.f32 1.0, %v6904_v2  ;;  %v6906_v27 = vpop.eup %6905 }
 0xc5b   :  { %v3310_v41 = vadd.f32 1.0, %v6906_v27 }
 0xc5c   :  { %6907 = vrcp.f32 %v3303_v17 }
 0xc5d   :  { %6909 = vrcp.f32 %v3310_v41 }
 0xc66   :  { %v6908_v55 = vpop.eup %6907 }
 0xc67   :  { %v3313_v20 = vmul.f32 %v6908_v55, %v3294_v9  ;;  %v6910_v45 = vpop.eup %6909 }
 0xc68   :  { %v3316_v63 = vsub.f32 1.0, %v6910_v45  ;;  %v3318_v25 = vmul.f32 %v6910_v45, %v9287_v21 }
 0xc69   :  { %v3314_v19 = vadd.f32 %v3313_v20, %v9232_v48 }
 0xc6b   :  { %6911 = vtanh.f32 %v3314_v19 }
 0xc75   :  { %v6912_v39 = vpop.eup %6911 }
 0xc76   :  { %v3317_v18 = vmul.f32 %v6912_v39, %v3316_v63 }
 0xc78   :  { %v9339_v23 = vadd.f32 %v3318_v25, %v3317_v18 }
 0xc7a   :  { %v3324_v33 = vpack.c.bf16 %v9339_v23, %v9339_v23  ;;  %v9345_v22 = vadd.f32 %v9339_v23, %v8921_v42 }
 0xc7c   :  { %3358 = vmatmul.mubr.bf16.vlgmr.msra.gmra.mrb[112].mxu1 %v3324_v33  ;;  %6283 = vmatmul.mubr.bf16.vlgmr.msra.gmra.mrb[104].mxu0 %v3324_v33  ;;  %v3984_v48 = vsel %vm2562_vm3, %v9345_v22, 0.0 }
 0xc7d   :  { %3985 = vadd.xlane.f32.xlu0 %v3984_v48  ;;  %3433 = vmatpush1.bf16.msra.mxu1 %v9013_v10 }
 0xc7e   :  { %6287 = vmatpush3.bf16.msra.mxu0 %v9034_v28  ;;  %3434 = vmatprep.subr.bf16.mxu1 %v9018_v32 }
 0xc7f   :  { %6288 = vmatprep.subr.bf16.mxu0 %v10578_v40  ;;  %3464 = vmatprep.mubr.bf16.mxu1 %v10579_v34 }
 0xc80   :  { %6302 = vmatprep.mubr.msk.bf16.mxu0 %vm7217_vm1, %v10578_v40 }
 0xc81   :  { %3435 = vmatpush1.bf16.msra.mxu1 %v9028_v26 }
 0xc82   :  { %6289 = vmatpush3.bf16.msra.mxu0 %v9061_v36  ;;  %3436 = vmatprep.subr.bf16.mxu1 %v9040_v1 }
 0xc83   :  { %6290 = vmatprep.subr.bf16.mxu0 %v10578_v40 }
 0xc85   :  { %3437 = vmatpush1.bf16.msra.mxu1 %v9048_v8 }
 0xc86   :  { %6291 = vmatpush3.bf16.msra.mxu0 %v9082_v47  ;;  %3438 = vmatprep.subr.bf16.mxu1 %v9055_v16 }
 0xc87   :  { %6292 = vmatprep.subr.bf16.mxu0 %v10578_v40 }
 0xc89   :  { %3439 = vmatpush1.bf16.msra.mxu1 %v9069_v0 }
 0xc8a   :  { %6293 = vmatpush3.bf16.msra.mxu0 %v9104_v44  ;;  %3440 = vmatprep.subr.bf16.mxu1 %v9076_v38 }
 0xc8b   :  { %6294 = vmatprep.subr.bf16.mxu0 %v10578_v40 }
 0xc8d   :  { %3441 = vmatpush1.bf16.msra.mxu1 %v9090_v46 }
 0xc8e   :  { %6295 = vmatpush3.bf16.msra.mxu0 %v9125_v24  ;;  %3442 = vmatprep.subr.bf16.mxu1 %v9098_v3 }
 0xc8f   :  { %6296 = vmatprep.subr.bf16.mxu0 %v10578_v40 }
 0xc91   :  { %3443 = vmatpush1.bf16.msra.mxu1 %v9112_v4 }
 0xc92   :  { %6297 = vmatpush3.bf16.msra.mxu0 %v9144_v60  ;;  %3444 = vmatprep.subr.bf16.mxu1 %v9119_v12 }
 0xc93   :  { %6298 = vmatprep.subr.bf16.mxu0 %v10578_v40 }
 0xc95   :  { %3445 = vmatpush1.bf16.msra.mxu1 %v9132_v51 }
 0xc96   :  { %6299 = vmatpush3.bf16.msra.mxu0 %v9160_v58  ;;  %3446 = vmatprep.subr.bf16.mxu1 %v9138_v57 }
 0xc97   :  { %6300 = vmatprep.subr.bf16.mxu0 %v10578_v40 }
 0xc99   :  { %3447 = vmatpush1.bf16.msra.mxu1 %v9152_v61 }
 0xc9a   :  { %6301 = vmatpush3.bf16.msra.mxu0 %v9168_v62  ;;  %3539 = vmatprep.subr.bf16.mxu1 %v8995_v7 }
 0xc9b   :  { %6306 = vmatprep.subr.bf16.mxu0 %v10578_v40 }
 0xd4f   :  { %v3359_v42 = vpop.f32.mrb[112].mxu1  ;;  %v3400_v21 = vpop.f32.mrb[104].mxu0 }
 0xd50   :  { %v3360_v13 = vadd.f32 %v3359_v42, %v9274_v11  ;;  %v3361_v50 = vpop.f32.mrb[113].mxu1  ;;  %v6284_v30 = vpop.f32.mrb[105].mxu0  ;;  %v3401_v45 = vadd.f32 %v3400_v21, %v9282_v52 }
 0xd51   :  { %v3362_v54 = vadd.f32 %v3361_v50, %v9277_v49  ;;  %v3363_v14 = vpop.f32.mrb[114].mxu1  ;;  %v3403_v56 = vpop.f32.mrb[106].mxu0  ;;  %v7161_v50 = vld [vmem:[#allocation5 + $0x10] sm:$0xff] }
 0xd52   :  { %v3406_v59 = vadd.f32 %v3360_v13, %v9234_v35  ;;  %v3364_v37 = vpop.f32.mrb[115].mxu1  ;;  %v6285_v2 = vpop.f32.mrb[107].mxu0 }
 0xd53   :  { %v3413_v17 = vadd.f32 %v3362_v54, %v9236_v5 }
 0xd54   :  { %v5526_v27 = vmul.f32 -1.442695, %v3406_v59 }
 0xd55   :  { %v5527_v41 = vmul.f32 -1.442695, %v3413_v17 }
 0xd56   :  { %6913 = vpow2.f32 %v5526_v27 }
 0xd57   :  { %6915 = vpow2.f32 %v5527_v41 }
 0xd60   :  { %v6914_v9 = vpop.eup %6913 }
 0xd61   :  { %v3410_v55 = vadd.f32 1.0, %v6914_v9  ;;  %v6916_v20 = vpop.eup %6915 }
 0xd62   :  { %v3417_v19 = vadd.f32 1.0, %v6916_v20 }
 0xd63   :  { %6917 = vrcp.f32 %v3410_v55 }
 0xd64   :  { %6919 = vrcp.f32 %v3417_v19 }
 0xd6d   :  { %v6918_v63 = vpop.eup %6917 }
 0xd6e   :  { %v3420_v39 = vmul.f32 %v6918_v63, %v3401_v45  ;;  %v6920_v18 = vpop.eup %6919 }
 0xd6f   :  { %v3423_v25 = vsub.f32 1.0, %v6920_v18  ;;  %v3425_v48 = vmul.f32 %v6920_v18, %v9339_v23 }
 0xd70   :  { %v3421_v35 = vadd.f32 %v3420_v39, %v9224_v43 }
 0xd72   :  { %6921 = vtanh.f32 %v3421_v35 }
 0xd7c   :  { %v6922_v5 = vpop.eup %6921 }
 0xd7d   :  { %v3424_v33 = vmul.f32 %v6922_v5, %v3423_v25 }
 0xd7f   :  { %v9391_v42 = vadd.f32 %v3425_v48, %v3424_v33 }
 0xd81   :  { %v3431_v13 = vpack.c.bf16 %v9391_v42, %v9391_v42  ;;  %v9396_v21 = vadd.f32 %v7161_v50, %v9391_v42 }
 0xd83   :  { %3465 = vmatmul.mubr.bf16.vlgmr.msra.gmra.mrb[116].mxu1 %v3431_v13  ;;  %6303 = vmatmul.mubr.bf16.vlgmr.msra.gmra.mrb[108].mxu0 %v3431_v13  ;;  %v3987_v43 = vsel %vm2562_vm3, %v9396_v21, 0.0 }
 0xd84   :  { %3988 = vadd.xlane.f32.xlu1 %v3987_v43  ;;  %3540 = vmatpush1.bf16.msra.mxu1 %v9013_v10  ;;  %v7162_v43 = vld [vmem:[#allocation5 + $0x18] sm:$0xff] }
 0xd85   :  { %6307 = vmatpush3.bf16.msra.mxu0 %v9034_v28  ;;  %3541 = vmatprep.subr.bf16.mxu1 %v9018_v32 }
 0xd86   :  { %6308 = vmatprep.subr.bf16.mxu0 %v10578_v40  ;;  %3571 = vmatprep.mubr.bf16.mxu1 %v10579_v34 }
 0xd87   :  { %6322 = vmatprep.mubr.msk.bf16.mxu0 %vm7217_vm1, %v10578_v40 }
 0xd88   :  { %3542 = vmatpush1.bf16.msra.mxu1 %v9028_v26 }
 0xd89   :  { %6309 = vmatpush3.bf16.msra.mxu0 %v9061_v36  ;;  %3543 = vmatprep.subr.bf16.mxu1 %v9040_v1 }
 0xd8a   :  { %6310 = vmatprep.subr.bf16.mxu0 %v10578_v40 }
 0xd8c   :  { %3544 = vmatpush1.bf16.msra.mxu1 %v9048_v8 }
 0xd8d   :  { %6311 = vmatpush3.bf16.msra.mxu0 %v9082_v47  ;;  %3545 = vmatprep.subr.bf16.mxu1 %v9055_v16 }
 0xd8e   :  { %6312 = vmatprep.subr.bf16.mxu0 %v10578_v40 }
 0xd90   :  { %3546 = vmatpush1.bf16.msra.mxu1 %v9069_v0 }
 0xd91   :  { %6313 = vmatpush3.bf16.msra.mxu0 %v9104_v44  ;;  %3547 = vmatprep.subr.bf16.mxu1 %v9076_v38 }
 0xd92   :  { %6314 = vmatprep.subr.bf16.mxu0 %v10578_v40 }
 0xd94   :  { %3548 = vmatpush1.bf16.msra.mxu1 %v9090_v46 }
 0xd95   :  { %6315 = vmatpush3.bf16.msra.mxu0 %v9125_v24  ;;  %3549 = vmatprep.subr.bf16.mxu1 %v9098_v3 }
 0xd96   :  { %6316 = vmatprep.subr.bf16.mxu0 %v10578_v40 }
 0xd98   :  { %3550 = vmatpush1.bf16.msra.mxu1 %v9112_v4 }
 0xd99   :  { %6317 = vmatpush3.bf16.msra.mxu0 %v9144_v60  ;;  %3551 = vmatprep.subr.bf16.mxu1 %v9119_v12 }
 0xd9a   :  { %6318 = vmatprep.subr.bf16.mxu0 %v10578_v40 }
 0xd9c   :  { %3552 = vmatpush1.bf16.msra.mxu1 %v9132_v51 }
 0xd9d   :  { %6319 = vmatpush3.bf16.msra.mxu0 %v9160_v58  ;;  %3553 = vmatprep.subr.bf16.mxu1 %v9138_v57 }
 0xd9e   :  { %6320 = vmatprep.subr.bf16.mxu0 %v10578_v40 }
 0xda0   :  { %3554 = vmatpush1.bf16.msra.mxu1 %v9152_v61 }
 0xda1   :  { %6321 = vmatpush3.bf16.msra.mxu0 %v9168_v62  ;;  %3646 = vmatprep.subr.bf16.mxu1 %v8995_v7 }
 0xda2   :  { %6326 = vmatprep.subr.bf16.mxu0 %v10578_v40 }
 0xe56   :  { %v3466_v23 = vpop.f32.mrb[116].mxu1  ;;  %v3507_v30 = vpop.f32.mrb[108].mxu0 }
 0xe57   :  { %v3467_v54 = vadd.f32 %v3466_v23, %v9274_v11  ;;  %v3468_v14 = vpop.f32.mrb[117].mxu1  ;;  %v6304_v56 = vpop.f32.mrb[109].mxu0  ;;  %v3508_v39 = vadd.f32 %v3507_v30, %v9282_v52 }
 0xe58   :  { %v3469_v59 = vadd.f32 %v3468_v14, %v9277_v49  ;;  %v3470_v37 = vpop.f32.mrb[118].mxu1  ;;  %v3510_v2 = vpop.f32.mrb[110].mxu0 }
 0xe59   :  { %v3513_v17 = vadd.f32 %v3467_v54, %v9238_v29  ;;  %v3471_v27 = vpop.f32.mrb[119].mxu1  ;;  %v6305_v41 = vpop.f32.mrb[111].mxu0  ;;  %v10701_v2 = vld [vmem:[#allocation33_spill] sm:$0xff] }
 0xe5a   :  { %v3520_v9 = vadd.f32 %v3469_v59, %v9240_v15 }
 0xe5b   :  { %v5528_v55 = vmul.f32 -1.442695, %v3513_v17 }
 0xe5c   :  { %v5529_v7 = vmul.f32 -1.442695, %v3520_v9  ;;  %v10702_v9 = vld [vmem:[#allocation34_spill] sm:$0xff] }
 0xe5d   :  { %6923 = vpow2.f32 %v5528_v55 }
 0xe5e   :  { %6925 = vpow2.f32 %v5529_v7 }
 0xe67   :  { %v6924_v20 = vpop.eup %6923 }
 0xe68   :  { %v3517_v19 = vadd.f32 1.0, %v6924_v20  ;;  %v6926_v45 = vpop.eup %6925 }
 0xe69   :  { %v3524_v63 = vadd.f32 1.0, %v6926_v45 }
 0xe6a   :  { %6927 = vrcp.f32 %v3517_v19 }
 0xe6b   :  { %6929 = vrcp.f32 %v3524_v63 }
 0xe74   :  { %v6928_v35 = vpop.eup %6927 }
 0xe75   :  { %v3527_v18 = vmul.f32 %v6928_v35, %v3508_v39  ;;  %v6930_v25 = vpop.eup %6929 }
 0xe76   :  { %v3530_v5 = vsub.f32 1.0, %v6930_v25  ;;  %v3532_v48 = vmul.f32 %v6930_v25, %v9391_v42  ;;  %v10703_v25 = vld [vmem:[#allocation24_spill] sm:$0xff] }
 0xe77   :  { %v3528_v29 = vadd.f32 %v3527_v18, %v9229_v6 }
 0xe79   :  { %6931 = vtanh.f32 %v3528_v29 }
 0xe83   :  { %v6932_v15 = vpop.eup %6931 }
 0xe84   :  { %v3531_v33 = vmul.f32 %v6932_v15, %v3530_v5 }
 0xe86   :  { %v9442_v13 = vadd.f32 %v3532_v48, %v3531_v33 }
 0xe88   :  { %v3538_v50 = vpack.c.bf16 %v9442_v13, %v9442_v13  ;;  %v9447_v23 = vadd.f32 %v7162_v43, %v9442_v13 }
 0xe8a   :  { %3572 = vmatmul.mubr.bf16.vlgmr.msra.gmra.mrb[120].mxu1 %v3538_v50  ;;  %6323 = vmatmul.mubr.bf16.vlgmr.msra.gmra.mrb[112].mxu0 %v3538_v50  ;;  %v3990_v6 = vsel %vm2562_vm3, %v9447_v23, 0.0 }
 0xe8b   :  { %3991 = vadd.xlane.f32.xlu0 %v3990_v6  ;;  %3647 = vmatpush1.bf16.msra.mxu1 %v9013_v10  ;;  %v9487_v10 = vld [vmem:[%s10424_s11 + $0x4] ss:$12 sps:$4 sm:$0xff]  }
 0xe8c   :  { %6327 = vmatpush3.bf16.msra.mxu0 %v9034_v28  ;;  %3648 = vmatprep.subr.bf16.mxu1 %v9018_v32 }
 0xe8d   :  { %6328 = vmatprep.subr.bf16.mxu0 %v10578_v40  ;;  %3678 = vmatprep.mubr.bf16.mxu1 %v10579_v34 }
 0xe8e   :  { %6342 = vmatprep.mubr.msk.bf16.mxu0 %vm7217_vm1, %v10578_v40 }
 0xe8f   :  { %3649 = vmatpush1.bf16.msra.mxu1 %v9028_v26 }
 0xe90   :  { %6329 = vmatpush3.bf16.msra.mxu0 %v9061_v36  ;;  %3650 = vmatprep.subr.bf16.mxu1 %v9040_v1 }
 0xe91   :  { %6330 = vmatprep.subr.bf16.mxu0 %v10578_v40 }
 0xe93   :  { %3651 = vmatpush1.bf16.msra.mxu1 %v9048_v8 }
 0xe94   :  { %6331 = vmatpush3.bf16.msra.mxu0 %v9082_v47  ;;  %3652 = vmatprep.subr.bf16.mxu1 %v9055_v16 }
 0xe95   :  { %6332 = vmatprep.subr.bf16.mxu0 %v10578_v40 }
 0xe97   :  { %3653 = vmatpush1.bf16.msra.mxu1 %v9069_v0 }
 0xe98   :  { %6333 = vmatpush3.bf16.msra.mxu0 %v9104_v44  ;;  %3654 = vmatprep.subr.bf16.mxu1 %v9076_v38 }
 0xe99   :  { %6334 = vmatprep.subr.bf16.mxu0 %v10578_v40 }
 0xe9b   :  { %3655 = vmatpush1.bf16.msra.mxu1 %v9090_v46 }
 0xe9c   :  { %6335 = vmatpush3.bf16.msra.mxu0 %v9125_v24  ;;  %3656 = vmatprep.subr.bf16.mxu1 %v9098_v3 }
 0xe9d   :  { %6336 = vmatprep.subr.bf16.mxu0 %v10578_v40 }
 0xe9f   :  { %3657 = vmatpush1.bf16.msra.mxu1 %v9112_v4 }
 0xea0   :  { %6337 = vmatpush3.bf16.msra.mxu0 %v9144_v60  ;;  %3658 = vmatprep.subr.bf16.mxu1 %v9119_v12 }
 0xea1   :  { %6338 = vmatprep.subr.bf16.mxu0 %v10578_v40 }
 0xea3   :  { %3659 = vmatpush1.bf16.msra.mxu1 %v9132_v51 }
 0xea4   :  { %6339 = vmatpush3.bf16.msra.mxu0 %v9160_v58  ;;  %3660 = vmatprep.subr.bf16.mxu1 %v9138_v57 }
 0xea5   :  { %6340 = vmatprep.subr.bf16.mxu0 %v10578_v40 }
 0xea7   :  { %3661 = vmatpush1.bf16.msra.mxu1 %v9152_v61 }
 0xea8   :  { %6341 = vmatpush3.bf16.msra.mxu0 %v9168_v62  ;;  %3753 = vmatprep.subr.bf16.mxu1 %v9487_v10 }
 0xea9   :  { %6346 = vmatprep.subr.bf16.mxu0 %v10578_v40 }
 0xf5d   :  { %v3573_v32 = vpop.f32.mrb[120].mxu1  ;;  %v3614_v42 = vpop.f32.mrb[112].mxu0 }
 0xf5e   :  { %v3574_v30 = vadd.f32 %v3573_v32, %v9274_v11  ;;  %v3575_v54 = vpop.f32.mrb[121].mxu1  ;;  %v6324_v14 = vpop.f32.mrb[113].mxu0  ;;  %v3615_v35 = vadd.f32 %v3614_v42, %v9282_v52 }
 0xf5f   :  { %v3576_v56 = vadd.f32 %v3575_v54, %v9277_v49  ;;  %v3577_v59 = vpop.f32.mrb[122].mxu1  ;;  %v3617_v37 = vpop.f32.mrb[114].mxu0  ;;  %v9510_v14 = vld [vmem:[%s10424_s11] ss:$12 sps:$4 sm:$0xff]  }
 0xf60   :  { %v3620_v17 = vadd.f32 %v3574_v30, %v10701_v2  ;;  %v3578_v27 = vpop.f32.mrb[123].mxu1  ;;  %v6325_v41 = vpop.f32.mrb[115].mxu0  ;;  %v7164_v30 = vld [vmem:[#allocation5 + $0x20] sm:$0xff] }
 0xf61   :  { %v3627_v55 = vadd.f32 %v3576_v56, %v10702_v9  ;;  %v10706_v59 = vld [vmem:[#allocation25_spill] sm:$0xff] }
 0xf62   :  { %v5530_v7 = vmul.f32 -1.442695, %v3620_v17 }
 0xf63   :  { %v5531_v20 = vmul.f32 -1.442695, %v3627_v55 }
 0xf64   :  { %6933 = vpow2.f32 %v5530_v7 }
 0xf65   :  { %6935 = vpow2.f32 %v5531_v20  ;;  %v7167_v20 = vld [vmem:[#allocation5 + $0x28] sm:$0xff] }
 0xf6e   :  { %v6934_v19 = vpop.eup %6933 }
 0xf6f   :  { %v3624_v45 = vadd.f32 1.0, %v6934_v19  ;;  %v6936_v63 = vpop.eup %6935 }
 0xf70   :  { %v3631_v39 = vadd.f32 1.0, %v6936_v63  ;;  %v7168_v63 = vld [vmem:[%s10424_s11 + $0x8] ss:$12 sps:$4 sm:$0xff]  }
 0xf71   :  { %6937 = vrcp.f32 %v3624_v45 }
 0xf72   :  { %6939 = vrcp.f32 %v3631_v39  ;;  %v7169_v39 = vld [vmem:[%s10424_s11 + $0x18] ss:$12 sps:$4 sm:$0xff]  }
 0xf7b   :  { %v6938_v18 = vpop.eup %6937 }
 0xf7c   :  { %v3634_v29 = vmul.f32 %v6938_v18, %v3615_v35  ;;  %v6940_v15 = vpop.eup %6939  ;;  %v7170_v35 = vld [vmem:[%s10424_s11 + $0x20] ss:$12 sps:$4 sm:$0xff]  }
 0xf7d   :  { %v3637_v33 = vsub.f32 1.0, %v6940_v15  ;;  %v3639_v43 = vmul.f32 %v6940_v15, %v9442_v13  ;;  %v9517_v13 = vld [vmem:[%s10424_s11 + $0x1c] ss:$12 sps:$4 sm:$0xff]   ;;  %v7171_v18 = vld [vmem:[%s10424_s11 + $0x34] ss:$12 sps:$4 sm:$0xff]  }
 0xf7e   :  { %v3635_v5 = vadd.f32 %v3634_v29, %v10703_v25  ;;  %v7172_v29 = vld [vmem:[%s10424_s11 + $0x30] ss:$12 sps:$4 sm:$0xff]   ;;  %v7173_v25 = vld [vmem:[%s10424_s11 + $0x38] ss:$12 sps:$4 sm:$0xff]   ;;  %v7175_v15 = vld [vmem:[%s10424_s11 + $0x48] ss:$12 sps:$4 sm:$0xff]  }
 0xf80   :  { %6941 = vtanh.f32 %v3635_v5  ;;  %v7174_v5 = vld [vmem:[%s10424_s11 + $0x4c] ss:$12 sps:$4 sm:$0xff]  }
 0xf8a   :  { %v6942_v48 = vpop.eup %6941 }
 0xf8b   :  { %v3638_v50 = vmul.f32 %v6942_v48, %v3637_v33  ;;  %v7176_v33 = vld [vmem:[%s10424_s11 + $0x50] ss:$12 sps:$4 sm:$0xff]  }
 0xf8c   :  { %v7177_v48 = vld [vmem:[%s10424_s11 + $0x64] ss:$12 sps:$4 sm:$0xff]  }
 0xf8d   :  { %v9498_v6 = vadd.f32 %v3639_v43, %v3638_v50  ;;  %v7178_v50 = vld [vmem:[%s10424_s11 + $0x60] ss:$12 sps:$4 sm:$0xff]   ;;  %v7179_v43 = vld [vmem:[%s10424_s11 + $0x68] ss:$12 sps:$4 sm:$0xff]  }
 0xf8f   :  { %v3645_v32 = vpack.c.bf16 %v9498_v6, %v9498_v6  ;;  %v9503_v42 = vadd.f32 %v7164_v30, %v9498_v6  ;;  %v7182_v30 = vld [vmem:[%s10424_s11 + $0x80] ss:$12 sps:$4 sm:$0xff]  }
 0xf91   :  { %3679 = vmatmul.mubr.bf16.vlgmr.msra.gmra.mrb[124].mxu1 %v3645_v32  ;;  %6343 = vmatmul.mubr.bf16.vlgmr.msra.gmra.mrb[116].mxu0 %v3645_v32  ;;  %v3993_v54 = vsel %vm2562_vm3, %v9503_v42, 0.0  ;;  %v7181_v32 = vld [vmem:[%s10424_s11 + $0x78] ss:$12 sps:$4 sm:$0xff]  }
 0xf92   :  { %3994 = vadd.xlane.f32.xlu1 %v3993_v54  ;;  %3754 = vmatpush1.bf16.msra.mxu1 %v9510_v14  ;;  %v7183_v54 = vld [vmem:[%s10424_s11 + $0x94] ss:$12 sps:$4 sm:$0xff]  }
 0xf93   :  { %6347 = vmatpush3.bf16.msra.mxu0 %v9034_v28  ;;  %3755 = vmatprep.subr.bf16.mxu1 %v9517_v13 }
 0xf94   :  { %6348 = vmatprep.subr.bf16.mxu0 %v10578_v40  ;;  %3785 = vmatprep.mubr.bf16.mxu1 %v10579_v34 }
 0xf95   :  { %6362 = vmatprep.mubr.msk.bf16.mxu0 %vm7217_vm1, %v10578_v40 }
 0xf96   :  { %3756 = vmatpush1.bf16.msra.mxu1 %v9028_v26 }
 0xf97   :  { %6349 = vmatpush3.bf16.msra.mxu0 %v9061_v36  ;;  %3757 = vmatprep.subr.bf16.mxu1 %v9040_v1 }
 0xf98   :  { %6350 = vmatprep.subr.bf16.mxu0 %v10578_v40 }
 0xf9a   :  { %3758 = vmatpush1.bf16.msra.mxu1 %v9048_v8 }
 0xf9b   :  { %6351 = vmatpush3.bf16.msra.mxu0 %v9082_v47  ;;  %3759 = vmatprep.subr.bf16.mxu1 %v9055_v16  ;;  %v10704_v47 = vld [vmem:[#allocation45_spill] sm:$0xff] }
 0xf9c   :  { %6352 = vmatprep.subr.bf16.mxu0 %v10578_v40 }
 0xf9e   :  { %3760 = vmatpush1.bf16.msra.mxu1 %v9069_v0 }
 0xf9f   :  { %6353 = vmatpush3.bf16.msra.mxu0 %v9104_v44  ;;  %3761 = vmatprep.subr.bf16.mxu1 %v9076_v38 }
 0xfa0   :  { %6354 = vmatprep.subr.bf16.mxu0 %v10578_v40 }
 0xfa2   :  { %3762 = vmatpush1.bf16.msra.mxu1 %v9090_v46 }
 0xfa3   :  { %6355 = vmatpush3.bf16.msra.mxu0 %v9125_v24  ;;  %3763 = vmatprep.subr.bf16.mxu1 %v9098_v3 }
 0xfa4   :  { %6356 = vmatprep.subr.bf16.mxu0 %v10578_v40 }
 0xfa6   :  { %3764 = vmatpush1.bf16.msra.mxu1 %v9112_v4  ;;  %v10705_v4 = vld [vmem:[#allocation68_spill] sm:$0xff] }
 0xfa7   :  { %6357 = vmatpush3.bf16.msra.mxu0 %v9144_v60  ;;  %3765 = vmatprep.subr.bf16.mxu1 %v9119_v12 }
 0xfa8   :  { %6358 = vmatprep.subr.bf16.mxu0 %v10578_v40 }
 0xfaa   :  { %3766 = vmatpush1.bf16.msra.mxu1 %v9132_v51 }
 0xfab   :  { %6359 = vmatpush3.bf16.msra.mxu0 %v9160_v58  ;;  %3767 = vmatprep.subr.bf16.mxu1 %v9138_v57 }
 0xfac   :  { %6360 = vmatprep.subr.bf16.mxu0 %v10578_v40 }
 0xfae   :  { %3768 = vmatpush1.bf16.msra.mxu1 %v9152_v61 }
 0xfaf   :  { %6361 = vmatpush3.bf16.msra.mxu0 %v9168_v62  ;;  %3860 = vmatprep.subr.bf16.mxu1 %v9487_v10 }
 0xfb0   :  { %6366 = vmatprep.subr.bf16.mxu0 %v10578_v40 }
0x1064   :  { %v3680_v26 = vpop.f32.mrb[124].mxu1  ;;  %v3721_v28 = vpop.f32.mrb[116].mxu0 }
0x1065   :  { %v3681_v1 = vadd.f32 %v3680_v26, %v9274_v11  ;;  %v3682_v8 = vpop.f32.mrb[125].mxu1  ;;  %v6344_v16 = vpop.f32.mrb[117].mxu0  ;;  %v3722_v62 = vadd.f32 %v3721_v28, %v9282_v52  ;;  %v7186_v26 = vld [vmem:[%s10424_s11 + $0xac] ss:$12 sps:$4 sm:$0xff]   ;;  %v7187_v28 = vld [vmem:[%s10424_s11 + $0xa8] ss:$12 sps:$4 sm:$0xff]  }
0x1066   :  { %v3683_v36 = vadd.f32 %v3682_v8, %v9277_v49  ;;  %v3684_v0 = vpop.f32.mrb[126].mxu1  ;;  %v3724_v38 = vpop.f32.mrb[118].mxu0 }
0x1067   :  { %v3727_v46 = vadd.f32 %v3681_v1, %v10704_v47  ;;  %v3685_v3 = vpop.f32.mrb[127].mxu1  ;;  %v6345_v44 = vpop.f32.mrb[119].mxu0  ;;  %v7188_v1 = vld [vmem:[%s10424_s11 + $0xb0] ss:$12 sps:$4 sm:$0xff]  }
0x1068   :  { %v3734_v12 = vadd.f32 %v3683_v36, %v10705_v4  ;;  %v10707_v44 = vld [vmem:[#allocation70_spill] sm:$0xff] }
0x1069   :  { %v5532_v24 = vmul.f32 -1.442695, %v3727_v46 }
0x106a   :  { %v5533_v51 = vmul.f32 -1.442695, %v3734_v12 }
0x106b   :  { %6943 = vpow2.f32 %v5532_v24 }
0x106c   :  { %6945 = vpow2.f32 %v5533_v51  ;;  %v10708_v51 = vld [vmem:[#allocation71_spill] sm:$0xff] }
0x1075   :  { %v6944_v57 = vpop.eup %6943 }
0x1076   :  { %v3731_v60 = vadd.f32 1.0, %v6944_v57  ;;  %v6946_v61 = vpop.eup %6945 }
0x1077   :  { %v3738_v58 = vadd.f32 1.0, %v6946_v61 }
0x1078   :  { %6947 = vrcp.f32 %v3731_v60 }
0x1079   :  { %6949 = vrcp.f32 %v3738_v58 }
0x1082   :  { %v6948_v10 = vpop.eup %6947 }
0x1083   :  { %v3741_v56 = vmul.f32 %v6948_v10, %v3722_v62  ;;  %v6950_v2 = vpop.eup %6949 }
0x1084   :  { %v3744_v17 = vsub.f32 1.0, %v6950_v2  ;;  %v3746_v9 = vmul.f32 %v6950_v2, %v9498_v6  ;;  %v7180_v6 = vld [vmem:[%s10424_s11 + $0x7c] ss:$12 sps:$4 sm:$0xff]  }
0x1085   :  { %v3742_v37 = vadd.f32 %v3741_v56, %v10706_v59 }
0x1087   :  { %6951 = vtanh.f32 %v3742_v37 }
0x1091   :  { %v6952_v27 = vpop.eup %6951 }
0x1092   :  { %v3745_v41 = vmul.f32 %v6952_v27, %v3744_v17  ;;  %v10709_v17 = vld [vmem:[#allocation22_spill] sm:$0xff] }
0x1094   :  { %v9559_v55 = vadd.f32 %v3746_v9, %v3745_v41  ;;  %v3983_v9 = vpop.xlane.xlu1 %3982 }
0x1096   :  { %v3752_v7 = vpack.c.bf16 %v9559_v55, %v9559_v55  ;;  %v9564_v19 = vadd.f32 %v7167_v20, %v9559_v55 }
0x1098   :  { %3786 = vmatmul.mubr.bf16.vlgmr.msra.gmra.mrb[128].mxu1 %v3752_v7  ;;  %6363 = vmatmul.mubr.bf16.vlgmr.msra.gmra.mrb[120].mxu0 %v3752_v7  ;;  %v3996_v45 = vsel %vm2562_vm3, %v9564_v19, 0.0  ;;  %v4005_v7 = vmul.f32 0.03125, %v3983_v9 }
0x1099   :  { %3997 = vadd.xlane.f32.xlu0 %v3996_v45  ;;  %3861 = vmatpush1.bf16.msra.mxu1 %v9510_v14  ;;  %v7184_v14 = vld [vmem:[%s10424_s11 + $0x90] ss:$12 sps:$4 sm:$0xff]  }
0x109a   :  { %6367 = vmatpush3.bf16.msra.mxu0 %v7168_v63  ;;  %3862 = vmatprep.subr.bf16.mxu1 %v9517_v13  ;;  %v7185_v13 = vld [vmem:[%s10424_s11 + $0x98] ss:$12 sps:$4 sm:$0xff]   ;;  %v3989_v63 = vpop.xlane.xlu1 %3988 }
0x109b   :  { %6368 = vmatprep.subr.bf16.mxu0 %v10578_v40  ;;  %3892 = vmatprep.mubr.bf16.mxu1 %v10579_v34 }
0x109c   :  { %6382 = vmatprep.mubr.msk.bf16.mxu0 %vm7217_vm1, %v10578_v40 }
0x109d   :  { %3863 = vmatpush1.bf16.msra.mxu1 %v7169_v39 }
0x109e   :  { %6369 = vmatpush3.bf16.msra.mxu0 %v7170_v35  ;;  %3864 = vmatprep.subr.bf16.mxu1 %v7171_v18  ;;  %v9651_v18 = vsub.f32 %v9293_v31, %v4005_v7 }
0x109f   :  { %6370 = vmatprep.subr.bf16.mxu0 %v10578_v40 }
0x10a1   :  { %3865 = vmatpush1.bf16.msra.mxu1 %v7172_v29  ;;  %v4007_v29 = vmul.f32 0.03125, %v3989_v63 }
0x10a2   :  { %6371 = vmatpush3.bf16.msra.mxu0 %v7173_v25  ;;  %3866 = vmatprep.subr.bf16.mxu1 %v7174_v5  ;;  %v3995_v5 = vpop.xlane.xlu1 %3994 }
0x10a3   :  { %6372 = vmatprep.subr.bf16.mxu0 %v10578_v40 }
0x10a5   :  { %3867 = vmatpush1.bf16.msra.mxu1 %v7175_v15 }
0x10a6   :  { %6373 = vmatpush3.bf16.msra.mxu0 %v7176_v33  ;;  %3868 = vmatprep.subr.bf16.mxu1 %v7177_v48  ;;  %v7189_v33 = vld [vmem:[#allocation5 + $0x30] sm:$0xff] }
0x10a7   :  { %6374 = vmatprep.subr.bf16.mxu0 %v10578_v40 }
0x10a9   :  { %3869 = vmatpush1.bf16.msra.mxu1 %v7178_v50  ;;  %v9654_v50 = vsub.f32 %v9396_v21, %v4007_v29 }
0x10aa   :  { %6375 = vmatpush3.bf16.msra.mxu0 %v7179_v43  ;;  %3870 = vmatprep.subr.bf16.mxu1 %v7180_v6  ;;  %v4009_v43 = vmul.f32 0.03125, %v3995_v5  ;;  %v7190_v5 = vld [vmem:[#allocation5 + $0x38] sm:$0xff] }
0x10ab   :  { %6376 = vmatprep.subr.bf16.mxu0 %v10578_v40  ;;  %v4023_v21 = vmul.f32 %v9654_v50, %v9654_v50 }
0x10ac   :  { %v9661_v31 = vsub.f32 %v9503_v42, %v4009_v43 }
0x10ad   :  { %3871 = vmatpush1.bf16.msra.mxu1 %v7181_v32 }
0x10ae   :  { %6377 = vmatpush3.bf16.msra.mxu0 %v7182_v30  ;;  %3872 = vmatprep.subr.bf16.mxu1 %v7183_v54  ;;  %v4035_v30 = vsel %vm2562_vm3, %v4023_v21, 0.0  ;;  %v4025_v54 = vmul.f32 %v9661_v31, %v9661_v31 }
0x10af   :  { %6378 = vmatprep.subr.bf16.mxu0 %v10578_v40 }
0x10b1   :  { %3873 = vmatpush1.bf16.msra.mxu1 %v7184_v14  ;;  %v4041_v14 = vsel %vm2562_vm3, %v4025_v54, 0.0  ;;  %v6682_v54 = vld [vmem:[%s10429_s15 + $0x1c] ss:$12 sps:$4 sm:$0xff]  }
0x10b2   :  { %6379 = vmatpush3.bf16.msra.mxu0 %v7185_v13  ;;  %3874 = vmatprep.subr.bf16.mxu1 %v7186_v26 }
0x10b3   :  { %6380 = vmatprep.subr.bf16.mxu0 %v10578_v40 }
0x10b5   :  { %3875 = vmatpush1.bf16.msra.mxu1 %v7187_v28 }
0x10b6   :  { %6381 = vmatpush3.bf16.msra.mxu0 %v7188_v1 }
0x116b   :  { %v3787_v8 = vpop.f32.mrb[128].mxu1  ;;  %v3828_v16 = vpop.f32.mrb[120].mxu0 }
0x116c   :  { %v3788_v36 = vadd.f32 %v3787_v8, %v9274_v11  ;;  %v3789_v0 = vpop.f32.mrb[129].mxu1  ;;  %v6364_v38 = vpop.f32.mrb[121].mxu0  ;;  %v3829_v59 = vadd.f32 %v3828_v16, %v9282_v52 }
0x116d   :  { %v3790_v47 = vadd.f32 %v3789_v0, %v9277_v49  ;;  %v3791_v46 = vpop.f32.mrb[130].mxu1  ;;  %v3831_v3 = vpop.f32.mrb[122].mxu0 }
0x116e   :  { %v3834_v4 = vadd.f32 %v3788_v36, %v10707_v44  ;;  %v3792_v12 = vpop.f32.mrb[131].mxu1  ;;  %v6365_v24 = vpop.f32.mrb[123].mxu0  ;;  %v10710_v44 = vld [vmem:[#allocation38_spill] sm:$0xff] }
0x116f   :  { %v3841_v57 = vadd.f32 %v3790_v47, %v10708_v51  ;;  %v10711_v51 = vld [vmem:[#allocation40_spill] sm:$0xff] }
0x1170   :  { %v5534_v60 = vmul.f32 -1.442695, %v3834_v4 }
0x1171   :  { %v5535_v61 = vmul.f32 -1.442695, %v3841_v57 }
0x1172   :  { %6953 = vpow2.f32 %v5534_v60 }
0x1173   :  { %6955 = vpow2.f32 %v5535_v61 }
0x117c   :  { %v6954_v58 = vpop.eup %6953 }
0x117d   :  { %v3838_v62 = vadd.f32 1.0, %v6954_v58  ;;  %v6956_v10 = vpop.eup %6955 }
0x117e   :  { %v3845_v56 = vadd.f32 1.0, %v6956_v10 }
0x117f   :  { %6957 = vrcp.f32 %v3838_v62 }
0x1180   :  { %6959 = vrcp.f32 %v3845_v56 }
0x1189   :  { %v6958_v37 = vpop.eup %6957 }
0x118a   :  { %v3848_v2 = vmul.f32 %v6958_v37, %v3829_v59  ;;  %v6960_v41 = vpop.eup %6959  ;;  %v10712_v37 = vld [vmem:[#allocation26_spill] sm:$0xff] }
0x118b   :  { %v3851_v20 = vsub.f32 1.0, %v6960_v41  ;;  %v3853_v35 = vmul.f32 %v6960_v41, %v9559_v55  ;;  %v4021_v55 = vmul.f32 %v9651_v18, %v9651_v18 }
0x118c   :  { %v3849_v27 = vadd.f32 %v3848_v2, %v10709_v17 }
0x118d   :  { %v4029_v32 = vsel %vm2562_vm3, %v4021_v55, 0.0 }
0x118e   :  { %6961 = vtanh.f32 %v3849_v27  ;;  %v3986_v27 = vpop.xlane.xlu0 %3985 }
0x118f   :  { %v4006_v41 = vmul.f32 0.03125, %v3986_v27 }
0x1198   :  { %v6962_v45 = vpop.eup %6961 }
0x1199   :  { %v3852_v39 = vmul.f32 %v6962_v45, %v3851_v20  ;;  %v3992_v20 = vpop.xlane.xlu0 %3991 }
0x119b   :  { %v3854_v25 = vadd.f32 %v3853_v35, %v3852_v39  ;;  %v9682_v39 = vsub.f32 %v9345_v22, %v4006_v41  ;;  %v4008_v35 = vmul.f32 0.03125, %v3992_v20 }
0x119d   :  { %v3859_v15 = vpack.c.bf16 %v3854_v25, %v3854_v25  ;;  %v3977_v48 = vadd.f32 %v7189_v33, %v3854_v25  ;;  %v9685_v33 = vsub.f32 %v9447_v23, %v4008_v35 }
0x119f   :  { %3893 = vmatmul.mubr.bf16.vlgmr.msra.gmra.mrb[132].mxu1 %v3859_v15  ;;  %6383 = vmatmul.mubr.bf16.vlgmr.msra.gmra.mrb[124].mxu0 %v3859_v15  ;;  %v3999_v6 = vsel %vm2562_vm3, %v3977_v48, 0.0  ;;  %v4024_v55 = vmul.f32 %v9685_v33, %v9685_v33 }
0x11a0   :  { %4000 = vadd.xlane.f32.xlu1 %v3999_v6  ;;  %4218 = vmatprep.mubr.bf16.mxu1 %v10579_v34  ;;  %v4022_v6 = vmul.f32 %v9682_v39, %v9682_v39 }
0x11a2   :  { %v4032_v22 = vsel %vm2562_vm3, %v4022_v6, 0.0 }
0x11a4   :  { %4030 = vadd.xlane.f32.xlu1 %v4029_v32  ;;  %v4038_v32 = vsel %vm2562_vm3, %v4024_v55, 0.0 }
0x11a8   :  { %4036 = vadd.xlane.f32.xlu1 %v4035_v30  ;;  %v6677_v30 = vld [vmem:[%s10429_s15] ss:$12 sps:$4 sm:$0xff]  }
0x11ac   :  { %4042 = vadd.xlane.f32.xlu1 %v4041_v14  ;;  %v6683_v14 = vld [vmem:[%s10429_s15 + $0x8] ss:$12 sps:$4 sm:$0xff]  }
0x11ad   :  { %6386 = vmatprep.subr.bf16.mxu0 %v6683_v14 }
0x11ae   :  { %6387 = vmatpush3.bf16.msra.mxu0 %v6683_v14 }
0x122d   :  { %v4001_v13 = vpop.xlane.xlu1 %4000 }
0x122e   :  { %v4011_v26 = vmul.f32 0.03125, %v4001_v13  ;;  %v6680_v13 = vld [vmem:[%s10429_s15 + $0x18] ss:$12 sps:$4 sm:$0xff]  }
0x1230   :  { %v9670_v28 = vsub.f32 %v3977_v48, %v4011_v26  ;;  %v6684_v26 = vld [vmem:[%s10429_s15 + $0x20] ss:$12 sps:$4 sm:$0xff]  }
0x1231   :  { %6388 = vmatprep.subr.bf16.mxu0 %v6684_v26 }
0x1232   :  { %v4027_v42 = vmul.f32 %v9670_v28, %v9670_v28  ;;  %6389 = vmatpush3.bf16.msra.mxu0 %v6684_v26  ;;  %v9803_v26 = vld [vmem:[%s10430_s17 + $0x48] ss:$12 sps:$4 sm:$0xff]  }
0x1233   :  { %6398 = vmatprep.subr.bf16.mxu0 %v10578_v40 }
0x1234   :  { %v4047_v1 = vsel %vm2562_vm3, %v4027_v42, 0.0  ;;  %v9722_v42 = vld [vmem:[%s10430_s17 + $0x4] ss:$12 sps:$4 sm:$0xff]  }
0x1235   :  { %4048 = vadd.xlane.f32.xlu1 %v4047_v1  ;;  %v4031_v1 = vpop.xlane.xlu1 %4030 }
0x1272   :  { %v3894_v8 = vpop.f32.mrb[132].mxu1  ;;  %v3935_v16 = vpop.f32.mrb[124].mxu0 }
0x1273   :  { %v3895_v36 = vadd.f32 %v3894_v8, %v9274_v11  ;;  %v3896_v0 = vpop.f32.mrb[133].mxu1  ;;  %v6384_v38 = vpop.f32.mrb[125].mxu0  ;;  %v3936_v56 = vadd.f32 %v3935_v16, %v9282_v52  ;;  %v4053_v16 = vmul.f32 0.03125, %v4031_v1  ;;  %v9809_v1 = vld [vmem:[%s10430_s17 + $0x64] ss:$12 sps:$4 sm:$0xff]  }
0x1274   :  { %v3897_v47 = vadd.f32 %v3896_v0, %v9277_v49  ;;  %v3898_v46 = vpop.f32.mrb[134].mxu1  ;;  %v3938_v3 = vpop.f32.mrb[126].mxu0 }
0x1275   :  { %v3941_v4 = vadd.f32 %v3895_v36, %v10710_v44  ;;  %v3899_v12 = vpop.f32.mrb[135].mxu1  ;;  %v6385_v24 = vpop.f32.mrb[127].mxu0  ;;  %v4061_v0 = vadd.f32 1e-05, %v4053_v16  ;;  %v9821_v16 = vld [vmem:[%s10430_s17 + $0x7c] ss:$12 sps:$4 sm:$0xff]  }
0x1276   :  { %v3948_v57 = vadd.f32 %v3897_v47, %v10711_v51  ;;  %v3998_v52 = vpop.xlane.xlu0 %3997  ;;  %v4037_v8 = vpop.xlane.xlu1 %4036 }
0x1277   :  { %v5536_v60 = vmul.f32 -1.442695, %v3941_v4  ;;  %v4010_v48 = vmul.f32 0.03125, %v3998_v52  ;;  %v4055_v36 = vmul.f32 0.03125, %v4037_v8  ;;  %v9815_v8 = vld [vmem:[%s10430_s17 + $0x60] ss:$12 sps:$4 sm:$0xff]  }
0x1278   :  { %v5537_v61 = vmul.f32 -1.442695, %v3948_v57 }
0x1279   :  { %6963 = vpow2.f32 %v5536_v60  ;;  %v4063_v3 = vadd.f32 1e-05, %v4055_v36  ;;  %v9828_v36 = vld [vmem:[%s10430_s17 + $0x78] ss:$12 sps:$4 sm:$0xff]  }
0x127a   :  { %6965 = vpow2.f32 %v5537_v61  ;;  %v4043_v38 = vpop.xlane.xlu1 %4042 }
0x127b   :  { %v4057_v44 = vmul.f32 0.03125, %v4043_v38  ;;  %v9840_v38 = vld [vmem:[%s10430_s17 + $0x94] ss:$12 sps:$4 sm:$0xff]  }
0x127d   :  { %v4065_v57 = vadd.f32 1e-05, %v4057_v44  ;;  %v9867_v44 = vld [vmem:[%s10430_s17 + $0xa8] ss:$12 sps:$4 sm:$0xff]  }
0x1283   :  { %v6964_v58 = vpop.eup %6963 }
0x1284   :  { %v3945_v62 = vadd.f32 1.0, %v6964_v58  ;;  %v6966_v11 = vpop.eup %6965 }
0x1285   :  { %v3952_v10 = vadd.f32 1.0, %v6966_v11 }
0x1286   :  { %6967 = vrcp.f32 %v3945_v62 }
0x1287   :  { %6969 = vrcp.f32 %v3952_v10 }
0x1290   :  { %v6968_v49 = vpop.eup %6967 }
0x1291   :  { %v3955_v59 = vmul.f32 %v6968_v49, %v3936_v56  ;;  %v6970_v17 = vpop.eup %6969 }
0x1292   :  { %v3958_v9 = vsub.f32 1.0, %v6970_v17  ;;  %v3960_v63 = vmul.f32 %v6970_v17, %v3854_v25  ;;  %v9691_v25 = vsub.f32 %v9564_v19, %v4010_v48  ;;  %v6679_v19 = vld [vmem:[%s10429_s15 + $0x4] ss:$12 sps:$4 sm:$0xff]   ;;  %v9734_v17 = vld [vmem:[%s10431_s13] ss:$0 sm:$0xff] }
0x1293   :  { %v3956_v2 = vadd.f32 %v3955_v59, %v10712_v37  ;;  %4186 = vmatprep.subr.bf16.mxu1 %v6679_v19 }
0x1294   :  { %v4026_v23 = vmul.f32 %v9691_v25, %v9691_v25  ;;  %4187 = vmatpush1.bf16.msra.mxu1 %v6677_v30 }
0x1295   :  { %6971 = vtanh.f32 %v3956_v2  ;;  %4188 = vmatprep.subr.bf16.mxu1 %v6682_v54  ;;  %v9788_v54 = vld [vmem:[%s10430_s17 + $0x30] ss:$12 sps:$4 sm:$0xff]  }
0x1296   :  { %v4044_v21 = vsel %vm2562_vm3, %v4026_v23, 0.0  ;;  %6973 = vrsqrt.f32 %v4061_v0  ;;  %v9834_v0 = vld [vmem:[%s10430_s17 + $0x8] ss:$12 sps:$4 sm:$0xff]  }
0x1297   :  { %6975 = vrsqrt.f32 %v4063_v3  ;;  %v9859_v3 = vld [vmem:[%s10430_s17 + $0xac] ss:$12 sps:$4 sm:$0xff]  }
0x1298   :  { %4189 = vmatpush1.bf16.msra.mxu1 %v6680_v13  ;;  %v9794_v13 = vld [vmem:[%s10430_s17 + $0x4c] ss:$12 sps:$4 sm:$0xff]  }
0x1299   :  { %4528 = vmatprep.subr.bf16.mxu1 %v9722_v42 }
0x129f   :  { %v6972_v7 = vpop.eup %6971 }
0x12a0   :  { %v3959_v45 = vmul.f32 %v6972_v7, %v3958_v9  ;;  %v6974_v56 = vpop.eup %6973 }
0x12a1   :  { %v6976_v37 = vpop.eup %6975  ;;  %v4077_v2 = vmul.f32 %v6974_v56, %v9651_v18 }
0x12a2   :  { %v3961_v29 = vadd.f32 %v3960_v63, %v3959_v45  ;;  %v4079_v41 = vmul.f32 %v6976_v37, %v9654_v50  ;;  %v9742_v45 = vld [vmem:[%s10432_s14] ss:$0 sm:$0xff] }
0x12a3   :  { %v4091_v9 = vmul.f32 %v9734_v17, %v4077_v2 }
0x12a4   :  { %v3978_v15 = vadd.f32 %v7190_v5, %v3961_v29  ;;  %v4093_v35 = vmul.f32 %v9734_v17, %v4079_v41 }
0x12a5   :  { %v4105_v50 = vadd.f32 %v9742_v45, %v4091_v9 }
0x12a6   :  { %v4002_v43 = vsel %vm2562_vm3, %v3978_v15, 0.0 }
0x12a7   :  { %4003 = vadd.xlane.f32.xlu0 %v4002_v43  ;;  %v9759_v43 = vld [vmem:[%s10430_s17 + $0x1c] ss:$12 sps:$4 sm:$0xff]  }
0x12ab   :  { %4033 = vadd.xlane.f32.xlu0 %v4032_v22 }
0x12af   :  { %4039 = vadd.xlane.f32.xlu0 %v4038_v32  ;;  %v9772_v32 = vld [vmem:[%s10430_s17 + $0x18] ss:$12 sps:$4 sm:$0xff]  }
0x12b3   :  { %4045 = vadd.xlane.f32.xlu0 %v4044_v21  ;;  %v9779_v21 = vld [vmem:[%s10430_s17 + $0x34] ss:$12 sps:$4 sm:$0xff]  }
0x1334   :  { %v4004_v47 = vpop.xlane.xlu0 %4003 }
0x1335   :  { %v4012_v46 = vmul.f32 0.03125, %v4004_v47  ;;  %v9846_v47 = vld [vmem:[%s10430_s17 + $0x20] ss:$12 sps:$4 sm:$0xff]  }
0x1337   :  { %v9725_v4 = vsub.f32 %v3978_v15, %v4012_v46  ;;  %v9853_v46 = vld [vmem:[%s10430_s17 + $0x90] ss:$12 sps:$4 sm:$0xff]  }
0x1338   :  { %v4034_v12 = vpop.xlane.xlu0 %4033 }
0x1339   :  { %v4054_v24 = vmul.f32 0.03125, %v4034_v12  ;;  %v4028_v51 = vmul.f32 %v9725_v4, %v9725_v4  ;;  %v9872_v12 = vld [vmem:[%s10430_s17 + $0x38] ss:$12 sps:$4 sm:$0xff]  }
0x133b   :  { %v4062_v60 = vadd.f32 1e-05, %v4054_v24  ;;  %v4050_v61 = vsel %vm2562_vm3, %v4028_v51, 0.0  ;;  %v9879_v24 = vld [vmem:[%s10430_s17 + $0x50] ss:$12 sps:$4 sm:$0xff]  }
0x133c   :  { %4051 = vadd.xlane.f32.xlu0 %v4050_v61  ;;  %v4040_v58 = vpop.xlane.xlu0 %4039  ;;  %v9888_v51 = vld [vmem:[%s10430_s17 + $0x68] ss:$12 sps:$4 sm:$0xff]   ;;  %v9909_v61 = vld [vmem:[%s10430_s17 + $0xb0] ss:$12 sps:$4 sm:$0xff]  }
0x133d   :  { %6977 = vrsqrt.f32 %v4062_v60  ;;  %v4056_v62 = vmul.f32 0.03125, %v4040_v58  ;;  %v9902_v60 = vld [vmem:[%s10430_s17 + $0x98] ss:$12 sps:$4 sm:$0xff]   ;;  %v4049_v58 = vpop.xlane.xlu1 %4048 }
0x133e   :  { %6979 = vrsqrt.f32 %v4065_v57  ;;  %v9895_v57 = vld [vmem:[%s10430_s17 + $0x80] ss:$12 sps:$4 sm:$0xff]  }
0x133f   :  { %v4064_v11 = vadd.f32 1e-05, %v4056_v62  ;;  %v4059_v62 = vmul.f32 0.03125, %v4049_v58 }
0x1340   :  { %v4046_v10 = vpop.xlane.xlu0 %4045 }
0x1341   :  { %6981 = vrsqrt.f32 %v4064_v11  ;;  %v4058_v49 = vmul.f32 0.03125, %v4046_v10  ;;  %v4067_v11 = vadd.f32 1e-05, %v4059_v62  ;;  %v4380_v62 = vld [vmem:[%s10434_s18] sm:$0x7] }
0x1343   :  { %v4066_v59 = vadd.f32 1e-05, %v4058_v49 }
0x1345   :  { %6983 = vrsqrt.f32 %v4066_v59 }
0x1346   :  { %6985 = vrsqrt.f32 %v4067_v11 }
0x1347   :  { %v6978_v27 = vpop.eup %6977 }
0x1348   :  { %v4078_v7 = vmul.f32 %v6978_v27, %v9682_v39  ;;  %v6980_v20 = vpop.eup %6979  ;;  %v9753_v39 = vld [vmem:[%s10430_s17] ss:$12 sps:$4 sm:$0xff]  }
0x1349   :  { %v4081_v29 = vmul.f32 %v6980_v20, %v9661_v31 }
0x134a   :  { %v4092_v18 = vmul.f32 %v9734_v17, %v4078_v7 }
0x134b   :  { %v6982_v63 = vpop.eup %6981  ;;  %v4095_v55 = vmul.f32 %v9734_v17, %v4081_v29 }
0x134c   :  { %v4080_v52 = vmul.f32 %v6982_v63, %v9685_v33  ;;  %v4106_v5 = vadd.f32 %v9742_v45, %v4092_v18  ;;  %v4107_v33 = vadd.f32 %v9742_v45, %v4093_v35 }
0x134d   :  { %v4109_v19 = vadd.f32 %v9742_v45, %v4095_v55 }
0x134e   :  { %v4094_v15 = vmul.f32 %v9734_v17, %v4080_v52  ;;  %v4113_v48 = vpack.c.bf16 %v4106_v5, %v4105_v50 }
0x134f   :  { %v6984_v31 = vpop.eup %6983 }
0x1350   :  { %v4082_v6 = vmul.f32 %v6984_v31, %v9691_v25  ;;  %5546 = vmatmul.mubr.msk.bf16.vlgmr.msra.gmra.mrb[136].mxu1 %vm2562_vm3, %v4113_v48  ;;  %6390 = vmatprep.mubr.msk.bf16.mxu0 %vm2562_vm3, %v4113_v48  ;;  %v4108_v22 = vadd.f32 %v9742_v45, %v4094_v15  ;;  %v6986_v59 = vpop.eup %6985 }
0x1351   :  { %4228 = vmatprep.mubr.bf16.mxu1 %v10579_v34  ;;  %4529 = vmatpush1.bf16.msra.mxu1 %v9753_v39  ;;  %v4083_v37 = vmul.f32 %v6986_v59, %v9670_v28 }
0x1352   :  { %v4114_v23 = vpack.c.bf16 %v4108_v22, %v4107_v33  ;;  %v4096_v25 = vmul.f32 %v9734_v17, %v4082_v6  ;;  %4530 = vmatprep.subr.bf16.mxu1 %v9759_v43 }
0x1353   :  { %v4097_v41 = vmul.f32 %v9734_v17, %v4083_v37  ;;  %v10724_v37 = vld [vmem:[#allocation28_spill] sm:$0xff] }
0x1354   :  { %6391 = vmatmul.mubr.msk.bf16.vlgmr.msra.gmra.mrb[128].mxu0 %vm2562_vm3, %v4114_v23  ;;  %v4110_v30 = vadd.f32 %v9742_v45, %v4096_v25 }
0x1355   :  { %4531 = vmatpush1.bf16.msra.mxu1 %v9772_v32  ;;  %6399 = vmatpush3.bf16.msra.mxu0 %v9834_v0  ;;  %v4111_v7 = vadd.f32 %v9742_v45, %v4097_v41 }
0x1356   :  { %v4115_v14 = vpack.c.bf16 %v4110_v30, %v4109_v19  ;;  %4532 = vmatprep.subr.bf16.mxu1 %v9779_v21  ;;  %6400 = vmatprep.subr.bf16.mxu0 %v10578_v40  ;;  %v4125_v30 = vld [vmem:[%s10433_s16] sm:$0x7] }
0x1358   :  { %5547 = vmatmul.mubr.msk.bf16.gmra.mrb[140].mxu1 %vm2562_vm3, %v4114_v23  ;;  %6394 = vmatprep.mubr.msk.bf16.mxu0 %vm2562_vm3, %v4115_v14 }
0x1359   :  { %4238 = vmatprep.mubr.bf16.mxu1 %v10579_v34  ;;  %4533 = vmatpush1.bf16.msra.mxu1 %v9788_v54 }
0x135a   :  { %4534 = vmatprep.subr.bf16.mxu1 %v9794_v13  ;;  %6401 = vmatpush3.bf16.msra.mxu0 %v9846_v47 }
0x135b   :  { %6402 = vmatprep.subr.bf16.mxu0 %v10578_v40 }
0x135d   :  { %4535 = vmatpush1.bf16.msra.mxu1 %v9803_v26 }
0x135e   :  { %4536 = vmatprep.subr.bf16.mxu1 %v9809_v1  ;;  %6403 = vmatpush3.bf16.msra.mxu0 %v9872_v12 }
0x135f   :  { %6404 = vmatprep.subr.bf16.mxu0 %v10578_v40 }
0x1360   :  { %5548 = vmatmul.mubr.msk.bf16.gmra.mrb[144].mxu1 %vm2562_vm3, %v4115_v14 }
0x1361   :  { %4537 = vmatpush1.bf16.msra.mxu1 %v9815_v8  ;;  %4248 = vmatprep.mubr.bf16.mxu1 %v10579_v34 }
0x1362   :  { %4538 = vmatprep.subr.bf16.mxu1 %v9821_v16  ;;  %6405 = vmatpush3.bf16.msra.mxu0 %v9879_v24 }
0x1363   :  { %6406 = vmatprep.subr.bf16.mxu0 %v10578_v40 }
0x1365   :  { %4539 = vmatpush1.bf16.msra.mxu1 %v9828_v36 }
0x1366   :  { %4540 = vmatprep.subr.bf16.mxu1 %v9840_v38  ;;  %6407 = vmatpush3.bf16.msra.mxu0 %v9888_v51 }
0x1367   :  { %6408 = vmatprep.subr.bf16.mxu0 %v10578_v40 }
0x1369   :  { %4541 = vmatpush1.bf16.msra.mxu1 %v9853_v46 }
0x136a   :  { %4542 = vmatprep.subr.bf16.mxu1 %v9859_v3  ;;  %6409 = vmatpush3.bf16.msra.mxu0 %v9895_v57 }
0x136b   :  { %6410 = vmatprep.subr.bf16.mxu0 %v10578_v40 }
0x136d   :  { %4543 = vmatpush1.bf16.msra.mxu1 %v9867_v44 }
0x136e   :  { %4635 = vmatprep.subr.bf16.mxu1 %v9722_v42  ;;  %6411 = vmatpush3.bf16.msra.mxu0 %v9902_v60 }
0x136f   :  { %6412 = vmatprep.subr.bf16.mxu0 %v10578_v40 }
0x1372   :  { %6413 = vmatpush3.bf16.msra.mxu0 %v9909_v61 }
0x1373   :  { %6418 = vmatprep.subr.bf16.mxu0 %v10578_v40 }
0x13c9   :  { %v4052_v10 = vpop.xlane.xlu0 %4051 }
0x13ca   :  { %v4060_v56 = vmul.f32 0.03125, %v4052_v10 }
0x13cc   :  { %v4068_v49 = vadd.f32 1e-05, %v4060_v56  ;;  %v10723_v56 = vld [vmem:[#allocation27_spill] sm:$0xff] }
0x13cd   :  { %v10014_v59 = vrot.slane %v4380_v62, %v10723_v56 }
0x13ce   :  { %6987 = vrsqrt.f32 %v4068_v49  ;;  %v10011_v49 = vrot.slane %v4125_v30, %v10723_v56 }
0x13d8   :  { %v6988_v2 = vpop.eup %6987 }
0x13d9   :  { %v4084_v27 = vmul.f32 %v6988_v2, %v9725_v4  ;;  %v10017_v2 = vrot.slane %v4125_v30, %v10724_v37 }
0x13db   :  { %v4098_v9 = vmul.f32 %v9734_v17, %v4084_v27  ;;  %v10020_v27 = vrot.slane %v4380_v62, %v10724_v37 }
0x13dd   :  { %v4112_v20 = vadd.f32 %v9742_v45, %v4098_v9 }
0x13df   :  { %v4116_v18 = vpack.c.bf16 %v4112_v20, %v4111_v7 }
0x13e1   :  { %5549 = vmatmul.mubr.msk.bf16.gmra.mrb[148].mxu1 %vm2562_vm3, %v4116_v18  ;;  %6395 = vmatmul.mubr.msk.bf16.gmra.mrb[132].mxu0 %vm2562_vm3, %v4116_v18 }
0x13e2   :  { %4560 = vmatprep.mubr.bf16.mxu1 %v10579_v34  ;;  %6414 = vmatprep.mubr.msk.bf16.mxu0 %vm7217_vm1, %v10578_v40 }
0x13e9   :  { %4561 = vmatmul.mubr.bf16.vlgmr.msra.gmra.mrb[152].mxu1 %v10579_v34  ;;  %6415 = vmatmul.mubr.bf16.vlgmr.msra.gmra.mrb[136].mxu0 %v10579_v34 }
0x13ea   :  { %4636 = vmatpush1.bf16.msra.mxu1 %v9753_v39  ;;  %6419 = vmatpush3.bf16.msra.mxu0 %v9834_v0 }
0x13eb   :  { %4637 = vmatprep.subr.bf16.mxu1 %v9759_v43  ;;  %6420 = vmatprep.subr.bf16.mxu0 %v10578_v40 }
0x13ec   :  { %4667 = vmatprep.mubr.bf16.mxu1 %v10579_v34  ;;  %6434 = vmatprep.mubr.msk.bf16.mxu0 %vm7217_vm1, %v10578_v40 }
0x13ee   :  { %4638 = vmatpush1.bf16.msra.mxu1 %v9772_v32  ;;  %6421 = vmatpush3.bf16.msra.mxu0 %v9846_v47 }
0x13ef   :  { %4639 = vmatprep.subr.bf16.mxu1 %v9779_v21  ;;  %6422 = vmatprep.subr.bf16.mxu0 %v10578_v40 }
0x13f2   :  { %4640 = vmatpush1.bf16.msra.mxu1 %v9788_v54  ;;  %6423 = vmatpush3.bf16.msra.mxu0 %v9872_v12 }
0x13f3   :  { %4641 = vmatprep.subr.bf16.mxu1 %v9794_v13  ;;  %6424 = vmatprep.subr.bf16.mxu0 %v10578_v40 }
0x13f6   :  { %4642 = vmatpush1.bf16.msra.mxu1 %v9803_v26  ;;  %6425 = vmatpush3.bf16.msra.mxu0 %v9879_v24 }
0x13f7   :  { %4643 = vmatprep.subr.bf16.mxu1 %v9809_v1  ;;  %6426 = vmatprep.subr.bf16.mxu0 %v10578_v40 }
0x13fa   :  { %4644 = vmatpush1.bf16.msra.mxu1 %v9815_v8  ;;  %6427 = vmatpush3.bf16.msra.mxu0 %v9888_v51 }
0x13fb   :  { %4645 = vmatprep.subr.bf16.mxu1 %v9821_v16  ;;  %6428 = vmatprep.subr.bf16.mxu0 %v10578_v40 }
0x13fe   :  { %4646 = vmatpush1.bf16.msra.mxu1 %v9828_v36  ;;  %6429 = vmatpush3.bf16.msra.mxu0 %v9895_v57 }
0x13ff   :  { %4647 = vmatprep.subr.bf16.mxu1 %v9840_v38  ;;  %6430 = vmatprep.subr.bf16.mxu0 %v10578_v40 }
0x1402   :  { %4648 = vmatpush1.bf16.msra.mxu1 %v9853_v46  ;;  %6431 = vmatpush3.bf16.msra.mxu0 %v9902_v60 }
0x1403   :  { %4649 = vmatprep.subr.bf16.mxu1 %v9859_v3  ;;  %6432 = vmatprep.subr.bf16.mxu0 %v10578_v40 }
0x1406   :  { %4650 = vmatpush1.bf16.msra.mxu1 %v9867_v44  ;;  %6433 = vmatpush3.bf16.msra.mxu0 %v9909_v61 }
0x1407   :  { %4742 = vmatprep.subr.bf16.mxu1 %v9722_v42  ;;  %6438 = vmatprep.subr.bf16.mxu0 %v10578_v40 }
0x1423   :  { %v4220_v28 = vpop.f32.mrb[136].mxu1 }
0x1424   :  { %v4222_v4 = vpop.f32.mrb[137].mxu1  ;;  %v4221_v7 = vadd.f32 %v4220_v28, %v10011_v49 }
0x1425   :  { %v9962_v17 = vpop.f32.mrb[138].mxu1 }
0x1426   :  { %v9964_v45 = vpop.f32.mrb[139].mxu1 }
0x1427   :  { %v9966_v63 = vpop.f32.mrb[128].mxu0 }
0x1428   :  { %v4293_v35 = vpop.f32.mrb[129].mxu0 }
0x1429   :  { %v9968_v29 = vpop.f32.mrb[130].mxu0 }
0x142a   :  { %v9970_v52 = vpop.f32.mrb[131].mxu0 }
0x142b   :  { %v9972_v50 = vpop.f32.mrb[140].mxu1 }
0x142c   :  { %v9974_v5 = vpop.f32.mrb[141].mxu1 }
0x142d   :  { %v9976_v15 = vpop.f32.mrb[142].mxu1 }
0x142e   :  { %v9978_v48 = vpop.f32.mrb[143].mxu1 }
0x1433   :  { %v9980_v31 = vpop.f32.mrb[144].mxu1 }
0x1434   :  { %v9982_v33 = vpop.f32.mrb[145].mxu1 }
0x1435   :  { %v9984_v6 = vpop.f32.mrb[146].mxu1 }
0x1436   :  { %10713 = vst [vmem:[#allocation51_spill] sm:$0xff] %v9984_v6  ;;  %v9986_v22 = vpop.f32.mrb[147].mxu1 }
0x1437   :  { %10714 = vst [vmem:[#allocation63_spill] sm:$0xff] %v9986_v22 }
0x14b4   :  { %v9988_v55 = vpop.f32.mrb[148].mxu1  ;;  %v9990_v23 = vpop.f32.mrb[132].mxu0 }
0x14b5   :  { %10715 = vst [vmem:[#allocation65_spill] sm:$0xff] %v9988_v55  ;;  %10716 = vst [vmem:[#allocation66_spill] sm:$0xff] %v9990_v23  ;;  %v9992_v25 = vpop.f32.mrb[149].mxu1  ;;  %v9994_v19 = vpop.f32.mrb[133].mxu0 }
0x14b6   :  { %10717 = vst [vmem:[#allocation42_spill] sm:$0xff] %v9992_v25  ;;  %10718 = vst [vmem:[#allocation43_spill] sm:$0xff] %v9994_v19  ;;  %v9999_v14 = vpop.f32.mrb[150].mxu1  ;;  %v10001_v58 = vpop.f32.mrb[134].mxu0 }
0x14b7   :  { %10719 = vst [vmem:[#allocation53_spill] sm:$0xff] %v9999_v14  ;;  %10720 = vst [vmem:[#allocation60_spill] sm:$0xff] %v10001_v58  ;;  %v10006_v11 = vpop.f32.mrb[151].mxu1  ;;  %v10008_v10 = vpop.f32.mrb[135].mxu0 }
0x14b8   :  { %10721 = vst [vmem:[#allocation62_spill] sm:$0xff] %v10006_v11  ;;  %10722 = vst [vmem:[#allocation64_spill] sm:$0xff] %v10008_v10  ;;  %v4223_v11 = vadd.f32 %v4222_v4, %v10017_v2  ;;  %v10030_v4 = vrot.slane %v4125_v30, %v10687_v53 }
0x14bc   :  { %v4562_v41 = vpop.f32.mrb[152].mxu1  ;;  %v4603_v9 = vpop.f32.mrb[136].mxu0 }
0x14bd   :  { %v4563_v20 = vadd.f32 %v4562_v41, %v10014_v59  ;;  %v4564_v18 = vpop.f32.mrb[153].mxu1  ;;  %v6416_v58 = vpop.f32.mrb[137].mxu0  ;;  %v10027_v41 = vrot.slane %v4380_v62, %v10687_v53 }
0x14be   :  { %v4565_v14 = vadd.f32 %v4564_v18, %v10020_v27  ;;  %v4566_v56 = vpop.f32.mrb[154].mxu1  ;;  %v4606_v23 = vpop.f32.mrb[138].mxu0 }
0x14bf   :  { %v4609_v25 = vadd.f32 %v4563_v20, %v4221_v7  ;;  %v4567_v55 = vpop.f32.mrb[155].mxu1  ;;  %v6417_v10 = vpop.f32.mrb[139].mxu0  ;;  %v4604_v23 = vadd.f32 %v4603_v9, %v10027_v41  ;;  %v4225_v9 = vadd.f32 %v9962_v17, %v10011_v49 }
0x14c0   :  { %v4616_v22 = vadd.f32 %v4565_v14, %v4223_v11  ;;  %v4294_v14 = vadd.f32 %v4293_v35, %v10030_v4 }
0x14c1   :  { %v5578_v37 = vmul.f32 -1.442695, %v4609_v25 }
0x14c2   :  { %v5579_v6 = vmul.f32 -1.442695, %v4616_v22 }
0x14c3   :  { %6989 = vpow2.f32 %v5578_v37 }
0x14c4   :  { %6991 = vpow2.f32 %v5579_v6 }
0x14cd   :  { %v6990_v19 = vpop.eup %6989 }
0x14ce   :  { %v4613_v28 = vadd.f32 1.0, %v6990_v19  ;;  %v6992_v58 = vpop.eup %6991 }
0x14cf   :  { %v4620_v18 = vadd.f32 1.0, %v6992_v58 }
0x14d0   :  { %6993 = vrcp.f32 %v4613_v28  ;;  %v4227_v28 = vadd.f32 %v9964_v45, %v10017_v2 }
0x14d1   :  { %6995 = vrcp.f32 %v4620_v18 }
0x14da   :  { %v6994_v55 = vpop.eup %6993 }
0x14db   :  { %v4623_v25 = vmul.f32 %v6994_v55, %v4604_v23  ;;  %v6996_v6 = vpop.eup %6995 }
0x14dc   :  { %v4626_v19 = vsub.f32 1.0, %v6996_v6  ;;  %v4628_v62 = vmul.f32 0.0, %v6996_v6 }
0x14dd   :  { %v4624_v22 = vadd.f32 %v4623_v25, %v4294_v14 }
0x14df   :  { %6997 = vtanh.f32 %v4624_v22 }
0x14e9   :  { %v6998_v11 = vpop.eup %6997 }
0x14ea   :  { %v4627_v10 = vmul.f32 %v6998_v11, %v4626_v19 }
0x14ec   :  { %v10034_v7 = vadd.f32 %v4628_v62, %v4627_v10 }
0x14ee   :  { %4630 = vst [vmem:[%s10435_s19] sm:$0xff] %v10034_v7  ;;  %v4634_v53 = vpack.c.bf16 %v10034_v7, %v10034_v7 }
0x14f0   :  { %4668 = vmatmul.mubr.bf16.vlgmr.msra.gmra.mrb[156].mxu1 %v4634_v53  ;;  %6435 = vmatmul.mubr.bf16.vlgmr.msra.gmra.mrb[140].mxu0 %v4634_v53 }
0x14f1   :  { %4743 = vmatpush1.bf16.msra.mxu1 %v9753_v39  ;;  %6439 = vmatpush3.bf16.msra.mxu0 %v9834_v0 }
0x14f2   :  { %4744 = vmatprep.subr.bf16.mxu1 %v9759_v43  ;;  %6440 = vmatprep.subr.bf16.mxu0 %v10578_v40 }
0x14f3   :  { %4774 = vmatprep.mubr.bf16.mxu1 %v10579_v34  ;;  %6454 = vmatprep.mubr.msk.bf16.mxu0 %vm7217_vm1, %v10578_v40 }
0x14f5   :  { %4745 = vmatpush1.bf16.msra.mxu1 %v9772_v32  ;;  %6441 = vmatpush3.bf16.msra.mxu0 %v9846_v47 }
0x14f6   :  { %4746 = vmatprep.subr.bf16.mxu1 %v9779_v21  ;;  %6442 = vmatprep.subr.bf16.mxu0 %v10578_v40 }
0x14f9   :  { %4747 = vmatpush1.bf16.msra.mxu1 %v9788_v54  ;;  %6443 = vmatpush3.bf16.msra.mxu0 %v9872_v12 }
0x14fa   :  { %4748 = vmatprep.subr.bf16.mxu1 %v9794_v13  ;;  %6444 = vmatprep.subr.bf16.mxu0 %v10578_v40 }
0x14fd   :  { %4749 = vmatpush1.bf16.msra.mxu1 %v9803_v26  ;;  %6445 = vmatpush3.bf16.msra.mxu0 %v9879_v24 }
0x14fe   :  { %4750 = vmatprep.subr.bf16.mxu1 %v9809_v1  ;;  %6446 = vmatprep.subr.bf16.mxu0 %v10578_v40 }
0x1501   :  { %4751 = vmatpush1.bf16.msra.mxu1 %v9815_v8  ;;  %6447 = vmatpush3.bf16.msra.mxu0 %v9888_v51 }
0x1502   :  { %4752 = vmatprep.subr.bf16.mxu1 %v9821_v16  ;;  %6448 = vmatprep.subr.bf16.mxu0 %v10578_v40 }
0x1505   :  { %4753 = vmatpush1.bf16.msra.mxu1 %v9828_v36  ;;  %6449 = vmatpush3.bf16.msra.mxu0 %v9895_v57 }
0x1506   :  { %4754 = vmatprep.subr.bf16.mxu1 %v9840_v38  ;;  %6450 = vmatprep.subr.bf16.mxu0 %v10578_v40 }
0x1509   :  { %4755 = vmatpush1.bf16.msra.mxu1 %v9853_v46  ;;  %6451 = vmatpush3.bf16.msra.mxu0 %v9902_v60 }
0x150a   :  { %4756 = vmatprep.subr.bf16.mxu1 %v9859_v3  ;;  %6452 = vmatprep.subr.bf16.mxu0 %v10578_v40 }
0x150d   :  { %4757 = vmatpush1.bf16.msra.mxu1 %v9867_v44  ;;  %6453 = vmatpush3.bf16.msra.mxu0 %v9909_v61 }
0x150e   :  { %4849 = vmatprep.subr.bf16.mxu1 %v9722_v42  ;;  %6458 = vmatprep.subr.bf16.mxu0 %v10578_v40 }
0x15c3   :  { %v4669_v35 = vpop.f32.mrb[156].mxu1  ;;  %v4710_v30 = vpop.f32.mrb[140].mxu0 }
0x15c4   :  { %v4670_v20 = vadd.f32 %v4669_v35, %v10014_v59  ;;  %v4671_v56 = vpop.f32.mrb[157].mxu1  ;;  %v6436_v37 = vpop.f32.mrb[141].mxu0  ;;  %v4711_v53 = vadd.f32 %v4710_v30, %v10027_v41  ;;  %v4297_v35 = vadd.f32 %v9970_v52, %v10030_v4 }
0x15c5   :  { %v4672_v58 = vadd.f32 %v4671_v56, %v10020_v27  ;;  %v4673_v18 = vpop.f32.mrb[158].mxu1  ;;  %v4713_v23 = vpop.f32.mrb[142].mxu0 }
0x15c6   :  { %v4716_v55 = vadd.f32 %v4670_v20, %v4225_v9  ;;  %v4674_v14 = vpop.f32.mrb[159].mxu1  ;;  %v6437_v25 = vpop.f32.mrb[143].mxu0 }
0x15c7   :  { %v4723_v22 = vadd.f32 %v4672_v58, %v4227_v28 }
0x15c8   :  { %v5580_v6 = vmul.f32 -1.442695, %v4716_v55  ;;  %v4231_v55 = vadd.f32 %v9972_v50, %v10011_v49 }
0x15c9   :  { %v5581_v19 = vmul.f32 -1.442695, %v4723_v22 }
0x15ca   :  { %6999 = vpow2.f32 %v5580_v6  ;;  %v4233_v6 = vadd.f32 %v9974_v5, %v10017_v2 }
0x15cb   :  { %7001 = vpow2.f32 %v5581_v19 }
0x15d4   :  { %v7000_v17 = vpop.eup %6999 }
0x15d5   :  { %v4720_v11 = vadd.f32 1.0, %v7000_v17  ;;  %v7002_v10 = vpop.eup %7001 }
0x15d6   :  { %v4727_v62 = vadd.f32 1.0, %v7002_v10 }
0x15d7   :  { %7003 = vrcp.f32 %v4720_v11 }
0x15d8   :  { %7005 = vrcp.f32 %v4727_v62 }
0x15e1   :  { %v7004_v45 = vpop.eup %7003 }
0x15e2   :  { %v4730_v56 = vmul.f32 %v7004_v45, %v4711_v53  ;;  %v7006_v20 = vpop.eup %7005 }
0x15e3   :  { %v4733_v37 = vsub.f32 1.0, %v7006_v20  ;;  %v4735_v18 = vmul.f32 %v7006_v20, %v10034_v7 }
0x15e4   :  { %v4731_v9 = vadd.f32 %v4730_v56, %v4297_v35 }
0x15e6   :  { %7007 = vtanh.f32 %v4731_v9 }
0x15f0   :  { %v7008_v28 = vpop.eup %7007 }
0x15f1   :  { %v4734_v58 = vmul.f32 %v7008_v28, %v4733_v37 }
0x15f3   :  { %v10087_v23 = vadd.f32 %v4735_v18, %v4734_v58  ;;  %v4302_v58 = vadd.f32 %v9966_v63, %v10030_v4 }
0x15f5   :  { %4737 = vst [vmem:[%s10435_s19 + $0x8] sm:$0xff] %v10087_v23  ;;  %v4741_v52 = vpack.c.bf16 %v10087_v23, %v10087_v23 }
0x15f7   :  { %4775 = vmatmul.mubr.bf16.vlgmr.msra.gmra.mrb[160].mxu1 %v4741_v52  ;;  %6455 = vmatmul.mubr.bf16.vlgmr.msra.gmra.mrb[144].mxu0 %v4741_v52 }
0x15f8   :  { %4850 = vmatpush1.bf16.msra.mxu1 %v9753_v39  ;;  %6459 = vmatpush3.bf16.msra.mxu0 %v9834_v0 }
0x15f9   :  { %4851 = vmatprep.subr.bf16.mxu1 %v9759_v43  ;;  %6460 = vmatprep.subr.bf16.mxu0 %v10578_v40 }
0x15fa   :  { %4881 = vmatprep.mubr.bf16.mxu1 %v10579_v34  ;;  %6474 = vmatprep.mubr.msk.bf16.mxu0 %vm7217_vm1, %v10578_v40 }
0x15fc   :  { %4852 = vmatpush1.bf16.msra.mxu1 %v9772_v32  ;;  %6461 = vmatpush3.bf16.msra.mxu0 %v9846_v47 }
0x15fd   :  { %4853 = vmatprep.subr.bf16.mxu1 %v9779_v21  ;;  %6462 = vmatprep.subr.bf16.mxu0 %v10578_v40 }
0x1600   :  { %4854 = vmatpush1.bf16.msra.mxu1 %v9788_v54  ;;  %6463 = vmatpush3.bf16.msra.mxu0 %v9872_v12 }
0x1601   :  { %4855 = vmatprep.subr.bf16.mxu1 %v9794_v13  ;;  %6464 = vmatprep.subr.bf16.mxu0 %v10578_v40 }
0x1604   :  { %4856 = vmatpush1.bf16.msra.mxu1 %v9803_v26  ;;  %6465 = vmatpush3.bf16.msra.mxu0 %v9879_v24 }
0x1605   :  { %4857 = vmatprep.subr.bf16.mxu1 %v9809_v1  ;;  %6466 = vmatprep.subr.bf16.mxu0 %v10578_v40 }
0x1608   :  { %4858 = vmatpush1.bf16.msra.mxu1 %v9815_v8  ;;  %6467 = vmatpush3.bf16.msra.mxu0 %v9888_v51 }
0x1609   :  { %4859 = vmatprep.subr.bf16.mxu1 %v9821_v16  ;;  %6468 = vmatprep.subr.bf16.mxu0 %v10578_v40 }
0x160c   :  { %4860 = vmatpush1.bf16.msra.mxu1 %v9828_v36  ;;  %6469 = vmatpush3.bf16.msra.mxu0 %v9895_v57 }
0x160d   :  { %4861 = vmatprep.subr.bf16.mxu1 %v9840_v38  ;;  %6470 = vmatprep.subr.bf16.mxu0 %v10578_v40 }
0x1610   :  { %4862 = vmatpush1.bf16.msra.mxu1 %v9853_v46  ;;  %6471 = vmatpush3.bf16.msra.mxu0 %v9902_v60 }
0x1611   :  { %4863 = vmatprep.subr.bf16.mxu1 %v9859_v3  ;;  %6472 = vmatprep.subr.bf16.mxu0 %v10578_v40 }
0x1614   :  { %4864 = vmatpush1.bf16.msra.mxu1 %v9867_v44  ;;  %6473 = vmatpush3.bf16.msra.mxu0 %v9909_v61 }
0x1615   :  { %4956 = vmatprep.subr.bf16.mxu1 %v9722_v42  ;;  %6478 = vmatprep.subr.bf16.mxu0 %v10578_v40 }
0x16ca   :  { %v4776_v7 = vpop.f32.mrb[160].mxu1  ;;  %v4817_v30 = vpop.f32.mrb[144].mxu0 }
0x16cb   :  { %v4777_v14 = vadd.f32 %v4776_v7, %v10014_v59  ;;  %v4778_v25 = vpop.f32.mrb[161].mxu1  ;;  %v6456_v22 = vpop.f32.mrb[145].mxu0  ;;  %v4818_v28 = vadd.f32 %v4817_v30, %v10027_v41 }
0x16cc   :  { %v4779_v19 = vadd.f32 %v4778_v25, %v10020_v27  ;;  %v4780_v17 = vpop.f32.mrb[162].mxu1  ;;  %v4820_v11 = vpop.f32.mrb[146].mxu0 }
0x16cd   :  { %v4823_v10 = vadd.f32 %v4777_v14, %v4231_v55  ;;  %v4781_v62 = vpop.f32.mrb[163].mxu1  ;;  %v6457_v53 = vpop.f32.mrb[147].mxu0 }
0x16ce   :  { %v4830_v45 = vadd.f32 %v4779_v19, %v4233_v6  ;;  %v4235_v19 = vadd.f32 %v9976_v15, %v10011_v49  ;;  %v4237_v62 = vadd.f32 %v9978_v48, %v10017_v2 }
0x16cf   :  { %v5582_v35 = vmul.f32 -1.442695, %v4823_v10 }
0x16d0   :  { %v5583_v56 = vmul.f32 -1.442695, %v4830_v45 }
0x16d1   :  { %7009 = vpow2.f32 %v5582_v35 }
0x16d2   :  { %7011 = vpow2.f32 %v5583_v56 }
0x16db   :  { %v7010_v50 = vpop.eup %7009 }
0x16dc   :  { %v4827_v9 = vadd.f32 1.0, %v7010_v50  ;;  %v7012_v20 = vpop.eup %7011 }
0x16dd   :  { %v4834_v37 = vadd.f32 1.0, %v7012_v20 }
0x16de   :  { %7013 = vrcp.f32 %v4827_v9 }
0x16df   :  { %7015 = vrcp.f32 %v4834_v37 }
0x16e8   :  { %v7014_v5 = vpop.eup %7013 }
0x16e9   :  { %v4837_v18 = vmul.f32 %v7014_v5, %v4818_v28  ;;  %v7016_v7 = vpop.eup %7015 }
0x16ea   :  { %v4840_v55 = vsub.f32 1.0, %v7016_v7  ;;  %v4842_v22 = vmul.f32 %v7016_v7, %v10087_v23 }
0x16eb   :  { %v4838_v52 = vadd.f32 %v4837_v18, %v4302_v58 }
0x16ed   :  { %7017 = vtanh.f32 %v4838_v52  ;;  %v4305_v52 = vadd.f32 %v9968_v29, %v10030_v4 }
0x16f7   :  { %v7018_v14 = vpop.eup %7017 }
0x16f8   :  { %v4841_v25 = vmul.f32 %v7018_v14, %v4840_v55 }
0x16fa   :  { %v10140_v6 = vadd.f32 %v4842_v22, %v4841_v25 }
0x16fc   :  { %4844 = vst [vmem:[%s10435_s19 + $0x10] sm:$0xff] %v10140_v6  ;;  %v4848_v63 = vpack.c.bf16 %v10140_v6, %v10140_v6 }
0x16fe   :  { %4882 = vmatmul.mubr.bf16.vlgmr.msra.gmra.mrb[164].mxu1 %v4848_v63  ;;  %6475 = vmatmul.mubr.bf16.vlgmr.msra.gmra.mrb[148].mxu0 %v4848_v63 }
0x16ff   :  { %4957 = vmatpush1.bf16.msra.mxu1 %v9753_v39  ;;  %6479 = vmatpush3.bf16.msra.mxu0 %v9834_v0 }
0x1700   :  { %4958 = vmatprep.subr.bf16.mxu1 %v9759_v43  ;;  %6480 = vmatprep.subr.bf16.mxu0 %v10578_v40 }
0x1701   :  { %4988 = vmatprep.mubr.bf16.mxu1 %v10579_v34  ;;  %6494 = vmatprep.mubr.msk.bf16.mxu0 %vm7217_vm1, %v10578_v40 }
0x1703   :  { %4959 = vmatpush1.bf16.msra.mxu1 %v9772_v32  ;;  %6481 = vmatpush3.bf16.msra.mxu0 %v9846_v47 }
0x1704   :  { %4960 = vmatprep.subr.bf16.mxu1 %v9779_v21  ;;  %6482 = vmatprep.subr.bf16.mxu0 %v10578_v40 }
0x1707   :  { %4961 = vmatpush1.bf16.msra.mxu1 %v9788_v54  ;;  %6483 = vmatpush3.bf16.msra.mxu0 %v9872_v12 }
0x1708   :  { %4962 = vmatprep.subr.bf16.mxu1 %v9794_v13  ;;  %6484 = vmatprep.subr.bf16.mxu0 %v10578_v40 }
0x170b   :  { %4963 = vmatpush1.bf16.msra.mxu1 %v9803_v26  ;;  %6485 = vmatpush3.bf16.msra.mxu0 %v9879_v24 }
0x170c   :  { %4964 = vmatprep.subr.bf16.mxu1 %v9809_v1  ;;  %6486 = vmatprep.subr.bf16.mxu0 %v10578_v40 }
0x170f   :  { %4965 = vmatpush1.bf16.msra.mxu1 %v9815_v8  ;;  %6487 = vmatpush3.bf16.msra.mxu0 %v9888_v51 }
0x1710   :  { %4966 = vmatprep.subr.bf16.mxu1 %v9821_v16  ;;  %6488 = vmatprep.subr.bf16.mxu0 %v10578_v40 }
0x1713   :  { %4967 = vmatpush1.bf16.msra.mxu1 %v9828_v36  ;;  %6489 = vmatpush3.bf16.msra.mxu0 %v9895_v57 }
0x1714   :  { %4968 = vmatprep.subr.bf16.mxu1 %v9840_v38  ;;  %6490 = vmatprep.subr.bf16.mxu0 %v10578_v40 }
0x1717   :  { %4969 = vmatpush1.bf16.msra.mxu1 %v9853_v46  ;;  %6491 = vmatpush3.bf16.msra.mxu0 %v9902_v60 }
0x1718   :  { %4970 = vmatprep.subr.bf16.mxu1 %v9859_v3  ;;  %6492 = vmatprep.subr.bf16.mxu0 %v10578_v40 }
0x171b   :  { %4971 = vmatpush1.bf16.msra.mxu1 %v9867_v44  ;;  %6493 = vmatpush3.bf16.msra.mxu0 %v9909_v61 }
0x171c   :  { %5063 = vmatprep.subr.bf16.mxu1 %v9722_v42  ;;  %6498 = vmatprep.subr.bf16.mxu0 %v10578_v40 }
0x17d1   :  { %v4883_v23 = vpop.f32.mrb[164].mxu1  ;;  %v4924_v30 = vpop.f32.mrb[148].mxu0 }
0x17d2   :  { %v4884_v17 = vadd.f32 %v4883_v23, %v10014_v59  ;;  %v4885_v11 = vpop.f32.mrb[165].mxu1  ;;  %v6476_v10 = vpop.f32.mrb[149].mxu0  ;;  %v4925_v18 = vadd.f32 %v4924_v30, %v10027_v41 }
0x17d3   :  { %v4886_v53 = vadd.f32 %v4885_v11, %v10020_v27  ;;  %v4887_v45 = vpop.f32.mrb[166].mxu1  ;;  %v4927_v35 = vpop.f32.mrb[150].mxu0  ;;  %v4241_v11 = vadd.f32 %v9980_v31, %v10011_v49 }
0x17d4   :  { %v4930_v56 = vadd.f32 %v4884_v17, %v4235_v19  ;;  %v4888_v42 = vpop.f32.mrb[167].mxu1  ;;  %v6477_v50 = vpop.f32.mrb[151].mxu0  ;;  %v4243_v45 = vadd.f32 %v9982_v33, %v10017_v2 }
0x17d5   :  { %v4937_v9 = vadd.f32 %v4886_v53, %v4237_v62 }
0x17d6   :  { %v5584_v20 = vmul.f32 -1.442695, %v4930_v56 }
0x17d7   :  { %v5585_v37 = vmul.f32 -1.442695, %v4937_v9 }
0x17d8   :  { %7019 = vpow2.f32 %v5584_v20 }
0x17d9   :  { %7021 = vpow2.f32 %v5585_v37 }
0x17e2   :  { %v7020_v15 = vpop.eup %7019 }
0x17e3   :  { %v4934_v28 = vadd.f32 1.0, %v7020_v15  ;;  %v7022_v5 = vpop.eup %7021 }
0x17e4   :  { %v4941_v58 = vadd.f32 1.0, %v7022_v5 }
0x17e5   :  { %7023 = vrcp.f32 %v4934_v28 }
0x17e6   :  { %7025 = vrcp.f32 %v4941_v58 }
0x17ef   :  { %v7024_v48 = vpop.eup %7023 }
0x17f0   :  { %v4944_v7 = vmul.f32 %v7024_v48, %v4925_v18  ;;  %v7026_v14 = vpop.eup %7025 }
0x17f1   :  { %v4947_v25 = vsub.f32 1.0, %v7026_v14  ;;  %v4949_v23 = vmul.f32 %v7026_v14, %v10140_v6  ;;  %v10237_v6 = vld [vmem:[%s10430_s17 + $0x4] ss:$12 sps:$4 sm:$0xff]  }
0x17f2   :  { %v4945_v55 = vadd.f32 %v4944_v7, %v4305_v52  ;;  %v10725_v52 = vld [vmem:[#allocation43_spill] sm:$0xff] }
0x17f3   :  { %v4310_v7 = vadd.f32 %v10725_v52, %v10030_v4  ;;  %v7203_v52 = vld [vmem:[%s10430_s17 + $0x64] ss:$12 sps:$4 sm:$0xff]  }
0x17f4   :  { %7027 = vtanh.f32 %v4945_v55 }
0x17fe   :  { %v7028_v22 = vpop.eup %7027 }
0x17ff   :  { %v4948_v63 = vmul.f32 %v7028_v22, %v4947_v25 }
0x1801   :  { %v10193_v19 = vadd.f32 %v4949_v23, %v4948_v63 }
0x1803   :  { %4951 = vst [vmem:[%s10435_s19 + $0x18] sm:$0xff] %v10193_v19  ;;  %v4955_v29 = vpack.c.bf16 %v10193_v19, %v10193_v19 }
0x1805   :  { %4989 = vmatmul.mubr.bf16.vlgmr.msra.gmra.mrb[168].mxu1 %v4955_v29  ;;  %6495 = vmatmul.mubr.bf16.vlgmr.msra.gmra.mrb[152].mxu0 %v4955_v29 }
0x1806   :  { %5064 = vmatpush1.bf16.msra.mxu1 %v9753_v39  ;;  %6499 = vmatpush3.bf16.msra.mxu0 %v9834_v0 }
0x1807   :  { %5065 = vmatprep.subr.bf16.mxu1 %v9759_v43  ;;  %6500 = vmatprep.subr.bf16.mxu0 %v10578_v40 }
0x1808   :  { %5095 = vmatprep.mubr.bf16.mxu1 %v10579_v34  ;;  %6514 = vmatprep.mubr.msk.bf16.mxu0 %vm7217_vm1, %v10578_v40 }
0x180a   :  { %5066 = vmatpush1.bf16.msra.mxu1 %v9772_v32  ;;  %6501 = vmatpush3.bf16.msra.mxu0 %v9846_v47 }
0x180b   :  { %5067 = vmatprep.subr.bf16.mxu1 %v9779_v21  ;;  %6502 = vmatprep.subr.bf16.mxu0 %v10578_v40 }
0x180e   :  { %5068 = vmatpush1.bf16.msra.mxu1 %v9788_v54  ;;  %6503 = vmatpush3.bf16.msra.mxu0 %v9872_v12 }
0x180f   :  { %5069 = vmatprep.subr.bf16.mxu1 %v9794_v13  ;;  %6504 = vmatprep.subr.bf16.mxu0 %v10578_v40 }
0x1812   :  { %5070 = vmatpush1.bf16.msra.mxu1 %v9803_v26  ;;  %6505 = vmatpush3.bf16.msra.mxu0 %v9879_v24 }
0x1813   :  { %5071 = vmatprep.subr.bf16.mxu1 %v9809_v1  ;;  %6506 = vmatprep.subr.bf16.mxu0 %v10578_v40 }
0x1816   :  { %5072 = vmatpush1.bf16.msra.mxu1 %v9815_v8  ;;  %6507 = vmatpush3.bf16.msra.mxu0 %v9888_v51 }
0x1817   :  { %5073 = vmatprep.subr.bf16.mxu1 %v9821_v16  ;;  %6508 = vmatprep.subr.bf16.mxu0 %v10578_v40 }
0x181a   :  { %5074 = vmatpush1.bf16.msra.mxu1 %v9828_v36  ;;  %6509 = vmatpush3.bf16.msra.mxu0 %v9895_v57 }
0x181b   :  { %5075 = vmatprep.subr.bf16.mxu1 %v9840_v38  ;;  %6510 = vmatprep.subr.bf16.mxu0 %v10578_v40 }
0x181e   :  { %5076 = vmatpush1.bf16.msra.mxu1 %v9853_v46  ;;  %6511 = vmatpush3.bf16.msra.mxu0 %v9902_v60 }
0x181f   :  { %5077 = vmatprep.subr.bf16.mxu1 %v9859_v3  ;;  %6512 = vmatprep.subr.bf16.mxu0 %v10578_v40 }
0x1822   :  { %5078 = vmatpush1.bf16.msra.mxu1 %v9867_v44  ;;  %6513 = vmatpush3.bf16.msra.mxu0 %v9909_v61 }
0x1823   :  { %5170 = vmatprep.subr.bf16.mxu1 %v10237_v6  ;;  %6518 = vmatprep.subr.bf16.mxu0 %v10578_v40 }
0x18d8   :  { %v4990_v30 = vpop.f32.mrb[168].mxu1  ;;  %v5031_v17 = vpop.f32.mrb[152].mxu0 }
0x18d9   :  { %v4991_v10 = vadd.f32 %v4990_v30, %v10014_v59  ;;  %v4992_v62 = vpop.f32.mrb[169].mxu1  ;;  %v6496_v53 = vpop.f32.mrb[153].mxu0  ;;  %v5032_v48 = vadd.f32 %v5031_v17, %v10027_v41 }
0x18da   :  { %v4993_v35 = vadd.f32 %v4992_v62, %v10020_v27  ;;  %v4994_v56 = vpop.f32.mrb[170].mxu1  ;;  %v5034_v42 = vpop.f32.mrb[154].mxu0 }
0x18db   :  { %v5037_v50 = vadd.f32 %v4991_v10, %v4241_v11  ;;  %v4995_v9 = vpop.f32.mrb[171].mxu1  ;;  %v6497_v20 = vpop.f32.mrb[155].mxu0 }
0x18dc   :  { %v5044_v37 = vadd.f32 %v4993_v35, %v4243_v45  ;;  %v7192_v20 = vld [vmem:[%s10430_s17] ss:$12 sps:$4 sm:$0xff]  }
0x18dd   :  { %v5586_v15 = vmul.f32 -1.442695, %v5037_v50 }
0x18de   :  { %v5587_v28 = vmul.f32 -1.442695, %v5044_v37  ;;  %v7193_v37 = vld [vmem:[%s10430_s17 + $0x8] ss:$12 sps:$4 sm:$0xff]  }
0x18df   :  { %7029 = vpow2.f32 %v5586_v15  ;;  %v7194_v15 = vld [vmem:[%s10430_s17 + $0x1c] ss:$12 sps:$4 sm:$0xff]  }
0x18e0   :  { %7031 = vpow2.f32 %v5587_v28  ;;  %v7195_v28 = vld [vmem:[%s10430_s17 + $0x18] ss:$12 sps:$4 sm:$0xff]  }
0x18e9   :  { %v7030_v31 = vpop.eup %7029 }
0x18ea   :  { %v5041_v5 = vadd.f32 1.0, %v7030_v31  ;;  %v7032_v58 = vpop.eup %7031  ;;  %v7196_v31 = vld [vmem:[%s10430_s17 + $0x20] ss:$12 sps:$4 sm:$0xff]  }
0x18eb   :  { %v5048_v18 = vadd.f32 1.0, %v7032_v58  ;;  %v7199_v58 = vld [vmem:[%s10430_s17 + $0x38] ss:$12 sps:$4 sm:$0xff]  }
0x18ec   :  { %7033 = vrcp.f32 %v5041_v5  ;;  %v7197_v5 = vld [vmem:[%s10430_s17 + $0x34] ss:$12 sps:$4 sm:$0xff]  }
0x18ed   :  { %7035 = vrcp.f32 %v5048_v18  ;;  %v7200_v18 = vld [vmem:[%s10430_s17 + $0x4c] ss:$12 sps:$4 sm:$0xff]  }
0x18f6   :  { %v7034_v33 = vpop.eup %7033 }
0x18f7   :  { %v5051_v55 = vmul.f32 %v7034_v33, %v5032_v48  ;;  %v7036_v25 = vpop.eup %7035  ;;  %v7201_v48 = vld [vmem:[%s10430_s17 + $0x48] ss:$12 sps:$4 sm:$0xff]   ;;  %v7202_v33 = vld [vmem:[%s10430_s17 + $0x50] ss:$12 sps:$4 sm:$0xff]  }
0x18f8   :  { %v5054_v22 = vsub.f32 1.0, %v7036_v25  ;;  %v5056_v29 = vmul.f32 %v7036_v25, %v10193_v19  ;;  %v7207_v25 = vld [vmem:[%s10430_s17 + $0x78] ss:$12 sps:$4 sm:$0xff]  }
0x18f9   :  { %v5052_v14 = vadd.f32 %v5051_v55, %v4310_v7  ;;  %v7204_v7 = vld [vmem:[%s10430_s17 + $0x60] ss:$12 sps:$4 sm:$0xff]   ;;  %v7205_v55 = vld [vmem:[%s10430_s17 + $0x68] ss:$12 sps:$4 sm:$0xff]  }
0x18fb   :  { %7037 = vtanh.f32 %v5052_v14  ;;  %v7206_v14 = vld [vmem:[%s10430_s17 + $0x7c] ss:$12 sps:$4 sm:$0xff]  }
0x1905   :  { %v7038_v63 = vpop.eup %7037 }
0x1906   :  { %v5055_v23 = vmul.f32 %v7038_v63, %v5054_v22  ;;  %v7208_v22 = vld [vmem:[%s10430_s17 + $0x80] ss:$12 sps:$4 sm:$0xff]  }
0x1907   :  { %v7209_v63 = vld [vmem:[%s10430_s17 + $0x94] ss:$12 sps:$4 sm:$0xff]  }
0x1908   :  { %v10251_v30 = vadd.f32 %v5056_v29, %v5055_v23  ;;  %v7210_v23 = vld [vmem:[%s10430_s17 + $0x90] ss:$12 sps:$4 sm:$0xff]   ;;  %v7211_v29 = vld [vmem:[%s10430_s17 + $0x98] ss:$12 sps:$4 sm:$0xff]  }
0x190a   :  { %5058 = vst [vmem:[%s10435_s19 + $0x20] sm:$0xff] %v10251_v30  ;;  %v5062_v17 = vpack.c.bf16 %v10251_v30, %v10251_v30 }
0x190c   :  { %5096 = vmatmul.mubr.bf16.vlgmr.msra.gmra.mrb[172].mxu1 %v5062_v17  ;;  %6515 = vmatmul.mubr.bf16.vlgmr.msra.gmra.mrb[156].mxu0 %v5062_v17  ;;  %v7213_v17 = vld [vmem:[%s10430_s17 + $0xa8] ss:$12 sps:$4 sm:$0xff]  }
0x190d   :  { %5171 = vmatpush1.bf16.msra.mxu1 %v9753_v39  ;;  %6519 = vmatpush3.bf16.msra.mxu0 %v9834_v0 }
0x190e   :  { %5172 = vmatprep.subr.bf16.mxu1 %v9759_v43  ;;  %6520 = vmatprep.subr.bf16.mxu0 %v10578_v40 }
0x190f   :  { %5202 = vmatprep.mubr.bf16.mxu1 %v10579_v34  ;;  %6534 = vmatprep.mubr.msk.bf16.mxu0 %vm7217_vm1, %v10578_v40 }
0x1911   :  { %5173 = vmatpush1.bf16.msra.mxu1 %v9772_v32  ;;  %6521 = vmatpush3.bf16.msra.mxu0 %v9846_v47  ;;  %v10726_v32 = vld [vmem:[#allocation51_spill] sm:$0xff] }
0x1912   :  { %5174 = vmatprep.subr.bf16.mxu1 %v9779_v21  ;;  %6522 = vmatprep.subr.bf16.mxu0 %v10578_v40  ;;  %v4245_v21 = vadd.f32 %v10726_v32, %v10011_v49 }
0x1915   :  { %5175 = vmatpush1.bf16.msra.mxu1 %v9788_v54  ;;  %6523 = vmatpush3.bf16.msra.mxu0 %v9872_v12 }
0x1916   :  { %5176 = vmatprep.subr.bf16.mxu1 %v9794_v13  ;;  %6524 = vmatprep.subr.bf16.mxu0 %v10578_v40 }
0x1919   :  { %5177 = vmatpush1.bf16.msra.mxu1 %v9803_v26  ;;  %6525 = vmatpush3.bf16.msra.mxu0 %v9879_v24 }
0x191a   :  { %5178 = vmatprep.subr.bf16.mxu1 %v9809_v1  ;;  %6526 = vmatprep.subr.bf16.mxu0 %v10578_v40  ;;  %v10727_v1 = vld [vmem:[#allocation63_spill] sm:$0xff] }
0x191d   :  { %5179 = vmatpush1.bf16.msra.mxu1 %v9815_v8  ;;  %6527 = vmatpush3.bf16.msra.mxu0 %v9888_v51  ;;  %v4247_v8 = vadd.f32 %v10727_v1, %v10017_v2 }
0x191e   :  { %5180 = vmatprep.subr.bf16.mxu1 %v9821_v16  ;;  %6528 = vmatprep.subr.bf16.mxu0 %v10578_v40 }
0x1921   :  { %5181 = vmatpush1.bf16.msra.mxu1 %v9828_v36  ;;  %6529 = vmatpush3.bf16.msra.mxu0 %v9895_v57 }
0x1922   :  { %5182 = vmatprep.subr.bf16.mxu1 %v9840_v38  ;;  %6530 = vmatprep.subr.bf16.mxu0 %v10578_v40 }
0x1925   :  { %5183 = vmatpush1.bf16.msra.mxu1 %v9853_v46  ;;  %6531 = vmatpush3.bf16.msra.mxu0 %v9902_v60 }
0x1926   :  { %5184 = vmatprep.subr.bf16.mxu1 %v9859_v3  ;;  %6532 = vmatprep.subr.bf16.mxu0 %v10578_v40 }
0x1929   :  { %5185 = vmatpush1.bf16.msra.mxu1 %v9867_v44  ;;  %6533 = vmatpush3.bf16.msra.mxu0 %v9909_v61 }
0x192a   :  { %5277 = vmatprep.subr.bf16.mxu1 %v10237_v6  ;;  %6538 = vmatprep.subr.bf16.mxu0 %v10578_v40  ;;  %v10728_v6 = vld [vmem:[#allocation64_spill] sm:$0xff] }
0x192b   :  { %v4313_v11 = vadd.f32 %v10728_v6, %v10030_v4  ;;  %v10731_v6 = vld [vmem:[#allocation66_spill] sm:$0xff] }
0x19df   :  { %v5097_v39 = vpop.f32.mrb[172].mxu1  ;;  %v5138_v43 = vpop.f32.mrb[156].mxu0 }
0x19e0   :  { %v5098_v54 = vadd.f32 %v5097_v39, %v10014_v59  ;;  %v5099_v13 = vpop.f32.mrb[173].mxu1  ;;  %v6516_v26 = vpop.f32.mrb[157].mxu0  ;;  %v5139_v61 = vadd.f32 %v5138_v43, %v10027_v41  ;;  %v7214_v39 = vld [vmem:[%s10430_s17 + $0xb0] ss:$12 sps:$4 sm:$0xff]  }
0x19e1   :  { %v5100_v16 = vadd.f32 %v5099_v13, %v10020_v27  ;;  %v5101_v36 = vpop.f32.mrb[174].mxu1  ;;  %v5141_v0 = vpop.f32.mrb[158].mxu0 }
0x19e2   :  { %v5144_v38 = vadd.f32 %v5098_v54, %v4245_v21  ;;  %v5102_v47 = vpop.f32.mrb[175].mxu1  ;;  %v6517_v46 = vpop.f32.mrb[159].mxu0  ;;  %v10729_v21 = vld [vmem:[#allocation65_spill] sm:$0xff] }
0x19e3   :  { %v5151_v3 = vadd.f32 %v5100_v16, %v4247_v8  ;;  %v4251_v54 = vadd.f32 %v10729_v21, %v10011_v49 }
0x19e4   :  { %v5588_v44 = vmul.f32 -1.442695, %v5144_v38 }
0x19e5   :  { %v5589_v12 = vmul.f32 -1.442695, %v5151_v3 }
0x19e6   :  { %7039 = vpow2.f32 %v5588_v44 }
0x19e7   :  { %7041 = vpow2.f32 %v5589_v12 }
0x19f0   :  { %v7040_v24 = vpop.eup %7039 }
0x19f1   :  { %v5148_v51 = vadd.f32 1.0, %v7040_v24  ;;  %v7042_v57 = vpop.eup %7041 }
0x19f2   :  { %v5155_v60 = vadd.f32 1.0, %v7042_v57 }
0x19f3   :  { %7043 = vrcp.f32 %v5148_v51 }
0x19f4   :  { %7045 = vrcp.f32 %v5155_v60 }
0x19fd   :  { %v7044_v19 = vpop.eup %7043 }
0x19fe   :  { %v5158_v10 = vmul.f32 %v7044_v19, %v5139_v61  ;;  %v7046_v53 = vpop.eup %7045 }
0x19ff   :  { %v5161_v45 = vsub.f32 1.0, %v7046_v53  ;;  %v5163_v42 = vmul.f32 %v7046_v53, %v10251_v30  ;;  %v7212_v30 = vld [vmem:[%s10430_s17 + $0xac] ss:$12 sps:$4 sm:$0xff]  }
0x1a00   :  { %v5159_v62 = vadd.f32 %v5158_v10, %v4313_v11  ;;  %v4318_v11 = vadd.f32 %v10731_v6, %v10030_v4 }
0x1a02   :  { %7047 = vtanh.f32 %v5159_v62 }
0x1a0c   :  { %v7048_v35 = vpop.eup %7047 }
0x1a0d   :  { %v5162_v56 = vmul.f32 %v7048_v35, %v5161_v45 }
0x1a0f   :  { %v10304_v50 = vadd.f32 %v5163_v42, %v5162_v56 }
0x1a11   :  { %5165 = vst [vmem:[%s10435_s19 + $0x28] sm:$0xff] %v10304_v50  ;;  %v5169_v9 = vpack.c.bf16 %v10304_v50, %v10304_v50 }
0x1a13   :  { %5203 = vmatmul.mubr.bf16.vlgmr.msra.gmra.mrb[176].mxu1 %v5169_v9  ;;  %6535 = vmatmul.mubr.bf16.vlgmr.msra.gmra.mrb[160].mxu0 %v5169_v9 }
0x1a14   :  { %5278 = vmatpush1.bf16.msra.mxu1 %v7192_v20  ;;  %6539 = vmatpush3.bf16.msra.mxu0 %v7193_v37 }
0x1a15   :  { %5279 = vmatprep.subr.bf16.mxu1 %v7194_v15  ;;  %6540 = vmatprep.subr.bf16.mxu0 %v10578_v40 }
0x1a16   :  { %5309 = vmatprep.mubr.bf16.mxu1 %v10579_v34  ;;  %6554 = vmatprep.mubr.msk.bf16.mxu0 %vm7217_vm1, %v10578_v40  ;;  %v7198_v34 = vld [vmem:[%s10430_s17 + $0x30] ss:$12 sps:$4 sm:$0xff]  }
0x1a18   :  { %5280 = vmatpush1.bf16.msra.mxu1 %v7195_v28  ;;  %6541 = vmatpush3.bf16.msra.mxu0 %v7196_v31  ;;  %v10732_v28 = vld [vmem:[#allocation53_spill] sm:$0xff] }
0x1a19   :  { %5281 = vmatprep.subr.bf16.mxu1 %v7197_v5  ;;  %6542 = vmatprep.subr.bf16.mxu0 %v10578_v40  ;;  %v4255_v31 = vadd.f32 %v10732_v28, %v10011_v49 }
0x1a1c   :  { %5282 = vmatpush1.bf16.msra.mxu1 %v7198_v34  ;;  %6543 = vmatpush3.bf16.msra.mxu0 %v7199_v58 }
0x1a1d   :  { %5283 = vmatprep.subr.bf16.mxu1 %v7200_v18  ;;  %6544 = vmatprep.subr.bf16.mxu0 %v10578_v40  ;;  %v10733_v18 = vld [vmem:[#allocation62_spill] sm:$0xff] }
0x1a20   :  { %5284 = vmatpush1.bf16.msra.mxu1 %v7201_v48  ;;  %6545 = vmatpush3.bf16.msra.mxu0 %v7202_v33 }
0x1a21   :  { %5285 = vmatprep.subr.bf16.mxu1 %v7203_v52  ;;  %6546 = vmatprep.subr.bf16.mxu0 %v10578_v40 }
0x1a24   :  { %5286 = vmatpush1.bf16.msra.mxu1 %v7204_v7  ;;  %6547 = vmatpush3.bf16.msra.mxu0 %v7205_v55 }
0x1a25   :  { %5287 = vmatprep.subr.bf16.mxu1 %v7206_v14  ;;  %6548 = vmatprep.subr.bf16.mxu0 %v10578_v40 }
0x1a28   :  { %5288 = vmatpush1.bf16.msra.mxu1 %v7207_v25  ;;  %6549 = vmatpush3.bf16.msra.mxu0 %v7208_v22 }
0x1a29   :  { %5289 = vmatprep.subr.bf16.mxu1 %v7209_v63  ;;  %6550 = vmatprep.subr.bf16.mxu0 %v10578_v40 }
0x1a2c   :  { %5290 = vmatpush1.bf16.msra.mxu1 %v7210_v23  ;;  %6551 = vmatpush3.bf16.msra.mxu0 %v7211_v29 }
0x1a2d   :  { %5291 = vmatprep.subr.bf16.mxu1 %v7212_v30  ;;  %6552 = vmatprep.subr.bf16.mxu0 %v10578_v40  ;;  %v10730_v40 = vld [vmem:[#allocation42_spill] sm:$0xff] }
0x1a2e   :  { %v4253_v8 = vadd.f32 %v10730_v40, %v10017_v2 }
0x1a30   :  { %5292 = vmatpush1.bf16.msra.mxu1 %v7213_v17  ;;  %6553 = vmatpush3.bf16.msra.mxu0 %v7214_v39 }
0x1ae6   :  { %v5204_v43 = vpop.f32.mrb[176].mxu1  ;;  %v5245_v32 = vpop.f32.mrb[160].mxu0 }
0x1ae7   :  { %v5205_v13 = vadd.f32 %v5204_v43, %v10014_v59  ;;  %v5206_v26 = vpop.f32.mrb[177].mxu1  ;;  %v6536_v1 = vpop.f32.mrb[161].mxu0  ;;  %v5246_v61 = vadd.f32 %v5245_v32, %v10027_v41 }
0x1ae8   :  { %v5207_v16 = vadd.f32 %v5206_v26, %v10020_v27  ;;  %v5208_v36 = vpop.f32.mrb[178].mxu1  ;;  %v5248_v0 = vpop.f32.mrb[162].mxu0 }
0x1ae9   :  { %v5251_v38 = vadd.f32 %v5205_v13, %v4251_v54  ;;  %v5209_v47 = vpop.f32.mrb[179].mxu1  ;;  %v6537_v46 = vpop.f32.mrb[163].mxu0 }
0x1aea   :  { %v5258_v3 = vadd.f32 %v5207_v16, %v4253_v8 }
0x1aeb   :  { %v5590_v44 = vmul.f32 -1.442695, %v5251_v38 }
0x1aec   :  { %v5591_v12 = vmul.f32 -1.442695, %v5258_v3 }
0x1aed   :  { %7049 = vpow2.f32 %v5590_v44 }
0x1aee   :  { %7051 = vpow2.f32 %v5591_v12 }
0x1af7   :  { %v7050_v24 = vpop.eup %7049 }
0x1af8   :  { %v5255_v51 = vadd.f32 1.0, %v7050_v24  ;;  %v7052_v57 = vpop.eup %7051 }
0x1af9   :  { %v5262_v60 = vadd.f32 1.0, %v7052_v57 }
0x1afa   :  { %7053 = vrcp.f32 %v5255_v51 }
0x1afb   :  { %7055 = vrcp.f32 %v5262_v60 }
0x1b04   :  { %v7054_v19 = vpop.eup %7053 }
0x1b05   :  { %v5265_v10 = vmul.f32 %v7054_v19, %v5246_v61  ;;  %v7056_v53 = vpop.eup %7055 }
0x1b06   :  { %v5268_v45 = vsub.f32 1.0, %v7056_v53  ;;  %v5270_v42 = vmul.f32 %v7056_v53, %v10304_v50  ;;  %v4257_v50 = vadd.f32 %v10733_v18, %v10017_v2 }
0x1b07   :  { %v5266_v62 = vadd.f32 %v5265_v10, %v4318_v11 }
0x1b09   :  { %7057 = vtanh.f32 %v5266_v62 }
0x1b13   :  { %v7058_v35 = vpop.eup %7057 }
0x1b14   :  { %v5269_v56 = vmul.f32 %v7058_v35, %v5268_v45 }
0x1b16   :  { %v5271_v9 = vadd.f32 %v5270_v42, %v5269_v56 }
0x1b18   :  { %5272 = vst [vmem:[%s10435_s19 + $0x30] sm:$0xff] %v5271_v9  ;;  %v5276_v20 = vpack.c.bf16 %v5271_v9, %v5271_v9 }
0x1b1a   :  { %5310 = vmatmul.mubr.bf16.vlgmr.msra.gmra.mrb[180].mxu1 %v5276_v20  ;;  %6555 = vmatmul.mubr.bf16.vlgmr.msra.gmra.mrb[164].mxu0 %v5276_v20 }
0x1bed   :  { %v5311_v37 = vpop.f32.mrb[180].mxu1  ;;  %v5352_v15 = vpop.f32.mrb[164].mxu0 }
0x1bee   :  { %v5312_v5 = vadd.f32 %v5311_v37, %v10014_v59  ;;  %v5313_v34 = vpop.f32.mrb[181].mxu1  ;;  %v6556_v58 = vpop.f32.mrb[165].mxu0  ;;  %v5353_v30 = vadd.f32 %v5352_v15, %v10027_v41 }
0x1bef   :  { %v5314_v48 = vadd.f32 %v5313_v34, %v10020_v27  ;;  %v5315_v33 = vpop.f32.mrb[182].mxu1  ;;  %v5355_v52 = vpop.f32.mrb[166].mxu0  ;;  %v10734_v27 = vld [vmem:[#allocation60_spill] sm:$0xff] }
0x1bf0   :  { %v5358_v7 = vadd.f32 %v5312_v5, %v4255_v31  ;;  %v5316_v55 = vpop.f32.mrb[183].mxu1  ;;  %v6557_v14 = vpop.f32.mrb[167].mxu0  ;;  %v4321_v17 = vadd.f32 %v10734_v27, %v10030_v4 }
0x1bf1   :  { %v5365_v25 = vadd.f32 %v5314_v48, %v4257_v50 }
0x1bf2   :  { %v5592_v22 = vmul.f32 -1.442695, %v5358_v7 }
0x1bf3   :  { %v5593_v63 = vmul.f32 -1.442695, %v5365_v25 }
0x1bf4   :  { %7059 = vpow2.f32 %v5592_v22 }
0x1bf5   :  { %7061 = vpow2.f32 %v5593_v63 }
0x1bfe   :  { %v7060_v49 = vpop.eup %7059 }
0x1bff   :  { %v5362_v23 = vadd.f32 1.0, %v7060_v49  ;;  %v7062_v59 = vpop.eup %7061 }
0x1c00   :  { %v5369_v29 = vadd.f32 1.0, %v7062_v59 }
0x1c01   :  { %7063 = vrcp.f32 %v5362_v23 }
0x1c02   :  { %7065 = vrcp.f32 %v5369_v29 }
0x1c0b   :  { %v7064_v2 = vpop.eup %7063 }
0x1c0c   :  { %v5372_v39 = vmul.f32 %v7064_v2, %v5353_v30  ;;  %v7066_v32 = vpop.eup %7065 }
0x1c0d   :  { %v5375_v21 = vsub.f32 1.0, %v7066_v32  ;;  %v5377_v26 = vmul.f32 %v7066_v32, %v5271_v9 }
0x1c0e   :  { %v5373_v43 = vadd.f32 %v5372_v39, %v4321_v17 }
0x1c10   :  { %7067 = vtanh.f32 %v5373_v43 }
0x1c1a   :  { %v7068_v54 = vpop.eup %7067 }
0x1c1b   :  { %v5376_v13 = vmul.f32 %v7068_v54, %v5375_v21 }
0x1c1d   :  { %v5378_v1 = vadd.f32 %v5377_v26, %v5376_v13 }
0x1c1f   :  { %5379 = vst [vmem:[%s10435_s19 + $0x38] sm:$0xff] %v5378_v1 }

</bundles_post_ra>
